<compile_context>
chip_gen: v7x
topology: tpu7x:2x2x1
jax: 0.10.0
libtpu: 0.0.40
codegen_flags: <defaults>
</compile_context>

<pallas_src>
import functools

import jax
import jax.numpy as jnp
from jax.experimental import pallas as pl
from jax.experimental.pallas import tpu as pltpu

BN_EPS = 1e-3


# ---------------------------------------------------------------------------
# Fused kernel builder: one grid step == one image, run every Bottleneck block
# and the trailing AvgPool2d with the activation resident in VMEM throughout.
# ---------------------------------------------------------------------------
def _make_mbconv_kernel(block_cfgs, *, kernel_size, pkernel_size, H, W):
    k = kernel_size
    pad = (k - 1) // 2
    p = pkernel_size
    Ho, Wo = H // p, W // p

    def kernel(*refs):
        x_ref = refs[0]
        pool_ref = refs[-3]          # (Ho*Wo, H*W) avg-pool matrix (last input)
        o_ref = refs[-2]
        pad_ref = refs[-1]           # VMEM scratch: zero-padded depthwise input
        wrefs = refs[1:-3]

        # Zero the scratch once per image; only its interior is ever written,
        # so the halo stays zero for every block ('same' padding, stride 1).
        pad_ref[...] = jnp.zeros(pad_ref.shape, pad_ref.dtype)

        x3 = x_ref[0].astype(jnp.float32)                 # (H, W, Cin)
        # (H, W, C) -> (H*W, C) is layout preserving: W is a multiple of 8.
        x = x3.reshape(H * W, x3.shape[-1])               # lives in VMEM/vregs
        i = 0
        for cfg in block_cfgs:
            x_in = x

            # ---- 1x1 expand conv + folded BN + swish (MXU matmul) ----
            if cfg["has_expand"]:
                w1 = wrefs[i][...]                        # (cin, cexp)
                sc1, sh1 = wrefs[i + 1][...], wrefs[i + 2][...]   # (1, cexp)
                i += 3
                h = jnp.dot(x, w1, preferred_element_type=jnp.float32)
                h = h * sc1 + sh1
                h = h * jax.nn.sigmoid(h)
            else:
                h = x
            cexp = h.shape[-1]

            # ---- depthwise kxk 'same' conv + folded BN + swish (VPU MACs) ----
            w2 = wrefs[i][...]                            # (k, k, cexp)
            sc2, sh2 = wrefs[i + 1][...], wrefs[i + 2][...]
            i += 3
            pad_ref[pad:pad + H, pad:pad + W, 0:cexp] = h.reshape(H, W, cexp)
            acc = jnp.zeros((H, W, cexp), jnp.float32)
            for dy in range(k):
                for dx in range(k):
                    acc = acc + (pad_ref[dy:dy + H, dx:dx + W, 0:cexp]
                                 * w2[dy, dx:dx + 1, :])
            h = acc.reshape(H * W, cexp) * sc2 + sh2
            h = h * jax.nn.sigmoid(h)

            # ---- squeeze-excitation (tiny matvecs on the VPU, no MXU) ----
            w_se1t = wrefs[i][...]                        # (hid, cexp)
            w_se2 = wrefs[i + 1][...]                     # (hid, cexp)
            i += 2
            hid = w_se1t.shape[0]
            pooled = jnp.sum(h, axis=0, keepdims=True) * (1.0 / (H * W))
            s_acc = jnp.zeros((1, cexp), jnp.float32)
            for j in range(hid):                          # hid is tiny
                tj = jnp.sum(pooled * w_se1t[j:j + 1, :], axis=1, keepdims=True)
                tj = tj * jax.nn.sigmoid(tj)              # swish
                s_acc = s_acc + tj * w_se2[j:j + 1, :]
            h = h * jax.nn.sigmoid(s_acc)                 # (1, cexp) broadcast

            # ---- 1x1 project conv + folded BN (+ residual) (MXU matmul) ----
            w3 = wrefs[i][...]                            # (cexp, planes)
            sc3, sh3 = wrefs[i + 1][...], wrefs[i + 2][...]
            i += 3
            y = jnp.dot(h, w3, preferred_element_type=jnp.float32)
            y = y * sc3 + sh3
            if cfg["correct_dim"]:                        # static bool
                y = y + x_in
            x = y

        # ---- AvgPool2d(p, stride=p) as ONE MXU matmul + ONE dense store ----
        planes = x.shape[-1]
        pooled2d = jnp.dot(pool_ref[...], x,
                           preferred_element_type=jnp.float32)   # (Ho*Wo, planes)
        o_ref[0, :, :, :] = pooled2d.reshape(Ho, Wo, planes).astype(o_ref.dtype)

    return kernel


def _const_index_map(ndim):
    return lambda n, _nd=ndim: (0,) * _nd


def _make_pool_matrix(H, W, p):
    """(Ho*Wo, H*W) matrix that averages non-overlapping p x p cells."""
    Ho, Wo = H // p, W // p
    idx = jnp.arange(H * W)
    rows, cols = idx // W, idx % W
    cell = (rows // p) * Wo + (cols // p)                       # (H*W,)
    mat = (jnp.arange(Ho * Wo)[:, None] == cell[None, :]).astype(jnp.float32)
    return mat * (1.0 / (p * p))


# ---------------------------------------------------------------------------
# Public forward: NCHW in, NCHW out (matches the PyTorch module).
# ---------------------------------------------------------------------------
def mbconv_forward(x_nchw, params, *, block_cfgs, kernel_size, pkernel_size):
    x = jnp.transpose(x_nchw, (0, 2, 3, 1))        # NCHW -> NHWC (C on lanes)
    N, H, W, cin = x.shape
    p = pkernel_size
    Ho, Wo = H // p, W // p
    pad = (kernel_size - 1) // 2

    # Flatten per-block weights in exactly the order the kernel consumes them.
    weights = []
    max_cexp = 0
    for blk, cfg in zip(params["blocks"], block_cfgs):
        if cfg["has_expand"]:
            weights += [blk["conv1_w"], blk["bn1_scale"], blk["bn1_shift"]]
        weights += [blk["conv2_w"], blk["bn2_scale"], blk["bn2_shift"],
                    blk["se_w1"].T,                # (hid, cexp): row access in kernel
                    blk["se_w2"],                  # (hid, cexp)
                    blk["conv3_w"], blk["bn3_scale"], blk["bn3_shift"]]
        max_cexp = max(max_cexp, blk["conv2_w"].shape[-1])
    planes = params["blocks"][-1]["conv3_w"].shape[1]

    pool_mat = _make_pool_matrix(H, W, p)          # (Ho*Wo, H*W)

    kernel = _make_mbconv_kernel(block_cfgs, kernel_size=kernel_size,
                                 pkernel_size=pkernel_size, H=H, W=W)

    in_specs = [pl.BlockSpec((1, H, W, cin), lambda n: (n, 0, 0, 0))]
    for w in weights:
        in_specs.append(pl.BlockSpec(w.shape, _const_index_map(w.ndim)))
    in_specs.append(pl.BlockSpec(pool_mat.shape, _const_index_map(pool_mat.ndim)))

    out = pl.pallas_call(
        kernel,
        out_shape=jax.ShapeDtypeStruct((N, Ho, Wo, planes), x.dtype),
        grid=(N,),                                  # one image per grid step
        in_specs=in_specs,
        out_specs=pl.BlockSpec((1, Ho, Wo, planes), lambda n: (n, 0, 0, 0)),
        scratch_shapes=[
            pltpu.VMEM((H + 2 * pad, W + 2 * pad, max_cexp), jnp.float32)],
        compiler_params=pltpu.CompilerParams(
            dimension_semantics=("parallel",)),     # N>=2 feeds both megacore TCs
    )(x, *weights, pool_mat)
    return jnp.transpose(out, (0, 3, 1, 2))         # NHWC -> NCHW


# ---------------------------------------------------------------------------
# Deterministic parameter initialization (shapes from the PyTorch __init__)
# ---------------------------------------------------------------------------
def _bn_fold(keys, c):
    gamma = 1.0 + 0.1 * jax.random.normal(keys[0], (c,), jnp.float32)
    beta = 0.1 * jax.random.normal(keys[1], (c,), jnp.float32)
    mean = 0.1 * jax.random.normal(keys[2], (c,), jnp.float32)
    var = 0.5 + jnp.abs(jax.random.normal(keys[3], (c,), jnp.float32)) * 0.1
    scale = gamma / jnp.sqrt(var + BN_EPS)
    shift = beta - mean * scale
    return scale.reshape(1, c), shift.reshape(1, c)


def init_bottleneck(key, inplanes, planes, kernel_size, stride, expand, se_ratio):
    cexp = inplanes * expand
    hidden = int(cexp * se_ratio)
    ks = jax.random.split(key, 20)
    blk = {}
    if expand != 1:
        blk["conv1_w"] = 0.2 * jax.random.normal(ks[0], (inplanes, cexp), jnp.float32)
        blk["bn1_scale"], blk["bn1_shift"] = _bn_fold(ks[1:5], cexp)
    blk["conv2_w"] = 0.2 * jax.random.normal(
        ks[5], (kernel_size, kernel_size, cexp), jnp.float32)
    blk["bn2_scale"], blk["bn2_shift"] = _bn_fold(ks[6:10], cexp)
    blk["se_w1"] = 0.2 * jax.random.normal(ks[10], (cexp, hidden), jnp.float32)
    blk["se_w2"] = 0.2 * jax.random.normal(ks[11], (hidden, cexp), jnp.float32)
    blk["conv3_w"] = 0.2 * jax.random.normal(ks[12], (cexp, planes), jnp.float32)
    blk["bn3_scale"], blk["bn3_shift"] = _bn_fold(ks[13:17], planes)
    # Static (non-traced) structural config kept OUT of the params pytree.
    cfg = {"has_expand": expand != 1,
           "correct_dim": bool(stride == 1 and inplanes == planes)}
    return blk, cfg


# ---------------------------------------------------------------------------
# Pure-JAX reference (lax.conv) for correctness check
# ---------------------------------------------------------------------------
def reference_forward(x_nchw, params, block_cfgs, *, kernel_size, pkernel_size):
    dn = ("NHWC", "HWIO", "NHWC")
    x = jnp.transpose(x_nchw, (0, 2, 3, 1))
    for blk, cfg in zip(params["blocks"], block_cfgs):
        res = x
        if cfg["has_expand"]:
            cin, cexp = blk["conv1_w"].shape
            w = blk["conv1_w"].reshape(1, 1, cin, cexp)
            h = jax.lax.conv_general_dilated(x, w, (1, 1), "VALID", dimension_numbers=dn)
            h = h * blk["bn1_scale"].reshape(1, 1, 1, -1) + blk["bn1_shift"].reshape(1, 1, 1, -1)
            h = h * jax.nn.sigmoid(h)
        else:
            h = x
        cexp = h.shape[-1]
        wd = blk["conv2_w"].reshape(kernel_size, kernel_size, 1, cexp)
        h = jax.lax.conv_general_dilated(
            h, wd, (1, 1), "SAME", dimension_numbers=dn, feature_group_count=cexp)
        h = h * blk["bn2_scale"].reshape(1, 1, 1, -1) + blk["bn2_shift"].reshape(1, 1, 1, -1)
        h = h * jax.nn.sigmoid(h)
        pooled = jnp.mean(h, axis=(1, 2))
        s = pooled @ blk["se_w1"]
        s = s * jax.nn.sigmoid(s)
        s = jax.nn.sigmoid(s @ blk["se_w2"])
        h = h * s[:, None, None, :]
        planes = blk["conv3_w"].shape[1]
        w3 = blk["conv3_w"].reshape(1, 1, cexp, planes)
        h = jax.lax.conv_general_dilated(h, w3, (1, 1), "VALID", dimension_numbers=dn)
        h = h * blk["bn3_scale"].reshape(1, 1, 1, -1) + blk["bn3_shift"].reshape(1, 1, 1, -1)
        if cfg["correct_dim"]:
            h = h + res
        x = h
    N, H, W, C = x.shape
    p = pkernel_size
    out = x.reshape(N, H // p, p, W // p, p, C).mean(axis=(2, 4))
    return jnp.transpose(out, (0, 3, 1, 2))


# ---------------------------------------------------------------------------
if __name__ == "__main__":
    # MBConv config: inplanes=4, planes=4, repeat=2, kernel_size=3, stride=1,
    # expand=2, se_ratio=0.25, pkernel_size=2 (count_layer=None -> prob=1.0)
    inplanes, planes, repeat = 4, 4, 2
    kernel_size, stride, expand, se_ratio, pkernel_size = 3, 1, 2, 0.25, 2

    key = jax.random.PRNGKey(0)
    kx, *bkeys = jax.random.split(key, repeat + 1)

    blocks, cfgs = [], []
    blk, cfg = init_bottleneck(bkeys[0], inplanes, planes, kernel_size, stride,
                               expand, se_ratio)
    blocks.append(blk); cfgs.append(cfg)
    for l in range(1, repeat):
        blk, cfg = init_bottleneck(bkeys[l], planes, planes, kernel_size, 1,
                                   expand, se_ratio)
        blocks.append(blk); cfgs.append(cfg)
    params = {"blocks": blocks}
    cfgs = tuple(cfgs)

    x = jax.random.normal(kx, (2, inplanes, 16, 16), jnp.float32)  # NCHW

    fwd = jax.jit(functools.partial(
        mbconv_forward, block_cfgs=cfgs,
        kernel_size=kernel_size, pkernel_size=pkernel_size))
    out = jax.block_until_ready(fwd(x, params))

    ref = jax.block_until_ready(reference_forward(
        x, params, cfgs, kernel_size=kernel_size, pkernel_size=pkernel_size))

    assert out.shape == (2, planes, 16 // pkernel_size, 16 // pkernel_size), out.shape
    err = float(jnp.max(jnp.abs(out - ref)))
    assert err < 5e-4, err
    print("KERNEL_OK")
</pallas_src>

<mosaic_0001>
module attributes {stable_mosaic.version = 11 : i64} {
  func.func @kernel(%arg0: i32, %arg1: memref<1x16x16x4xf32, #tpu.memory_space<vmem>>, %arg2: memref<4x8xf32, #tpu.memory_space<vmem>>, %arg3: memref<1x8xf32, #tpu.memory_space<vmem>>, %arg4: memref<1x8xf32, #tpu.memory_space<vmem>>, %arg5: memref<3x3x8xf32, #tpu.memory_space<vmem>>, %arg6: memref<1x8xf32, #tpu.memory_space<vmem>>, %arg7: memref<1x8xf32, #tpu.memory_space<vmem>>, %arg8: memref<2x8xf32, #tpu.memory_space<vmem>>, %arg9: memref<2x8xf32, #tpu.memory_space<vmem>>, %arg10: memref<8x4xf32, #tpu.memory_space<vmem>>, %arg11: memref<1x4xf32, #tpu.memory_space<vmem>>, %arg12: memref<1x4xf32, #tpu.memory_space<vmem>>, %arg13: memref<4x8xf32, #tpu.memory_space<vmem>>, %arg14: memref<1x8xf32, #tpu.memory_space<vmem>>, %arg15: memref<1x8xf32, #tpu.memory_space<vmem>>, %arg16: memref<3x3x8xf32, #tpu.memory_space<vmem>>, %arg17: memref<1x8xf32, #tpu.memory_space<vmem>>, %arg18: memref<1x8xf32, #tpu.memory_space<vmem>>, %arg19: memref<2x8xf32, #tpu.memory_space<vmem>>, %arg20: memref<2x8xf32, #tpu.memory_space<vmem>>, %arg21: memref<8x4xf32, #tpu.memory_space<vmem>>, %arg22: memref<1x4xf32, #tpu.memory_space<vmem>>, %arg23: memref<1x4xf32, #tpu.memory_space<vmem>>, %arg24: memref<64x256xf32, #tpu.memory_space<vmem>>, %arg25: memref<1x8x8x4xf32, #tpu.memory_space<vmem>>, %arg26: memref<18x18x8xf32, #tpu.memory_space<vmem>>) attributes {dimension_semantics = [#tpu.dimension_semantics<parallel>], iteration_bounds = array<i64: 2>, scalar_prefetch = 0 : i64, scratch_operands = 1 : i64, tpu.core_type = #tpu.core_type<tc>, window_params = [{transform_indices = @transform_0, window_bounds = array<i64: 1, 16, 16, 4>}, {pipeline_mode = #tpu.pipeline_mode<synchronous>, transform_indices = @transform_1, window_bounds = array<i64: 4, 8>}, {pipeline_mode = #tpu.pipeline_mode<synchronous>, transform_indices = @transform_2, window_bounds = array<i64: 1, 8>}, {pipeline_mode = #tpu.pipeline_mode<synchronous>, transform_indices = @transform_3, window_bounds = array<i64: 1, 8>}, {pipeline_mode = #tpu.pipeline_mode<synchronous>, transform_indices = @transform_4, window_bounds = array<i64: 3, 3, 8>}, {pipeline_mode = #tpu.pipeline_mode<synchronous>, transform_indices = @transform_5, window_bounds = array<i64: 1, 8>}, {pipeline_mode = #tpu.pipeline_mode<synchronous>, transform_indices = @transform_6, window_bounds = array<i64: 1, 8>}, {pipeline_mode = #tpu.pipeline_mode<synchronous>, transform_indices = @transform_7, window_bounds = array<i64: 2, 8>}, {pipeline_mode = #tpu.pipeline_mode<synchronous>, transform_indices = @transform_8, window_bounds = array<i64: 2, 8>}, {pipeline_mode = #tpu.pipeline_mode<synchronous>, transform_indices = @transform_9, window_bounds = array<i64: 8, 4>}, {pipeline_mode = #tpu.pipeline_mode<synchronous>, transform_indices = @transform_10, window_bounds = array<i64: 1, 4>}, {pipeline_mode = #tpu.pipeline_mode<synchronous>, transform_indices = @transform_11, window_bounds = array<i64: 1, 4>}, {pipeline_mode = #tpu.pipeline_mode<synchronous>, transform_indices = @transform_12, window_bounds = array<i64: 4, 8>}, {pipeline_mode = #tpu.pipeline_mode<synchronous>, transform_indices = @transform_13, window_bounds = array<i64: 1, 8>}, {pipeline_mode = #tpu.pipeline_mode<synchronous>, transform_indices = @transform_14, window_bounds = array<i64: 1, 8>}, {pipeline_mode = #tpu.pipeline_mode<synchronous>, transform_indices = @transform_15, window_bounds = array<i64: 3, 3, 8>}, {pipeline_mode = #tpu.pipeline_mode<synchronous>, transform_indices = @transform_16, window_bounds = array<i64: 1, 8>}, {pipeline_mode = #tpu.pipeline_mode<synchronous>, transform_indices = @transform_17, window_bounds = array<i64: 1, 8>}, {pipeline_mode = #tpu.pipeline_mode<synchronous>, transform_indices = @transform_18, window_bounds = array<i64: 2, 8>}, {pipeline_mode = #tpu.pipeline_mode<synchronous>, transform_indices = @transform_19, window_bounds = array<i64: 2, 8>}, {pipeline_mode = #tpu.pipeline_mode<synchronous>, transform_indices = @transform_20, window_bounds = array<i64: 8, 4>}, {pipeline_mode = #tpu.pipeline_mode<synchronous>, transform_indices = @transform_21, window_bounds = array<i64: 1, 4>}, {pipeline_mode = #tpu.pipeline_mode<synchronous>, transform_indices = @transform_22, window_bounds = array<i64: 1, 4>}, {pipeline_mode = #tpu.pipeline_mode<synchronous>, transform_indices = @transform_23, window_bounds = array<i64: 64, 256>}, {transform_indices = @transform_24, window_bounds = array<i64: 1, 8, 8, 4>}]} {
    %cst = arith.constant 0.000000e+00 : f32
    %0 = vector.broadcast %cst : f32 to vector<18x18x8xf32>
    %c0 = arith.constant 0 : index
    %c0_0 = arith.constant 0 : index
    %c0_1 = arith.constant 0 : index
    %1 = vector.load %arg26[%c0, %c0_0, %c0_1] : memref<18x18x8xf32, #tpu.memory_space<vmem>>, vector<18x18x8xf32>
    tpu.vector_store %arg26[%c0, %c0_0, %c0_1], %0 {strides = array<i32>} : memref<18x18x8xf32, #tpu.memory_space<vmem>>, vector<18x18x8xf32>,
    %c0_2 = arith.constant 0 : index
    %c0_3 = arith.constant 0 : index
    %c0_4 = arith.constant 0 : index
    %c0_5 = arith.constant 0 : index
    %2 = vector.load %arg1[%c0_2, %c0_3, %c0_4, %c0_5] : memref<1x16x16x4xf32, #tpu.memory_space<vmem>>, vector<1x16x16x4xf32>
    %3 = vector.shape_cast %2 : vector<1x16x16x4xf32> to vector<16x16x4xf32>
    %4 = vector.shape_cast %3 : vector<16x16x4xf32> to vector<256x4xf32>
    %c0_6 = arith.constant 0 : index
    %c0_7 = arith.constant 0 : index
    %5 = vector.load %arg2[%c0_6, %c0_7] : memref<4x8xf32, #tpu.memory_space<vmem>>, vector<4x8xf32>
    %c0_8 = arith.constant 0 : index
    %c0_9 = arith.constant 0 : index
    %6 = vector.load %arg3[%c0_8, %c0_9] : memref<1x8xf32, #tpu.memory_space<vmem>>, vector<1x8xf32>
    %c0_10 = arith.constant 0 : index
    %c0_11 = arith.constant 0 : index
    %7 = vector.load %arg4[%c0_10, %c0_11] : memref<1x8xf32, #tpu.memory_space<vmem>>, vector<1x8xf32>
    %cst_12 = arith.constant dense<0.000000e+00> : vector<256x8xf32>
    %8 = tpu.matmul %4, %5, %cst_12 {dimension_numbers = #tpu.dot_dimension_numbers<[1], [0], [0], [1], [0, 0, 1, 1], [], []>} : vector<256x4xf32>, vector<4x8xf32>, vector<256x8xf32> -> vector<256x8xf32>
    %9 = vector.broadcast %6 : vector<1x8xf32> to vector<256x8xf32>
    %10 = arith.mulf %8, %9 : vector<256x8xf32>
    %11 = vector.broadcast %7 : vector<1x8xf32> to vector<256x8xf32>
    %12 = arith.addf %10, %11 : vector<256x8xf32>
    %13 = arith.negf %12 : vector<256x8xf32>
    %14 = math.exp %13 : vector<256x8xf32>
    %cst_13 = arith.constant 1.000000e+00 : f32
    %15 = vector.broadcast %cst_13 : f32 to vector<256x8xf32>
    %16 = arith.addf %15, %14 : vector<256x8xf32>
    %17 = arith.divf %15, %16 : vector<256x8xf32>
    %18 = arith.mulf %12, %17 : vector<256x8xf32>
    %c0_14 = arith.constant 0 : index
    %c0_15 = arith.constant 0 : index
    %c0_16 = arith.constant 0 : index
    %19 = vector.load %arg5[%c0_14, %c0_15, %c0_16] : memref<3x3x8xf32, #tpu.memory_space<vmem>>, vector<3x3x8xf32>
    %c0_17 = arith.constant 0 : index
    %c0_18 = arith.constant 0 : index
    %20 = vector.load %arg6[%c0_17, %c0_18] : memref<1x8xf32, #tpu.memory_space<vmem>>, vector<1x8xf32>
    %c0_19 = arith.constant 0 : index
    %c0_20 = arith.constant 0 : index
    %21 = vector.load %arg7[%c0_19, %c0_20] : memref<1x8xf32, #tpu.memory_space<vmem>>, vector<1x8xf32>
    %22 = vector.shape_cast %18 : vector<256x8xf32> to vector<16x16x8xf32>
    %c1 = arith.constant 1 : index
    %c1_21 = arith.constant 1 : index
    %c0_22 = arith.constant 0 : index
    %23 = vector.load %arg26[%c1, %c1_21, %c0_22] : memref<18x18x8xf32, #tpu.memory_space<vmem>>, vector<16x16x8xf32>
    tpu.vector_store %arg26[%c1, %c1_21, %c0_22], %22 {strides = array<i32>} : memref<18x18x8xf32, #tpu.memory_space<vmem>>, vector<16x16x8xf32>,
    %cst_23 = arith.constant 0.000000e+00 : f32
    %24 = vector.broadcast %cst_23 : f32 to vector<16x16x8xf32>
    %c0_24 = arith.constant 0 : index
    %c0_25 = arith.constant 0 : index
    %c0_26 = arith.constant 0 : index
    %25 = vector.load %arg26[%c0_24, %c0_25, %c0_26] : memref<18x18x8xf32, #tpu.memory_space<vmem>>, vector<16x16x8xf32>
    %26 = vector.extract_strided_slice %19 {offsets = [0, 0, 0], sizes = [1, 1, 8], strides = [1, 1, 1]} : vector<3x3x8xf32> to vector<1x1x8xf32>
    %27 = vector.shape_cast %26 : vector<1x1x8xf32> to vector<1x8xf32>
    %28 = vector.shape_cast %27 : vector<1x8xf32> to vector<1x1x8xf32>
    %29 = vector.broadcast %28 : vector<1x1x8xf32> to vector<16x16x8xf32>
    %30 = arith.mulf %25, %29 : vector<16x16x8xf32>
    %31 = arith.addf %24, %30 : vector<16x16x8xf32>
    %c0_27 = arith.constant 0 : index
    %c1_28 = arith.constant 1 : index
    %c0_29 = arith.constant 0 : index
    %32 = vector.load %arg26[%c0_27, %c1_28, %c0_29] : memref<18x18x8xf32, #tpu.memory_space<vmem>>, vector<16x16x8xf32>
    %33 = vector.extract_strided_slice %19 {offsets = [0, 1, 0], sizes = [1, 1, 8], strides = [1, 1, 1]} : vector<3x3x8xf32> to vector<1x1x8xf32>
    %34 = vector.shape_cast %33 : vector<1x1x8xf32> to vector<1x8xf32>
    %35 = vector.shape_cast %34 : vector<1x8xf32> to vector<1x1x8xf32>
    %36 = vector.broadcast %35 : vector<1x1x8xf32> to vector<16x16x8xf32>
    %37 = arith.mulf %32, %36 : vector<16x16x8xf32>
    %38 = arith.addf %31, %37 : vector<16x16x8xf32>
    %c0_30 = arith.constant 0 : index
    %c2 = arith.constant 2 : index
    %c0_31 = arith.constant 0 : index
    %39 = vector.load %arg26[%c0_30, %c2, %c0_31] : memref<18x18x8xf32, #tpu.memory_space<vmem>>, vector<16x16x8xf32>
    %40 = vector.extract_strided_slice %19 {offsets = [0, 2, 0], sizes = [1, 1, 8], strides = [1, 1, 1]} : vector<3x3x8xf32> to vector<1x1x8xf32>
    %41 = vector.shape_cast %40 : vector<1x1x8xf32> to vector<1x8xf32>
    %42 = vector.shape_cast %41 : vector<1x8xf32> to vector<1x1x8xf32>
    %43 = vector.broadcast %42 : vector<1x1x8xf32> to vector<16x16x8xf32>
    %44 = arith.mulf %39, %43 : vector<16x16x8xf32>
    %45 = arith.addf %38, %44 : vector<16x16x8xf32>
    %c1_32 = arith.constant 1 : index
    %c0_33 = arith.constant 0 : index
    %c0_34 = arith.constant 0 : index
    %46 = vector.load %arg26[%c1_32, %c0_33, %c0_34] : memref<18x18x8xf32, #tpu.memory_space<vmem>>, vector<16x16x8xf32>
    %47 = vector.extract_strided_slice %19 {offsets = [1, 0, 0], sizes = [1, 1, 8], strides = [1, 1, 1]} : vector<3x3x8xf32> to vector<1x1x8xf32>
    %48 = vector.shape_cast %47 : vector<1x1x8xf32> to vector<1x8xf32>
    %49 = vector.shape_cast %48 : vector<1x8xf32> to vector<1x1x8xf32>
    %50 = vector.broadcast %49 : vector<1x1x8xf32> to vector<16x16x8xf32>
    %51 = arith.mulf %46, %50 : vector<16x16x8xf32>
    %52 = arith.addf %45, %51 : vector<16x16x8xf32>
    %c1_35 = arith.constant 1 : index
    %c1_36 = arith.constant 1 : index
    %c0_37 = arith.constant 0 : index
    %53 = vector.load %arg26[%c1_35, %c1_36, %c0_37] : memref<18x18x8xf32, #tpu.memory_space<vmem>>, vector<16x16x8xf32>
    %54 = vector.extract_strided_slice %19 {offsets = [1, 1, 0], sizes = [1, 1, 8], strides = [1, 1, 1]} : vector<3x3x8xf32> to vector<1x1x8xf32>
    %55 = vector.shape_cast %54 : vector<1x1x8xf32> to vector<1x8xf32>
    %56 = vector.shape_cast %55 : vector<1x8xf32> to vector<1x1x8xf32>
    %57 = vector.broadcast %56 : vector<1x1x8xf32> to vector<16x16x8xf32>
    %58 = arith.mulf %53, %57 : vector<16x16x8xf32>
    %59 = arith.addf %52, %58 : vector<16x16x8xf32>
    %c1_38 = arith.constant 1 : index
    %c2_39 = arith.constant 2 : index
    %c0_40 = arith.constant 0 : index
    %60 = vector.load %arg26[%c1_38, %c2_39, %c0_40] : memref<18x18x8xf32, #tpu.memory_space<vmem>>, vector<16x16x8xf32>
    %61 = vector.extract_strided_slice %19 {offsets = [1, 2, 0], sizes = [1, 1, 8], strides = [1, 1, 1]} : vector<3x3x8xf32> to vector<1x1x8xf32>
    %62 = vector.shape_cast %61 : vector<1x1x8xf32> to vector<1x8xf32>
    %63 = vector.shape_cast %62 : vector<1x8xf32> to vector<1x1x8xf32>
    %64 = vector.broadcast %63 : vector<1x1x8xf32> to vector<16x16x8xf32>
    %65 = arith.mulf %60, %64 : vector<16x16x8xf32>
    %66 = arith.addf %59, %65 : vector<16x16x8xf32>
    %c2_41 = arith.constant 2 : index
    %c0_42 = arith.constant 0 : index
    %c0_43 = arith.constant 0 : index
    %67 = vector.load %arg26[%c2_41, %c0_42, %c0_43] : memref<18x18x8xf32, #tpu.memory_space<vmem>>, vector<16x16x8xf32>
    %68 = vector.extract_strided_slice %19 {offsets = [2, 0, 0], sizes = [1, 1, 8], strides = [1, 1, 1]} : vector<3x3x8xf32> to vector<1x1x8xf32>
    %69 = vector.shape_cast %68 : vector<1x1x8xf32> to vector<1x8xf32>
    %70 = vector.shape_cast %69 : vector<1x8xf32> to vector<1x1x8xf32>
    %71 = vector.broadcast %70 : vector<1x1x8xf32> to vector<16x16x8xf32>
    %72 = arith.mulf %67, %71 : vector<16x16x8xf32>
    %73 = arith.addf %66, %72 : vector<16x16x8xf32>
    %c2_44 = arith.constant 2 : index
    %c1_45 = arith.constant 1 : index
    %c0_46 = arith.constant 0 : index
    %74 = vector.load %arg26[%c2_44, %c1_45, %c0_46] : memref<18x18x8xf32, #tpu.memory_space<vmem>>, vector<16x16x8xf32>
    %75 = vector.extract_strided_slice %19 {offsets = [2, 1, 0], sizes = [1, 1, 8], strides = [1, 1, 1]} : vector<3x3x8xf32> to vector<1x1x8xf32>
    %76 = vector.shape_cast %75 : vector<1x1x8xf32> to vector<1x8xf32>
    %77 = vector.shape_cast %76 : vector<1x8xf32> to vector<1x1x8xf32>
    %78 = vector.broadcast %77 : vector<1x1x8xf32> to vector<16x16x8xf32>
    %79 = arith.mulf %74, %78 : vector<16x16x8xf32>
    %80 = arith.addf %73, %79 : vector<16x16x8xf32>
    %c2_47 = arith.constant 2 : index
    %c2_48 = arith.constant 2 : index
    %c0_49 = arith.constant 0 : index
    %81 = vector.load %arg26[%c2_47, %c2_48, %c0_49] : memref<18x18x8xf32, #tpu.memory_space<vmem>>, vector<16x16x8xf32>
    %82 = vector.extract_strided_slice %19 {offsets = [2, 2, 0], sizes = [1, 1, 8], strides = [1, 1, 1]} : vector<3x3x8xf32> to vector<1x1x8xf32>
    %83 = vector.shape_cast %82 : vector<1x1x8xf32> to vector<1x8xf32>
    %84 = vector.shape_cast %83 : vector<1x8xf32> to vector<1x1x8xf32>
    %85 = vector.broadcast %84 : vector<1x1x8xf32> to vector<16x16x8xf32>
    %86 = arith.mulf %81, %85 : vector<16x16x8xf32>
    %87 = arith.addf %80, %86 : vector<16x16x8xf32>
    %88 = vector.shape_cast %87 : vector<16x16x8xf32> to vector<256x8xf32>
    %89 = vector.broadcast %20 : vector<1x8xf32> to vector<256x8xf32>
    %90 = arith.mulf %88, %89 : vector<256x8xf32>
    %91 = vector.broadcast %21 : vector<1x8xf32> to vector<256x8xf32>
    %92 = arith.addf %90, %91 : vector<256x8xf32>
    %93 = arith.negf %92 : vector<256x8xf32>
    %94 = math.exp %93 : vector<256x8xf32>
    %cst_50 = arith.constant 1.000000e+00 : f32
    %95 = vector.broadcast %cst_50 : f32 to vector<256x8xf32>
    %96 = arith.addf %95, %94 : vector<256x8xf32>
    %97 = arith.divf %95, %96 : vector<256x8xf32>
    %98 = arith.mulf %92, %97 : vector<256x8xf32>
    %c0_51 = arith.constant 0 : index
    %c0_52 = arith.constant 0 : index
    %99 = vector.load %arg8[%c0_51, %c0_52] : memref<2x8xf32, #tpu.memory_space<vmem>>, vector<2x8xf32>
    %c0_53 = arith.constant 0 : index
    %c0_54 = arith.constant 0 : index
    %100 = vector.load %arg9[%c0_53, %c0_54] : memref<2x8xf32, #tpu.memory_space<vmem>>, vector<2x8xf32>
    %cst_55 = arith.constant dense<0.000000e+00> : vector<8xf32>
    %101 = vector.multi_reduction <add>, %98, %cst_55 [0] : vector<256x8xf32> to vector<8xf32>
    %102 = vector.shape_cast %101 : vector<8xf32> to vector<1x8xf32>
    %cst_56 = arith.constant 3.906250e-03 : f32
    %103 = vector.broadcast %cst_56 : f32 to vector<1x8xf32>
    %104 = arith.mulf %102, %103 : vector<1x8xf32>
    %cst_57 = arith.constant 0.000000e+00 : f32
    %105 = vector.broadcast %cst_57 : f32 to vector<1x8xf32>
    %106 = vector.extract_strided_slice %99 {offsets = [0, 0], sizes = [1, 8], strides = [1, 1]} : vector<2x8xf32> to vector<1x8xf32>
    %107 = arith.mulf %104, %106 : vector<1x8xf32>
    %cst_58 = arith.constant dense<0.000000e+00> : vector<1xf32>
    %108 = vector.multi_reduction <add>, %107, %cst_58 [1] : vector<1x8xf32> to vector<1xf32>
    %109 = vector.shape_cast %108 : vector<1xf32> to vector<1x1xf32>
    %110 = arith.negf %109 : vector<1x1xf32>
    %111 = math.exp %110 : vector<1x1xf32>
    %cst_59 = arith.constant 1.000000e+00 : f32
    %112 = vector.broadcast %cst_59 : f32 to vector<1x1xf32>
    %113 = arith.addf %112, %111 : vector<1x1xf32>
    %114 = arith.divf %112, %113 : vector<1x1xf32>
    %115 = arith.mulf %109, %114 : vector<1x1xf32>
    %116 = vector.extract_strided_slice %100 {offsets = [0, 0], sizes = [1, 8], strides = [1, 1]} : vector<2x8xf32> to vector<1x8xf32>
    %117 = vector.broadcast %115 : vector<1x1xf32> to vector<1x8xf32>
    %118 = arith.mulf %117, %116 : vector<1x8xf32>
    %119 = arith.addf %105, %118 : vector<1x8xf32>
    %120 = vector.extract_strided_slice %99 {offsets = [1, 0], sizes = [1, 8], strides = [1, 1]} : vector<2x8xf32> to vector<1x8xf32>
    %121 = arith.mulf %104, %120 : vector<1x8xf32>
    %cst_60 = arith.constant dense<0.000000e+00> : vector<1xf32>
    %122 = vector.multi_reduction <add>, %121, %cst_60 [1] : vector<1x8xf32> to vector<1xf32>
    %123 = vector.shape_cast %122 : vector<1xf32> to vector<1x1xf32>
    %124 = arith.negf %123 : vector<1x1xf32>
    %125 = math.exp %124 : vector<1x1xf32>
    %cst_61 = arith.constant 1.000000e+00 : f32
    %126 = vector.broadcast %cst_61 : f32 to vector<1x1xf32>
    %127 = arith.addf %126, %125 : vector<1x1xf32>
    %128 = arith.divf %126, %127 : vector<1x1xf32>
    %129 = arith.mulf %123, %128 : vector<1x1xf32>
    %130 = vector.extract_strided_slice %100 {offsets = [1, 0], sizes = [1, 8], strides = [1, 1]} : vector<2x8xf32> to vector<1x8xf32>
    %131 = vector.broadcast %129 : vector<1x1xf32> to vector<1x8xf32>
    %132 = arith.mulf %131, %130 : vector<1x8xf32>
    %133 = arith.addf %119, %132 : vector<1x8xf32>
    %134 = arith.negf %133 : vector<1x8xf32>
    %135 = math.exp %134 : vector<1x8xf32>
    %cst_62 = arith.constant 1.000000e+00 : f32
    %136 = vector.broadcast %cst_62 : f32 to vector<1x8xf32>
    %137 = arith.addf %136, %135 : vector<1x8xf32>
    %138 = arith.divf %136, %137 : vector<1x8xf32>
    %139 = vector.broadcast %138 : vector<1x8xf32> to vector<256x8xf32>
    %140 = arith.mulf %98, %139 : vector<256x8xf32>
    %c0_63 = arith.constant 0 : index
    %c0_64 = arith.constant 0 : index
    %141 = vector.load %arg10[%c0_63, %c0_64] : memref<8x4xf32, #tpu.memory_space<vmem>>, vector<8x4xf32>
    %c0_65 = arith.constant 0 : index
    %c0_66 = arith.constant 0 : index
    %142 = vector.load %arg11[%c0_65, %c0_66] : memref<1x4xf32, #tpu.memory_space<vmem>>, vector<1x4xf32>
    %c0_67 = arith.constant 0 : index
    %c0_68 = arith.constant 0 : index
    %143 = vector.load %arg12[%c0_67, %c0_68] : memref<1x4xf32, #tpu.memory_space<vmem>>, vector<1x4xf32>
    %cst_69 = arith.constant dense<0.000000e+00> : vector<256x4xf32>
    %144 = tpu.matmul %140, %141, %cst_69 {dimension_numbers = #tpu.dot_dimension_numbers<[1], [0], [0], [1], [0, 0, 1, 1], [], []>} : vector<256x8xf32>, vector<8x4xf32>, vector<256x4xf32> -> vector<256x4xf32>
    %145 = vector.broadcast %142 : vector<1x4xf32> to vector<256x4xf32>
    %146 = arith.mulf %144, %145 : vector<256x4xf32>
    %147 = vector.broadcast %143 : vector<1x4xf32> to vector<256x4xf32>
    %148 = arith.addf %146, %147 : vector<256x4xf32>
    %149 = arith.addf %148, %4 : vector<256x4xf32>
    %c0_70 = arith.constant 0 : index
    %c0_71 = arith.constant 0 : index
    %150 = vector.load %arg13[%c0_70, %c0_71] : memref<4x8xf32, #tpu.memory_space<vmem>>, vector<4x8xf32>
    %c0_72 = arith.constant 0 : index
    %c0_73 = arith.constant 0 : index
    %151 = vector.load %arg14[%c0_72, %c0_73] : memref<1x8xf32, #tpu.memory_space<vmem>>, vector<1x8xf32>
    %c0_74 = arith.constant 0 : index
    %c0_75 = arith.constant 0 : index
    %152 = vector.load %arg15[%c0_74, %c0_75] : memref<1x8xf32, #tpu.memory_space<vmem>>, vector<1x8xf32>
    %cst_76 = arith.constant dense<0.000000e+00> : vector<256x8xf32>
    %153 = tpu.matmul %149, %150, %cst_76 {dimension_numbers = #tpu.dot_dimension_numbers<[1], [0], [0], [1], [0, 0, 1, 1], [], []>} : vector<256x4xf32>, vector<4x8xf32>, vector<256x8xf32> -> vector<256x8xf32>
    %154 = vector.broadcast %151 : vector<1x8xf32> to vector<256x8xf32>
    %155 = arith.mulf %153, %154 : vector<256x8xf32>
    %156 = vector.broadcast %152 : vector<1x8xf32> to vector<256x8xf32>
    %157 = arith.addf %155, %156 : vector<256x8xf32>
    %158 = arith.negf %157 : vector<256x8xf32>
    %159 = math.exp %158 : vector<256x8xf32>
    %cst_77 = arith.constant 1.000000e+00 : f32
    %160 = vector.broadcast %cst_77 : f32 to vector<256x8xf32>
    %161 = arith.addf %160, %159 : vector<256x8xf32>
    %162 = arith.divf %160, %161 : vector<256x8xf32>
    %163 = arith.mulf %157, %162 : vector<256x8xf32>
    %c0_78 = arith.constant 0 : index
    %c0_79 = arith.constant 0 : index
    %c0_80 = arith.constant 0 : index
    %164 = vector.load %arg16[%c0_78, %c0_79, %c0_80] : memref<3x3x8xf32, #tpu.memory_space<vmem>>, vector<3x3x8xf32>
    %c0_81 = arith.constant 0 : index
    %c0_82 = arith.constant 0 : index
    %165 = vector.load %arg17[%c0_81, %c0_82] : memref<1x8xf32, #tpu.memory_space<vmem>>, vector<1x8xf32>
    %c0_83 = arith.constant 0 : index
    %c0_84 = arith.constant 0 : index
    %166 = vector.load %arg18[%c0_83, %c0_84] : memref<1x8xf32, #tpu.memory_space<vmem>>, vector<1x8xf32>
    %167 = vector.shape_cast %163 : vector<256x8xf32> to vector<16x16x8xf32>
    %c1_85 = arith.constant 1 : index
    %c1_86 = arith.constant 1 : index
    %c0_87 = arith.constant 0 : index
    %168 = vector.load %arg26[%c1_85, %c1_86, %c0_87] : memref<18x18x8xf32, #tpu.memory_space<vmem>>, vector<16x16x8xf32>
    tpu.vector_store %arg26[%c1_85, %c1_86, %c0_87], %167 {strides = array<i32>} : memref<18x18x8xf32, #tpu.memory_space<vmem>>, vector<16x16x8xf32>,
    %cst_88 = arith.constant 0.000000e+00 : f32
    %169 = vector.broadcast %cst_88 : f32 to vector<16x16x8xf32>
    %c0_89 = arith.constant 0 : index
    %c0_90 = arith.constant 0 : index
    %c0_91 = arith.constant 0 : index
    %170 = vector.load %arg26[%c0_89, %c0_90, %c0_91] : memref<18x18x8xf32, #tpu.memory_space<vmem>>, vector<16x16x8xf32>
    %171 = vector.extract_strided_slice %164 {offsets = [0, 0, 0], sizes = [1, 1, 8], strides = [1, 1, 1]} : vector<3x3x8xf32> to vector<1x1x8xf32>
    %172 = vector.shape_cast %171 : vector<1x1x8xf32> to vector<1x8xf32>
    %173 = vector.shape_cast %172 : vector<1x8xf32> to vector<1x1x8xf32>
    %174 = vector.broadcast %173 : vector<1x1x8xf32> to vector<16x16x8xf32>
    %175 = arith.mulf %170, %174 : vector<16x16x8xf32>
    %176 = arith.addf %169, %175 : vector<16x16x8xf32>
    %c0_92 = arith.constant 0 : index
    %c1_93 = arith.constant 1 : index
    %c0_94 = arith.constant 0 : index
    %177 = vector.load %arg26[%c0_92, %c1_93, %c0_94] : memref<18x18x8xf32, #tpu.memory_space<vmem>>, vector<16x16x8xf32>
    %178 = vector.extract_strided_slice %164 {offsets = [0, 1, 0], sizes = [1, 1, 8], strides = [1, 1, 1]} : vector<3x3x8xf32> to vector<1x1x8xf32>
    %179 = vector.shape_cast %178 : vector<1x1x8xf32> to vector<1x8xf32>
    %180 = vector.shape_cast %179 : vector<1x8xf32> to vector<1x1x8xf32>
    %181 = vector.broadcast %180 : vector<1x1x8xf32> to vector<16x16x8xf32>
    %182 = arith.mulf %177, %181 : vector<16x16x8xf32>
    %183 = arith.addf %176, %182 : vector<16x16x8xf32>
    %c0_95 = arith.constant 0 : index
    %c2_96 = arith.constant 2 : index
    %c0_97 = arith.constant 0 : index
    %184 = vector.load %arg26[%c0_95, %c2_96, %c0_97] : memref<18x18x8xf32, #tpu.memory_space<vmem>>, vector<16x16x8xf32>
    %185 = vector.extract_strided_slice %164 {offsets = [0, 2, 0], sizes = [1, 1, 8], strides = [1, 1, 1]} : vector<3x3x8xf32> to vector<1x1x8xf32>
    %186 = vector.shape_cast %185 : vector<1x1x8xf32> to vector<1x8xf32>
    %187 = vector.shape_cast %186 : vector<1x8xf32> to vector<1x1x8xf32>
    %188 = vector.broadcast %187 : vector<1x1x8xf32> to vector<16x16x8xf32>
    %189 = arith.mulf %184, %188 : vector<16x16x8xf32>
    %190 = arith.addf %183, %189 : vector<16x16x8xf32>
    %c1_98 = arith.constant 1 : index
    %c0_99 = arith.constant 0 : index
    %c0_100 = arith.constant 0 : index
    %191 = vector.load %arg26[%c1_98, %c0_99, %c0_100] : memref<18x18x8xf32, #tpu.memory_space<vmem>>, vector<16x16x8xf32>
    %192 = vector.extract_strided_slice %164 {offsets = [1, 0, 0], sizes = [1, 1, 8], strides = [1, 1, 1]} : vector<3x3x8xf32> to vector<1x1x8xf32>
    %193 = vector.shape_cast %192 : vector<1x1x8xf32> to vector<1x8xf32>
    %194 = vector.shape_cast %193 : vector<1x8xf32> to vector<1x1x8xf32>
    %195 = vector.broadcast %194 : vector<1x1x8xf32> to vector<16x16x8xf32>
    %196 = arith.mulf %191, %195 : vector<16x16x8xf32>
    %197 = arith.addf %190, %196 : vector<16x16x8xf32>
    %c1_101 = arith.constant 1 : index
    %c1_102 = arith.constant 1 : index
    %c0_103 = arith.constant 0 : index
    %198 = vector.load %arg26[%c1_101, %c1_102, %c0_103] : memref<18x18x8xf32, #tpu.memory_space<vmem>>, vector<16x16x8xf32>
    %199 = vector.extract_strided_slice %164 {offsets = [1, 1, 0], sizes = [1, 1, 8], strides = [1, 1, 1]} : vector<3x3x8xf32> to vector<1x1x8xf32>
    %200 = vector.shape_cast %199 : vector<1x1x8xf32> to vector<1x8xf32>
    %201 = vector.shape_cast %200 : vector<1x8xf32> to vector<1x1x8xf32>
    %202 = vector.broadcast %201 : vector<1x1x8xf32> to vector<16x16x8xf32>
    %203 = arith.mulf %198, %202 : vector<16x16x8xf32>
    %204 = arith.addf %197, %203 : vector<16x16x8xf32>
    %c1_104 = arith.constant 1 : index
    %c2_105 = arith.constant 2 : index
    %c0_106 = arith.constant 0 : index
    %205 = vector.load %arg26[%c1_104, %c2_105, %c0_106] : memref<18x18x8xf32, #tpu.memory_space<vmem>>, vector<16x16x8xf32>
    %206 = vector.extract_strided_slice %164 {offsets = [1, 2, 0], sizes = [1, 1, 8], strides = [1, 1, 1]} : vector<3x3x8xf32> to vector<1x1x8xf32>
    %207 = vector.shape_cast %206 : vector<1x1x8xf32> to vector<1x8xf32>
    %208 = vector.shape_cast %207 : vector<1x8xf32> to vector<1x1x8xf32>
    %209 = vector.broadcast %208 : vector<1x1x8xf32> to vector<16x16x8xf32>
    %210 = arith.mulf %205, %209 : vector<16x16x8xf32>
    %211 = arith.addf %204, %210 : vector<16x16x8xf32>
    %c2_107 = arith.constant 2 : index
    %c0_108 = arith.constant 0 : index
    %c0_109 = arith.constant 0 : index
    %212 = vector.load %arg26[%c2_107, %c0_108, %c0_109] : memref<18x18x8xf32, #tpu.memory_space<vmem>>, vector<16x16x8xf32>
    %213 = vector.extract_strided_slice %164 {offsets = [2, 0, 0], sizes = [1, 1, 8], strides = [1, 1, 1]} : vector<3x3x8xf32> to vector<1x1x8xf32>
    %214 = vector.shape_cast %213 : vector<1x1x8xf32> to vector<1x8xf32>
    %215 = vector.shape_cast %214 : vector<1x8xf32> to vector<1x1x8xf32>
    %216 = vector.broadcast %215 : vector<1x1x8xf32> to vector<16x16x8xf32>
    %217 = arith.mulf %212, %216 : vector<16x16x8xf32>
    %218 = arith.addf %211, %217 : vector<16x16x8xf32>
    %c2_110 = arith.constant 2 : index
    %c1_111 = arith.constant 1 : index
    %c0_112 = arith.constant 0 : index
    %219 = vector.load %arg26[%c2_110, %c1_111, %c0_112] : memref<18x18x8xf32, #tpu.memory_space<vmem>>, vector<16x16x8xf32>
    %220 = vector.extract_strided_slice %164 {offsets = [2, 1, 0], sizes = [1, 1, 8], strides = [1, 1, 1]} : vector<3x3x8xf32> to vector<1x1x8xf32>
    %221 = vector.shape_cast %220 : vector<1x1x8xf32> to vector<1x8xf32>
    %222 = vector.shape_cast %221 : vector<1x8xf32> to vector<1x1x8xf32>
    %223 = vector.broadcast %222 : vector<1x1x8xf32> to vector<16x16x8xf32>
    %224 = arith.mulf %219, %223 : vector<16x16x8xf32>
    %225 = arith.addf %218, %224 : vector<16x16x8xf32>
    %c2_113 = arith.constant 2 : index
    %c2_114 = arith.constant 2 : index
    %c0_115 = arith.constant 0 : index
    %226 = vector.load %arg26[%c2_113, %c2_114, %c0_115] : memref<18x18x8xf32, #tpu.memory_space<vmem>>, vector<16x16x8xf32>
    %227 = vector.extract_strided_slice %164 {offsets = [2, 2, 0], sizes = [1, 1, 8], strides = [1, 1, 1]} : vector<3x3x8xf32> to vector<1x1x8xf32>
    %228 = vector.shape_cast %227 : vector<1x1x8xf32> to vector<1x8xf32>
    %229 = vector.shape_cast %228 : vector<1x8xf32> to vector<1x1x8xf32>
    %230 = vector.broadcast %229 : vector<1x1x8xf32> to vector<16x16x8xf32>
    %231 = arith.mulf %226, %230 : vector<16x16x8xf32>
    %232 = arith.addf %225, %231 : vector<16x16x8xf32>
    %233 = vector.shape_cast %232 : vector<16x16x8xf32> to vector<256x8xf32>
    %234 = vector.broadcast %165 : vector<1x8xf32> to vector<256x8xf32>
    %235 = arith.mulf %233, %234 : vector<256x8xf32>
    %236 = vector.broadcast %166 : vector<1x8xf32> to vector<256x8xf32>
    %237 = arith.addf %235, %236 : vector<256x8xf32>
    %238 = arith.negf %237 : vector<256x8xf32>
    %239 = math.exp %238 : vector<256x8xf32>
    %cst_116 = arith.constant 1.000000e+00 : f32
    %240 = vector.broadcast %cst_116 : f32 to vector<256x8xf32>
    %241 = arith.addf %240, %239 : vector<256x8xf32>
    %242 = arith.divf %240, %241 : vector<256x8xf32>
    %243 = arith.mulf %237, %242 : vector<256x8xf32>
    %c0_117 = arith.constant 0 : index
    %c0_118 = arith.constant 0 : index
    %244 = vector.load %arg19[%c0_117, %c0_118] : memref<2x8xf32, #tpu.memory_space<vmem>>, vector<2x8xf32>
    %c0_119 = arith.constant 0 : index
    %c0_120 = arith.constant 0 : index
    %245 = vector.load %arg20[%c0_119, %c0_120] : memref<2x8xf32, #tpu.memory_space<vmem>>, vector<2x8xf32>
    %cst_121 = arith.constant dense<0.000000e+00> : vector<8xf32>
    %246 = vector.multi_reduction <add>, %243, %cst_121 [0] : vector<256x8xf32> to vector<8xf32>
    %247 = vector.shape_cast %246 : vector<8xf32> to vector<1x8xf32>
    %cst_122 = arith.constant 3.906250e-03 : f32
    %248 = vector.broadcast %cst_122 : f32 to vector<1x8xf32>
    %249 = arith.mulf %247, %248 : vector<1x8xf32>
    %cst_123 = arith.constant 0.000000e+00 : f32
    %250 = vector.broadcast %cst_123 : f32 to vector<1x8xf32>
    %251 = vector.extract_strided_slice %244 {offsets = [0, 0], sizes = [1, 8], strides = [1, 1]} : vector<2x8xf32> to vector<1x8xf32>
    %252 = arith.mulf %249, %251 : vector<1x8xf32>
    %cst_124 = arith.constant dense<0.000000e+00> : vector<1xf32>
    %253 = vector.multi_reduction <add>, %252, %cst_124 [1] : vector<1x8xf32> to vector<1xf32>
    %254 = vector.shape_cast %253 : vector<1xf32> to vector<1x1xf32>
    %255 = arith.negf %254 : vector<1x1xf32>
    %256 = math.exp %255 : vector<1x1xf32>
    %cst_125 = arith.constant 1.000000e+00 : f32
    %257 = vector.broadcast %cst_125 : f32 to vector<1x1xf32>
    %258 = arith.addf %257, %256 : vector<1x1xf32>
    %259 = arith.divf %257, %258 : vector<1x1xf32>
    %260 = arith.mulf %254, %259 : vector<1x1xf32>
    %261 = vector.extract_strided_slice %245 {offsets = [0, 0], sizes = [1, 8], strides = [1, 1]} : vector<2x8xf32> to vector<1x8xf32>
    %262 = vector.broadcast %260 : vector<1x1xf32> to vector<1x8xf32>
    %263 = arith.mulf %262, %261 : vector<1x8xf32>
    %264 = arith.addf %250, %263 : vector<1x8xf32>
    %265 = vector.extract_strided_slice %244 {offsets = [1, 0], sizes = [1, 8], strides = [1, 1]} : vector<2x8xf32> to vector<1x8xf32>
    %266 = arith.mulf %249, %265 : vector<1x8xf32>
    %cst_126 = arith.constant dense<0.000000e+00> : vector<1xf32>
    %267 = vector.multi_reduction <add>, %266, %cst_126 [1] : vector<1x8xf32> to vector<1xf32>
    %268 = vector.shape_cast %267 : vector<1xf32> to vector<1x1xf32>
    %269 = arith.negf %268 : vector<1x1xf32>
    %270 = math.exp %269 : vector<1x1xf32>
    %cst_127 = arith.constant 1.000000e+00 : f32
    %271 = vector.broadcast %cst_127 : f32 to vector<1x1xf32>
    %272 = arith.addf %271, %270 : vector<1x1xf32>
    %273 = arith.divf %271, %272 : vector<1x1xf32>
    %274 = arith.mulf %268, %273 : vector<1x1xf32>
    %275 = vector.extract_strided_slice %245 {offsets = [1, 0], sizes = [1, 8], strides = [1, 1]} : vector<2x8xf32> to vector<1x8xf32>
    %276 = vector.broadcast %274 : vector<1x1xf32> to vector<1x8xf32>
    %277 = arith.mulf %276, %275 : vector<1x8xf32>
    %278 = arith.addf %264, %277 : vector<1x8xf32>
    %279 = arith.negf %278 : vector<1x8xf32>
    %280 = math.exp %279 : vector<1x8xf32>
    %cst_128 = arith.constant 1.000000e+00 : f32
    %281 = vector.broadcast %cst_128 : f32 to vector<1x8xf32>
    %282 = arith.addf %281, %280 : vector<1x8xf32>
    %283 = arith.divf %281, %282 : vector<1x8xf32>
    %284 = vector.broadcast %283 : vector<1x8xf32> to vector<256x8xf32>
    %285 = arith.mulf %243, %284 : vector<256x8xf32>
    %c0_129 = arith.constant 0 : index
    %c0_130 = arith.constant 0 : index
    %286 = vector.load %arg21[%c0_129, %c0_130] : memref<8x4xf32, #tpu.memory_space<vmem>>, vector<8x4xf32>
    %c0_131 = arith.constant 0 : index
    %c0_132 = arith.constant 0 : index
    %287 = vector.load %arg22[%c0_131, %c0_132] : memref<1x4xf32, #tpu.memory_space<vmem>>, vector<1x4xf32>
    %c0_133 = arith.constant 0 : index
    %c0_134 = arith.constant 0 : index
    %288 = vector.load %arg23[%c0_133, %c0_134] : memref<1x4xf32, #tpu.memory_space<vmem>>, vector<1x4xf32>
    %cst_135 = arith.constant dense<0.000000e+00> : vector<256x4xf32>
    %289 = tpu.matmul %285, %286, %cst_135 {dimension_numbers = #tpu.dot_dimension_numbers<[1], [0], [0], [1], [0, 0, 1, 1], [], []>} : vector<256x8xf32>, vector<8x4xf32>, vector<256x4xf32> -> vector<256x4xf32>
    %290 = vector.broadcast %287 : vector<1x4xf32> to vector<256x4xf32>
    %291 = arith.mulf %289, %290 : vector<256x4xf32>
    %292 = vector.broadcast %288 : vector<1x4xf32> to vector<256x4xf32>
    %293 = arith.addf %291, %292 : vector<256x4xf32>
    %294 = arith.addf %293, %149 : vector<256x4xf32>
    %c0_136 = arith.constant 0 : index
    %c0_137 = arith.constant 0 : index
    %295 = vector.load %arg24[%c0_136, %c0_137] : memref<64x256xf32, #tpu.memory_space<vmem>>, vector<64x256xf32>
    %cst_138 = arith.constant dense<0.000000e+00> : vector<64x4xf32>
    %296 = tpu.matmul %295, %294, %cst_138 {dimension_numbers = #tpu.dot_dimension_numbers<[1], [0], [0], [1], [0, 0, 1, 1], [], []>} : vector<64x256xf32>, vector<256x4xf32>, vector<64x4xf32> -> vector<64x4xf32>
    %297 = vector.shape_cast %296 : vector<64x4xf32> to vector<8x8x4xf32>
    %c0_139 = arith.constant 0 : index
    %c0_140 = arith.constant 0 : index
    %c0_141 = arith.constant 0 : index
    %c0_142 = arith.constant 0 : index
    %298 = vector.load %arg25[%c0_139, %c0_140, %c0_141, %c0_142] : memref<1x8x8x4xf32, #tpu.memory_space<vmem>>, vector<1x8x8x4xf32>
    %299 = vector.shape_cast %298 : vector<1x8x8x4xf32> to vector<8x8x4xf32>
    %300 = vector.shape_cast %297 : vector<8x8x4xf32> to vector<1x8x8x4xf32>
    tpu.vector_store %arg25[%c0_139, %c0_140, %c0_141, %c0_142], %300 {strides = array<i32>} : memref<1x8x8x4xf32, #tpu.memory_space<vmem>>, vector<1x8x8x4xf32>,
    return
  }
  func.func @transform_0(%arg0: i32) -> (i32, i32, i32, i32) {
    %c0_i32 = arith.constant 0 : i32
    %c0_i32_0 = arith.constant 0 : i32
    %c0_i32_1 = arith.constant 0 : i32
    %c0_i32_2 = arith.constant 0 : i32
    return %arg0, %c0_i32, %c0_i32_0, %c0_i32_1 : i32, i32, i32, i32
  }
  func.func @transform_1(%arg0: i32) -> (i32, i32) {
    %c0_i32 = arith.constant 0 : i32
    %c0_i32_0 = arith.constant 0 : i32
    %c0_i32_1 = arith.constant 0 : i32
    return %c0_i32, %c0_i32_0 : i32, i32
  }
  func.func @transform_2(%arg0: i32) -> (i32, i32) {
    %c0_i32 = arith.constant 0 : i32
    %c0_i32_0 = arith.constant 0 : i32
    %c0_i32_1 = arith.constant 0 : i32
    return %c0_i32, %c0_i32_0 : i32, i32
  }
  func.func @transform_3(%arg0: i32) -> (i32, i32) {
    %c0_i32 = arith.constant 0 : i32
    %c0_i32_0 = arith.constant 0 : i32
    %c0_i32_1 = arith.constant 0 : i32
    return %c0_i32, %c0_i32_0 : i32, i32
  }
  func.func @transform_4(%arg0: i32) -> (i32, i32, i32) {
    %c0_i32 = arith.constant 0 : i32
    %c0_i32_0 = arith.constant 0 : i32
    %c0_i32_1 = arith.constant 0 : i32
    %c0_i32_2 = arith.constant 0 : i32
    return %c0_i32, %c0_i32_0, %c0_i32_1 : i32, i32, i32
  }
  func.func @transform_5(%arg0: i32) -> (i32, i32) {
    %c0_i32 = arith.constant 0 : i32
    %c0_i32_0 = arith.constant 0 : i32
    %c0_i32_1 = arith.constant 0 : i32
    return %c0_i32, %c0_i32_0 : i32, i32
  }
  func.func @transform_6(%arg0: i32) -> (i32, i32) {
    %c0_i32 = arith.constant 0 : i32
    %c0_i32_0 = arith.constant 0 : i32
    %c0_i32_1 = arith.constant 0 : i32
    return %c0_i32, %c0_i32_0 : i32, i32
  }
  func.func @transform_7(%arg0: i32) -> (i32, i32) {
    %c0_i32 = arith.constant 0 : i32
    %c0_i32_0 = arith.constant 0 : i32
    %c0_i32_1 = arith.constant 0 : i32
    return %c0_i32, %c0_i32_0 : i32, i32
  }
  func.func @transform_8(%arg0: i32) -> (i32, i32) {
    %c0_i32 = arith.constant 0 : i32
    %c0_i32_0 = arith.constant 0 : i32
    %c0_i32_1 = arith.constant 0 : i32
    return %c0_i32, %c0_i32_0 : i32, i32
  }
  func.func @transform_9(%arg0: i32) -> (i32, i32) {
    %c0_i32 = arith.constant 0 : i32
    %c0_i32_0 = arith.constant 0 : i32
    %c0_i32_1 = arith.constant 0 : i32
    return %c0_i32, %c0_i32_0 : i32, i32
  }
  func.func @transform_10(%arg0: i32) -> (i32, i32) {
    %c0_i32 = arith.constant 0 : i32
    %c0_i32_0 = arith.constant 0 : i32
    %c0_i32_1 = arith.constant 0 : i32
    return %c0_i32, %c0_i32_0 : i32, i32
  }
  func.func @transform_11(%arg0: i32) -> (i32, i32) {
    %c0_i32 = arith.constant 0 : i32
    %c0_i32_0 = arith.constant 0 : i32
    %c0_i32_1 = arith.constant 0 : i32
    return %c0_i32, %c0_i32_0 : i32, i32
  }
  func.func @transform_12(%arg0: i32) -> (i32, i32) {
    %c0_i32 = arith.constant 0 : i32
    %c0_i32_0 = arith.constant 0 : i32
    %c0_i32_1 = arith.constant 0 : i32
    return %c0_i32, %c0_i32_0 : i32, i32
  }
  func.func @transform_13(%arg0: i32) -> (i32, i32) {
    %c0_i32 = arith.constant 0 : i32
    %c0_i32_0 = arith.constant 0 : i32
    %c0_i32_1 = arith.constant 0 : i32
    return %c0_i32, %c0_i32_0 : i32, i32
  }
  func.func @transform_14(%arg0: i32) -> (i32, i32) {
    %c0_i32 = arith.constant 0 : i32
    %c0_i32_0 = arith.constant 0 : i32
    %c0_i32_1 = arith.constant 0 : i32
    return %c0_i32, %c0_i32_0 : i32, i32
  }
  func.func @transform_15(%arg0: i32) -> (i32, i32, i32) {
    %c0_i32 = arith.constant 0 : i32
    %c0_i32_0 = arith.constant 0 : i32
    %c0_i32_1 = arith.constant 0 : i32
    %c0_i32_2 = arith.constant 0 : i32
    return %c0_i32, %c0_i32_0, %c0_i32_1 : i32, i32, i32
  }
  func.func @transform_16(%arg0: i32) -> (i32, i32) {
    %c0_i32 = arith.constant 0 : i32
    %c0_i32_0 = arith.constant 0 : i32
    %c0_i32_1 = arith.constant 0 : i32
    return %c0_i32, %c0_i32_0 : i32, i32
  }
  func.func @transform_17(%arg0: i32) -> (i32, i32) {
    %c0_i32 = arith.constant 0 : i32
    %c0_i32_0 = arith.constant 0 : i32
    %c0_i32_1 = arith.constant 0 : i32
    return %c0_i32, %c0_i32_0 : i32, i32
  }
  func.func @transform_18(%arg0: i32) -> (i32, i32) {
    %c0_i32 = arith.constant 0 : i32
    %c0_i32_0 = arith.constant 0 : i32
    %c0_i32_1 = arith.constant 0 : i32
    return %c0_i32, %c0_i32_0 : i32, i32
  }
  func.func @transform_19(%arg0: i32) -> (i32, i32) {
    %c0_i32 = arith.constant 0 : i32
    %c0_i32_0 = arith.constant 0 : i32
    %c0_i32_1 = arith.constant 0 : i32
    return %c0_i32, %c0_i32_0 : i32, i32
  }
  func.func @transform_20(%arg0: i32) -> (i32, i32) {
    %c0_i32 = arith.constant 0 : i32
    %c0_i32_0 = arith.constant 0 : i32
    %c0_i32_1 = arith.constant 0 : i32
    return %c0_i32, %c0_i32_0 : i32, i32
  }
  func.func @transform_21(%arg0: i32) -> (i32, i32) {
    %c0_i32 = arith.constant 0 : i32
    %c0_i32_0 = arith.constant 0 : i32
    %c0_i32_1 = arith.constant 0 : i32
    return %c0_i32, %c0_i32_0 : i32, i32
  }
  func.func @transform_22(%arg0: i32) -> (i32, i32) {
    %c0_i32 = arith.constant 0 : i32
    %c0_i32_0 = arith.constant 0 : i32
    %c0_i32_1 = arith.constant 0 : i32
    return %c0_i32, %c0_i32_0 : i32, i32
  }
  func.func @transform_23(%arg0: i32) -> (i32, i32) {
    %c0_i32 = arith.constant 0 : i32
    %c0_i32_0 = arith.constant 0 : i32
    %c0_i32_1 = arith.constant 0 : i32
    return %c0_i32, %c0_i32_0 : i32, i32
  }
  func.func @transform_24(%arg0: i32) -> (i32, i32, i32, i32) {
    %c0_i32 = arith.constant 0 : i32
    %c0_i32_0 = arith.constant 0 : i32
    %c0_i32_1 = arith.constant 0 : i32
    %c0_i32_2 = arith.constant 0 : i32
    return %arg0, %c0_i32, %c0_i32_0, %c0_i32_1 : i32, i32, i32, i32
  }
}

</mosaic_0001>

<bundles_post_ra>
// kernel: mbconv_forward.1
= control target key start
LH: loop header
LB: loop body
LE: loop exit
PB: predicated region body
PF: predicated region fallthrough
CT: control target
= control target key end

     0   :  { %s11663_s0 = inlined_call_operand.vmem [shape: f32[2,16,16,4], index: 0, kind: input, shape index: {}]   ;;  %s11664_s1 = inlined_call_operand.vmem [shape: f32[4,8], index: 1, kind: input, shape index: {}]   ;;  %s11665_s2 = inlined_call_operand.vmem [shape: f32[1,8], index: 2, kind: input, shape index: {}]   ;;  %s11666_s3 = inlined_call_operand.vmem [shape: f32[1,8], index: 3, kind: input, shape index: {}]   ;;  %s11667_s4 = inlined_call_operand.vmem [shape: f32[3,3,8], index: 4, kind: input, shape index: {}]   ;;  %s11668_s5 = inlined_call_operand.vmem [shape: f32[1,8], index: 5, kind: input, shape index: {}]   ;;  %s11669_s6 = inlined_call_operand.vmem [shape: f32[1,8], index: 6, kind: input, shape index: {}]   ;;  %s11670_s7 = inlined_call_operand.vmem [shape: f32[2,8], index: 7, kind: input, shape index: {}]   ;;  %s11671_s8 = inlined_call_operand.vmem [shape: f32[2,8], index: 8, kind: input, shape index: {}]   ;;  %s11672_s9 = inlined_call_operand.vmem [shape: f32[8,4], index: 9, kind: input, shape index: {}]   ;;  %s11673_s10 = inlined_call_operand.vmem [shape: f32[1,4], index: 10, kind: input, shape index: {}]   ;;  %s11674_s11 = inlined_call_operand.vmem [shape: f32[1,4], index: 11, kind: input, shape index: {}]   ;;  %s11675_s12 = inlined_call_operand.vmem [shape: f32[4,8], index: 12, kind: input, shape index: {}]   ;;  %s11676_s13 = inlined_call_operand.vmem [shape: f32[1,8], index: 13, kind: input, shape index: {}]   ;;  %s11677_s14 = inlined_call_operand.vmem [shape: f32[1,8], index: 14, kind: input, shape index: {}]   ;;  %s11678_s15 = inlined_call_operand.vmem [shape: f32[3,3,8], index: 15, kind: input, shape index: {}]   ;;  %s11679_s16 = inlined_call_operand.vmem [shape: f32[1,8], index: 16, kind: input, shape index: {}]   ;;  %s11680_s17 = inlined_call_operand.vmem [shape: f32[1,8], index: 17, kind: input, shape index: {}]   ;;  %s11681_s18 = inlined_call_operand.vmem [shape: f32[2,8], index: 18, kind: input, shape index: {}]   ;;  %s11682_s19 = inlined_call_operand.vmem [shape: f32[2,8], index: 19, kind: input, shape index: {}]   ;;  %s11683_s20 = inlined_call_operand.vmem [shape: f32[8,4], index: 20, kind: input, shape index: {}]   ;;  %s11684_s21 = inlined_call_operand.vmem [shape: f32[1,4], index: 21, kind: input, shape index: {}]   ;;  %s11685_s22 = inlined_call_operand.vmem [shape: f32[1,4], index: 22, kind: input, shape index: {}]   ;;  %s11686_s23 = inlined_call_operand.vmem [shape: f32[64,256], index: 23, kind: input, shape index: {}]   ;;  %s11687_s24 = inlined_call_operand.vmem [shape: f32[2,8,8,4], index: 24, kind: output, shape index: {}]  }
   0x1   :  { %11884 = sst [smem:[#allocation146_spill]] %s11663_s0 }
   0x2   :  { %11885 = sst [smem:[#allocation147_spill]] %s11664_s1 }
   0x3   :  { %11886 = sst [smem:[#allocation148_spill]] %s11665_s2 }
   0x4   :  { %11887 = sst [smem:[#allocation149_spill]] %s11666_s3 }
   0x5   :  { %11888 = sst [smem:[#allocation150_spill]] %s11667_s4 }
   0x6   :  { %11889 = sst [smem:[#allocation151_spill]] %s11668_s5  ;;  %s7326_s5 = smov 0  }
   0x7   :  { %11890 = sst [smem:[#allocation152_spill]] %s11669_s6 }
   0x8   :  { %11891 = sst [smem:[#allocation153_spill]] %s11670_s7 }
   0x9   :  { %11892 = sst [smem:[#allocation154_spill]] %s11671_s8 }
   0xa LB: > { %s5892_s26 = sadd.s32 4294967295, %s7198_s5   ;;  %p5896_p0 = scmp.ge.s32.totalorder %s7198_s5, 1  ;;  %s7198_s5 = sphi %s7326_s5, %s34_s5  }
   0xb   : > { %p662_p1 = scmp.lt.s32.totalorder %s7198_s5, 3 }
   0xd   : > { %p663_p2 = pnand %p5896_p0, %p662_p1 }
   0xf   : > { %666 = sbr.rel (%p663_p2) target bundleno = 2305 (0x901), region = 116 }
  0x16   : > { %s11893_s6 = sld [smem:[#allocation147_spill]]  ;;  %vm926_vm0 = vcmask 1043456   ;;  %p728_p3 = scmp.lt.s32.totalorder %s5892_s26, 1  ;;  %vm738_vm1 = vcmask 64512   ;;  %vm741_vm2 = vcmask 58368   ;;  %v7200_v1 = vmov 0.0  }
  0x17   : > { %744 = vst.msk [vmem:[#allocation2 + $0x20] sm:$0xff] %vm738_vm1, %v7200_v1  ;;  %739 = vst.msk [vmem:[#allocation2] sm:$0xff] %vm738_vm1, %v7200_v1  ;;  %vm829_vm3 = vcmask 31744   ;;  %s11894_s7 = sld [smem:[#allocation146_spill]]  ;;  %s11895_s8 = sld [smem:[#allocation148_spill]]  ;;  %vm2780_vm4 = vcmask 58369  }
  0x18   : > { %s12429_s26 = smov (!%p728_p3, %s5892_s26), 1  ;;  %745 = vst.msk [vmem:[#allocation2 + $0x28] sm:$0x3] %vm741_vm2, %v7200_v1  ;;  %742 = vst.msk [vmem:[#allocation2 + $0x10] sm:$0x3] %vm741_vm2, %v7200_v1  ;;  %s11896_s27 = sld [smem:[#allocation149_spill]] }
  0x19   : > { %740 = vst.msk [vmem:[#allocation2 + $0x8] sm:$0xff] %vm738_vm1, %v7200_v1  ;;  %743 = vst.msk [vmem:[#allocation2 + $0x18] sm:$0xff] %vm738_vm1, %v7200_v1  ;;  %s6179_s2 = sshll.u32 %s12429_s26, 8  ;;  %s11903_s4 = sld [smem:[#allocation151_spill]]  ;;  %vm2767_vm5 = vcmask 57344  }
  0x1a   : > { %746 = vst.msk [vmem:[#allocation2 + $0x30] sm:$0xff] %vm738_vm1, %v7200_v1  ;;  %747 = vst.msk [vmem:[#allocation2 + $0x38] sm:$0xff] %vm738_vm1, %v7200_v1  ;;  %s11905_s28 = sld [smem:[#allocation152_spill]]  ;;  %s12037_s3 = sld [smem:[#allocation154_spill]] }
  0x1b   : > { %748 = vst.msk [vmem:[#allocation2 + $0x40] sm:$0x3] %vm741_vm2, %v7200_v1  ;;  %751 = vst.msk [vmem:[#allocation2 + $0x58] sm:$0x3] %vm741_vm2, %v7200_v1  ;;  %s6180_s1 = sshll.u32 %s12429_s26, 6 }
  0x1c   : > { %v826_v0 = vld [vmem:[%s11893_s6] sm:$0xf]  ;;  %749 = vst.msk [vmem:[#allocation2 + $0x48] sm:$0xff] %vm738_vm1, %v7200_v1  ;;  %750 = vst.msk [vmem:[#allocation2 + $0x50] sm:$0xff] %vm738_vm1, %v7200_v1  ;;  %s11642_s29 = scalar_lea.vmem %s11687_s24, %s6180_s1 }
  0x1d   : > { %6369 = vmatprep.subr.msk.mxu0 %vm926_vm0, %v826_v0  ;;  %6601 = vmatprep.subr.msk.mxu1 %vm926_vm0, %v826_v0  ;;  %752 = vst.msk [vmem:[#allocation2 + $0x60] sm:$0xff] %vm738_vm1, %v7200_v1  ;;  %753 = vst.msk [vmem:[#allocation2 + $0x68] sm:$0xff] %vm738_vm1, %v7200_v1  ;;  %s7401_s30 = scalar_lea.vmem %s11894_s7, %s6179_s2  ;;  %v7470_v34 = vld [vmem:[%s11895_s8] ss:$0 sm:$0xff]  ;;  %s11898_s2 = sld [smem:[#allocation150_spill]] }
  0x1e   : > { %6370 = vmatpush3.msk.msra.mxu0 %vm926_vm0, %v826_v0  ;;  %6602 = vmatpush3.msk.msra.mxu1 %vm926_vm0, %v826_v0  ;;  %754 = vst.msk [vmem:[#allocation2 + $0x70] sm:$0x3] %vm741_vm2, %v7200_v1  ;;  %757 = vst.msk [vmem:[#allocation2 + $0x88] sm:$0x3] %vm741_vm2, %v7200_v1  ;;  %v794_v2 = vld [vmem:[%s7401_s30] sm:$0xff]  ;;  %v795_v4 = vld [vmem:[%s7401_s30 + $0x8] sm:$0xff] }
  0x1f   : > { %755 = vst.msk [vmem:[#allocation2 + $0x78] sm:$0xff] %vm738_vm1, %v7200_v1  ;;  %756 = vst.msk [vmem:[#allocation2 + $0x80] sm:$0xff] %vm738_vm1, %v7200_v1  ;;  %v818_v3 = vld [vmem:[%s7401_s30 + $0xc0] sm:$0xff]  ;;  %6371 = vmatprep.mubr.msk.f32.mxu0 %vm829_vm3, %v794_v2  ;;  %v819_v5 = vld [vmem:[%s7401_s30 + $0xc8] sm:$0xff]  ;;  %s12036_s8 = sld [smem:[#allocation153_spill]] }
  0x20   : > { %758 = vst.msk [vmem:[#allocation2 + $0x90] sm:$0xff] %vm738_vm1, %v7200_v1  ;;  %759 = vst.msk [vmem:[#allocation2 + $0x98] sm:$0xff] %vm738_vm1, %v7200_v1  ;;  %6407 = vmatprep.mubr.msk.f32.mxu1 %vm829_vm3, %v818_v3  ;;  %v796_v6 = vld [vmem:[%s7401_s30 + $0x10] sm:$0xff]  ;;  %6372 = vmatmul.mubr.msk.f32.vlgmr.msra.gmra.mrb[0].mxu0 %vm829_vm3, %v795_v4  ;;  %v797_v8 = vld [vmem:[%s7401_s30 + $0x18] sm:$0xff] }
  0x21   : > { %760 = vst.msk [vmem:[#allocation2 + $0xa0] sm:$0x3] %vm741_vm2, %v7200_v1  ;;  %763 = vst.msk [vmem:[#allocation2 + $0xb8] sm:$0x3] %vm741_vm2, %v7200_v1  ;;  %v820_v7 = vld [vmem:[%s7401_s30 + $0xd0] sm:$0xff]  ;;  %6408 = vmatmul.mubr.msk.f32.vlgmr.msra.gmra.mrb[0].mxu1 %vm829_vm3, %v819_v5  ;;  %6374 = vmatprep.mubr.msk.f32.mxu0 %vm829_vm3, %v796_v6  ;;  %v821_v9 = vld [vmem:[%s7401_s30 + $0xd8] sm:$0xff] }
  0x22   : > { %761 = vst.msk [vmem:[#allocation2 + $0xa8] sm:$0xff] %vm738_vm1, %v7200_v1  ;;  %762 = vst.msk [vmem:[#allocation2 + $0xb0] sm:$0xff] %vm738_vm1, %v7200_v1  ;;  %6410 = vmatprep.mubr.msk.f32.mxu1 %vm829_vm3, %v820_v7  ;;  %v798_v10 = vld [vmem:[%s7401_s30 + $0x20] sm:$0xff]  ;;  %v799_v12 = vld [vmem:[%s7401_s30 + $0x28] sm:$0xff] }
  0x23   : > { %764 = vst.msk [vmem:[#allocation2 + $0xc0] sm:$0xff] %vm738_vm1, %v7200_v1  ;;  %765 = vst.msk [vmem:[#allocation2 + $0xc8] sm:$0xff] %vm738_vm1, %v7200_v1  ;;  %v822_v11 = vld [vmem:[%s7401_s30 + $0xe0] sm:$0xff]  ;;  %v823_v13 = vld [vmem:[%s7401_s30 + $0xe8] sm:$0xff] }
  0x24   : > { %766 = vst.msk [vmem:[#allocation2 + $0xd0] sm:$0x3] %vm741_vm2, %v7200_v1  ;;  %769 = vst.msk [vmem:[#allocation2 + $0xe8] sm:$0x3] %vm741_vm2, %v7200_v1  ;;  %6375 = vmatmul.mubr.msk.f32.gmra.mrb[2].mxu0 %vm829_vm3, %v797_v8  ;;  %v800_v14 = vld [vmem:[%s7401_s30 + $0x30] sm:$0xff]  ;;  %v801_v16 = vld [vmem:[%s7401_s30 + $0x38] sm:$0xff] }
  0x25   : > { %767 = vst.msk [vmem:[#allocation2 + $0xd8] sm:$0xff] %vm738_vm1, %v7200_v1  ;;  %768 = vst.msk [vmem:[#allocation2 + $0xe0] sm:$0xff] %vm738_vm1, %v7200_v1  ;;  %6411 = vmatmul.mubr.msk.f32.gmra.mrb[2].mxu1 %vm829_vm3, %v821_v9  ;;  %6377 = vmatprep.mubr.msk.f32.mxu0 %vm829_vm3, %v798_v10  ;;  %v824_v15 = vld [vmem:[%s7401_s30 + $0xf0] sm:$0xff]  ;;  %v825_v17 = vld [vmem:[%s7401_s30 + $0xf8] sm:$0xff] }
  0x26   : > { %770 = vst.msk [vmem:[#allocation2 + $0xf0] sm:$0xff] %vm738_vm1, %v7200_v1  ;;  %771 = vst.msk [vmem:[#allocation2 + $0xf8] sm:$0xff] %vm738_vm1, %v7200_v1  ;;  %6413 = vmatprep.mubr.msk.f32.mxu1 %vm829_vm3, %v822_v11  ;;  %v802_v18 = vld [vmem:[%s7401_s30 + $0x40] sm:$0xff]  ;;  %v803_v19 = vld [vmem:[%s7401_s30 + $0x48] sm:$0xff] }
  0x27   : > { %772 = vst.msk [vmem:[#allocation2 + $0x100] sm:$0x3] %vm741_vm2, %v7200_v1  ;;  %775 = vst.msk [vmem:[#allocation2 + $0x118] sm:$0x3] %vm741_vm2, %v7200_v1  ;;  %v804_v20 = vld [vmem:[%s7401_s30 + $0x50] sm:$0xff]  ;;  %v805_v21 = vld [vmem:[%s7401_s30 + $0x58] sm:$0xff] }
  0x28   : > { %773 = vst.msk [vmem:[#allocation2 + $0x108] sm:$0xff] %vm738_vm1, %v7200_v1  ;;  %774 = vst.msk [vmem:[#allocation2 + $0x110] sm:$0xff] %vm738_vm1, %v7200_v1  ;;  %6378 = vmatmul.mubr.msk.f32.gmra.mrb[4].mxu0 %vm829_vm3, %v799_v12  ;;  %v806_v22 = vld [vmem:[%s7401_s30 + $0x60] sm:$0xff]  ;;  %v807_v23 = vld [vmem:[%s7401_s30 + $0x68] sm:$0xff] }
  0x29   : > { %776 = vst.msk [vmem:[#allocation2 + $0x120] sm:$0xff] %vm738_vm1, %v7200_v1  ;;  %777 = vst.msk [vmem:[#allocation2 + $0x128] sm:$0xff] %vm738_vm1, %v7200_v1  ;;  %6414 = vmatmul.mubr.msk.f32.gmra.mrb[4].mxu1 %vm829_vm3, %v823_v13  ;;  %6380 = vmatprep.mubr.msk.f32.mxu0 %vm829_vm3, %v800_v14  ;;  %v808_v24 = vld [vmem:[%s7401_s30 + $0x70] sm:$0xff]  ;;  %v809_v25 = vld [vmem:[%s7401_s30 + $0x78] sm:$0xff] }
  0x2a   : > { %778 = vst.msk [vmem:[#allocation2 + $0x130] sm:$0x3] %vm741_vm2, %v7200_v1  ;;  %781 = vst.msk [vmem:[#allocation2 + $0x148] sm:$0x3] %vm741_vm2, %v7200_v1  ;;  %6416 = vmatprep.mubr.msk.f32.mxu1 %vm829_vm3, %v824_v15  ;;  %v810_v26 = vld [vmem:[%s7401_s30 + $0x80] sm:$0xff]  ;;  %v811_v27 = vld [vmem:[%s7401_s30 + $0x88] sm:$0xff] }
  0x2b   : > { %779 = vst.msk [vmem:[#allocation2 + $0x138] sm:$0xff] %vm738_vm1, %v7200_v1  ;;  %780 = vst.msk [vmem:[#allocation2 + $0x140] sm:$0xff] %vm738_vm1, %v7200_v1  ;;  %v812_v28 = vld [vmem:[%s7401_s30 + $0x90] sm:$0xff]  ;;  %v813_v29 = vld [vmem:[%s7401_s30 + $0x98] sm:$0xff] }
  0x2c   : > { %782 = vst.msk [vmem:[#allocation2 + $0x150] sm:$0xff] %vm738_vm1, %v7200_v1  ;;  %783 = vst.msk [vmem:[#allocation2 + $0x158] sm:$0xff] %vm738_vm1, %v7200_v1  ;;  %6381 = vmatmul.mubr.msk.f32.gmra.mrb[6].mxu0 %vm829_vm3, %v801_v16  ;;  %v814_v30 = vld [vmem:[%s7401_s30 + $0xa0] sm:$0xff]  ;;  %v815_v31 = vld [vmem:[%s7401_s30 + $0xa8] sm:$0xff] }
  0x2d   : > { %784 = vst.msk [vmem:[#allocation2 + $0x160] sm:$0x3] %vm741_vm2, %v7200_v1  ;;  %787 = vst.msk [vmem:[#allocation2 + $0x178] sm:$0x3] %vm741_vm2, %v7200_v1  ;;  %6417 = vmatmul.mubr.msk.f32.gmra.mrb[6].mxu1 %vm829_vm3, %v825_v17  ;;  %6383 = vmatprep.mubr.msk.f32.mxu0 %vm829_vm3, %v802_v18  ;;  %v816_v32 = vld [vmem:[%s7401_s30 + $0xb0] sm:$0xff]  ;;  %v817_v33 = vld [vmem:[%s7401_s30 + $0xb8] sm:$0xff] }
  0x2e   : > { %785 = vst.msk [vmem:[#allocation2 + $0x168] sm:$0xff] %vm738_vm1, %v7200_v1  ;;  %786 = vst.msk [vmem:[#allocation2 + $0x170] sm:$0xff] %vm738_vm1, %v7200_v1  ;;  %v7475_v35 = vld [vmem:[%s11896_s27] ss:$0 sm:$0xff] }
  0x2f   : > { %788 = vst.msk [vmem:[#allocation2 + $0x180] sm:$0xff] %vm738_vm1, %v7200_v1  ;;  %789 = vst.msk [vmem:[#allocation2 + $0x188] sm:$0xff] %vm738_vm1, %v7200_v1 }
  0x30   : > { %790 = vst.msk [vmem:[#allocation2 + $0x190] sm:$0x3] %vm741_vm2, %v7200_v1  ;;  %793 = vst.msk [vmem:[#allocation2 + $0x1a8] sm:$0x3] %vm741_vm2, %v7200_v1  ;;  %6384 = vmatmul.mubr.msk.f32.gmra.mrb[8].mxu0 %vm829_vm3, %v803_v19 }
  0x31   : > { %791 = vst.msk [vmem:[#allocation2 + $0x198] sm:$0xff] %vm738_vm1, %v7200_v1  ;;  %792 = vst.msk [vmem:[#allocation2 + $0x1a0] sm:$0xff] %vm738_vm1, %v7200_v1  ;;  %6386 = vmatprep.mubr.msk.f32.mxu0 %vm829_vm3, %v804_v20 }
  0x34   : > { %6387 = vmatmul.mubr.msk.f32.gmra.mrb[10].mxu0 %vm829_vm3, %v805_v21 }
  0x35   : > { %6389 = vmatprep.mubr.msk.f32.mxu0 %vm829_vm3, %v806_v22 }
  0x38   : > { %6390 = vmatmul.mubr.msk.f32.gmra.mrb[12].mxu0 %vm829_vm3, %v807_v23 }
  0x39   : > { %6392 = vmatprep.mubr.msk.f32.mxu0 %vm829_vm3, %v808_v24  ;;  %v1525_v24 = vlaneseq }
  0x3c   : > { %6393 = vmatmul.mubr.msk.f32.gmra.mrb[14].mxu0 %vm829_vm3, %v809_v25 }
  0x3d   : > { %6395 = vmatprep.mubr.msk.f32.mxu0 %vm829_vm3, %v810_v26 }
  0x40   : > { %6396 = vmatmul.mubr.msk.f32.gmra.mrb[16].mxu0 %vm829_vm3, %v811_v27 }
  0x41   : > { %6398 = vmatprep.mubr.msk.f32.mxu0 %vm829_vm3, %v812_v28 }
  0x44   : > { %6399 = vmatmul.mubr.msk.f32.gmra.mrb[18].mxu0 %vm829_vm3, %v813_v29 }
  0x45   : > { %6401 = vmatprep.mubr.msk.f32.mxu0 %vm829_vm3, %v814_v30 }
  0x48   : > { %6402 = vmatmul.mubr.msk.f32.gmra.mrb[20].mxu0 %vm829_vm3, %v815_v31 }
  0x49   : > { %6404 = vmatprep.mubr.msk.f32.mxu0 %vm829_vm3, %v816_v32 }
  0x4c   : > { %6405 = vmatmul.mubr.msk.f32.gmra.mrb[22].mxu0 %vm829_vm3, %v817_v33  ;;  %v1526_v33 = vshrl.u32 %v1525_v24, 7  ;;  %v1594_v24 = vld [vmem:[#allocation2 + $0x9] sm:$0xff] }
  0xf3   : > { %v6373_v36 = vpop.f32.mrb[0].mxu0 }
  0xf4   : > { %v6409_v37 = vpop.f32.mrb[0].mxu1  ;;  %v1162_v38 = vmul.f32 %v6373_v36, %v7470_v34  ;;  %v996_v40 = vpop.f32.mrb[1].mxu0 }
  0xf5   : > { %v1186_v39 = vmul.f32 %v6409_v37, %v7470_v34  ;;  %v1116_v41 = vpop.f32.mrb[1].mxu1  ;;  %v1161_v42 = vmul.f32 %v7470_v34, %v996_v40 }
  0xf6   : > { %v1185_v43 = vmul.f32 %v7470_v34, %v1116_v41  ;;  %v7482_v44 = vadd.f32 %v7475_v35, %v1162_v38 }
  0xf7   : > { %v7485_v45 = vadd.f32 %v7475_v35, %v1186_v39  ;;  %v7488_v46 = vadd.f32 %v7475_v35, %v1161_v42  ;;  %v6376_v48 = vpop.f32.mrb[2].mxu0 }
  0xf8   : > { %v7491_v47 = vadd.f32 %v7475_v35, %v1185_v43  ;;  %v6412_v49 = vpop.f32.mrb[2].mxu1  ;;  %v5937_v50 = vmul.f32 -1.442695, %v7482_v44  ;;  %v1164_v52 = vmul.f32 %v6376_v48, %v7470_v34  ;;  %v1006_v54 = vpop.f32.mrb[3].mxu0 }
  0xf9   : > { %v5961_v51 = vmul.f32 -1.442695, %v7485_v45  ;;  %v1188_v53 = vmul.f32 %v6412_v49, %v7470_v34  ;;  %v1126_v55 = vpop.f32.mrb[3].mxu1  ;;  %v5936_v56 = vmul.f32 -1.442695, %v7488_v46  ;;  %v1163_v58 = vmul.f32 %v7470_v34, %v1006_v54 }
  0xfa   : > { %v5960_v57 = vmul.f32 -1.442695, %v7491_v47  ;;  %v1187_v59 = vmul.f32 %v7470_v34, %v1126_v55  ;;  %6612 = vpow2.f32 %v5937_v50  ;;  %v7502_v60 = vadd.f32 %v7475_v35, %v1164_v52  ;;  %v1455_v54 = vld [vmem:[%s11898_s2] sm:$0x7] }
  0xfb   : > { %v7505_v61 = vadd.f32 %v7475_v35, %v1188_v53  ;;  %6614 = vpow2.f32 %v5961_v51  ;;  %v7508_v62 = vadd.f32 %v7475_v35, %v1163_v58  ;;  %v6379_v0 = vpop.f32.mrb[4].mxu0  ;;  %v7553_v50 = vsub.s32 1, %v1526_v33 }
  0xfc   : > { %v7511_v63 = vadd.f32 %v7475_v35, %v1187_v59  ;;  %v6415_v1 = vpop.f32.mrb[4].mxu1  ;;  %6616 = vpow2.f32 %v5936_v56  ;;  %v5939_v2 = vmul.f32 -1.442695, %v7502_v60  ;;  %v1166_v4 = vmul.f32 %v6379_v0, %v7470_v34  ;;  %v1016_v5 = vpop.f32.mrb[5].mxu0 }
  0xfd   : > { %v5963_v3 = vmul.f32 -1.442695, %v7505_v61  ;;  %v1136_v6 = vpop.f32.mrb[5].mxu1  ;;  %6618 = vpow2.f32 %v5960_v57  ;;  %v5938_v7 = vmul.f32 -1.442695, %v7508_v62  ;;  %v1190_v9 = vmul.f32 %v6415_v1, %v7470_v34  ;;  %11897 = vst [vmem:[#allocation3_spill] sm:$0xff] %v7553_v50 }
  0xfe   : > { %v5962_v8 = vmul.f32 -1.442695, %v7511_v63  ;;  %6620 = vpow2.f32 %v5939_v2  ;;  %v7520_v10 = vadd.f32 %v7475_v35, %v1166_v4  ;;  %v1165_v11 = vmul.f32 %v7470_v34, %v1016_v5 }
  0xff   : > { %v1189_v12 = vmul.f32 %v7470_v34, %v1136_v6  ;;  %6622 = vpow2.f32 %v5963_v3  ;;  %v7525_v13 = vadd.f32 %v7475_v35, %v1190_v9  ;;  %v7527_v14 = vpop.f32.mrb[6].mxu0  ;;  %v7560_v55 = vsub.s32 0, %v1526_v33 }
 0x100   : > { %v7529_v15 = vpop.f32.mrb[6].mxu1  ;;  %6624 = vpow2.f32 %v5938_v7  ;;  %v5941_v16 = vmul.f32 -1.442695, %v7520_v10  ;;  %v7533_v17 = vadd.f32 %v7475_v35, %v1165_v11  ;;  %v7538_v19 = vpop.f32.mrb[7].mxu0  ;;  %v7565_v3 = vrot.slane %v1455_v54, %v7553_v50 }
 0x101   : > { %v7536_v18 = vadd.f32 %v7475_v35, %v1189_v12  ;;  %v7540_v20 = vpop.f32.mrb[7].mxu1  ;;  %6626 = vpow2.f32 %v5962_v8  ;;  %v5965_v21 = vmul.f32 -1.442695, %v7525_v13  ;;  %11899 = vst [vmem:[#allocation4_spill] sm:$0xff] %v7560_v55  ;;  %v7569_v6 = vsub.s32 2, %v1526_v33  ;;  %v1493_v12 = vld [vmem:[#allocation2] sm:$0xff] }
 0x102   : > { %6628 = vpow2.f32 %v5941_v16  ;;  %v5940_v22 = vmul.f32 -1.442695, %v7533_v17  ;;  %v7572_v7 = vrot.slane %v1455_v54, %v7560_v55  ;;  %v1593_v16 = vld [vmem:[#allocation2 + $0x1] sm:$0xff] }
 0x103   : > { %v5964_v23 = vmul.f32 -1.442695, %v7536_v18  ;;  %6630 = vpow2.f32 %v5965_v21  ;;  %v7545_v25 = vpop.f32.mrb[8].mxu0  ;;  %11900 = vst [vmem:[#allocation5_spill] sm:$0xff] %v7569_v6 }
 0x104   : > { %v6613_v26 = vpop.eup %6612  ;;  %6632 = vpow2.f32 %v5940_v22  ;;  %v7547_v27 = vpop.f32.mrb[9].mxu0  ;;  %v1529_v33 = vmul.f32 %v7572_v7, %v1493_v12 }
 0x105   : > { %v6615_v28 = vpop.eup %6614  ;;  %v1328_v29 = vadd.f32 1.0, %v6613_v26  ;;  %6634 = vpow2.f32 %v5964_v23  ;;  %v1494_v23 = vld [vmem:[#allocation2 + $0x8] sm:$0xff] }
 0x106   : > { %v6617_v30 = vpop.eup %6616  ;;  %v1352_v31 = vadd.f32 1.0, %v6615_v28 }
 0x107   : > { %v6619_v32 = vpop.eup %6618  ;;  %6636 = vrcp.f32 %v1328_v29  ;;  %v1327_v36 = vadd.f32 1.0, %v6617_v30  ;;  %v7549_v37 = vpop.f32.mrb[10].mxu0 }
 0x108   : > { %v6621_v38 = vpop.eup %6620  ;;  %6638 = vrcp.f32 %v1352_v31  ;;  %v1351_v39 = vadd.f32 1.0, %v6619_v32  ;;  %v7551_v40 = vpop.f32.mrb[11].mxu0  ;;  %v7582_v31 = vrot.slane %v1455_v54, %v7569_v6 }
 0x109   : > { %v6623_v41 = vpop.eup %6622  ;;  %6640 = vrcp.f32 %v1327_v36  ;;  %v1330_v42 = vadd.f32 1.0, %v6621_v38 }
 0x10a   : > { %v6625_v43 = vpop.eup %6624  ;;  %6642 = vrcp.f32 %v1351_v39  ;;  %v1354_v48 = vadd.f32 1.0, %v6623_v41  ;;  %v1630_v39 = vmul.f32 %v7565_v3, %v1594_v24  ;;  %v1693_v41 = vld [vmem:[#allocation2 + $0x2] sm:$0xff] }
 0x10b   : > { %v6627_v49 = vpop.eup %6626  ;;  %6644 = vrcp.f32 %v1330_v42  ;;  %v1329_v51 = vadd.f32 1.0, %v6625_v43  ;;  %v7555_v52 = vpop.f32.mrb[12].mxu0 }
 0x10c   : > { %v6629_v53 = vpop.eup %6628  ;;  %6646 = vrcp.f32 %v1354_v48  ;;  %v1353_v56 = vadd.f32 1.0, %v6627_v49  ;;  %v7562_v57 = vpop.f32.mrb[13].mxu0  ;;  %v1168_v49 = vmul.f32 %v7527_v14, %v7470_v34 }
 0x10d   : > { %v6631_v58 = vpop.eup %6630  ;;  %6648 = vrcp.f32 %v1329_v51  ;;  %v1332_v59 = vadd.f32 1.0, %v6629_v53  ;;  %v1456_v53 = vld [vmem:[%s11898_s2 + $0x4] sm:$0x7] }
 0x10e   : > { %v6633_v0 = vpop.eup %6632  ;;  %6650 = vrcp.f32 %v1353_v56  ;;  %v1356_v1 = vadd.f32 1.0, %v6631_v58  ;;  %v7620_v12 = vadd.f32 %v7475_v35, %v1168_v49  ;;  %v7633_v24 = vrot.slane %v1456_v53, %v7553_v50 }
 0x10f   : > { %v6635_v2 = vpop.eup %6634  ;;  %6652 = vrcp.f32 %v1332_v59  ;;  %v1331_v4 = vadd.f32 1.0, %v6633_v0  ;;  %v7567_v5 = vpop.f32.mrb[14].mxu0  ;;  %v1729_v59 = vmul.f32 %v7582_v31, %v1693_v41 }
 0x110   : > { %6654 = vrcp.f32 %v1356_v1  ;;  %v1355_v8 = vadd.f32 1.0, %v6635_v2  ;;  %v7574_v9 = vpop.f32.mrb[15].mxu0 }
 0x111   : > { %v6637_v11 = vpop.eup %6636  ;;  %6656 = vrcp.f32 %v1331_v4  ;;  %v1192_v4 = vmul.f32 %v7529_v15, %v7470_v34  ;;  %v1191_v15 = vmul.f32 %v7470_v34, %v7540_v20 }
 0x112   : > { %v6639_v21 = vpop.eup %6638  ;;  %v1424_v22 = vmul.f32 %v6637_v11, %v7482_v44  ;;  %6658 = vrcp.f32 %v1355_v8  ;;  %v1629_v44 = vmul.f32 %v7565_v3, %v1593_v16  ;;  %v7615_v11 = vrot.slane %v1456_v53, %v7560_v55 }
 0x113   : > { %v6641_v26 = vpop.eup %6640  ;;  %v1448_v28 = vmul.f32 %v6639_v21, %v7485_v45  ;;  %v7578_v29 = vpop.f32.mrb[16].mxu0  ;;  %v1530_v45 = vmul.f32 %v7572_v7, %v1494_v23  ;;  %v1167_v16 = vmul.f32 %v7470_v34, %v7538_v19 }
 0x114   : > { %v6643_v30 = vpop.eup %6642  ;;  %1462 = vst.msk [vmem:[#allocation2 + $0x21] sm:$0xff] %vm738_vm1, %v1424_v22  ;;  %v1423_v32 = vmul.f32 %v6641_v26, %v7488_v46  ;;  %v7587_v36 = vpop.f32.mrb[17].mxu0  ;;  %v1694_v46 = vld [vmem:[#allocation2 + $0xa] sm:$0xff]  ;;  %v1661_v58 = vadd.f32 %v1629_v44, %v1529_v33  ;;  %v1170_v22 = vmul.f32 %v7545_v25, %v7470_v34  ;;  %v7636_v26 = vrot.slane %v1456_v53, %v7569_v6 }
 0x115   : > { %v6645_v38 = vpop.eup %6644  ;;  %1486 = vst.msk [vmem:[#allocation2 + $0x141] sm:$0xff] %vm738_vm1, %v1448_v28  ;;  %v1447_v42 = vmul.f32 %v6643_v30, %v7491_v47  ;;  %v1662_v1 = vadd.f32 %v1630_v39, %v1530_v45  ;;  %v1730_v2 = vmul.f32 %v7582_v31, %v1694_v46  ;;  %v7652_v41 = vadd.f32 %v7475_v35, %v1167_v16 }
 0x116   : > { %v6647_v43 = vpop.eup %6646  ;;  %1461 = vst.msk [vmem:[#allocation2 + $0x19] sm:$0xff] %vm738_vm1, %v1423_v32  ;;  %v1426_v48 = vmul.f32 %v6645_v38, %v7502_v60  ;;  %v1761_v19 = vadd.f32 %v1729_v59, %v1661_v58  ;;  %v7647_v38 = vadd.f32 %v7475_v35, %v1192_v4  ;;  %v7666_v46 = vadd.f32 %v7475_v35, %v1170_v22 }
 0x117   : > { %v6649_v51 = vpop.eup %6648  ;;  %1485 = vst.msk [vmem:[#allocation2 + $0x139] sm:$0xff] %vm738_vm1, %v1447_v42  ;;  %v1450_v54 = vmul.f32 %v6647_v43, %v7505_v61  ;;  %v7602_v56 = vpop.f32.mrb[18].mxu0  ;;  %v1762_v32 = vadd.f32 %v1730_v2, %v1662_v1  ;;  %v1172_v42 = vmul.f32 %v7549_v37, %v7470_v34 }
 0x118   : > { %v6651_v47 = vpop.eup %6650  ;;  %1464 = vst.msk [vmem:[#allocation2 + $0x39] sm:$0xff] %vm738_vm1, %v1426_v48  ;;  %v1425_v60 = vmul.f32 %v6649_v51, %v7508_v62  ;;  %v7607_v14 = vpop.f32.mrb[19].mxu0  ;;  %v1171_v48 = vmul.f32 %v7470_v34, %v7551_v40 }
 0x119   : > { %v6653_v0 = vpop.eup %6652  ;;  %1488 = vst.msk [vmem:[#allocation2 + $0x159] sm:$0xff] %vm738_vm1, %v1450_v54  ;;  %v1449_v61 = vmul.f32 %v6651_v47, %v7511_v63  ;;  %v7688_v4 = vadd.f32 %v7475_v35, %v1172_v42 }
 0x11a   : > { %v6655_v8 = vpop.eup %6654  ;;  %1463 = vst.msk [vmem:[#allocation2 + $0x31] sm:$0xff] %vm738_vm1, %v1425_v60  ;;  %v1428_v62 = vmul.f32 %v6653_v0, %v7520_v10 }
 0x11b   : > { %v6657_v21 = vpop.eup %6656  ;;  %1487 = vst.msk [vmem:[#allocation2 + $0x151] sm:$0xff] %vm738_vm1, %v1449_v61  ;;  %v1452_v63 = vmul.f32 %v6655_v8, %v7525_v13  ;;  %v7630_v23 = vpop.f32.mrb[20].mxu0  ;;  %v1169_v13 = vmul.f32 %v7470_v34, %v7547_v27  ;;  %v1596_v45 = vld [vmem:[#allocation2 + $0x21] sm:$0xff]  ;;  %v5943_v27 = vmul.f32 -1.442695, %v7620_v12 }
 0x11c   : > { %v6659_v10 = vpop.eup %6658  ;;  %1466 = vst.msk [vmem:[#allocation2 + $0x51] sm:$0xff] %vm738_vm1, %v1428_v62  ;;  %v7641_v28 = vpop.f32.mrb[21].mxu0  ;;  %v1427_v33 = vmul.f32 %v6657_v21, %v7533_v17  ;;  %v1457_v17 = vld [vmem:[%s11898_s2 + $0x8] sm:$0x7]  ;;  %v1632_v58 = vmul.f32 %v7565_v3, %v1596_v45  ;;  %v1930_v40 = vmul.f32 %v7633_v24, %v1596_v45  ;;  %v5967_v61 = vmul.f32 -1.442695, %v7647_v38 }
 0x11d   : > { %v1495_v20 = vld [vmem:[#allocation2 + $0x18] sm:$0xff]  ;;  %v1496_v30 = vld [vmem:[#allocation2 + $0x20] sm:$0xff]  ;;  %1490 = vst.msk [vmem:[#allocation2 + $0x171] sm:$0xff] %vm738_vm1, %v1452_v63  ;;  %v1451_v44 = vmul.f32 %v6659_v10, %v7536_v18  ;;  %v7663_v18 = vadd.f32 %v7475_v35, %v1191_v15  ;;  %v7675_v54 = vadd.f32 %v7475_v35, %v1169_v13  ;;  %v7684_v2 = vrot.slane %v1457_v17, %v7553_v50 }
 0x11e   : > { %v1595_v25 = vld [vmem:[#allocation2 + $0x19] sm:$0xff]  ;;  %v1829_v39 = vmul.f32 %v7615_v11, %v1495_v20  ;;  %v1830_v43 = vmul.f32 %v7615_v11, %v1496_v30  ;;  %1465 = vst.msk [vmem:[#allocation2 + $0x49] sm:$0xff] %vm738_vm1, %v1427_v33  ;;  %v1531_v49 = vmul.f32 %v7572_v7, %v1495_v20  ;;  %v1532_v59 = vmul.f32 %v7572_v7, %v1496_v30  ;;  %v1696_v8 = vld [vmem:[#allocation2 + $0x22] sm:$0xff] }
 0x11f   : > { %1489 = vst.msk [vmem:[#allocation2 + $0x169] sm:$0xff] %vm738_vm1, %v1451_v44  ;;  %v7670_v37 = vpop.f32.mrb[22].mxu0  ;;  %v1631_v51 = vmul.f32 %v7565_v3, %v1595_v25  ;;  %v1929_v0 = vmul.f32 %v7633_v24, %v1595_v25  ;;  %v1695_v1 = vld [vmem:[#allocation2 + $0x1a] sm:$0xff]  ;;  %v7691_v16 = vrot.slane %v1457_v17, %v7560_v55  ;;  %v5942_v21 = vmul.f32 -1.442695, %v7652_v41 }
 0x120   : > { %v1861_v53 = vadd.f32 %v1829_v39, %v1761_v19  ;;  %v7677_v47 = vpop.f32.mrb[23].mxu0  ;;  %v1862_v60 = vadd.f32 %v1830_v43, %v1762_v32  ;;  %v7695_v63 = vadd.f32 %v7475_v35, %v1171_v48  ;;  %v5966_v10 = vmul.f32 -1.442695, %v7663_v18 }
 0x121   : > { %v1663_v15 = vadd.f32 %v1631_v51, %v1531_v49  ;;  %v5945_v19 = vmul.f32 -1.442695, %v7666_v46  ;;  %v1664_v13 = vadd.f32 %v1632_v58, %v1532_v59  ;;  %v2029_v20 = vmul.f32 %v7636_v26, %v1695_v1  ;;  %v7700_v30 = vld [vmem:[#allocation2 + $0x30] sm:$0xff]  ;;  %v7705_v44 = vld [vmem:[#allocation2 + $0x38] sm:$0xff] }
 0x122   : > { %v1961_v62 = vadd.f32 %v1929_v0, %v1861_v53  ;;  %v1962_v22 = vadd.f32 %v1930_v40, %v1862_v60  ;;  %6660 = vpow2.f32 %v5943_v27  ;;  %v5944_v25 = vmul.f32 -1.442695, %v7675_v54  ;;  %v7716_v59 = vld [vmem:[#allocation2 + $0x31] sm:$0xff]  ;;  %v7722_v40 = vld [vmem:[#allocation2 + $0x39] sm:$0xff] }
 0x123   : > { %v2030_v32 = vmul.f32 %v7636_v26, %v1696_v8  ;;  %v1731_v33 = vmul.f32 %v7582_v31, %v1695_v1  ;;  %6662 = vpow2.f32 %v5967_v61  ;;  %v5947_v45 = vmul.f32 -1.442695, %v7688_v4 }
 0x124   : > { %v1732_v39 = vmul.f32 %v7582_v31, %v1696_v8  ;;  %v2061_v42 = vadd.f32 %v2029_v20, %v1961_v62  ;;  %6664 = vpow2.f32 %v5942_v21  ;;  %v5946_v43 = vmul.f32 -1.442695, %v7695_v63 }
 0x125   : > { %v1763_v48 = vadd.f32 %v1731_v33, %v1663_v15  ;;  %v1831_v27 = vmul.f32 %v7615_v11, %v7700_v30  ;;  %v2062_v49 = vadd.f32 %v2030_v32, %v1962_v22  ;;  %6666 = vpow2.f32 %v5966_v10  ;;  %v7733_v10 = vld [vmem:[#allocation2 + $0x32] sm:$0xff] }
 0x126   : > { %v1764_v51 = vadd.f32 %v1732_v39, %v1664_v13  ;;  %v1832_v53 = vmul.f32 %v7615_v11, %v7705_v44  ;;  %v2130_v58 = vmul.f32 %v7691_v16, %v7700_v30  ;;  %6668 = vpow2.f32 %v5945_v19 }
 0x127   : > { %v2131_v60 = vmul.f32 %v7691_v16, %v7705_v44  ;;  %6670 = vpow2.f32 %v5944_v25  ;;  %v1174_v0 = vmul.f32 %v7555_v52, %v7470_v34  ;;  %v1863_v61 = vadd.f32 %v1831_v27, %v1763_v48  ;;  %v7742_v25 = vld [vmem:[#allocation2 + $0x3a] sm:$0xff] }
 0x128   : > { %v2162_v1 = vadd.f32 %v2130_v58, %v2061_v42  ;;  %6672 = vpow2.f32 %v5947_v45  ;;  %v7725_v62 = vrot.slane %v1457_v17, %v7569_v6  ;;  %v1864_v21 = vadd.f32 %v1832_v53, %v1764_v51 }
 0x129   : > { %v2163_v8 = vadd.f32 %v2131_v60, %v2062_v49  ;;  %6674 = vpow2.f32 %v5946_v43  ;;  %v2230_v15 = vmul.f32 %v7684_v2, %v7716_v59  ;;  %v1173_v22 = vmul.f32 %v7470_v34, %v7562_v57 }
 0x12a   : > { %11901 = vst [vmem:[#allocation6_spill] sm:$0xff] %v7725_v62  ;;  %v2231_v52 = vmul.f32 %v7684_v2, %v7722_v40  ;;  %v1931_v19 = vmul.f32 %v7633_v24, %v7716_v59  ;;  %v7738_v13 = vadd.f32 %v7475_v35, %v1174_v0  ;;  %v1176_v17 = vmul.f32 %v7567_v5, %v7470_v34 }
 0x12b   : > { %v1932_v57 = vmul.f32 %v7633_v24, %v7722_v40  ;;  %v2262_v32 = vadd.f32 %v2230_v15, %v2162_v1  ;;  %v1175_v42 = vmul.f32 %v7470_v34, %v7574_v9  ;;  %v2330_v27 = vmul.f32 %v7725_v62, %v7733_v10 }
 0x12c   : > { %v6661_v20 = vpop.eup %6660  ;;  %v1963_v45 = vadd.f32 %v1931_v19, %v1863_v61  ;;  %v2263_v39 = vadd.f32 %v2231_v52, %v2163_v8  ;;  %v7751_v5 = vadd.f32 %v7475_v35, %v1173_v22  ;;  %v2331_v51 = vmul.f32 %v7725_v62, %v7742_v25  ;;  %v7765_v61 = vld [vmem:[#allocation2 + $0x48] sm:$0xff]  ;;  %v7770_v22 = vld [vmem:[%s11903_s4] ss:$0 sm:$0xff] }
 0x12d   : > { %v6663_v33 = vpop.eup %6662  ;;  %v1964_v48 = vadd.f32 %v1932_v57, %v1864_v21  ;;  %v2031_v53 = vmul.f32 %v7636_v26, %v7733_v10  ;;  %v7758_v58 = vmul.f32 -1.442695, %v7738_v13  ;;  %v7761_v9 = vadd.f32 %v7475_v35, %v1176_v17  ;;  %v7772_v57 = vld [vmem:[#allocation2 + $0x50] sm:$0xff] }
 0x12e   : > { %v6665_v43 = vpop.eup %6664  ;;  %v2032_v0 = vmul.f32 %v7636_v26, %v7742_v25  ;;  %v2362_v1 = vadd.f32 %v2330_v27, %v2262_v32  ;;  %v1334_v8 = vadd.f32 1.0, %v6661_v20  ;;  %v1358_v21 = vadd.f32 1.0, %v6663_v33 }
 0x12f   : > { %v6667_v49 = vpop.eup %6666  ;;  %11902 = vst [vmem:[#allocation7_spill] sm:$0xff] %v7761_v9  ;;  %v2063_v52 = vadd.f32 %v2031_v53, %v1963_v45  ;;  %v2363_v19 = vadd.f32 %v2331_v51, %v2263_v39  ;;  %v1333_v17 = vadd.f32 1.0, %v6665_v43  ;;  %v7775_v6 = vadd.f32 %v7475_v35, %v1175_v42  ;;  %v7786_v51 = vld [vmem:[#allocation2 + $0x49] sm:$0xff] }
 0x130   : > { %v6669_v60 = vpop.eup %6668  ;;  %v2064_v32 = vadd.f32 %v2032_v0, %v1964_v48  ;;  %v1357_v27 = vadd.f32 1.0, %v6667_v49  ;;  %v1178_v20 = vmul.f32 %v7578_v29, %v7470_v34  ;;  %v1177_v33 = vmul.f32 %v7470_v34, %v7587_v36  ;;  %v7793_v36 = vld [vmem:[%s11905_s28] ss:$0 sm:$0xff]  ;;  %v7796_v49 = vld [vmem:[#allocation2 + $0x51] sm:$0xff] }
 0x131   : > { %v6671_v15 = vpop.eup %6670  ;;  %11904 = vst [vmem:[#allocation8_spill] sm:$0xff] %v7775_v6  ;;  %v1533_v45 = vmul.f32 %v7572_v7, %v7700_v30  ;;  %v2132_v39 = vmul.f32 %v7691_v16, %v7765_v61  ;;  %6676 = vrcp.f32 %v1334_v8  ;;  %v1336_v43 = vadd.f32 1.0, %v6669_v60 }
 0x132   : > { %v6673_v50 = vpop.eup %6672  ;;  %v2400_v42 = vmul.f32 %v7770_v22, %v2362_v1  ;;  %v2133_v48 = vmul.f32 %v7691_v16, %v7772_v57  ;;  %6678 = vrcp.f32 %v1358_v21  ;;  %v1335_v29 = vadd.f32 1.0, %v6671_v15 }
 0x133   : > { %v6675_v55 = vpop.eup %6674  ;;  %v2401_v30 = vmul.f32 %v7770_v22, %v2363_v19  ;;  %v2164_v53 = vadd.f32 %v2132_v39, %v2063_v52  ;;  %6680 = vrcp.f32 %v1333_v17  ;;  %v1338_v60 = vadd.f32 1.0, %v6673_v50 }
 0x134   : > { %v1633_v0 = vmul.f32 %v7565_v3, %v7716_v59  ;;  %v2165_v1 = vadd.f32 %v2133_v48, %v2064_v32  ;;  %6682 = vrcp.f32 %v1357_v27  ;;  %v1337_v8 = vadd.f32 1.0, %v6675_v55  ;;  %v7811_v59 = vld [vmem:[#allocation2 + $0x4a] sm:$0xff] }
 0x135   : > { %v1634_v21 = vmul.f32 %v7565_v3, %v7722_v40  ;;  %v1534_v15 = vmul.f32 %v7572_v7, %v7705_v44  ;;  %v2232_v19 = vmul.f32 %v7684_v2, %v7786_v51  ;;  %6684 = vrcp.f32 %v1336_v43  ;;  %v7819_v44 = vld [vmem:[#allocation2 + $0x52] sm:$0xff] }
 0x136   : > { %v7807_v52 = vadd.f32 %v7793_v36, %v2400_v42  ;;  %v2233_v50 = vmul.f32 %v7684_v2, %v7796_v49  ;;  %6686 = vrcp.f32 %v1335_v29  ;;  %v7814_v55 = vadd.f32 %v7475_v35, %v1178_v20 }
 0x137   : > { %v7817_v40 = vadd.f32 %v7793_v36, %v2401_v30  ;;  %v2264_v17 = vadd.f32 %v2232_v19, %v2164_v53  ;;  %6688 = vrcp.f32 %v1338_v60  ;;  %v5948_v32 = vmul.f32 -1.442695, %v7751_v5 }
 0x138   : > { %11906 = vst [vmem:[#allocation9_spill] sm:$0xff] %v7814_v55  ;;  %v1665_v27 = vadd.f32 %v1633_v0, %v1533_v45  ;;  %v2265_v39 = vadd.f32 %v2233_v50, %v2165_v1  ;;  %6690 = vrcp.f32 %v1337_v8  ;;  %v7823_v43 = vmul.f32 -1.442695, %v7761_v9 }
 0x139   : > { %11907 = vst [vmem:[#allocation10_spill] sm:$0xff] %v7817_v40  ;;  %v1666_v42 = vadd.f32 %v1634_v21, %v1534_v15  ;;  %v2332_v20 = vmul.f32 %v7725_v62, %v7811_v59  ;;  %v7828_v48 = vmul.f32 -1.442695, %v7775_v6  ;;  %v7831_v29 = vadd.f32 %v7475_v35, %v1177_v33 }
 0x13a   : > { %v1733_v30 = vmul.f32 %v7582_v31, %v7733_v10  ;;  %v5970_v45 = vmul.f32 -1.442695, %v7807_v52  ;;  %v2333_v53 = vmul.f32 %v7725_v62, %v7819_v44  ;;  %v7839_v60 = vmul.f32 -1.442695, %v7814_v55 }
 0x13b   : > { %11908 = vst [vmem:[#allocation11_spill] sm:$0xff] %v7831_v29  ;;  %v6677_v0 = vpop.eup %6676  ;;  %v1734_v1 = vmul.f32 %v7582_v31, %v7742_v25  ;;  %v5971_v8 = vmul.f32 -1.442695, %v7817_v40  ;;  %v2364_v21 = vadd.f32 %v2332_v20, %v2264_v17  ;;  %6692 = vpow2.f32 %v7758_v58 }
 0x13c   : > { %v6679_v33 = vpop.eup %6678  ;;  %v1765_v15 = vadd.f32 %v1733_v30, %v1665_v27  ;;  %v1833_v10 = vmul.f32 %v7615_v11, %v7765_v61  ;;  %v2365_v19 = vadd.f32 %v2333_v53, %v2265_v39  ;;  %v1430_v50 = vmul.f32 %v6677_v0, %v7620_v12 }
 0x13d   : > { %v6681_v6 = vpop.eup %6680  ;;  %v1766_v55 = vadd.f32 %v1734_v1, %v1666_v42  ;;  %v1834_v9 = vmul.f32 %v7615_v11, %v7772_v57  ;;  %v1454_v25 = vmul.f32 %v6679_v33, %v7647_v38  ;;  %6694 = vpow2.f32 %v5948_v32 }
 0x13e   : > { %v6683_v40 = vpop.eup %6682  ;;  %6696 = vpow2.f32 %v5970_v45  ;;  %1468 = vst.msk [vmem:[#allocation2 + $0x69] sm:$0xff] %vm738_vm1, %v1430_v50  ;;  %v1429_v58 = vmul.f32 %v6681_v6, %v7652_v41  ;;  %v1180_v17 = vmul.f32 %v7602_v56, %v7470_v34  ;;  %v1179_v12 = vmul.f32 %v7470_v34, %v7607_v14 }
 0x13f   : > { %v6685_v27 = vpop.eup %6684  ;;  %6698 = vpow2.f32 %v5971_v8  ;;  %v1535_v39 = vmul.f32 %v7572_v7, %v7765_v61  ;;  %v2402_v38 = vmul.f32 %v7770_v22, %v2364_v21  ;;  %1492 = vst.msk [vmem:[#allocation2 + $0x189] sm:$0xff] %vm738_vm1, %v1454_v25  ;;  %v1453_v32 = vmul.f32 %v6683_v40, %v7663_v18 }
 0x140   : > { %v6687_v42 = vpop.eup %6686  ;;  %v1635_v6 = vmul.f32 %v7565_v3, %v7786_v51  ;;  %v1865_v41 = vadd.f32 %v1833_v10, %v1765_v15  ;;  %v2403_v56 = vmul.f32 %v7770_v22, %v2365_v19  ;;  %1467 = vst.msk [vmem:[#allocation2 + $0x61] sm:$0xff] %vm738_vm1, %v1429_v58  ;;  %v1432_v14 = vmul.f32 %v6685_v27, %v7666_v46 }
 0x141   : > { %v6689_v20 = vpop.eup %6688  ;;  %v1636_v61 = vmul.f32 %v7565_v3, %v7796_v49  ;;  %v1536_v30 = vmul.f32 %v7572_v7, %v7772_v57  ;;  %v1866_v45 = vadd.f32 %v1834_v9, %v1766_v55  ;;  %1491 = vst.msk [vmem:[#allocation2 + $0x181] sm:$0xff] %vm738_vm1, %v1453_v32  ;;  %v1431_v18 = vmul.f32 %v6687_v42, %v7675_v54 }
 0x142   : > { %v6691_v40 = vpop.eup %6690  ;;  %v1933_v53 = vmul.f32 %v7633_v24, %v7786_v51  ;;  %1470 = vst.msk [vmem:[#allocation2 + $0x81] sm:$0xff] %vm738_vm1, %v1432_v14  ;;  %v1434_v46 = vmul.f32 %v6689_v20, %v7688_v4  ;;  %v7878_v0 = vmul.f32 -1.442695, %v7831_v29  ;;  %v1182_v1 = vmul.f32 %v7630_v23, %v7470_v34 }
 0x143   : > { %v1934_v9 = vmul.f32 %v7633_v24, %v7796_v49  ;;  %v7885_v57 = vadd.f32 %v7793_v36, %v2402_v38  ;;  %1469 = vst.msk [vmem:[#allocation2 + $0x79] sm:$0xff] %vm738_vm1, %v1431_v18  ;;  %v1433_v54 = vmul.f32 %v6691_v40, %v7695_v63  ;;  %v1181_v51 = vmul.f32 %v7470_v34, %v7641_v28 }
 0x144   : > { %v1667_v4 = vadd.f32 %v1635_v6, %v1535_v39  ;;  %v1965_v55 = vadd.f32 %v1933_v53, %v1865_v41  ;;  %v7892_v8 = vadd.f32 %v7793_v36, %v2403_v56  ;;  %1472 = vst.msk [vmem:[#allocation2 + $0x99] sm:$0xff] %vm738_vm1, %v1434_v46  ;;  %v7896_v23 = vadd.f32 %v7475_v35, %v1180_v17 }
 0x145   : > { %v6693_v49 = vpop.eup %6692  ;;  %v1736_v21 = vmul.f32 %v7582_v31, %v7819_v44  ;;  %v1668_v33 = vadd.f32 %v1636_v61, %v1536_v30  ;;  %v1966_v15 = vadd.f32 %v1934_v9, %v1866_v45  ;;  %1471 = vst.msk [vmem:[#allocation2 + $0x91] sm:$0xff] %vm738_vm1, %v1433_v54  ;;  %v7902_v28 = vadd.f32 %v7475_v35, %v1179_v12  ;;  %v1602_v18 = vld [vmem:[#allocation2 + $0x69] sm:$0xff] }
 0x146   : > { %11909 = vst [vmem:[#allocation12_spill] sm:$0xff] %v7892_v8  ;;  %11910 = vst [vmem:[#allocation13_spill] sm:$0xff] %v7896_v23  ;;  %v1735_v63 = vmul.f32 %v7582_v31, %v7811_v59  ;;  %v2033_v10 = vmul.f32 %v7636_v26, %v7811_v59  ;;  %v7909_v19 = vadd.f32 %v7475_v35, %v1182_v1  ;;  %v5972_v17 = vmul.f32 -1.442695, %v7885_v57 }
 0x147   : > { %11911 = vst [vmem:[#allocation14_spill] sm:$0xff] %v7902_v28  ;;  %v1184_v50 = vmul.f32 %v7670_v37, %v7470_v34  ;;  %v6695_v25 = vpop.eup %6694  ;;  %v2034_v58 = vmul.f32 %v7636_v26, %v7819_v44  ;;  %v1501_v12 = vld [vmem:[#allocation2 + $0x60] sm:$0xff]  ;;  %v7917_v27 = vadd.f32 %v7475_v35, %v1181_v51  ;;  %v1183_v39 = vmul.f32 %v7470_v34, %v7677_v47  ;;  %v1502_v6 = vld [vmem:[#allocation2 + $0x68] sm:$0xff]  ;;  %v7943_v51 = vld [vmem:[#allocation2 + $0x138] sm:$0xff] }
 0x148   : > { %11912 = vst [vmem:[#allocation15_spill] sm:$0xff] %v7909_v19  ;;  %v6697_v59 = vpop.eup %6696  ;;  %v1767_v38 = vadd.f32 %v1735_v63, %v1667_v4  ;;  %v2065_v32 = vadd.f32 %v2033_v10, %v1965_v55  ;;  %v5973_v42 = vmul.f32 -1.442695, %v7892_v8  ;;  %v7923_v37 = vmul.f32 -1.442695, %v7896_v23  ;;  %v1601_v61 = vld [vmem:[#allocation2 + $0x61] sm:$0xff] }
 0x149   : > { %11913 = vst [vmem:[#allocation16_spill] sm:$0xff] %v7917_v27  ;;  %v6699_v41 = vpop.eup %6698  ;;  %v1768_v44 = vadd.f32 %v1736_v21, %v1668_v33  ;;  %v1835_v56 = vmul.f32 %v7615_v11, %v1501_v12  ;;  %v2066_v14 = vadd.f32 %v2034_v58, %v1966_v15  ;;  %v1340_v20 = vadd.f32 1.0, %v6693_v49  ;;  %11917 = vst [vmem:[#allocation20_spill] sm:$0xff] %v7943_v51  ;;  %v7945_v4 = vld [vmem:[#allocation2 + $0x140] sm:$0xff] }
 0x14a   : > { %v1339_v30 = vadd.f32 1.0, %v6695_v25  ;;  %v7927_v45 = vmul.f32 -1.442695, %v7902_v28  ;;  %v7930_v34 = vmul.f32 -1.442695, %v7909_v19  ;;  %v7933_v47 = vadd.f32 %v7475_v35, %v1184_v50  ;;  %11918 = vst [vmem:[#allocation21_spill] sm:$0xff] %v7945_v4 }
 0x14b   : > { %6700 = vpow2.f32 %v5972_v17  ;;  %v1836_v40 = vmul.f32 %v7615_v11, %v1502_v6  ;;  %v7937_v53 = vmul.f32 -1.442695, %v7917_v27  ;;  %v7940_v46 = vadd.f32 %v7475_v35, %v1183_v39  ;;  %v1701_v50 = vld [vmem:[#allocation2 + $0x62] sm:$0xff] }
 0x14c   : > { %11914 = vst [vmem:[#allocation17_spill] sm:$0xff] %v7933_v47  ;;  %v2566_v1 = vadd.f32 1.0, %v6697_v59  ;;  %v2567_v9 = vadd.f32 1.0, %v6699_v41  ;;  %6702 = vpow2.f32 %v5973_v42  ;;  %v2134_v54 = vmul.f32 %v7691_v16, %v1501_v12  ;;  %v8039_v28 = vld [vmem:[#allocation2 + $0x82] sm:$0xff] }
 0x14d   : > { %11915 = vst [vmem:[#allocation18_spill] sm:$0xff] %v7937_v53  ;;  %11916 = vst [vmem:[#allocation19_spill] sm:$0xff] %v7940_v46  ;;  %v1537_v55 = vmul.f32 %v7572_v7, %v1501_v12  ;;  %v1637_v49 = vmul.f32 %v7565_v3, %v1601_v61  ;;  %v1867_v21 = vadd.f32 %v1835_v56, %v1767_v38  ;;  %6704 = vrcp.f32 %v1340_v20  ;;  %v1702_v38 = vld [vmem:[#allocation2 + $0x6a] sm:$0xff] }
 0x14e   : > { %v2135_v33 = vmul.f32 %v7691_v16, %v1502_v6  ;;  %v1638_v15 = vmul.f32 %v7565_v3, %v1602_v18  ;;  %v1538_v35 = vmul.f32 %v7572_v7, %v1502_v6  ;;  %v2166_v63 = vadd.f32 %v2134_v54, %v2065_v32 }
 0x14f   : > { %v2234_v10 = vmul.f32 %v7684_v2, %v1601_v61  ;;  %v1868_v25 = vadd.f32 %v1836_v40, %v1768_v44  ;;  %v1935_v58 = vmul.f32 %v7633_v24, %v1601_v61  ;;  %6706 = vrcp.f32 %v2566_v1 }
 0x150   : > { %v2167_v17 = vadd.f32 %v2135_v33, %v2066_v14  ;;  %v7956_v39 = vmul.f32 %v7572_v7, %v7943_v51  ;;  %v7960_v59 = vmul.f32 %v7572_v7, %v7945_v4  ;;  %v1936_v32 = vmul.f32 %v7633_v24, %v1602_v18  ;;  %v7965_v14 = vld [vmem:[#allocation2 + $0x78] sm:$0xff]  ;;  %v7972_v33 = vld [vmem:[#allocation2 + $0x80] sm:$0xff]  ;;  %v8053_v4 = vld [vmem:[#allocation2 + $0x169] sm:$0xff] }
 0x151   : > { %v2266_v12 = vadd.f32 %v2234_v10, %v2166_v63  ;;  %v2235_v42 = vmul.f32 %v7684_v2, %v1602_v18  ;;  %v1669_v6 = vadd.f32 %v1637_v49, %v1537_v55  ;;  %v1967_v41 = vadd.f32 %v1935_v58, %v1867_v21  ;;  %v7979_v10 = vld [vmem:[#allocation2 + $0x150] sm:$0xff]  ;;  %v1603_v58 = vld [vmem:[#allocation2 + $0x79] sm:$0xff]  ;;  %11929 = vst [vmem:[#allocation32_spill] sm:$0xff] %v8053_v4 }
 0x152   : > { %6708 = vrcp.f32 %v2567_v9  ;;  %v1670_v44 = vadd.f32 %v1638_v15, %v1538_v35  ;;  %v2334_v56 = vmul.f32 %v7725_v62, %v1701_v50  ;;  %v7968_v20 = vmul.f32 -1.442695, %v7933_v47  ;;  %11920 = vst [vmem:[#allocation23_spill] sm:$0xff] %v7979_v10 }
 0x153   : > { %v1737_v61 = vmul.f32 %v7582_v31, %v1701_v50  ;;  %v1968_v40 = vadd.f32 %v1936_v32, %v1868_v25  ;;  %v2035_v1 = vmul.f32 %v7636_v26, %v1701_v50  ;;  %v2267_v54 = vadd.f32 %v2235_v42, %v2167_v17  ;;  %v7981_v50 = vld [vmem:[#allocation2 + $0x158] sm:$0xff] }
 0x154   : > { %11919 = vst [vmem:[#allocation22_spill] sm:$0xff] %v7968_v20  ;;  %v1738_v18 = vmul.f32 %v7582_v31, %v1702_v38  ;;  %v2036_v9 = vmul.f32 %v7636_v26, %v1702_v38  ;;  %v2366_v55 = vadd.f32 %v2334_v56, %v2266_v12  ;;  %6710 = vrcp.f32 %v1339_v30  ;;  %11921 = vst [vmem:[#allocation24_spill] sm:$0xff] %v7981_v50 }
 0x155   : > { %v6701_v49 = vpop.eup %6700  ;;  %v2335_v21 = vmul.f32 %v7725_v62, %v1702_v38  ;;  %v1769_v15 = vadd.f32 %v1737_v61, %v1669_v6  ;;  %v2067_v35 = vadd.f32 %v2035_v1, %v1967_v41  ;;  %v1837_v63 = vmul.f32 %v7615_v11, %v7965_v14  ;;  %v7994_v6 = vld [vmem:[#allocation2 + $0x168] sm:$0xff]  ;;  %v7996_v41 = vld [vmem:[#allocation2 + $0x170] sm:$0xff] }
 0x156   : > { %v7983_v25 = vpop.eup %6702  ;;  %v1770_v17 = vadd.f32 %v1738_v18, %v1670_v44  ;;  %v1838_v12 = vmul.f32 %v7615_v11, %v7972_v33  ;;  %6712 = vpow2.f32 %v7823_v43  ;;  %v7989_v30 = vmul.f32 -1.442695, %v7940_v46  ;;  %11923 = vst [vmem:[#allocation26_spill] sm:$0xff] %v7994_v6  ;;  %11924 = vst [vmem:[#allocation27_spill] sm:$0xff] %v7996_v41 }
 0x157   : > { %v2367_v38 = vadd.f32 %v2335_v21, %v2267_v54  ;;  %v2068_v32 = vadd.f32 %v2036_v9, %v1968_v40  ;;  %v2136_v42 = vmul.f32 %v7691_v16, %v7965_v14  ;;  %6714 = vpow2.f32 %v7828_v48  ;;  %v8008_v61 = vpop.eup %6704  ;;  %v8010_v40 = vld [vmem:[#allocation2 + $0x81] sm:$0xff] }
 0x158   : > { %11922 = vst [vmem:[#allocation25_spill] sm:$0xff] %v7989_v30  ;;  %v2404_v44 = vmul.f32 %v7770_v22, %v2366_v55  ;;  %6716 = vpow2.f32 %v7839_v60  ;;  %v8002_v43 = vmul.f32 %v7572_v7, %v7979_v10  ;;  %v8006_v56 = vmul.f32 %v7572_v7, %v7981_v50  ;;  %v1703_v48 = vld [vmem:[#allocation2 + $0x7a] sm:$0xff] }
 0x159   : > { %v1869_v1 = vadd.f32 %v1837_v63, %v1769_v15  ;;  %v2137_v54 = vmul.f32 %v7691_v16, %v7972_v33  ;;  %v2168_v18 = vadd.f32 %v2136_v42, %v2067_v35  ;;  %v2236_v60 = vmul.f32 %v7684_v2, %v1603_v58  ;;  %v8015_v9 = vpop.eup %6706  ;;  %v1619_v55 = vld [vmem:[#allocation2 + $0x139] sm:$0xff]  ;;  %v8026_v15 = vld [vmem:[#allocation2 + $0x141] sm:$0xff] }
 0x15a   : > { %v1870_v21 = vadd.f32 %v1838_v12, %v1770_v17  ;;  %6718 = vpow2.f32 %v7878_v0  ;;  %v8020_v46 = vmul.f32 %v7572_v7, %v7994_v6  ;;  %v8024_v47 = vmul.f32 %v7572_v7, %v7996_v41  ;;  %11925 = vst [vmem:[#allocation28_spill] sm:$0xff] %v8026_v15 }
 0x15b   : > { %v2405_v35 = vmul.f32 %v7770_v22, %v2367_v38  ;;  %v1937_v63 = vmul.f32 %v7633_v24, %v1603_v58  ;;  %v2169_v42 = vadd.f32 %v2137_v54, %v2068_v32  ;;  %v2268_v27 = vadd.f32 %v2236_v60, %v2168_v18  ;;  %v8043_v32 = vld [vmem:[#allocation2 + $0x151] sm:$0xff]  ;;  %v8045_v54 = vld [vmem:[#allocation2 + $0x159] sm:$0xff] }
 0x15c   : > { %v8030_v19 = vpop.eup %6708  ;;  %v8033_v0 = vadd.f32 %v7793_v36, %v2404_v44  ;;  %v1938_v17 = vmul.f32 %v7633_v24, %v8010_v40  ;;  %v2336_v12 = vmul.f32 %v7725_v62, %v1703_v48  ;;  %6720 = vpow2.f32 %v7923_v37  ;;  %11927 = vst [vmem:[#allocation30_spill] sm:$0xff] %v8043_v32  ;;  %11928 = vst [vmem:[#allocation31_spill] sm:$0xff] %v8045_v54 }
 0x15d   : > { %v2237_v38 = vmul.f32 %v7684_v2, %v8010_v40  ;;  %v1969_v41 = vadd.f32 %v1937_v63, %v1869_v1  ;;  %v1655_v44 = vmul.f32 %v7565_v3, %v1619_v55  ;;  %v1656_v18 = vmul.f32 %v7565_v3, %v8026_v15  ;;  %v8055_v1 = vld [vmem:[#allocation2 + $0x171] sm:$0xff] }
 0x15e   : > { %11926 = vst [vmem:[#allocation29_spill] sm:$0xff] %v8033_v0  ;;  %v6711_v60 = vpop.eup %6710  ;;  %v1539_v6 = vmul.f32 %v7572_v7, %v7965_v14  ;;  %v1639_v37 = vmul.f32 %v7565_v3, %v1603_v58  ;;  %v1970_v50 = vadd.f32 %v1938_v17, %v1870_v21  ;;  %v2368_v10 = vadd.f32 %v2336_v12, %v2268_v27  ;;  %v8064_v58 = vld [vmem:[#allocation2 + $0x90] sm:$0xff]  ;;  %v8074_v17 = vld [vmem:[#allocation2 + $0x98] sm:$0xff] }
 0x15f   : > { %11930 = vst [vmem:[#allocation33_spill] sm:$0xff] %v8055_v1  ;;  %v2568_v63 = vadd.f32 1.0, %v6701_v49  ;;  %v8058_v51 = vadd.f32 %v7793_v36, %v2405_v35  ;;  %v2037_v55 = vmul.f32 %v7636_v26, %v1703_v48  ;;  %v2269_v30 = vadd.f32 %v2237_v38, %v2169_v42 }
 0x160   : > { %v6713_v15 = vpop.eup %6712  ;;  %v5974_v20 = vmul.f32 -1.442695, %v8033_v0  ;;  %v2038_v14 = vmul.f32 %v7636_v26, %v8039_v28  ;;  %v1657_v27 = vmul.f32 %v7565_v3, %v8043_v32  ;;  %v8070_v49 = vmul.f32 %v7565_v3, %v8045_v54 }
 0x161   : > { %v6715_v21 = vpop.eup %6714  ;;  %v2337_v35 = vmul.f32 %v7725_v62, %v8039_v28  ;;  %v2069_v42 = vadd.f32 %v2037_v55, %v1969_v41  ;;  %v8078_v12 = vmul.f32 %v7565_v3, %v8053_v4  ;;  %v8082_v38 = vmul.f32 %v7565_v3, %v8055_v1  ;;  %v8090_v1 = vld [vmem:[#allocation2 + $0x91] sm:$0xff] }
 0x162   : > { %v6717_v32 = vpop.eup %6716  ;;  %v2569_v53 = vadd.f32 1.0, %v7983_v25  ;;  %v1671_v54 = vadd.f32 %v1639_v37, %v1539_v6  ;;  %v2406_v0 = vmul.f32 %v7770_v22, %v2368_v10  ;;  %v2070_v23 = vadd.f32 %v2038_v14, %v1970_v50  ;;  %v8096_v50 = vld [vmem:[#allocation2 + $0x99] sm:$0xff] }
 0x163   : > { %6722 = vrcp.f32 %v2568_v63  ;;  %v5975_v41 = vmul.f32 -1.442695, %v8058_v51  ;;  %v2369_v55 = vadd.f32 %v2337_v35, %v2269_v30  ;;  %v2138_v29 = vmul.f32 %v7691_v16, %v8064_v58 }
 0x164   : > { %v6719_v4 = vpop.eup %6718  ;;  %6724 = vpow2.f32 %v5974_v20  ;;  %v1739_v8 = vmul.f32 %v7582_v31, %v1703_v48  ;;  %v2139_v25 = vmul.f32 %v7691_v16, %v8074_v17  ;;  %v1436_v10 = vmul.f32 %v8008_v61, %v7738_v13  ;;  %v8119_v61 = vld [vmem:[#allocation2 + $0x9a] sm:$0xff] }
 0x165   : > { %v2170_v6 = vadd.f32 %v2138_v29, %v2069_v42  ;;  %v1435_v30 = vmul.f32 %v6711_v60, %v7751_v5  ;;  %v8100_v37 = vadd.f32 %v1655_v44, %v7956_v39  ;;  %v8103_v20 = vadd.f32 %v1656_v18, %v7960_v59 }
 0x166   : > { %v6721_v48 = vpop.eup %6720  ;;  %6726 = vrcp.f32 %v2569_v53  ;;  %v1771_v63 = vadd.f32 %v1739_v8, %v1671_v54  ;;  %v8106_v14 = vadd.f32 %v7793_v36, %v2406_v0  ;;  %v2171_v35 = vadd.f32 %v2139_v25, %v2070_v23  ;;  %1474 = vst.msk [vmem:[#allocation2 + $0xb1] sm:$0xff] %vm738_vm1, %v1436_v10  ;;  %v8115_v53 = vld [vmem:[#allocation2 + $0x92] sm:$0xff] }
 0x167   : > { %6728 = vpow2.f32 %v5975_v41  ;;  %v2407_v13 = vmul.f32 %v7770_v22, %v2369_v55  ;;  %v2238_v5 = vmul.f32 %v7684_v2, %v8090_v1  ;;  %1473 = vst.msk [vmem:[#allocation2 + $0xa9] sm:$0xff] %vm738_vm1, %v1435_v30  ;;  %v1342_v29 = vadd.f32 1.0, %v6713_v15 }
 0x168   : > { %v2239_v39 = vmul.f32 %v7684_v2, %v8096_v50  ;;  %v1839_v8 = vmul.f32 %v7615_v11, %v8064_v58  ;;  %v1341_v23 = vadd.f32 1.0, %v6715_v21  ;;  %v1344_v59 = vadd.f32 1.0, %v6717_v32 }
 0x169   : > { %v2270_v0 = vadd.f32 %v2238_v5, %v2170_v6  ;;  %6730 = vrcp.f32 %v1342_v29  ;;  %v1343_v54 = vadd.f32 1.0, %v6719_v4  ;;  %v1346_v44 = vadd.f32 1.0, %v6721_v48 }
 0x16a   : > { %v5976_v18 = vmul.f32 -1.442695, %v8106_v14  ;;  %v2271_v60 = vadd.f32 %v2239_v39, %v2171_v35  ;;  %6732 = vrcp.f32 %v1341_v23  ;;  %v8123_v15 = vadd.f32 %v1657_v27, %v8002_v43  ;;  %v1719_v35 = vld [vmem:[#allocation2 + $0x13a] sm:$0xff] }
 0x16b   : > { %v8127_v42 = vmul.f32 %v8015_v9, %v7807_v52  ;;  %v8130_v21 = vadd.f32 %v7793_v36, %v2407_v13  ;;  %v2338_v32 = vmul.f32 %v7725_v62, %v8115_v53  ;;  %6734 = vrcp.f32 %v1344_v59  ;;  %v11932_v52 = vld [vmem:[#allocation10_spill] sm:$0xff] }
 0x16c   : > { %v1640_v4 = vmul.f32 %v7565_v3, %v8010_v40  ;;  %v1540_v41 = vmul.f32 %v7572_v7, %v7972_v33  ;;  %v2339_v43 = vmul.f32 %v7725_v62, %v8119_v61  ;;  %6736 = vrcp.f32 %v1343_v54 }
 0x16d   : > { %11931 = vst [vmem:[#allocation34_spill] sm:$0xff] %v8127_v42  ;;  %v6723_v27 = vpop.eup %6722  ;;  %v8142_v9 = vmul.f32 %v8030_v19, %v11932_v52  ;;  %v1871_v55 = vadd.f32 %v1839_v8, %v1771_v63  ;;  %v2370_v25 = vadd.f32 %v2338_v32, %v2270_v0  ;;  %6738 = vrcp.f32 %v1346_v44  ;;  %v11936_v32 = vld [vmem:[#allocation12_spill] sm:$0xff] }
 0x16e   : > { %v6725_v10 = vpop.eup %6724  ;;  %6740 = vpow2.f32 %v5976_v18  ;;  %v2371_v6 = vadd.f32 %v2339_v43, %v2271_v60  ;;  %v8146_v40 = vadd.f32 %v8070_v49, %v8006_v56  ;;  %v8150_v33 = vadd.f32 %v8078_v12, %v8020_v46  ;;  %v8166_v12 = vld [vmem:[#allocation2 + $0x142] sm:$0xff] }
 0x16f   : > { %11933 = vst [vmem:[#allocation10_spill] sm:$0xff] %v8142_v9  ;;  %v5977_v30 = vmul.f32 -1.442695, %v8130_v21  ;;  %v1939_v19 = vmul.f32 %v7633_v24, %v8090_v1  ;;  %6742 = vpow2.f32 %v7927_v45  ;;  %v8158_v48 = vadd.f32 %v8082_v38, %v8024_v47  ;;  %11935 = vst [vmem:[#allocation36_spill] sm:$0xff] %v8166_v12  ;;  %v8191_v18 = vld [vmem:[#allocation2 + $0xa8] sm:$0xff] }
 0x170   : > { %v6727_v63 = vpop.eup %6726  ;;  %v2696_v56 = vsel %vm738_vm1, %v8127_v42, 0.0  ;;  %v8163_v49 = vmul.f32 %v6723_v27, %v7885_v57  ;;  %v1672_v46 = vadd.f32 %v1640_v4, %v1540_v41  ;;  %6744 = vpow2.f32 %v7930_v34 }
 0x171   : > { %v6729_v13 = vpop.eup %6728  ;;  %v2697_v45 = vsel %vm738_vm1, %v8142_v9, 0.0  ;;  %v2570_v5 = vadd.f32 1.0, %v6725_v10  ;;  %v1971_v47 = vadd.f32 %v1939_v19, %v1871_v55  ;;  %v2408_v38 = vmul.f32 %v7770_v22, %v2370_v25 }
 0x172   : > { %11934 = vst [vmem:[#allocation35_spill] sm:$0xff] %v8163_v49  ;;  %v1740_v29 = vmul.f32 %v7582_v31, %v8039_v28  ;;  %v1541_v57 = vmul.f32 %v7572_v7, %v8064_v58  ;;  %v1641_v39 = vmul.f32 %v7565_v3, %v8090_v1  ;;  %v2409_v34 = vmul.f32 %v7770_v22, %v2371_v6 }
 0x173   : > { %v6731_v8 = vpop.eup %6730  ;;  %6746 = vpow2.f32 %v5977_v30  ;;  %v2039_v23 = vmul.f32 %v7636_v26, %v8115_v53  ;;  %v8181_v59 = vmul.f32 %v7582_v31, %v1719_v35  ;;  %v8185_v0 = vmul.f32 %v7582_v31, %v8166_v12  ;;  %v11940_v35 = vld [vmem:[#allocation7_spill] sm:$0xff] }
 0x174   : > { %v6733_v28 = vpop.eup %6732  ;;  %v2698_v54 = vadd.f32 %v2697_v45, %v2696_v56  ;;  %v2699_v58 = vsel %vm738_vm1, %v8163_v49, 0.0  ;;  %v1772_v1 = vadd.f32 %v1740_v29, %v1672_v46  ;;  %v1840_v44 = vmul.f32 %v7615_v11, %v8074_v17  ;;  %v1608_v49 = vld [vmem:[#allocation2 + $0xb1] sm:$0xff] }
 0x175   : > { %v6735_v60 = vpop.eup %6734  ;;  %v8194_v4 = vmul.f32 %v6727_v63, %v11936_v32  ;;  %6748 = vrcp.f32 %v2570_v5  ;;  %v2071_v41 = vadd.f32 %v2039_v23, %v1971_v47  ;;  %v8197_v43 = vadd.f32 %v7793_v36, %v2408_v38  ;;  %v8213_v47 = vld [vmem:[#allocation2 + $0xa9] sm:$0xff]  ;;  %v11941_v38 = vld [vmem:[#allocation8_spill] sm:$0xff] }
 0x176   : > { %v6737_v27 = vpop.eup %6736  ;;  %v1642_v52 = vmul.f32 %v7565_v3, %v8096_v50  ;;  %v1542_v55 = vmul.f32 %v7572_v7, %v8074_v17  ;;  %v1673_v25 = vadd.f32 %v1641_v39, %v1541_v57  ;;  %v8204_v10 = vadd.f32 %v7793_v36, %v2409_v34  ;;  %v11942_v34 = vld [vmem:[#allocation9_spill] sm:$0xff]  ;;  %v11943_v23 = vld [vmem:[#allocation11_spill] sm:$0xff] }
 0x177   : > { %11937 = vst [vmem:[#allocation12_spill] sm:$0xff] %v8194_v4  ;;  %11938 = vst [vmem:[#allocation37_spill] sm:$0xff] %v8197_v43  ;;  %v6739_v6 = vpop.eup %6738  ;;  %v2700_v30 = vadd.f32 %v2699_v58, %v2698_v54  ;;  %v2571_v19 = vadd.f32 1.0, %v6729_v13  ;;  %v2140_v63 = vmul.f32 %v7691_v16, %v8191_v18  ;;  %v1438_v56 = vmul.f32 %v6731_v8, %v11940_v35  ;;  %v8220_v58 = vld [vmem:[#allocation2 + $0x152] sm:$0xff] }
 0x178   : > { %11939 = vst [vmem:[#allocation38_spill] sm:$0xff] %v8204_v10  ;;  %v6741_v46 = vpop.eup %6740  ;;  %v1940_v45 = vmul.f32 %v7633_v24, %v8096_v50  ;;  %v1741_v5 = vmul.f32 %v7582_v31, %v8115_v53  ;;  %v1872_v17 = vadd.f32 %v1840_v44, %v1772_v1  ;;  %v1437_v29 = vmul.f32 %v6733_v28, %v11941_v38  ;;  %v8222_v50 = vld [vmem:[#allocation2 + $0x15a] sm:$0xff]  ;;  %v8224_v53 = vld [vmem:[#allocation2 + $0x16a] sm:$0xff] }
 0x179   : > { %v6743_v57 = vpop.eup %6742  ;;  %v5978_v13 = vmul.f32 -1.442695, %v8197_v43  ;;  %v2172_v39 = vadd.f32 %v2140_v63, %v2071_v41  ;;  %1476 = vst.msk [vmem:[#allocation2 + $0xc9] sm:$0xff] %vm738_vm1, %v1438_v56  ;;  %v1440_v8 = vmul.f32 %v6735_v60, %v11942_v34  ;;  %v1439_v54 = vmul.f32 %v6737_v27, %v11943_v23  ;;  %11944 = vst [vmem:[#allocation7_spill] sm:$0xff] %v8220_v58  ;;  %v11947_v41 = vld [vmem:[#allocation13_spill] sm:$0xff]  ;;  %v1508_v23 = vld [vmem:[#allocation2 + $0xb0] sm:$0xff] }
 0x17a   : > { %11945 = vst [vmem:[#allocation8_spill] sm:$0xff] %v8222_v50  ;;  %11946 = vst [vmem:[#allocation9_spill] sm:$0xff] %v8224_v53  ;;  %v6745_v1 = vpop.eup %6744  ;;  %v1674_v44 = vadd.f32 %v1642_v52, %v1542_v55  ;;  %v1773_v32 = vadd.f32 %v1741_v5, %v1673_v25  ;;  %v5979_v28 = vmul.f32 -1.442695, %v8204_v10  ;;  %v1442_v63 = vmul.f32 %v6739_v6, %v11947_v41  ;;  %v8235_v52 = vld [vmem:[#allocation2 + $0x172] sm:$0xff]  ;;  %v8237_v25 = vld [vmem:[#allocation2 + $0xaa] sm:$0xff] }
 0x17b   : > { %1475 = vst.msk [vmem:[#allocation2 + $0xc1] sm:$0xff] %vm738_vm1, %v1437_v29  ;;  %6750 = vrcp.f32 %v2571_v19  ;;  %v2572_v35 = vadd.f32 1.0, %v6741_v46  ;;  %v1841_v60 = vmul.f32 %v7615_v11, %v8191_v18  ;;  %v2240_v27 = vmul.f32 %v7684_v2, %v8213_v47  ;;  %1478 = vst.msk [vmem:[#allocation2 + $0xe1] sm:$0xff] %vm738_vm1, %v1440_v8 }
 0x17c   : > { %1477 = vst.msk [vmem:[#allocation2 + $0xd9] sm:$0xff] %vm738_vm1, %v1439_v54  ;;  %11948 = vst [vmem:[#allocation11_spill] sm:$0xff] %v8235_v52  ;;  %v1972_v55 = vadd.f32 %v1940_v45, %v1872_v17  ;;  %v1757_v6 = vmul.f32 %v7582_v31, %v8220_v58  ;;  %v1758_v19 = vmul.f32 %v7582_v31, %v8222_v50  ;;  %v2701_v5 = vsel %vm738_vm1, %v8194_v4, 0.0 }
 0x17d   : > { %1480 = vst.msk [vmem:[#allocation2 + $0xf9] sm:$0xff] %vm738_vm1, %v1442_v63  ;;  %v1759_v56 = vmul.f32 %v7582_v31, %v8224_v53  ;;  %v6747_v46 = vpop.eup %6746  ;;  %v1742_v45 = vmul.f32 %v7582_v31, %v8119_v61  ;;  %6752 = vpow2.f32 %v5978_v13  ;;  %v2272_v17 = vadd.f32 %v2240_v27, %v2172_v39 }
 0x17e   : > { %v2702_v38 = vadd.f32 %v2701_v5, %v2700_v30  ;;  %v2040_v29 = vmul.f32 %v7636_v26, %v8119_v61  ;;  %6754 = vpow2.f32 %v5979_v28  ;;  %v1760_v34 = vmul.f32 %v7582_v31, %v8235_v52 }
 0x17f   : > { %v6749_v8 = vpop.eup %6748  ;;  %6756 = vrcp.f32 %v2572_v35  ;;  %v1774_v54 = vadd.f32 %v1742_v45, %v1674_v44  ;;  %v1873_v41 = vadd.f32 %v1841_v60, %v1773_v32  ;;  %v2340_v63 = vmul.f32 %v7725_v62, %v8237_v25  ;;  %v11949_v32 = vld [vmem:[#allocation29_spill] sm:$0xff] }
 0x180   : > { %v2573_v4 = vadd.f32 1.0, %v6747_v46  ;;  %v2072_v13 = vadd.f32 %v2040_v29, %v1972_v55  ;;  %v1345_v39 = vadd.f32 1.0, %v6743_v57  ;;  %v1348_v30 = vadd.f32 1.0, %v6745_v1 }
 0x181   : > { %v1941_v61 = vmul.f32 %v7633_v24, %v8213_v47  ;;  %v2372_v28 = vadd.f32 %v2340_v63, %v2272_v17  ;;  %v8260_v27 = vadd.f32 %v8181_v59, %v8100_v37  ;;  %v8264_v44 = vadd.f32 %v8185_v0, %v8103_v20  ;;  %v1708_v59 = vld [vmem:[#allocation2 + $0xb2] sm:$0xff]  ;;  %v11953_v63 = vld [vmem:[#allocation22_spill] sm:$0xff] }
 0x182   : > { %v8267_v35 = vmul.f32 %v6749_v8, %v11949_v32  ;;  %v1842_v60 = vmul.f32 %v7615_v11, %v1508_v23  ;;  %v8271_v57 = vadd.f32 %v1757_v6, %v8123_v15  ;;  %v8274_v1 = vadd.f32 %v1758_v19, %v8146_v40 }
 0x183   : > { %v1644_v55 = vmul.f32 %v7565_v3, %v1608_v49  ;;  %v1973_v46 = vadd.f32 %v1941_v61, %v1873_v41  ;;  %v8278_v37 = vadd.f32 %v1759_v56, %v8150_v33  ;;  %v8281_v20 = vadd.f32 %v1760_v34, %v8158_v48  ;;  %v11951_v34 = vld [vmem:[#allocation18_spill] sm:$0xff]  ;;  %v11955_v61 = vld [vmem:[#allocation25_spill] sm:$0xff]  ;;  %v1511_v42 = vld [vmem:[#allocation2 + $0xd8] sm:$0xff] }
 0x184   : > { %11950 = vst [vmem:[#allocation13_spill] sm:$0xff] %v8267_v35  ;;  %6758 = vrcp.f32 %v2573_v4  ;;  %v1543_v0 = vmul.f32 %v7572_v7, %v8191_v18  ;;  %v1643_v15 = vmul.f32 %v7565_v3, %v8213_v47  ;;  %v2141_v40 = vmul.f32 %v7691_v16, %v1508_v23  ;;  %v1509_v18 = vld [vmem:[#allocation2 + $0xc0] sm:$0xff] }
 0x185   : > { %v6751_v6 = vpop.eup %6750  ;;  %v1544_v19 = vmul.f32 %v7572_v7, %v1508_v23  ;;  %v2041_v33 = vmul.f32 %v7636_v26, %v8237_v25  ;;  %v2410_v56 = vmul.f32 %v7770_v22, %v2372_v28  ;;  %6760 = vrcp.f32 %v1345_v39 }
 0x186   : > { %v2703_v48 = vsel %vm738_vm1, %v8267_v35, 0.0  ;;  %v1874_v4 = vadd.f32 %v1842_v60, %v1774_v54  ;;  %v2173_v5 = vadd.f32 %v2141_v40, %v2072_v13  ;;  %6762 = vrcp.f32 %v1348_v30 }
 0x187   : > { %v6753_v45 = vpop.eup %6752  ;;  %v1744_v47 = vmul.f32 %v7582_v31, %v1708_v59  ;;  %v1942_v17 = vmul.f32 %v7633_v24, %v1608_v49  ;;  %v2073_v29 = vadd.f32 %v2041_v33, %v1973_v46  ;;  %6764 = vpow2.f32 %v11951_v34  ;;  %v1609_v46 = vld [vmem:[#allocation2 + $0xc1] sm:$0xff] }
 0x188   : > { %v6755_v8 = vpop.eup %6754  ;;  %v8298_v23 = vmul.f32 %v6751_v6, %v8058_v51  ;;  %v2241_v22 = vmul.f32 %v7684_v2, %v1608_v49  ;;  %v1675_v41 = vadd.f32 %v1643_v15, %v1543_v0  ;;  %6766 = vpow2.f32 %v11953_v63  ;;  %v11960_v63 = vld [vmem:[#allocation23_spill] sm:$0xff] }
 0x189   : > { %v6757_v54 = vpop.eup %6756  ;;  %v2704_v13 = vadd.f32 %v2703_v48, %v2702_v38  ;;  %v8303_v39 = vadd.f32 %v7793_v36, %v2410_v56  ;;  %v2142_v30 = vmul.f32 %v7691_v16, %v1509_v18  ;;  %6768 = vpow2.f32 %v11955_v61 }
 0x18a   : > { %11952 = vst [vmem:[#allocation29_spill] sm:$0xff] %v8298_v23  ;;  %v1676_v28 = vadd.f32 %v1644_v55, %v1544_v19  ;;  %v1743_v32 = vmul.f32 %v7582_v31, %v8237_v25  ;;  %v1974_v51 = vadd.f32 %v1942_v17, %v1874_v4  ;;  %v2273_v60 = vadd.f32 %v2241_v22, %v2173_v5  ;;  %v1510_v5 = vld [vmem:[#allocation2 + $0xc8] sm:$0xff]  ;;  %v11958_v22 = vld [vmem:[#allocation21_spill] sm:$0xff] }
 0x18b   : > { %11954 = vst [vmem:[#allocation18_spill] sm:$0xff] %v8303_v39  ;;  %v2574_v49 = vadd.f32 1.0, %v6753_v45  ;;  %v2042_v0 = vmul.f32 %v7636_v26, %v1708_v59  ;;  %v2341_v15 = vmul.f32 %v7725_v62, %v1708_v59  ;;  %v2174_v38 = vadd.f32 %v2142_v30, %v2073_v29  ;;  %v1709_v59 = vld [vmem:[#allocation2 + $0xc2] sm:$0xff] }
 0x18c   : > { %v8312_v36 = vmul.f32 %v6757_v54, %v8106_v14  ;;  %v2705_v40 = vsel %vm738_vm1, %v8298_v23, 0.0  ;;  %v2575_v6 = vadd.f32 1.0, %v6755_v8  ;;  %v1775_v55 = vadd.f32 %v1743_v32, %v1675_v41  ;;  %v11957_v14 = vld [vmem:[#allocation20_spill] sm:$0xff]  ;;  %v1610_v30 = vld [vmem:[#allocation2 + $0xc9] sm:$0xff] }
 0x18d   : > { %v2706_v19 = vadd.f32 %v2705_v40, %v2704_v13  ;;  %v5980_v25 = vmul.f32 -1.442695, %v8303_v39  ;;  %v1843_v33 = vmul.f32 %v7615_v11, %v1509_v18  ;;  %v2242_v56 = vmul.f32 %v7684_v2, %v1609_v46  ;;  %v8347_v40 = vld [vmem:[%s11903_s4] ss:$0 sm:$0xff]  ;;  %v11968_v39 = vld [vmem:[#allocation14_spill] sm:$0xff] }
 0x18e   : > { %11956 = vst [vmem:[#allocation22_spill] sm:$0xff] %v8312_v36  ;;  %v6759_v48 = vpop.eup %6758  ;;  %v2373_v4 = vadd.f32 %v2341_v15, %v2273_v60  ;;  %v1776_v45 = vadd.f32 %v1744_v47, %v1676_v28  ;;  %v8319_v17 = vadd.f32 %v2042_v0, %v1974_v51  ;;  %v8323_v29 = vmul.f32 %v7615_v11, %v11957_v14  ;;  %v8339_v0 = vld [vmem:[#allocation2 + $0x180] sm:$0xff] }
 0x18f   : > { %v6761_v34 = vpop.eup %6760  ;;  %6770 = vrcp.f32 %v2574_v49  ;;  %v2274_v8 = vadd.f32 %v2242_v56, %v2174_v38  ;;  %v8327_v41 = vmul.f32 %v7615_v11, %v11958_v22  ;;  %v8331_v54 = vmul.f32 %v7615_v11, %v11960_v63  ;;  %11962 = vst [vmem:[#allocation21_spill] sm:$0xff] %v8347_v40 }
 0x190   : > { %v6763_v13 = vpop.eup %6762  ;;  %v2707_v47 = vsel %vm738_vm1, %v8312_v36, 0.0  ;;  %6772 = vrcp.f32 %v2575_v6  ;;  %v1545_v61 = vmul.f32 %v7572_v7, %v1509_v18  ;;  %v1645_v28 = vmul.f32 %v7565_v3, %v1609_v46  ;;  %v11964_v6 = vld [vmem:[#allocation24_spill] sm:$0xff]  ;;  %v11967_v36 = vld [vmem:[#allocation27_spill] sm:$0xff] }
 0x191   : > { %11959 = vst [vmem:[#allocation25_spill] sm:$0xff] %v8327_v41  ;;  %v6765_v32 = vpop.eup %6764  ;;  %6774 = vpow2.f32 %v5980_v25  ;;  %v1844_v51 = vmul.f32 %v7615_v11, %v1510_v5  ;;  %v1875_v60 = vadd.f32 %v1843_v33, %v1775_v55  ;;  %v2342_v49 = vmul.f32 %v7725_v62, %v1709_v59  ;;  %v11965_v55 = vld [vmem:[#allocation26_spill] sm:$0xff] }
 0x192   : > { %v6767_v15 = vpop.eup %6766  ;;  %v8342_v38 = vmul.f32 %v6759_v48, %v8130_v21  ;;  %v8350_v18 = vmul.f32 %v8347_v40, %v2373_v4  ;;  %v8354_v25 = vmul.f32 %v7615_v11, %v11964_v6  ;;  %v8358_v33 = vmul.f32 %v7615_v11, %v11965_v55 }
 0x193   : > { %v6769_v56 = vpop.eup %6768  ;;  %v1646_v21 = vmul.f32 %v7565_v3, %v1610_v30  ;;  %v1546_v48 = vmul.f32 %v7572_v7, %v1510_v5  ;;  %v1943_v14 = vmul.f32 %v7633_v24, %v1609_v46  ;;  %v2374_v22 = vadd.f32 %v2342_v49, %v2274_v8  ;;  %v1710_v46 = vld [vmem:[#allocation2 + $0xca] sm:$0xff] }
 0x194   : > { %11961 = vst [vmem:[#allocation20_spill] sm:$0xff] %v8342_v38  ;;  %11963 = vst [vmem:[#allocation23_spill] sm:$0xff] %v8350_v18  ;;  %v8363_v63 = vadd.f32 %v2707_v47, %v2706_v19  ;;  %v1677_v4 = vadd.f32 %v1645_v28, %v1545_v61  ;;  %v8367_v23 = vmul.f32 %v7615_v11, %v11967_v36  ;;  %v11969_v8 = vld [vmem:[#allocation15_spill] sm:$0xff]  ;;  %v1347_v47 = vadd.f32 1.0, %v6765_v32  ;;  %v8376_v49 = vld [vmem:[#allocation2 + $0x188] sm:$0xff] }
 0x195   : > { %v8371_v6 = vmul.f32 %v7615_v11, %v8339_v0  ;;  %v1745_v55 = vmul.f32 %v7582_v31, %v1709_v59  ;;  %v1876_v35 = vadd.f32 %v1844_v51, %v1776_v45  ;;  %v1975_v9 = vadd.f32 %v1943_v14, %v1875_v60  ;;  %v1712_v14 = vld [vmem:[#allocation2 + $0xe2] sm:$0xff] }
 0x196   : > { %11966 = vst [vmem:[#allocation24_spill] sm:$0xff] %v8363_v63  ;;  %v1441_v10 = vmul.f32 %v6761_v34, %v11968_v39  ;;  %v1444_v19 = vmul.f32 %v6763_v13, %v11969_v8  ;;  %v1350_v61 = vadd.f32 1.0, %v6767_v15  ;;  %v1349_v28 = vadd.f32 1.0, %v6769_v56  ;;  %v1611_v34 = vld [vmem:[#allocation2 + $0xd9] sm:$0xff] }
 0x197   : > { %v1944_v36 = vmul.f32 %v7633_v24, %v1610_v30  ;;  %v1678_v63 = vadd.f32 %v1646_v21, %v1546_v48  ;;  %v2043_v38 = vmul.f32 %v7636_v26, %v1709_v59  ;;  %v2412_v43 = vmul.f32 %v8347_v40, %v2374_v22  ;;  %v1512_v15 = vld [vmem:[#allocation2 + $0xe0] sm:$0xff] }
 0x198   : > { %1479 = vst.msk [vmem:[#allocation2 + $0xf1] sm:$0xff] %vm738_vm1, %v1441_v10  ;;  %v1777_v45 = vadd.f32 %v1745_v55, %v1677_v4  ;;  %v2143_v39 = vmul.f32 %v7691_v16, %v1510_v5  ;;  %v1845_v13 = vmul.f32 %v7615_v11, %v1511_v42  ;;  %1482 = vst.msk [vmem:[#allocation2 + $0x111] sm:$0xff] %vm738_vm1, %v1444_v19  ;;  %6776 = vrcp.f32 %v1347_v47  ;;  %v1612_v48 = vld [vmem:[#allocation2 + $0xe1] sm:$0xff] }
 0x199   : > { %v8385_v32 = vpop.eup %6770  ;;  %v1746_v51 = vmul.f32 %v7582_v31, %v1710_v46  ;;  %v1976_v60 = vadd.f32 %v1944_v36, %v1876_v35  ;;  %6778 = vrcp.f32 %v1350_v61  ;;  %v8390_v59 = vmul.f32 %v7615_v11, %v8376_v49  ;;  %v8400_v35 = vld [vmem:[%s11905_s28] ss:$0 sm:$0xff] }
 0x19a   : > { %11970 = vst [vmem:[#allocation26_spill] sm:$0xff] %v8385_v32  ;;  %v8392_v10 = vpop.eup %6772  ;;  %v2044_v5 = vmul.f32 %v7636_v26, %v1710_v46  ;;  %v2075_v56 = vadd.f32 %v2043_v38, %v1975_v9  ;;  %v2175_v21 = vadd.f32 %v2143_v39, %v8319_v17  ;;  %6780 = vrcp.f32 %v1349_v28  ;;  %11972 = vst [vmem:[#allocation14_spill] sm:$0xff] %v8400_v35 }
 0x19b   : > { %11971 = vst [vmem:[#allocation27_spill] sm:$0xff] %v8392_v10  ;;  %v6775_v22 = vpop.eup %6774  ;;  %v2243_v4 = vmul.f32 %v7684_v2, %v1610_v30  ;;  %v8403_v55 = vadd.f32 %v8400_v35, %v2412_v43  ;;  %v1547_v8 = vmul.f32 %v7572_v7, %v1511_v42  ;;  %v1647_v9 = vmul.f32 %v7565_v3, %v1611_v34  ;;  %v1711_v10 = vld [vmem:[#allocation2 + $0xda] sm:$0xff] }
 0x19c   : > { %v1778_v38 = vadd.f32 %v1746_v51, %v1678_v63  ;;  %v1846_v17 = vmul.f32 %v7615_v11, %v1512_v15  ;;  %v1877_v19 = vadd.f32 %v1845_v13, %v1777_v45  ;;  %v2144_v47 = vmul.f32 %v7691_v16, %v1511_v42 }
 0x19d   : > { %11973 = vst [vmem:[#allocation15_spill] sm:$0xff] %v8403_v55  ;;  %v2343_v30 = vmul.f32 %v7725_v62, %v1710_v46  ;;  %v1648_v61 = vmul.f32 %v7565_v3, %v1612_v48  ;;  %v1748_v28 = vmul.f32 %v7582_v31, %v1712_v14  ;;  %v2076_v36 = vadd.f32 %v2044_v5, %v1976_v60 }
 0x19e   : > { %v2576_v39 = vadd.f32 1.0, %v6775_v22  ;;  %v2275_v43 = vadd.f32 %v2243_v4, %v2175_v21  ;;  %v1945_v32 = vmul.f32 %v7633_v24, %v1611_v34  ;;  %v2176_v35 = vadd.f32 %v2144_v47, %v2075_v56  ;;  %v1614_v22 = vld [vmem:[#allocation2 + $0xf9] sm:$0xff] }
 0x19f   : > { %v5982_v63 = vmul.f32 -1.442695, %v8403_v55  ;;  %v1548_v51 = vmul.f32 %v7572_v7, %v1512_v15  ;;  %v1679_v45 = vadd.f32 %v1647_v9, %v1547_v8  ;;  %v2145_v42 = vmul.f32 %v7691_v16, %v1512_v15 }
 0x1a0   : > { %v1946_v46 = vmul.f32 %v7633_v24, %v1612_v48  ;;  %v1878_v13 = vadd.f32 %v1846_v17, %v1778_v38  ;;  %v1977_v18 = vadd.f32 %v1945_v32, %v1877_v19  ;;  %v2244_v41 = vmul.f32 %v7684_v2, %v1611_v34  ;;  %v1714_v38 = vld [vmem:[#allocation2 + $0xfa] sm:$0xff] }
 0x1a1   : > { %v2046_v60 = vmul.f32 %v7636_v26, %v1712_v14  ;;  %v2245_v5 = vmul.f32 %v7684_v2, %v1612_v48  ;;  %v1747_v21 = vmul.f32 %v7582_v31, %v1711_v10  ;;  %v2177_v56 = vadd.f32 %v2145_v42, %v2076_v36 }
 0x1a2   : > { %v6777_v4 = vpop.eup %6776  ;;  %6782 = vrcp.f32 %v2576_v39  ;;  %v8422_v8 = vmul.f32 %v7725_v62, %v1712_v14  ;;  %v2045_v15 = vmul.f32 %v7636_v26, %v1711_v10  ;;  %v2276_v9 = vadd.f32 %v2244_v41, %v2176_v35 }
 0x1a3   : > { %v6779_v32 = vpop.eup %6778  ;;  %v8425_v17 = vadd.f32 %v2343_v30, %v2275_v43  ;;  %6784 = vpow2.f32 %v5982_v63  ;;  %v1680_v34 = vadd.f32 %v1648_v61, %v1548_v51  ;;  %v1779_v19 = vadd.f32 %v1747_v21, %v1679_v45  ;;  %v11979_v63 = vld [vmem:[#allocation17_spill] sm:$0xff] }
 0x1a4   : > { %11974 = vst [vmem:[#allocation39_spill] sm:$0xff] %v8422_v8  ;;  %v6781_v48 = vpop.eup %6780  ;;  %v1978_v47 = vadd.f32 %v1946_v46, %v1878_v13  ;;  %v2077_v55 = vadd.f32 %v2045_v15, %v1977_v18  ;;  %v2344_v36 = vmul.f32 %v7725_v62, %v1711_v10  ;;  %v8429_v39 = vmul.f32 %v7565_v3, %v1614_v22  ;;  %v1513_v18 = vld [vmem:[#allocation2 + $0xf0] sm:$0xff]  ;;  %v11978_v10 = vld [vmem:[#allocation16_spill] sm:$0xff] }
 0x1a5   : > { %11975 = vst [vmem:[#allocation40_spill] sm:$0xff] %v8425_v17  ;;  %v8431_v14 = vadd.f32 %v2245_v5, %v2177_v56  ;;  %v8434_v42 = vmul.f32 %v7582_v31, %v1714_v38  ;;  %v8437_v41 = vmul.f32 %v7633_v24, %v1614_v22  ;;  %v8440_v35 = vmul.f32 %v7636_v26, %v1714_v38  ;;  %v11981_v13 = vld [vmem:[#allocation19_spill] sm:$0xff]  ;;  %v8453_v56 = vld [vmem:[#allocation2 + $0x181] sm:$0xff] }
 0x1a6   : > { %v2376_v30 = vadd.f32 %v2344_v36, %v2276_v9  ;;  %v8443_v61 = vmul.f32 %v7684_v2, %v1614_v22  ;;  %v1443_v43 = vmul.f32 %v6777_v4, %v11978_v10  ;;  %v1446_v51 = vmul.f32 %v6779_v32, %v11979_v63  ;;  %v1613_v15 = vld [vmem:[#allocation2 + $0xf1] sm:$0xff]  ;;  %v8463_v9 = vld [vmem:[#allocation2 + $0x189] sm:$0xff] }
 0x1a7   : > { %11976 = vst [vmem:[#allocation41_spill] sm:$0xff] %v8431_v14  ;;  %v8448_v45 = vmul.f32 %v7725_v62, %v1714_v38  ;;  %v1780_v46 = vadd.f32 %v1748_v28, %v1680_v34  ;;  %v1445_v5 = vmul.f32 %v6781_v48, %v11981_v13  ;;  %v1887_v21 = vadd.f32 %v8331_v54, %v8260_v27  ;;  %v11983_v38 = vld [vmem:[#allocation30_spill] sm:$0xff]  ;;  %v1514_v54 = vld [vmem:[#allocation2 + $0xf8] sm:$0xff]  ;;  %v11984_v48 = vld [vmem:[#allocation31_spill] sm:$0xff] }
 0x1a8   : > { %11977 = vst [vmem:[#allocation42_spill] sm:$0xff] %v8443_v61  ;;  %1481 = vst.msk [vmem:[#allocation2 + $0x109] sm:$0xff] %vm738_vm1, %v1443_v43  ;;  %v1888_v22 = vadd.f32 %v8354_v25, %v8264_v44  ;;  %v1889_v4 = vadd.f32 %v8358_v33, %v8271_v57  ;;  %v1890_v28 = vadd.f32 %v8367_v23, %v8274_v1  ;;  %v8469_v34 = vld [vmem:[#allocation2 + $0x139] sm:$0xff] }
 0x1a9   : > { %11980 = vst [vmem:[#allocation16_spill] sm:$0xff] %v8448_v45  ;;  %1484 = vst.msk [vmem:[#allocation2 + $0x129] sm:$0xff] %vm738_vm1, %v1446_v51  ;;  %v1955_v27 = vmul.f32 %v7633_v24, %v11983_v38  ;;  %v1847_v32 = vmul.f32 %v7615_v11, %v1513_v18  ;;  %v1956_v44 = vmul.f32 %v7633_v24, %v11984_v48  ;;  %v11985_v25 = vld [vmem:[#allocation32_spill] sm:$0xff]  ;;  %v11986_v33 = vld [vmem:[#allocation33_spill] sm:$0xff] }
 0x1aa   : > { %11982 = vst [vmem:[#allocation17_spill] sm:$0xff] %v8463_v9  ;;  %1483 = vst.msk [vmem:[#allocation2 + $0x121] sm:$0xff] %vm738_vm1, %v1445_v5  ;;  %v1957_v57 = vmul.f32 %v7633_v24, %v11985_v25  ;;  %v1958_v1 = vmul.f32 %v7633_v24, %v11986_v33  ;;  %v8478_v23 = vmul.f32 %v8347_v40, %v2376_v30  ;;  %v8490_v38 = vld [vmem:[#allocation2 + $0x13a] sm:$0xff]  ;;  %v1713_v40 = vld [vmem:[#allocation2 + $0xf2] sm:$0xff] }
 0x1ab   : > { %v2078_v36 = vadd.f32 %v2046_v60, %v1978_v47  ;;  %v1891_v10 = vadd.f32 %v8371_v6, %v8278_v37  ;;  %v1959_v43 = vmul.f32 %v7633_v24, %v8453_v56  ;;  %v1549_v63 = vmul.f32 %v7572_v7, %v1513_v18  ;;  %11988 = vst [vmem:[#allocation30_spill] sm:$0xff] %v8490_v38  ;;  %v11990_v6 = vld [vmem:[#allocation28_spill] sm:$0xff] }
 0x1ac   : > { %11987 = vst [vmem:[#allocation19_spill] sm:$0xff] %v8478_v23  ;;  %v1649_v51 = vmul.f32 %v7565_v3, %v1613_v15  ;;  %v1892_v13 = vadd.f32 %v8390_v59, %v8281_v20  ;;  %v1960_v5 = vmul.f32 %v7633_v24, %v8463_v9  ;;  %v8492_v30 = vpop.eup %6782  ;;  %v1848_v60 = vmul.f32 %v7615_v11, %v1514_v54 }
 0x1ad   : > { %11989 = vst [vmem:[#allocation31_spill] sm:$0xff] %v8492_v30  ;;  %v8497_v37 = vmul.f32 %v7633_v24, %v8469_v34  ;;  %v8501_v47 = vmul.f32 %v7633_v24, %v11990_v6  ;;  %v1987_v48 = vadd.f32 %v1955_v27, %v1887_v21  ;;  %v6785_v25 = vpop.eup %6784  ;;  %v1879_v20 = vadd.f32 %v1847_v32, %v1779_v19 }
 0x1ae   : > { %v1988_v59 = vadd.f32 %v1956_v44, %v1888_v22  ;;  %v1989_v33 = vadd.f32 %v1957_v57, %v1889_v4  ;;  %v1990_v23 = vadd.f32 %v1958_v1, %v1890_v28  ;;  %v1550_v45 = vmul.f32 %v7572_v7, %v1514_v54  ;;  %v1616_v28 = vld [vmem:[#allocation2 + $0x111] sm:$0xff] }
 0x1af   : > { %11991 = vst [vmem:[#allocation32_spill] sm:$0xff] %v8501_v47  ;;  %v2146_v30 = vmul.f32 %v7691_v16, %v1513_v18  ;;  %v1991_v17 = vadd.f32 %v1959_v43, %v1891_v10  ;;  %v8507_v8 = vmul.f32 %v7636_v26, %v8490_v38  ;;  %v1681_v14 = vadd.f32 %v1649_v51, %v1549_v63  ;;  %v8519_v44 = vld [vmem:[#allocation2 + $0x108] sm:$0xff]  ;;  %v8530_v63 = vld [vmem:[#allocation2 + $0x112] sm:$0xff] }
 0x1b0   : > { %v1947_v6 = vmul.f32 %v7633_v24, %v1613_v15  ;;  %v1992_v61 = vadd.f32 %v1960_v5, %v1892_v13  ;;  %v8512_v19 = vmul.f32 %v7636_v26, %v8166_v12  ;;  %v8514_v21 = vadd.f32 1.0, %v6785_v25  ;;  %v8521_v57 = vld [vmem:[#allocation2 + $0x109] sm:$0xff]  ;;  %11994 = vst [vmem:[#allocation43_spill] sm:$0xff] %v8530_v63 }
 0x1b1   : > { %v1880_v22 = vadd.f32 %v1848_v60, %v1780_v46  ;;  %v2178_v4 = vadd.f32 %v2146_v30, %v2077_v55  ;;  %v2055_v18 = vmul.f32 %v7636_v26, %v8220_v58  ;;  %v1749_v27 = vmul.f32 %v7582_v31, %v1713_v40  ;;  %v8532_v51 = vld [vmem:[#allocation2 + $0x182] sm:$0xff]  ;;  %v8534_v13 = vld [vmem:[#allocation2 + $0x18a] sm:$0xff] }
 0x1b2   : > { %11992 = vst [vmem:[#allocation33_spill] sm:$0xff] %v8512_v19  ;;  %11993 = vst [vmem:[#allocation28_spill] sm:$0xff] %v8514_v21  ;;  %v1979_v32 = vadd.f32 %v1947_v6, %v1879_v20  ;;  %v2056_v1 = vmul.f32 %v7636_v26, %v8222_v50  ;;  %v2057_v10 = vmul.f32 %v7636_v26, %v8224_v53  ;;  %v8547_v20 = vld [vmem:[#allocation2 + $0x121] sm:$0xff]  ;;  %v8585_v12 = vld [vmem:[#allocation2 + $0x129] sm:$0xff] }
 0x1b3   : > { %v1682_v46 = vadd.f32 %v8429_v39, %v1550_v45  ;;  %v2047_v55 = vmul.f32 %v7636_v26, %v1713_v40  ;;  %v2246_v43 = vmul.f32 %v7684_v2, %v1613_v15  ;;  %11995 = vst [vmem:[#allocation44_spill] sm:$0xff] %v8532_v51  ;;  %11996 = vst [vmem:[#allocation45_spill] sm:$0xff] %v8534_v13  ;;  %v8543_v45 = vld [vmem:[#allocation2 + $0x110] sm:$0xff]  ;;  %v8545_v15 = vld [vmem:[#allocation2 + $0x120] sm:$0xff] }
 0x1b4   : > { %v2058_v5 = vmul.f32 %v7636_v26, %v8235_v52  ;;  %v8538_v30 = vadd.f32 %v1749_v27, %v1681_v14  ;;  %v2147_v60 = vmul.f32 %v7691_v16, %v1514_v54  ;;  %v2346_v25 = vmul.f32 %v7725_v62, %v1713_v40  ;;  %v8592_v62 = vld [vmem:[#allocation2 + $0x122] sm:$0xff] }
 0x1b5   : > { %v1652_v39 = vmul.f32 %v7565_v3, %v1616_v28  ;;  %v1980_v6 = vadd.f32 %v8437_v41, %v1880_v22  ;;  %v2278_v21 = vadd.f32 %v2246_v43, %v2178_v4  ;;  %v1551_v52 = vmul.f32 %v7572_v7, %v8519_v44 }
 0x1b6   : > { %v1651_v14 = vmul.f32 %v7565_v3, %v8521_v57  ;;  %v8554_v54 = vadd.f32 %v2047_v55, %v1979_v32  ;;  %v8556_v40 = vadd.f32 %v2147_v60, %v2078_v36  ;;  %v1752_v27 = vmul.f32 %v7582_v31, %v8530_v63  ;;  %v8580_v60 = vld [vmem:[#allocation2 + $0x10a] sm:$0xff] }
 0x1b7   : > { %v2059_v53 = vmul.f32 %v7636_v26, %v8532_v51  ;;  %v1552_v41 = vmul.f32 %v7572_v7, %v8543_v45  ;;  %v1553_v22 = vmul.f32 %v7572_v7, %v8545_v15  ;;  %v1653_v4 = vmul.f32 %v7565_v3, %v8547_v20 }
 0x1b8   : > { %11997 = vst [vmem:[#allocation46_spill] sm:$0xff] %v8556_v40  ;;  %v2060_v32 = vmul.f32 %v7636_v26, %v8534_v13  ;;  %v8571_v36 = vmul.f32 %v7633_v24, %v1616_v28  ;;  %v8575_v55 = vmul.f32 %v7636_v26, %v8530_v63  ;;  %v8578_v43 = vmul.f32 %v7684_v2, %v1616_v28  ;;  %v8587_v13 = vld [vmem:[#allocation2 + $0x128] sm:$0xff]  ;;  %v2116_v63 = vld [vmem:[#allocation2 + $0x138] sm:$0xff] }
 0x1b9   : > { %v1782_v51 = vadd.f32 %v8434_v42, %v1682_v46  ;;  %v8583_v50 = vadd.f32 %v2346_v25, %v2278_v21  ;;  %v1683_v58 = vadd.f32 %v1651_v14, %v1551_v52  ;;  %v8590_v38 = vadd.f32 %v8440_v35, %v1980_v6  ;;  %v2117_v46 = vld [vmem:[#allocation2 + $0x140] sm:$0xff] }
 0x1ba   : > { %11998 = vst [vmem:[#allocation47_spill] sm:$0xff] %v8578_v43  ;;  %v2087_v19 = vadd.f32 %v2055_v18, %v1987_v48  ;;  %v2088_v28 = vadd.f32 %v2056_v1, %v1988_v59  ;;  %v2089_v43 = vadd.f32 %v2057_v10, %v1989_v33  ;;  %v2090_v40 = vadd.f32 %v2058_v5, %v1990_v23  ;;  %v2124_v33 = vld [vmem:[#allocation2 + $0x198] sm:$0xff]  ;;  %v2125_v18 = vld [vmem:[#allocation2 + $0x1a0] sm:$0xff]  ;;  %v7150_v1 = vld [vmem:[#allocation2 + $0x150] sm:$0xff] }
 0x1bb   : > { %v2091_v47 = vadd.f32 %v2059_v53, %v1991_v17  ;;  %v1684_v9 = vadd.f32 %v1652_v39, %v1552_v41  ;;  %v1751_v42 = vmul.f32 %v7582_v31, %v8580_v60  ;;  %v1685_v52 = vadd.f32 %v1653_v4, %v1553_v22  ;;  %v7151_v10 = vld [vmem:[#allocation2 + $0x158] sm:$0xff]  ;;  %v8621_v39 = vld [vmem:[#allocation2 + $0x12a] sm:$0xff] }
 0x1bc   : > { %v2092_v21 = vadd.f32 %v2060_v32, %v1992_v61  ;;  %v1849_v25 = vmul.f32 %v7615_v11, %v8519_v44  ;;  %v1654_v35 = vmul.f32 %v7565_v3, %v8585_v12  ;;  %v1554_v48 = vmul.f32 %v7572_v7, %v8587_v13  ;;  %v7153_v22 = vld [vmem:[#allocation2 + $0x170] sm:$0xff] }
 0x1bd   : > { %v8603_v59 = vmul.f32 %v7691_v16, %v2116_v63  ;;  %v1783_v53 = vadd.f32 %v1751_v42, %v1683_v58  ;;  %v1850_v17 = vmul.f32 %v7615_v11, %v8543_v45  ;;  %v1753_v61 = vmul.f32 %v7582_v31, %v8592_v62  ;;  %v7152_v63 = vld [vmem:[#allocation2 + $0x168] sm:$0xff] }
 0x1be   : > { %v1851_v23 = vmul.f32 %v7615_v11, %v8545_v15  ;;  %v8612_v3 = vmul.f32 %v7691_v16, %v2117_v46  ;;  %v8615_v7 = vmul.f32 %v7150_v1, %v7691_v16  ;;  %v8618_v58 = vmul.f32 %v7151_v10, %v7691_v16 }
 0x1bf   : > { %v2156_v5 = vmul.f32 %v7152_v63, %v7691_v16  ;;  %v1852_v6 = vmul.f32 %v7615_v11, %v8587_v13  ;;  %v1784_v14 = vadd.f32 %v1752_v27, %v1684_v9  ;;  %v1785_v41 = vadd.f32 %v1753_v61, %v1685_v52 }
 0x1c0   : > { %11999 = vst [vmem:[#allocation48_spill] sm:$0xff] %v8618_v58  ;;  %v2157_v4 = vmul.f32 %v7153_v22, %v7691_v16  ;;  %v1881_v32 = vadd.f32 %v1849_v25, %v8538_v30  ;;  %v1686_v42 = vadd.f32 %v1654_v35, %v1554_v48  ;;  %v2158_v46 = vmul.f32 %v7691_v16, %v8339_v0  ;;  %v7154_v25 = vld [vmem:[#allocation2 + $0x141] sm:$0xff] }
 0x1c1   : > { %v2159_v1 = vmul.f32 %v7691_v16, %v8376_v49  ;;  %v1882_v10 = vadd.f32 %v1850_v17, %v1782_v51  ;;  %v1883_v63 = vadd.f32 %v1851_v23, %v1783_v53  ;;  %v2160_v58 = vmul.f32 %v7691_v16, %v2124_v33 }
 0x1c2   : > { %v2161_v11 = vmul.f32 %v7691_v16, %v2125_v18  ;;  %v1949_v9 = vmul.f32 %v7633_v24, %v8521_v57  ;;  %v1754_v27 = vmul.f32 %v7582_v31, %v8621_v39  ;;  %v8637_v30 = vadd.f32 %v2156_v5, %v2087_v19  ;;  %v7155_v5 = vld [vmem:[#allocation2 + $0x151] sm:$0xff] }
 0x1c3   : > { %v8641_v0 = vmul.f32 %v7684_v2, %v8469_v34  ;;  %v1951_v49 = vmul.f32 %v7633_v24, %v8547_v20  ;;  %v1884_v51 = vadd.f32 %v1852_v6, %v1784_v14  ;;  %v1885_v52 = vadd.f32 %v8323_v29, %v1785_v41  ;;  %v7157_v41 = vld [vmem:[#allocation2 + $0x169] sm:$0xff] }
 0x1c4   : > { %v8647_v35 = vmul.f32 %v7154_v25, %v7684_v2  ;;  %v1981_v48 = vadd.f32 %v1949_v9, %v1881_v32  ;;  %v1786_v53 = vadd.f32 %v1754_v27, %v1686_v42  ;;  %v8649_v17 = vadd.f32 %v2157_v4, %v2088_v28  ;;  %v7158_v42 = vld [vmem:[#allocation2 + $0x171] sm:$0xff]  ;;  %v2224_v9 = vld [vmem:[#allocation2 + $0x199] sm:$0xff] }
 0x1c5   : > { %v8651_v31 = vadd.f32 %v2158_v46, %v2089_v43  ;;  %v1952_v34 = vmul.f32 %v7633_v24, %v8585_v12  ;;  %v1982_v19 = vadd.f32 %v8571_v36, %v1882_v10  ;;  %v1983_v61 = vadd.f32 %v1951_v49, %v1883_v63  ;;  %v7156_v36 = vld [vmem:[#allocation2 + $0x159] sm:$0xff] }
 0x1c6   : > { %v8656_v23 = vadd.f32 %v2159_v1, %v2090_v40  ;;  %v2049_v29 = vmul.f32 %v7636_v26, %v8580_v60  ;;  %v8660_v33 = vadd.f32 %v2160_v58, %v2091_v47  ;;  %v8662_v18 = vadd.f32 %v2161_v11, %v2092_v21  ;;  %v12000_v47 = vld [vmem:[#allocation25_spill] sm:$0xff] }
 0x1c7   : > { %v2254_v28 = vmul.f32 %v7155_v5, %v7684_v2  ;;  %v1984_v43 = vadd.f32 %v1952_v34, %v1884_v51  ;;  %v1985_v6 = vadd.f32 %v8497_v37, %v1885_v52  ;;  %v2051_v24 = vmul.f32 %v7636_v26, %v8592_v62  ;;  %v12001_v27 = vld [vmem:[#allocation17_spill] sm:$0xff]  ;;  %v12006_v34 = vld [vmem:[#allocation39_spill] sm:$0xff] }
 0x1c8   : > { %v8669_v40 = vmul.f32 %v7156_v36, %v7684_v2  ;;  %v2148_v14 = vmul.f32 %v7691_v16, %v8519_v44  ;;  %v1886_v58 = vadd.f32 %v12000_v47, %v1786_v53  ;;  %v2081_v21 = vadd.f32 %v2049_v29, %v1981_v48  ;;  %v12003_v48 = vld [vmem:[#allocation46_spill] sm:$0xff]  ;;  %v12009_v36 = vld [vmem:[#allocation21_spill] sm:$0xff] }
 0x1c9   : > { %v2256_v22 = vmul.f32 %v7157_v41, %v7684_v2  ;;  %v2052_v4 = vmul.f32 %v7636_v26, %v8621_v39  ;;  %v2082_v37 = vadd.f32 %v8575_v55, %v1982_v19  ;;  %v2083_v32 = vadd.f32 %v2051_v24, %v1983_v61  ;;  %v12004_v53 = vld [vmem:[#allocation42_spill] sm:$0xff]  ;;  %v12008_v24 = vld [vmem:[#allocation40_spill] sm:$0xff]  ;;  %v12010_v47 = vld [vmem:[#allocation33_spill] sm:$0xff] }
 0x1ca   : > { %v2257_v46 = vmul.f32 %v7158_v42, %v7684_v2  ;;  %v2149_v1 = vmul.f32 %v7691_v16, %v8543_v45  ;;  %v2180_v44 = vadd.f32 %v2148_v14, %v8554_v54  ;;  %v2150_v10 = vmul.f32 %v7691_v16, %v8545_v15  ;;  %v12002_v54 = vld [vmem:[#allocation32_spill] sm:$0xff]  ;;  %v12007_v61 = vld [vmem:[#allocation6_spill] sm:$0xff] }
 0x1cb   : > { %v8686_v63 = vmul.f32 %v7684_v2, %v8453_v56  ;;  %v2084_v11 = vadd.f32 %v2052_v4, %v1984_v43  ;;  %v2085_v26 = vadd.f32 %v8507_v8, %v1985_v6  ;;  %v2151_v55 = vmul.f32 %v7691_v16, %v8587_v13  ;;  %v2225_v8 = vld [vmem:[#allocation2 + $0x1a1] sm:$0xff] }
 0x1cc   : > { %v8693_v49 = vmul.f32 %v7684_v2, %v12001_v27  ;;  %v2248_v45 = vmul.f32 %v7684_v2, %v8521_v57  ;;  %v1986_v15 = vadd.f32 %v12002_v54, %v1886_v58  ;;  %v2181_v51 = vadd.f32 %v2149_v1, %v8590_v38  ;;  %v12005_v13 = vld [vmem:[#allocation41_spill] sm:$0xff] }
 0x1cd   : > { %v2182_v56 = vadd.f32 %v2150_v10, %v2081_v21  ;;  %v2183_v52 = vadd.f32 %v2151_v55, %v2082_v37  ;;  %v2184_v25 = vadd.f32 %v8603_v59, %v2083_v32  ;;  %v2279_v16 = vadd.f32 %v12004_v53, %v12003_v48  ;;  %v12014_v10 = vld [vmem:[#allocation14_spill] sm:$0xff]  ;;  %v12015_v55 = vld [vmem:[#allocation43_spill] sm:$0xff] }
 0x1ce   : > { %v2377_v19 = vadd.f32 %v12006_v34, %v12005_v13  ;;  %v2348_v29 = vmul.f32 %v12007_v61, %v8580_v60  ;;  %v2250_v57 = vmul.f32 %v7684_v2, %v8547_v20  ;;  %v8709_v5 = vmul.f32 %v7684_v2, %v2224_v9  ;;  %v12011_v20 = vld [vmem:[#allocation47_spill] sm:$0xff] }
 0x1cf   : > { %v2280_v38 = vadd.f32 %v2248_v45, %v2180_v44  ;;  %v2185_v43 = vadd.f32 %v8612_v3, %v2084_v11  ;;  %v2186_v59 = vadd.f32 %v8615_v7, %v2085_v26  ;;  %v2251_v6 = vmul.f32 %v7684_v2, %v8585_v12  ;;  %v12012_v3 = vld [vmem:[#allocation16_spill] sm:$0xff]  ;;  %v12013_v44 = vld [vmem:[#allocation23_spill] sm:$0xff] }
 0x1d0   : > { %v2413_v14 = vmul.f32 %v12009_v36, %v12008_v24  ;;  %v2086_v58 = vadd.f32 %v12010_v47, %v1986_v15  ;;  %v8719_v60 = vmul.f32 %v7684_v2, %v2225_v8  ;;  %v2281_v21 = vadd.f32 %v12011_v20, %v2181_v51  ;;  %v12017_v45 = vld [vmem:[#allocation19_spill] sm:$0xff]  ;;  %v12019_v8 = vld [vmem:[#allocation48_spill] sm:$0xff] }
 0x1d1   : > { %v2282_v41 = vadd.f32 %v2250_v57, %v2182_v56  ;;  %v2283_v4 = vadd.f32 %v2251_v6, %v2183_v52  ;;  %v2284_v37 = vadd.f32 %v8641_v0, %v2184_v25  ;;  %v2379_v32 = vadd.f32 %v12012_v3, %v2279_v16  ;;  %v12020_v53 = vld [vmem:[#allocation7_spill] sm:$0xff] }
 0x1d2   : > { %v2415_v7 = vmul.f32 %v12009_v36, %v2377_v19  ;;  %v2288_v12 = vadd.f32 %v2256_v22, %v8637_v30  ;;  %v2380_v42 = vadd.f32 %v2348_v29, %v2280_v38  ;;  %v2416_v1 = vmul.f32 %v12009_v36, %v8583_v50  ;;  %v12016_v50 = vld [vmem:[#allocation30_spill] sm:$0xff] }
 0x1d3   : > { %v8730_v2 = vadd.f32 %v12014_v10, %v12013_v44  ;;  %v2285_v11 = vadd.f32 %v8647_v35, %v2185_v43  ;;  %v2286_v26 = vadd.f32 %v2254_v28, %v2186_v59  ;;  %v2349_v0 = vmul.f32 %v12007_v61, %v12015_v55  ;;  %v12018_v35 = vld [vmem:[#allocation36_spill] sm:$0xff] }
 0x1d4   : > { %v8736_v9 = vadd.f32 %v12014_v10, %v2413_v14  ;;  %v2350_v30 = vmul.f32 %v12007_v61, %v8592_v62  ;;  %v2351_v22 = vmul.f32 %v12007_v61, %v8621_v39  ;;  %v2352_v27 = vmul.f32 %v12007_v61, %v12016_v50  ;;  %v2324_v44 = vld [vmem:[#allocation2 + $0x19a] sm:$0xff] }
 0x1d5   : > { %v8746_v54 = vadd.f32 %v12014_v10, %v12017_v45  ;;  %v2353_v28 = vmul.f32 %v12007_v61, %v12018_v35  ;;  %v2381_v15 = vadd.f32 %v2349_v0, %v2281_v21  ;;  %v2417_v51 = vmul.f32 %v12009_v36, %v2379_v32  ;;  %v12021_v21 = vld [vmem:[#allocation8_spill] sm:$0xff]  ;;  %v12025_v50 = vld [vmem:[#allocation45_spill] sm:$0xff] }
 0x1d6   : > { %v8752_v56 = vadd.f32 %v12014_v10, %v2415_v7  ;;  %v2382_v62 = vadd.f32 %v2350_v30, %v2282_v41  ;;  %v2418_v52 = vmul.f32 %v12009_v36, %v2380_v42  ;;  %v8756_v39 = vadd.f32 %v12014_v10, %v2416_v1  ;;  %v12024_v55 = vld [vmem:[#allocation44_spill] sm:$0xff] }
 0x1d7   : > { %v5981_v25 = vmul.f32 -1.442695, %v8730_v2  ;;  %v2187_v48 = vadd.f32 %v12019_v8, %v2086_v58  ;;  %v2354_v16 = vmul.f32 %v12007_v61, %v12020_v53  ;;  %v2383_v13 = vadd.f32 %v2351_v22, %v2283_v4  ;;  %v12022_v4 = vld [vmem:[#allocation9_spill] sm:$0xff] }
 0x1d8   : > { %v5983_v34 = vmul.f32 -1.442695, %v8736_v9  ;;  %v2289_v19 = vadd.f32 %v2257_v46, %v8649_v17  ;;  %v2384_v29 = vadd.f32 %v2352_v27, %v2284_v37  ;;  %v2385_v57 = vadd.f32 %v2353_v28, %v2285_v11  ;;  %v12023_v11 = vld [vmem:[#allocation11_spill] sm:$0xff] }
 0x1d9   : > { %v5984_v38 = vmul.f32 -1.442695, %v8746_v54  ;;  %v2386_v43 = vadd.f32 %v2354_v16, %v2286_v26  ;;  %v2419_v59 = vmul.f32 %v12009_v36, %v2381_v15  ;;  %v8767_v6 = vadd.f32 %v12014_v10, %v2417_v51  ;;  %v2325_v15 = vld [vmem:[#allocation2 + $0x1a2] sm:$0xff]  ;;  %v12028_v16 = vld [vmem:[#allocation28_spill] sm:$0xff] }
 0x1da   : > { %v5985_v24 = vmul.f32 -1.442695, %v8752_v56  ;;  %v2420_v14 = vmul.f32 %v12009_v36, %v2382_v62  ;;  %v8772_v47 = vadd.f32 %v12014_v10, %v2418_v52  ;;  %6786 = vpow2.f32 %v5981_v25  ;;  %v12027_v52 = vld [vmem:[#allocation26_spill] sm:$0xff] }
 0x1db   : > { %v5986_v17 = vmul.f32 -1.442695, %v8756_v39  ;;  %v2287_v46 = vadd.f32 %v8669_v40, %v2187_v48  ;;  %v2290_v58 = vadd.f32 %v8686_v63, %v8651_v31  ;;  %v2421_v20 = vmul.f32 %v12009_v36, %v2383_v13 }
 0x1dc   : > { %6788 = vpow2.f32 %v5983_v34  ;;  %v2355_v41 = vmul.f32 %v12007_v61, %v12021_v21  ;;  %v2356_v37 = vmul.f32 %v12007_v61, %v12022_v4  ;;  %v2422_v3 = vmul.f32 %v12009_v36, %v2384_v29 }
 0x1dd   : > { %6790 = vpow2.f32 %v5984_v38  ;;  %v2423_v32 = vmul.f32 %v12009_v36, %v2385_v57  ;;  %v8786_v7 = vadd.f32 %v12014_v10, %v2419_v59  ;;  %v5987_v31 = vmul.f32 -1.442695, %v8767_v6 }
 0x1de   : > { %6792 = vpow2.f32 %v5985_v24  ;;  %v2424_v40 = vmul.f32 %v12009_v36, %v2386_v43  ;;  %v8791_v63 = vadd.f32 %v12014_v10, %v2420_v14  ;;  %v5988_v42 = vmul.f32 -1.442695, %v8772_v47 }
 0x1df   : > { %6794 = vpow2.f32 %v5986_v17  ;;  %v2291_v1 = vadd.f32 %v8693_v49, %v8656_v23  ;;  %v2357_v26 = vmul.f32 %v12007_v61, %v12023_v11  ;;  %v2358_v0 = vmul.f32 %v12007_v61, %v12024_v55 }
 0x1e0   : > { %v8801_v30 = vadd.f32 %v12014_v10, %v2421_v20  ;;  %v2292_v22 = vadd.f32 %v8709_v5, %v8660_v33  ;;  %v2359_v27 = vmul.f32 %v12007_v61, %v12025_v50  ;;  %v2387_v45 = vadd.f32 %v2355_v41, %v2287_v46  ;;  %v12026_v5 = vld [vmem:[#allocation37_spill] sm:$0xff]  ;;  %v12029_v41 = vld [vmem:[#allocation20_spill] sm:$0xff] }
 0x1e1   : > { %v8808_v35 = vadd.f32 %v12014_v10, %v2422_v3  ;;  %v2388_v23 = vadd.f32 %v2356_v37, %v2288_v12  ;;  %v8811_v49 = vadd.f32 %v12014_v10, %v2423_v32  ;;  %6796 = vpow2.f32 %v5987_v31  ;;  %v12030_v32 = vld [vmem:[#allocation24_spill] sm:$0xff] }
 0x1e2   : > { %v5989_v28 = vmul.f32 -1.442695, %v8786_v7  ;;  %v2360_v51 = vmul.f32 %v12007_v61, %v2324_v44  ;;  %v8816_v62 = vadd.f32 %v12014_v10, %v2424_v40  ;;  %6798 = vpow2.f32 %v5988_v42 }
 0x1e3   : > { %v5990_v33 = vmul.f32 -1.442695, %v8791_v63  ;;  %v8821_v25 = vmul.f32 %v12027_v52, %v12026_v5  ;;  %v2389_v12 = vadd.f32 %v2357_v26, %v2289_v19  ;;  %v2390_v8 = vadd.f32 %v2358_v0, %v2290_v58  ;;  %v12033_v5 = vld [vmem:[#allocation18_spill] sm:$0xff]  ;;  %v12034_v52 = vld [vmem:[#allocation31_spill] sm:$0xff] }
 0x1e4   : > { %v5991_v48 = vmul.f32 -1.442695, %v8801_v30  ;;  %v6787_v53 = vpop.eup %6786  ;;  %6800 = vrcp.f32 %v12028_v16  ;;  %v2293_v13 = vadd.f32 %v8719_v60, %v8662_v18  ;;  %v2425_v34 = vmul.f32 %v12009_v36, %v2387_v45  ;;  %v12032_v45 = vld [vmem:[#allocation27_spill] sm:$0xff] }
 0x1e5   : > { %v5992_v29 = vmul.f32 -1.442695, %v8808_v35  ;;  %v2361_v38 = vmul.f32 %v12007_v61, %v2325_v15  ;;  %v2426_v43 = vmul.f32 %v12009_v36, %v2388_v23  ;;  %6802 = vpow2.f32 %v5989_v28 }
 0x1e6   : > { %v6789_v57 = vpop.eup %6788  ;;  %v5993_v19 = vmul.f32 -1.442695, %v8811_v49  ;;  %v2391_v24 = vadd.f32 %v2359_v27, %v2291_v1  ;;  %v2392_v14 = vadd.f32 %v2360_v51, %v2292_v22  ;;  %6804 = vpow2.f32 %v5990_v33  ;;  %v12031_v27 = vld [vmem:[#allocation38_spill] sm:$0xff] }
 0x1e7   : > { %v6791_v59 = vpop.eup %6790  ;;  %v5994_v17 = vmul.f32 -1.442695, %v8816_v62  ;;  %v2427_v18 = vmul.f32 %v12009_v36, %v2389_v12  ;;  %v2428_v60 = vmul.f32 %v12009_v36, %v2390_v8  ;;  %6806 = vpow2.f32 %v5991_v48 }
 0x1e8   : > { %v6793_v46 = vpop.eup %6792  ;;  %v2577_v58 = vadd.f32 1.0, %v6787_v53  ;;  %v8836_v61 = vadd.f32 %v12014_v10, %v2425_v34  ;;  %6808 = vpow2.f32 %v5992_v29  ;;  %v2579_v21 = vadd.f32 1.0, %v6789_v57 }
 0x1e9   : > { %v6795_v20 = vpop.eup %6794  ;;  %v2709_v4 = vsel %vm738_vm1, %v12029_v41, 0.0  ;;  %v8841_v37 = vadd.f32 %v12014_v10, %v2426_v43  ;;  %6810 = vpow2.f32 %v5993_v19  ;;  %v2580_v3 = vadd.f32 1.0, %v6791_v59 }
 0x1ea   : > { %v2710_v31 = vadd.f32 %v2709_v4, %v12030_v32  ;;  %v2711_v40 = vsel %vm738_vm1, %v8821_v25, 0.0  ;;  %v2393_v42 = vadd.f32 %v2361_v38, %v2293_v13  ;;  %6812 = vpow2.f32 %v5994_v17 }
 0x1eb   : > { %v2581_v1 = vadd.f32 1.0, %v6793_v46  ;;  %v6797_v44 = vpop.eup %6796  ;;  %v2429_v11 = vmul.f32 %v12009_v36, %v2391_v24  ;;  %v2430_v26 = vmul.f32 %v12009_v36, %v2392_v14  ;;  %v2582_v55 = vadd.f32 1.0, %v6795_v20 }
 0x1ec   : > { %6814 = vrcp.f32 %v2577_v58  ;;  %v6799_v0 = vpop.eup %6798  ;;  %v8849_v22 = vadd.f32 %v12014_v10, %v2427_v18  ;;  %v5995_v50 = vmul.f32 -1.442695, %v8836_v61  ;;  %v8854_v23 = vmul.f32 %v12032_v45, %v12031_v27  ;;  %v12035_v18 = vld [vmem:[#allocation15_spill] sm:$0xff] }
 0x1ed   : > { %6816 = vrcp.f32 %v2579_v21  ;;  %v8857_v28 = vadd.f32 %v12014_v10, %v2428_v60  ;;  %v5996_v15 = vmul.f32 -1.442695, %v8841_v37  ;;  %v2712_v51 = vadd.f32 %v2711_v40, %v2710_v31 }
 0x1ee   : > { %6818 = vrcp.f32 %v2580_v3  ;;  %v6801_v33 = vpop.eup %6800  ;;  %v8862_v12 = vmul.f32 %v12034_v52, %v12033_v5  ;;  %v2583_v8 = vadd.f32 1.0, %v6797_v44  ;;  %v2431_v53 = vmul.f32 %v12009_v36, %v2393_v42 }
 0x1ef   : > { %6820 = vrcp.f32 %v2581_v1  ;;  %v6803_v48 = vpop.eup %6802  ;;  %v2584_v16 = vadd.f32 1.0, %v6799_v0  ;;  %v8866_v34 = vadd.f32 %v12014_v10, %v2429_v11  ;;  %v5997_v29 = vmul.f32 -1.442695, %v8849_v22 }
 0x1f0   : > { %6822 = vrcp.f32 %v2582_v55  ;;  %v6805_v13 = vpop.eup %6804  ;;  %v2713_v57 = vsel %vm738_vm1, %v8854_v23, 0.0  ;;  %v8872_v43 = vadd.f32 %v12014_v10, %v2430_v26  ;;  %v5998_v19 = vmul.f32 -1.442695, %v8857_v28 }
 0x1f1   : > { %6824 = vpow2.f32 %v5995_v50  ;;  %v6807_v38 = vpop.eup %6806  ;;  %v2714_v36 = vadd.f32 %v2713_v57, %v2712_v51  ;;  %v2585_v24 = vadd.f32 1.0, %v6803_v48  ;;  %v2715_v14 = vsel %vm738_vm1, %v8862_v12, 0.0 }
 0x1f2   : > { %6826 = vpow2.f32 %v5996_v15  ;;  %v6809_v59 = vpop.eup %6808  ;;  %v2586_v46 = vadd.f32 1.0, %v6805_v13  ;;  %v8878_v60 = vmul.f32 %v6801_v33, %v12035_v18  ;;  %v5999_v20 = vmul.f32 -1.442695, %v8866_v34 }
 0x1f3   : > { %6828 = vrcp.f32 %v2583_v8  ;;  %v6811_v17 = vpop.eup %6810  ;;  %v8882_v4 = vadd.f32 %v12014_v10, %v2431_v53  ;;  %v6000_v3 = vmul.f32 -1.442695, %v8872_v43  ;;  %v2716_v32 = vadd.f32 %v2715_v14, %v2714_v36 }
 0x1f4   : > { %6830 = vrcp.f32 %v2584_v16  ;;  %v6813_v58 = vpop.eup %6812  ;;  %v2587_v40 = vadd.f32 1.0, %v6807_v38  ;;  %v2588_v44 = vadd.f32 1.0, %v6809_v59  ;;  %v2719_v11 = vsel %vm738_vm1, %v8878_v60, 0.0 }
 0x1f5   : > { %6832 = vpow2.f32 %v5997_v29  ;;  %v2589_v15 = vadd.f32 1.0, %v6811_v17  ;;  %v2590_v33 = vadd.f32 1.0, %v6813_v58 }
 0x1f6   : > { %v6815_v21 = vpop.eup %6814  ;;  %6834 = vpow2.f32 %v5998_v19 }
 0x1f7   : > { %v6817_v31 = vpop.eup %6816  ;;  %6836 = vrcp.f32 %v2585_v24  ;;  %v8886_v42 = vmul.f32 %v6815_v21, %v8730_v2  ;;  %v6001_v2 = vmul.f32 -1.442695, %v8882_v4 }
 0x1f8   : > { %v6819_v1 = vpop.eup %6818  ;;  %6838 = vrcp.f32 %v2586_v46  ;;  %v8891_v10 = vmul.f32 %v6817_v31, %v8736_v9 }
 0x1f9   : > { %v6821_v26 = vpop.eup %6820  ;;  %6840 = vpow2.f32 %v5999_v20  ;;  %v8894_v55 = vmul.f32 %v6819_v1, %v8746_v54  ;;  %v2717_v0 = vsel %vm738_vm1, %v8886_v42, 0.0 }
 0x1fa   : > { %v6823_v50 = vpop.eup %6822  ;;  %6842 = vpow2.f32 %v6000_v3  ;;  %v2718_v27 = vadd.f32 %v2717_v0, %v2716_v32  ;;  %v8900_v52 = vmul.f32 %v6821_v26, %v8752_v56  ;;  %v2721_v8 = vsel %vm738_vm1, %v8891_v10, 0.0 }
 0x1fb   : > { %v6825_v45 = vpop.eup %6824  ;;  %6844 = vrcp.f32 %v2587_v40  ;;  %v8903_v54 = vmul.f32 %v6823_v50, %v8756_v39  ;;  %v2723_v48 = vsel %vm738_vm1, %v8894_v55, 0.0 }
 0x1fc   : > { %v6827_v51 = vpop.eup %6826  ;;  %6846 = vrcp.f32 %v2588_v44  ;;  %v2720_v5 = vadd.f32 %v2719_v11, %v2718_v27  ;;  %v2591_v57 = vadd.f32 1.0, %v6825_v45  ;;  %v2725_v36 = vsel %vm738_vm1, %v8900_v52, 0.0 }
 0x1fd   : > { %v6829_v9 = vpop.eup %6828  ;;  %6848 = vpow2.f32 %v6001_v2  ;;  %v2727_v59 = vsel %vm738_vm1, %v8903_v54, 0.0  ;;  %v2592_v14 = vadd.f32 1.0, %v6827_v51 }
 0x1fe   : > { %v6831_v53 = vpop.eup %6830  ;;  %v2722_v16 = vadd.f32 %v2721_v8, %v2720_v5  ;;  %6850 = vrcp.f32 %v2589_v15  ;;  %v8910_v19 = vmul.f32 %v6829_v9, %v8767_v6 }
 0x1ff   : > { %v6833_v13 = vpop.eup %6832  ;;  %6852 = vrcp.f32 %v2590_v33  ;;  %v8913_v39 = vmul.f32 %v6831_v53, %v8772_v47 }
 0x200   : > { %v6835_v29 = vpop.eup %6834  ;;  %v2724_v38 = vadd.f32 %v2723_v48, %v2722_v16  ;;  %v2593_v58 = vadd.f32 1.0, %v6833_v13  ;;  %6854 = vrcp.f32 %v2591_v57  ;;  %v2729_v3 = vsel %vm738_vm1, %v8910_v19, 0.0 }
 0x201   : > { %v6837_v56 = vpop.eup %6836  ;;  %v2731_v32 = vsel %vm738_vm1, %v8913_v39, 0.0  ;;  %v2594_v40 = vadd.f32 1.0, %v6835_v29  ;;  %6856 = vrcp.f32 %v2592_v14 }
 0x202   : > { %v6839_v24 = vpop.eup %6838  ;;  %v2726_v17 = vadd.f32 %v2725_v36, %v2724_v38  ;;  %v8920_v6 = vmul.f32 %v6837_v56, %v8786_v7  ;;  %6858 = vrcp.f32 %v2593_v58 }
 0x203   : > { %v6841_v46 = vpop.eup %6840  ;;  %v8923_v47 = vmul.f32 %v6839_v24, %v8791_v63  ;;  %6860 = vrcp.f32 %v2594_v40 }
 0x204   : > { %v6843_v18 = vpop.eup %6842  ;;  %v2728_v20 = vadd.f32 %v2727_v59, %v2726_v17  ;;  %v2595_v11 = vadd.f32 1.0, %v6841_v46  ;;  %v2733_v50 = vsel %vm738_vm1, %v8920_v6, 0.0 }
 0x205   : > { %v6845_v21 = vpop.eup %6844  ;;  %v2735_v2 = vsel %vm738_vm1, %v8923_v47, 0.0  ;;  %v2596_v45 = vadd.f32 1.0, %v6843_v18 }
 0x206   : > { %v6847_v31 = vpop.eup %6846  ;;  %v2730_v1 = vadd.f32 %v2729_v3, %v2728_v20  ;;  %v8930_v7 = vmul.f32 %v6845_v21, %v8801_v30  ;;  %6862 = vrcp.f32 %v2595_v11 }
 0x207   : > { %v6849_v44 = vpop.eup %6848  ;;  %v8933_v63 = vmul.f32 %v6847_v31, %v8808_v35  ;;  %6864 = vrcp.f32 %v2596_v45 }
 0x208   : > { %v2732_v26 = vadd.f32 %v2731_v32, %v2730_v1  ;;  %v6851_v0 = vpop.eup %6850  ;;  %v2597_v51 = vadd.f32 1.0, %v6849_v44  ;;  %v2737_v35 = vsel %vm738_vm1, %v8930_v7, 0.0 }
 0x209   : > { %v6853_v27 = vpop.eup %6852  ;;  %v8940_v5 = vmul.f32 %v6851_v0, %v8811_v49  ;;  %v2739_v9 = vsel %vm738_vm1, %v8933_v63, 0.0 }
 0x20a   : > { %v2734_v15 = vadd.f32 %v2733_v50, %v2732_v26  ;;  %v8943_v30 = vmul.f32 %v6853_v27, %v8816_v62  ;;  %v6855_v8 = vpop.eup %6854  ;;  %6866 = vrcp.f32 %v2597_v51 }
 0x20b   : > { %v6857_v53 = vpop.eup %6856  ;;  %v8950_v13 = vmul.f32 %v6855_v8, %v8836_v61  ;;  %v2741_v49 = vsel %vm738_vm1, %v8940_v5, 0.0 }
 0x20c   : > { %v2736_v33 = vadd.f32 %v2735_v2, %v2734_v15  ;;  %v2743_v62 = vsel %vm738_vm1, %v8943_v30, 0.0  ;;  %v6859_v29 = vpop.eup %6858  ;;  %v8957_v38 = vmul.f32 %v6857_v53, %v8841_v37 }
 0x20d   : > { %v6861_v56 = vpop.eup %6860  ;;  %v8960_v59 = vmul.f32 %v6859_v29, %v8849_v22  ;;  %v2745_v61 = vsel %vm738_vm1, %v8950_v13, 0.0 }
 0x20e   : > { %v2738_v48 = vadd.f32 %v2737_v35, %v2736_v33  ;;  %v8965_v17 = vmul.f32 %v6861_v56, %v8857_v28  ;;  %v2747_v46 = vsel %vm738_vm1, %v8957_v38, 0.0 }
 0x20f   : > { %v2749_v22 = vsel %vm738_vm1, %v8960_v59, 0.0 }
 0x210   : > { %v2740_v16 = vadd.f32 %v2739_v9, %v2738_v48  ;;  %v6863_v24 = vpop.eup %6862  ;;  %v2751_v28 = vsel %vm738_vm1, %v8965_v17, 0.0  ;;  %v2838_v9 = vld [vmem:[%s11672_s9] sm:$0xff] }
 0x211   : > { %v6865_v18 = vpop.eup %6864  ;;  %v8970_v37 = vmul.f32 %v6863_v24, %v8866_v34  ;;  %6419 = vmatprep.subr.mxu1 %v2838_v9  ;;  %v3270_v48 = vld [vmem:[%s11675_s12] sm:$0xf] }
 0x212   : > { %v2742_v57 = vadd.f32 %v2741_v49, %v2740_v16  ;;  %v8975_v3 = vmul.f32 %v6865_v18, %v8872_v43  ;;  %6420 = vmatpush3.msra.mxu1 %v2838_v9  ;;  %6469 = vmatprep.subr.msk.mxu0 %vm926_vm0, %v3270_v48 }
 0x213   : > { %v2753_v40 = vsel %vm738_vm1, %v8970_v37, 0.0  ;;  %6470 = vmatpush3.msk.msra.mxu0 %vm926_vm0, %v3270_v48 }
 0x214   : > { %v2744_v36 = vadd.f32 %v2743_v62, %v2742_v57  ;;  %v6867_v20 = vpop.eup %6866  ;;  %v2755_v1 = vsel %vm738_vm1, %v8975_v3, 0.0 }
 0x215   : > { %v8980_v31 = vmul.f32 %v6867_v20, %v8882_v4  ;;  %v2694_v4 = vld [vmem:[%s12036_s8] sm:$0x3] }
 0x216   : > { %v2746_v14 = vadd.f32 %v2745_v61, %v2744_v36  ;;  %v2695_v61 = vld [vmem:[%s12037_s3] sm:$0x3] }
 0x217   : > { %v2757_v11 = vsel %vm738_vm1, %v8980_v31, 0.0 }
 0x218   : > { %v2748_v58 = vadd.f32 %v2747_v46, %v2746_v14 }
 0x21a   : > { %v2750_v21 = vadd.f32 %v2749_v22, %v2748_v58 }
 0x21c   : > { %v2752_v32 = vadd.f32 %v2751_v28, %v2750_v21 }
 0x21e   : > { %v2754_v34 = vadd.f32 %v2753_v40, %v2752_v32 }
 0x220   : > { %v2756_v44 = vadd.f32 %v2755_v1, %v2754_v34  ;;  %v12038_v34 = vld [vmem:[#allocation4_spill] sm:$0xff] }
 0x222   : > { %v2758_v43 = vadd.f32 %v2757_v11, %v2756_v44  ;;  %v12039_v44 = vld [vmem:[#allocation34_spill] sm:$0xff] }
 0x224   : > { %v2759_v26 = vrot.slane %v2758_v43, 4 }
 0x226   : > { %v2760_v0 = vadd.f32 %v2759_v26, %v2758_v43  ;;  %v12040_v43 = vld [vmem:[#allocation10_spill] sm:$0xff] }
 0x228   : > { %v2761_v50 = vrot.slane %v2760_v0, 2 }
 0x22a   : > { %v2762_v2 = vadd.f32 %v2761_v50, %v2760_v0  ;;  %v12041_v0 = vld [vmem:[#allocation35_spill] sm:$0xff] }
 0x22c   : > { %v2763_v27 = vrot.slane %v2762_v2, 1 }
 0x22e   : > { %v2764_v45 = vadd.f32 %v2763_v27, %v2762_v2  ;;  %v12042_v2 = vld [vmem:[#allocation12_spill] sm:$0xff] }
 0x230   : > { %v2765_v15 = vmul.f32 0.00390625, %v2764_v45  ;;  %v12043_v45 = vld [vmem:[#allocation13_spill] sm:$0xff] }
 0x232   : > { %v2766_v51 = vmul.f32 %v2765_v15, %v2694_v4  ;;  %v12044_v15 = vld [vmem:[#allocation29_spill] sm:$0xff] }
 0x234   : > { %v2781_v33 = vsel %vm2780_vm4, %v2766_v51, 0.0  ;;  %v2768_v35 = vsel %vm2767_vm5, %v2766_v51, 0.0 }
 0x235   : > { %2782 = vadd.xlane.f32.xlu0 %v2781_v33  ;;  %v12045_v33 = vld [vmem:[#allocation22_spill] sm:$0xff] }
 0x239   : > { %2769 = vadd.xlane.f32.xlu0 %v2768_v35 }
 0x2c2   : > { %v2783_v8 = vpop.xlane.xlu0 %2782 }
 0x2c3   : > { %v6003_v53 = vmul.f32 -1.442695, %v2783_v8 }
 0x2c5   : > { %6868 = vpow2.f32 %v6003_v53 }
 0x2c6   : > { %v2770_v16 = vpop.xlane.xlu0 %2769 }
 0x2c7   : > { %v6002_v49 = vmul.f32 -1.442695, %v2770_v16 }
 0x2c9   : > { %6870 = vpow2.f32 %v6002_v49 }
 0x2cf   : > { %v6869_v62 = vpop.eup %6868 }
 0x2d0   : > { %v2787_v29 = vadd.f32 1.0, %v6869_v62 }
 0x2d2   : > { %6872 = vrcp.f32 %v2787_v29 }
 0x2d3   : > { %v6871_v57 = vpop.eup %6870 }
 0x2d4   : > { %v2774_v56 = vadd.f32 1.0, %v6871_v57 }
 0x2d6   : > { %6874 = vrcp.f32 %v2774_v56 }
 0x2dc   : > { %v6873_v36 = vpop.eup %6872 }
 0x2dd   : > { %v2790_v24 = vmul.f32 %v6873_v36, %v2783_v8 }
 0x2df   : > { %v2791_v14 = vmul.f32 %v2790_v24, %v2695_v61 }
 0x2e0   : > { %v6875_v46 = vpop.eup %6874 }
 0x2e1   : > { %v2777_v18 = vmul.f32 %v6875_v46, %v2770_v16  ;;  %v2793_v58 = vrot.slane %v2791_v14, 1  ;;  %v7160_v46 = vld [vmem:[%s7401_s30 + $0x8] sm:$0xff] }
 0x2e3   : > { %v2778_v22 = vmul.f32 %v2777_v18, %v2695_v61  ;;  %v7159_v61 = vld [vmem:[%s7401_s30] sm:$0xff] }
 0x2e5   : > { %v2795_v20 = vadd.f32 %v2793_v58, %v2778_v22 }
 0x2e7   : > { %v6004_v21 = vmul.f32 -1.442695, %v2795_v20 }
 0x2e9   : > { %6876 = vpow2.f32 %v6004_v21 }
 0x2f3   : > { %v6877_v28 = vpop.eup %6876 }
 0x2f4   : > { %v2799_v32 = vadd.f32 1.0, %v6877_v28 }
 0x2f6   : > { %6878 = vrcp.f32 %v2799_v32  ;;  %v7161_v32 = vld [vmem:[%s7401_s30 + $0x10] sm:$0xff] }
 0x300   : > { %v6879_v40 = vpop.eup %6878 }
 0x301   : > { %v9005_v1 = vrot.slane %v6879_v40, %v12038_v34 }
 0x303   : > { %v2806_v11 = vmul.f32 %v9005_v1, %v12039_v44  ;;  %v2807_v26 = vmul.f32 %v9005_v1, %v12040_v43  ;;  %v2808_v50 = vmul.f32 %v9005_v1, %v12041_v0  ;;  %v2809_v27 = vmul.f32 %v9005_v1, %v12042_v2  ;;  %v7162_v44 = vld [vmem:[%s7401_s30 + $0x18] sm:$0xff] }
 0x304   : > { %v2810_v4 = vmul.f32 %v9005_v1, %v12043_v45  ;;  %v2811_v51 = vmul.f32 %v9005_v1, %v12044_v15  ;;  %v2812_v35 = vmul.f32 %v9005_v1, %v12045_v33  ;;  %v2813_v9 = vmul.f32 %v9005_v1, %v12029_v41  ;;  %v7164_v15 = vld [vmem:[%s7401_s30 + $0x28] sm:$0xff] }
 0x305   : > { %6421 = vmatprep.mubr.msk.f32.mxu1 %vm738_vm1, %v2806_v11  ;;  %v2814_v8 = vmul.f32 %v9005_v1, %v8821_v25  ;;  %v2815_v48 = vmul.f32 %v9005_v1, %v8854_v23  ;;  %v2816_v53 = vmul.f32 %v9005_v1, %v8862_v12  ;;  %v2817_v41 = vmul.f32 %v9005_v1, %v8886_v42 }
 0x306   : > { %6422 = vmatmul.mubr.msk.f32.vlgmr.msra.gmra.mrb[8].mxu1 %vm738_vm1, %v2807_v26  ;;  %v2818_v25 = vmul.f32 %v9005_v1, %v8878_v60  ;;  %v2819_v23 = vmul.f32 %v9005_v1, %v8891_v10  ;;  %v2820_v12 = vmul.f32 %v9005_v1, %v8894_v55  ;;  %v2821_v42 = vmul.f32 %v9005_v1, %v8900_v52 }
 0x307   : > { %6424 = vmatprep.mubr.msk.f32.mxu1 %vm738_vm1, %v2808_v50  ;;  %v2822_v60 = vmul.f32 %v9005_v1, %v8903_v54  ;;  %v2823_v10 = vmul.f32 %v9005_v1, %v8910_v19  ;;  %v2824_v55 = vmul.f32 %v9005_v1, %v8913_v39  ;;  %v2825_v52 = vmul.f32 %v9005_v1, %v8920_v6 }
 0x308   : > { %v2826_v54 = vmul.f32 %v9005_v1, %v8923_v47  ;;  %v2827_v19 = vmul.f32 %v9005_v1, %v8930_v7  ;;  %v2828_v39 = vmul.f32 %v9005_v1, %v8933_v63  ;;  %v2829_v6 = vmul.f32 %v9005_v1, %v8940_v5 }
 0x309   : > { %v2830_v47 = vmul.f32 %v9005_v1, %v8943_v30  ;;  %v2831_v7 = vmul.f32 %v9005_v1, %v8950_v13  ;;  %v2832_v63 = vmul.f32 %v9005_v1, %v8957_v38  ;;  %v2833_v5 = vmul.f32 %v9005_v1, %v8960_v59 }
 0x30a   : > { %6425 = vmatmul.mubr.msk.f32.gmra.mrb[10].mxu1 %vm738_vm1, %v2809_v27  ;;  %v2834_v30 = vmul.f32 %v9005_v1, %v8965_v17  ;;  %v2835_v13 = vmul.f32 %v9005_v1, %v8970_v37  ;;  %v2836_v38 = vmul.f32 %v9005_v1, %v8975_v3  ;;  %v2837_v59 = vmul.f32 %v9005_v1, %v8980_v31  ;;  %v9106_v17 = vld [vmem:[%s11673_s10] ss:$0 sm:$0xff] }
 0x30b   : > { %6427 = vmatprep.mubr.msk.f32.mxu1 %vm738_vm1, %v2810_v4  ;;  %v9111_v37 = vld [vmem:[%s11674_s11] ss:$0 sm:$0xff] }
 0x30c   : > { %v7163_v27 = vld [vmem:[%s7401_s30 + $0x20] sm:$0xff] }
 0x30e   : > { %6428 = vmatmul.mubr.msk.f32.gmra.mrb[12].mxu1 %vm738_vm1, %v2811_v51 }
 0x30f   : > { %6430 = vmatprep.mubr.msk.f32.mxu1 %vm738_vm1, %v2812_v35 }
 0x312   : > { %6431 = vmatmul.mubr.msk.f32.gmra.mrb[14].mxu1 %vm738_vm1, %v2813_v9 }
 0x313   : > { %6433 = vmatprep.mubr.msk.f32.mxu1 %vm738_vm1, %v2814_v8 }
 0x316   : > { %6434 = vmatmul.mubr.msk.f32.gmra.mrb[16].mxu1 %vm738_vm1, %v2815_v48 }
 0x317   : > { %6436 = vmatprep.mubr.msk.f32.mxu1 %vm738_vm1, %v2816_v53  ;;  %v7165_v53 = vld [vmem:[%s7401_s30 + $0x30] sm:$0xff] }
 0x31a   : > { %6437 = vmatmul.mubr.msk.f32.gmra.mrb[18].mxu1 %vm738_vm1, %v2817_v41 }
 0x31b   : > { %6439 = vmatprep.mubr.msk.f32.mxu1 %vm738_vm1, %v2818_v25 }
 0x31e   : > { %6440 = vmatmul.mubr.msk.f32.gmra.mrb[20].mxu1 %vm738_vm1, %v2819_v23  ;;  %v7166_v23 = vld [vmem:[%s7401_s30 + $0x38] sm:$0xff] }
 0x31f   : > { %6442 = vmatprep.mubr.msk.f32.mxu1 %vm738_vm1, %v2820_v12 }
 0x322   : > { %6443 = vmatmul.mubr.msk.f32.gmra.mrb[22].mxu1 %vm738_vm1, %v2821_v42 }
 0x323   : > { %6445 = vmatprep.mubr.msk.f32.mxu1 %vm738_vm1, %v2822_v60 }
 0x326   : > { %6446 = vmatmul.mubr.msk.f32.gmra.mrb[24].mxu1 %vm738_vm1, %v2823_v10 }
 0x327   : > { %6448 = vmatprep.mubr.msk.f32.mxu1 %vm738_vm1, %v2824_v55 }
 0x32a   : > { %6449 = vmatmul.mubr.msk.f32.gmra.mrb[26].mxu1 %vm738_vm1, %v2825_v52 }
 0x32b   : > { %6451 = vmatprep.mubr.msk.f32.mxu1 %vm738_vm1, %v2826_v54  ;;  %v7167_v54 = vld [vmem:[%s7401_s30 + $0x40] sm:$0xff] }
 0x32e   : > { %6452 = vmatmul.mubr.msk.f32.gmra.mrb[28].mxu1 %vm738_vm1, %v2827_v19 }
 0x32f   : > { %6454 = vmatprep.mubr.msk.f32.mxu1 %vm738_vm1, %v2828_v39 }
 0x332   : > { %6455 = vmatmul.mubr.msk.f32.gmra.mrb[30].mxu1 %vm738_vm1, %v2829_v6  ;;  %v7168_v6 = vld [vmem:[%s7401_s30 + $0x48] sm:$0xff] }
 0x333   : > { %6457 = vmatprep.mubr.msk.f32.mxu1 %vm738_vm1, %v2830_v47 }
 0x336   : > { %6458 = vmatmul.mubr.msk.f32.gmra.mrb[32].mxu1 %vm738_vm1, %v2831_v7 }
 0x337   : > { %6460 = vmatprep.mubr.msk.f32.mxu1 %vm738_vm1, %v2832_v63 }
 0x33a   : > { %6461 = vmatmul.mubr.msk.f32.gmra.mrb[34].mxu1 %vm738_vm1, %v2833_v5 }
 0x33b   : > { %6463 = vmatprep.mubr.msk.f32.mxu1 %vm738_vm1, %v2834_v30 }
 0x33e   : > { %6464 = vmatmul.mubr.msk.f32.gmra.mrb[36].mxu1 %vm738_vm1, %v2835_v13 }
 0x33f   : > { %6466 = vmatprep.mubr.msk.f32.mxu1 %vm738_vm1, %v2836_v38  ;;  %v7169_v38 = vld [vmem:[%s7401_s30 + $0x50] sm:$0xff] }
 0x342   : > { %6467 = vmatmul.mubr.msk.f32.gmra.mrb[38].mxu1 %vm738_vm1, %v2837_v59 }
 0x3d9   : > { %v6423_v3 = vpop.f32.mrb[8].mxu1 }
 0x3da   : > { %v3169_v16 = vmul.f32 %v6423_v3, %v9106_v17  ;;  %v3003_v49 = vpop.f32.mrb[9].mxu1 }
 0x3db   : > { %v3168_v62 = vmul.f32 %v9106_v17, %v3003_v49 }
 0x3dc   : > { %v3207_v31 = vadd.f32 %v9111_v37, %v3169_v16  ;;  %v7170_v16 = vld [vmem:[%s7401_s30 + $0x58] sm:$0xff] }
 0x3dd   : > { %v3206_v29 = vadd.f32 %v9111_v37, %v3168_v62  ;;  %v6426_v57 = vpop.f32.mrb[10].mxu1 }
 0x3de   : > { %v3171_v56 = vmul.f32 %v6426_v57, %v9106_v17  ;;  %v3013_v36 = vpop.f32.mrb[11].mxu1  ;;  %v9123_v18 = vadd.f32 %v7160_v46, %v3207_v31  ;;  %v7172_v46 = vld [vmem:[%s7401_s30 + $0x68] sm:$0xff] }
 0x3df   : > { %v9119_v24 = vadd.f32 %v7159_v61, %v3206_v29  ;;  %v3170_v14 = vmul.f32 %v9106_v17, %v3013_v36  ;;  %v7171_v36 = vld [vmem:[%s7401_s30 + $0x60] sm:$0xff] }
 0x3e0   : > { %12047 = vst [vmem:[#allocation17_spill] sm:$0xff] %v9123_v18  ;;  %v3209_v58 = vadd.f32 %v9111_v37, %v3171_v56 }
 0x3e1   : > { %12046 = vst [vmem:[#allocation25_spill] sm:$0xff] %v9119_v24  ;;  %v3208_v22 = vadd.f32 %v9111_v37, %v3170_v14  ;;  %v6429_v20 = vpop.f32.mrb[12].mxu1  ;;  %6471 = vmatprep.mubr.msk.f32.mxu0 %vm829_vm3, %v9119_v24 }
 0x3e2   : > { %v3173_v21 = vmul.f32 %v6429_v20, %v9106_v17  ;;  %v3023_v28 = vpop.f32.mrb[13].mxu1  ;;  %6472 = vmatmul.mubr.msk.f32.vlgmr.msra.gmra.mrb[24].mxu0 %vm829_vm3, %v9123_v18  ;;  %v9137_v11 = vadd.f32 %v7162_v44, %v3209_v58 }
 0x3e3   : > { %v9133_v40 = vadd.f32 %v7161_v32, %v3208_v22  ;;  %v3172_v1 = vmul.f32 %v9106_v17, %v3023_v28 }
 0x3e4   : > { %12049 = vst [vmem:[#allocation46_spill] sm:$0xff] %v9137_v11  ;;  %v3211_v43 = vadd.f32 %v9111_v37, %v3173_v21 }
 0x3e5   : > { %12048 = vst [vmem:[#allocation32_spill] sm:$0xff] %v9133_v40  ;;  %v3210_v26 = vadd.f32 %v9111_v37, %v3172_v1  ;;  %v6432_v0 = vpop.f32.mrb[14].mxu1  ;;  %6474 = vmatprep.mubr.msk.f32.mxu0 %vm829_vm3, %v9133_v40  ;;  %v7173_v1 = vld [vmem:[%s7401_s30 + $0x70] sm:$0xff] }
 0x3e6   : > { %v3175_v50 = vmul.f32 %v6432_v0, %v9106_v17  ;;  %v3033_v2 = vpop.f32.mrb[15].mxu1  ;;  %6475 = vmatmul.mubr.msk.f32.gmra.mrb[26].mxu0 %vm829_vm3, %v9137_v11  ;;  %v9151_v51 = vadd.f32 %v7164_v15, %v3211_v43 }
 0x3e7   : > { %v9147_v45 = vadd.f32 %v7163_v27, %v3210_v26  ;;  %v3174_v4 = vmul.f32 %v9106_v17, %v3033_v2  ;;  %v7174_v26 = vld [vmem:[%s7401_s30 + $0x78] sm:$0xff] }
 0x3e8   : > { %12051 = vst [vmem:[#allocation41_spill] sm:$0xff] %v9151_v51  ;;  %v3213_v33 = vadd.f32 %v9111_v37, %v3175_v50 }
 0x3e9   : > { %12050 = vst [vmem:[#allocation42_spill] sm:$0xff] %v9147_v45  ;;  %v3212_v35 = vadd.f32 %v9111_v37, %v3174_v4  ;;  %v6435_v9 = vpop.f32.mrb[16].mxu1  ;;  %6477 = vmatprep.mubr.msk.f32.mxu0 %vm829_vm3, %v9147_v45 }
 0x3ea   : > { %v3177_v8 = vmul.f32 %v6435_v9, %v9106_v17  ;;  %v3043_v48 = vpop.f32.mrb[17].mxu1  ;;  %6478 = vmatmul.mubr.msk.f32.gmra.mrb[28].mxu0 %vm829_vm3, %v9151_v51  ;;  %v9165_v12 = vadd.f32 %v7166_v23, %v3213_v33  ;;  %v7175_v33 = vld [vmem:[%s7401_s30 + $0x80] sm:$0xff] }
 0x3eb   : > { %v9161_v41 = vadd.f32 %v7165_v53, %v3212_v35  ;;  %v3176_v25 = vmul.f32 %v9106_v17, %v3043_v48 }
 0x3ec   : > { %12053 = vst [vmem:[#allocation6_spill] sm:$0xff] %v9165_v12  ;;  %v3215_v42 = vadd.f32 %v9111_v37, %v3177_v8  ;;  %v7176_v8 = vld [vmem:[%s7401_s30 + $0x88] sm:$0xff] }
 0x3ed   : > { %12052 = vst [vmem:[#allocation39_spill] sm:$0xff] %v9161_v41  ;;  %v3214_v60 = vadd.f32 %v9111_v37, %v3176_v25  ;;  %v6438_v10 = vpop.f32.mrb[18].mxu1  ;;  %6480 = vmatprep.mubr.msk.f32.mxu0 %vm829_vm3, %v9161_v41 }
 0x3ee   : > { %v3179_v55 = vmul.f32 %v6438_v10, %v9106_v17  ;;  %v3053_v52 = vpop.f32.mrb[19].mxu1  ;;  %6481 = vmatmul.mubr.msk.f32.gmra.mrb[30].mxu0 %vm829_vm3, %v9165_v12  ;;  %v9179_v47 = vadd.f32 %v7168_v6, %v3215_v42  ;;  %v7177_v10 = vld [vmem:[%s7401_s30 + $0x90] sm:$0xff] }
 0x3ef   : > { %v9175_v19 = vadd.f32 %v7167_v54, %v3214_v60  ;;  %v3178_v39 = vmul.f32 %v9106_v17, %v3053_v52  ;;  %v7178_v54 = vld [vmem:[%s7401_s30 + $0x98] sm:$0xff] }
 0x3f0   : > { %12055 = vst [vmem:[#allocation21_spill] sm:$0xff] %v9179_v47  ;;  %v3217_v7 = vadd.f32 %v9111_v37, %v3179_v55 }
 0x3f1   : > { %12054 = vst [vmem:[#allocation40_spill] sm:$0xff] %v9175_v19  ;;  %v3216_v63 = vadd.f32 %v9111_v37, %v3178_v39  ;;  %v6441_v5 = vpop.f32.mrb[20].mxu1  ;;  %6483 = vmatprep.mubr.msk.f32.mxu0 %vm829_vm3, %v9175_v19 }
 0x3f2   : > { %v3181_v30 = vmul.f32 %v6441_v5, %v9106_v17  ;;  %v3063_v13 = vpop.f32.mrb[21].mxu1  ;;  %6484 = vmatmul.mubr.msk.f32.gmra.mrb[32].mxu0 %vm829_vm3, %v9179_v47  ;;  %v9193_v49 = vadd.f32 %v7170_v16, %v3217_v7  ;;  %v7180_v16 = vld [vmem:[%s7401_s30 + $0xa8] sm:$0xff] }
 0x3f3   : > { %v9189_v59 = vadd.f32 %v7169_v38, %v3216_v63  ;;  %v3180_v3 = vmul.f32 %v9106_v17, %v3063_v13  ;;  %v7179_v13 = vld [vmem:[%s7401_s30 + $0xa0] sm:$0xff] }
 0x3f4   : > { %12057 = vst [vmem:[#allocation47_spill] sm:$0xff] %v9193_v49  ;;  %v3219_v62 = vadd.f32 %v9111_v37, %v3181_v30 }
 0x3f5   : > { %12056 = vst [vmem:[#allocation33_spill] sm:$0xff] %v9189_v59  ;;  %v3218_v31 = vadd.f32 %v9111_v37, %v3180_v3  ;;  %v6444_v29 = vpop.f32.mrb[22].mxu1  ;;  %6486 = vmatprep.mubr.msk.f32.mxu0 %vm829_vm3, %v9189_v59 }
 0x3f6   : > { %v3183_v57 = vmul.f32 %v6444_v29, %v9106_v17  ;;  %v3073_v56 = vpop.f32.mrb[23].mxu1  ;;  %6487 = vmatmul.mubr.msk.f32.gmra.mrb[34].mxu0 %vm829_vm3, %v9193_v49  ;;  %v9207_v58 = vadd.f32 %v7172_v46, %v3219_v62 }
 0x3f7   : > { %v9203_v61 = vadd.f32 %v7171_v36, %v3218_v31  ;;  %v3182_v14 = vmul.f32 %v9106_v17, %v3073_v56 }
 0x3f8   : > { %12059 = vst [vmem:[#allocation23_spill] sm:$0xff] %v9207_v58  ;;  %v3221_v22 = vadd.f32 %v9111_v37, %v3183_v57 }
 0x3f9   : > { %12058 = vst [vmem:[#allocation16_spill] sm:$0xff] %v9203_v61  ;;  %v3220_v20 = vadd.f32 %v9111_v37, %v3182_v14  ;;  %v6447_v21 = vpop.f32.mrb[24].mxu1  ;;  %6489 = vmatprep.mubr.msk.f32.mxu0 %vm829_vm3, %v9203_v61  ;;  %v7181_v14 = vld [vmem:[%s7401_s30 + $0xb0] sm:$0xff] }
 0x3fa   : > { %v3185_v28 = vmul.f32 %v6447_v21, %v9106_v17  ;;  %v3083_v32 = vpop.f32.mrb[25].mxu1  ;;  %6490 = vmatmul.mubr.msk.f32.gmra.mrb[36].mxu0 %vm829_vm3, %v9207_v58  ;;  %v9221_v0 = vadd.f32 %v7174_v26, %v3221_v22 }
 0x3fb   : > { %v9217_v44 = vadd.f32 %v7173_v1, %v3220_v20  ;;  %v3184_v43 = vmul.f32 %v9106_v17, %v3083_v32  ;;  %v7182_v20 = vld [vmem:[%s7401_s30 + $0xb8] sm:$0xff] }
 0x3fc   : > { %12061 = vst [vmem:[#allocation43_spill] sm:$0xff] %v9221_v0  ;;  %v3223_v50 = vadd.f32 %v9111_v37, %v3185_v28 }
 0x3fd   : > { %12060 = vst [vmem:[#allocation14_spill] sm:$0xff] %v9217_v44  ;;  %v3222_v2 = vadd.f32 %v9111_v37, %v3184_v43  ;;  %v6450_v27 = vpop.f32.mrb[26].mxu1  ;;  %6492 = vmatprep.mubr.msk.f32.mxu0 %vm829_vm3, %v9217_v44 }
 0x3fe   : > { %v3187_v4 = vmul.f32 %v6450_v27, %v9106_v17  ;;  %v3093_v15 = vpop.f32.mrb[27].mxu1  ;;  %6493 = vmatmul.mubr.msk.f32.gmra.mrb[38].mxu0 %vm829_vm3, %v9221_v0  ;;  %v9235_v48 = vadd.f32 %v7176_v8, %v3223_v50  ;;  %v7183_v50 = vld [vmem:[%s7401_s30 + $0xc0] sm:$0xff] }
 0x3ff   : > { %v9231_v35 = vadd.f32 %v7175_v33, %v3222_v2  ;;  %v3186_v9 = vmul.f32 %v9106_v17, %v3093_v15 }
 0x400   : > { %12063 = vst [vmem:[#allocation19_spill] sm:$0xff] %v9235_v48  ;;  %v3225_v53 = vadd.f32 %v9111_v37, %v3187_v4  ;;  %v7184_v4 = vld [vmem:[%s7401_s30 + $0xc8] sm:$0xff] }
 0x401   : > { %12062 = vst [vmem:[#allocation30_spill] sm:$0xff] %v9231_v35  ;;  %v3224_v25 = vadd.f32 %v9111_v37, %v3186_v9  ;;  %v6453_v23 = vpop.f32.mrb[28].mxu1  ;;  %6495 = vmatprep.mubr.msk.f32.mxu0 %vm829_vm3, %v9231_v35 }
 0x402   : > { %v3189_v42 = vmul.f32 %v6453_v23, %v9106_v17  ;;  %v3103_v60 = vpop.f32.mrb[29].mxu1  ;;  %6496 = vmatmul.mubr.msk.f32.gmra.mrb[40].mxu0 %vm829_vm3, %v9235_v48  ;;  %v9249_v39 = vadd.f32 %v7178_v54, %v3225_v53  ;;  %v7185_v23 = vld [vmem:[%s7401_s30 + $0xd0] sm:$0xff] }
 0x403   : > { %v9245_v55 = vadd.f32 %v7177_v10, %v3224_v25  ;;  %v3188_v52 = vmul.f32 %v9106_v17, %v3103_v60  ;;  %v7186_v10 = vld [vmem:[%s7401_s30 + $0xd8] sm:$0xff] }
 0x404   : > { %12065 = vst [vmem:[#allocation48_spill] sm:$0xff] %v9249_v39  ;;  %v3227_v6 = vadd.f32 %v9111_v37, %v3189_v42 }
 0x405   : > { %12064 = vst [vmem:[#allocation36_spill] sm:$0xff] %v9245_v55  ;;  %v3226_v7 = vadd.f32 %v9111_v37, %v3188_v52  ;;  %v6456_v63 = vpop.f32.mrb[30].mxu1  ;;  %6498 = vmatprep.mubr.msk.f32.mxu0 %vm829_vm3, %v9245_v55 }
 0x406   : > { %v3191_v5 = vmul.f32 %v6456_v63, %v9106_v17  ;;  %v3113_v30 = vpop.f32.mrb[31].mxu1  ;;  %6499 = vmatmul.mubr.msk.f32.gmra.mrb[42].mxu0 %vm829_vm3, %v9249_v39  ;;  %v9263_v62 = vadd.f32 %v7180_v16, %v3227_v6  ;;  %v7188_v16 = vld [vmem:[%s7401_s30 + $0xe8] sm:$0xff] }
 0x407   : > { %v9259_v38 = vadd.f32 %v7179_v13, %v3226_v7  ;;  %v3190_v3 = vmul.f32 %v9106_v17, %v3113_v30  ;;  %v7187_v30 = vld [vmem:[%s7401_s30 + $0xe0] sm:$0xff] }
 0x408   : > { %12067 = vst [vmem:[#allocation8_spill] sm:$0xff] %v9263_v62  ;;  %v3229_v31 = vadd.f32 %v9111_v37, %v3191_v5 }
 0x409   : > { %12066 = vst [vmem:[#allocation7_spill] sm:$0xff] %v9259_v38  ;;  %v3228_v29 = vadd.f32 %v9111_v37, %v3190_v3  ;;  %v6459_v57 = vpop.f32.mrb[32].mxu1  ;;  %6501 = vmatprep.mubr.msk.f32.mxu0 %vm829_vm3, %v9259_v38 }
 0x40a   : > { %v3193_v56 = vmul.f32 %v6459_v57, %v9106_v17  ;;  %v3123_v36 = vpop.f32.mrb[33].mxu1  ;;  %6502 = vmatmul.mubr.msk.f32.gmra.mrb[44].mxu0 %vm829_vm3, %v9263_v62  ;;  %v9277_v21 = vadd.f32 %v7182_v20, %v3229_v31 }
 0x40b   : > { %v9273_v46 = vadd.f32 %v7181_v14, %v3228_v29  ;;  %v3192_v22 = vmul.f32 %v9106_v17, %v3123_v36  ;;  %v7190_v14 = vld [vmem:[%s7401_s30 + $0xf8] sm:$0xff] }
 0x40c   : > { %12069 = vst [vmem:[#allocation11_spill] sm:$0xff] %v9277_v21  ;;  %v3231_v28 = vadd.f32 %v9111_v37, %v3193_v56  ;;  %v7189_v56 = vld [vmem:[%s7401_s30 + $0xf0] sm:$0xff] }
 0x40d   : > { %12068 = vst [vmem:[#allocation9_spill] sm:$0xff] %v9273_v46  ;;  %v3230_v32 = vadd.f32 %v9111_v37, %v3192_v22  ;;  %v6462_v1 = vpop.f32.mrb[34].mxu1  ;;  %6504 = vmatprep.mubr.msk.f32.mxu0 %vm829_vm3, %v9273_v46 }
 0x40e   : > { %v3195_v43 = vmul.f32 %v6462_v1, %v9106_v17  ;;  %v3133_v26 = vpop.f32.mrb[35].mxu1  ;;  %6505 = vmatmul.mubr.msk.f32.gmra.mrb[46].mxu0 %vm829_vm3, %v9277_v21  ;;  %v9291_v15 = vadd.f32 %v7184_v4, %v3231_v28 }
 0x40f   : > { %v9287_v2 = vadd.f32 %v7183_v50, %v3230_v32  ;;  %v3194_v27 = vmul.f32 %v9106_v17, %v3133_v26 }
 0x410   : > { %12071 = vst [vmem:[#allocation45_spill] sm:$0xff] %v9291_v15  ;;  %v3233_v33 = vadd.f32 %v9111_v37, %v3195_v43 }
 0x411   : > { %12070 = vst [vmem:[#allocation44_spill] sm:$0xff] %v9287_v2  ;;  %v3232_v9 = vadd.f32 %v9111_v37, %v3194_v27  ;;  %v6465_v8 = vpop.f32.mrb[36].mxu1  ;;  %6507 = vmatprep.mubr.msk.f32.mxu0 %vm829_vm3, %v9287_v2 }
 0x412   : > { %v3197_v53 = vmul.f32 %v6465_v8, %v9106_v17  ;;  %v3143_v25 = vpop.f32.mrb[37].mxu1  ;;  %6508 = vmatmul.mubr.msk.f32.gmra.mrb[48].mxu0 %vm829_vm3, %v9291_v15  ;;  %v9305_v52 = vadd.f32 %v7186_v10, %v3233_v33 }
 0x413   : > { %v9301_v42 = vadd.f32 %v7185_v23, %v3232_v9  ;;  %v3196_v60 = vmul.f32 %v9106_v17, %v3143_v25 }
 0x414   : > { %12073 = vst [vmem:[#allocation26_spill] sm:$0xff] %v9305_v52  ;;  %v3235_v54 = vadd.f32 %v9111_v37, %v3197_v53 }
 0x415   : > { %12072 = vst [vmem:[#allocation37_spill] sm:$0xff] %v9301_v42  ;;  %v3234_v6 = vadd.f32 %v9111_v37, %v3196_v60  ;;  %v6468_v7 = vpop.f32.mrb[38].mxu1  ;;  %6510 = vmatprep.mubr.msk.f32.mxu0 %vm829_vm3, %v9301_v42 }
 0x416   : > { %v3199_v63 = vmul.f32 %v6468_v7, %v9106_v17  ;;  %v3153_v5 = vpop.f32.mrb[39].mxu1  ;;  %6511 = vmatmul.mubr.msk.f32.gmra.mrb[50].mxu0 %vm829_vm3, %v9305_v52  ;;  %v9319_v31 = vadd.f32 %v7188_v16, %v3235_v54 }
 0x417   : > { %v9315_v13 = vadd.f32 %v7187_v30, %v3234_v6  ;;  %v3198_v3 = vmul.f32 %v9106_v17, %v3153_v5  ;;  %v9340_v17 = vld [vmem:[%s11676_s13] ss:$0 sm:$0xff] }
 0x418   : > { %12075 = vst [vmem:[#allocation20_spill] sm:$0xff] %v9319_v31  ;;  %v3237_v29 = vadd.f32 %v9111_v37, %v3199_v63 }
 0x419   : > { %12074 = vst [vmem:[#allocation28_spill] sm:$0xff] %v9315_v13  ;;  %v3236_v57 = vadd.f32 %v9111_v37, %v3198_v3  ;;  %6513 = vmatprep.mubr.msk.f32.mxu0 %vm829_vm3, %v9315_v13  ;;  %v9345_v37 = vld [vmem:[%s11677_s14] ss:$0 sm:$0xff] }
 0x41a   : > { %6514 = vmatmul.mubr.msk.f32.gmra.mrb[52].mxu0 %vm829_vm3, %v9319_v31  ;;  %v9331_v22 = vadd.f32 %v7190_v14, %v3237_v29 }
 0x41b   : > { %v9328_v36 = vadd.f32 %v7189_v56, %v3236_v57 }
 0x41c   : > { %12077 = vst [vmem:[#allocation38_spill] sm:$0xff] %v9331_v22 }
 0x41d   : > { %12076 = vst [vmem:[#allocation24_spill] sm:$0xff] %v9328_v36  ;;  %6516 = vmatprep.mubr.msk.f32.mxu0 %vm829_vm3, %v9328_v36 }
 0x41e   : > { %6517 = vmatmul.mubr.msk.f32.gmra.mrb[54].mxu0 %vm829_vm3, %v9331_v22 }
 0x4b5   : > { %v6473_v20 = vpop.f32.mrb[24].mxu0 }
 0x4b6   : > { %v3604_v28 = vmul.f32 %v6473_v20, %v9340_v17  ;;  %v3438_v32 = vpop.f32.mrb[25].mxu0 }
 0x4b7   : > { %v3603_v1 = vmul.f32 %v9340_v17, %v3438_v32 }
 0x4b8   : > { %v9350_v43 = vadd.f32 %v9345_v37, %v3604_v28 }
 0x4b9   : > { %v9353_v26 = vadd.f32 %v9345_v37, %v3603_v1  ;;  %v6476_v50 = vpop.f32.mrb[26].mxu0 }
 0x4ba   : > { %v6075_v27 = vmul.f32 -1.442695, %v9350_v43  ;;  %v3606_v4 = vmul.f32 %v6476_v50, %v9340_v17  ;;  %v3448_v33 = vpop.f32.mrb[27].mxu0 }
 0x4bb   : > { %v6074_v9 = vmul.f32 -1.442695, %v9353_v26  ;;  %v3605_v8 = vmul.f32 %v9340_v17, %v3448_v33 }
 0x4bc   : > { %6880 = vpow2.f32 %v6075_v27  ;;  %v9360_v53 = vadd.f32 %v9345_v37, %v3606_v4 }
 0x4bd   : > { %6882 = vpow2.f32 %v6074_v9  ;;  %v9363_v25 = vadd.f32 %v9345_v37, %v3605_v8  ;;  %v6479_v23 = vpop.f32.mrb[28].mxu0 }
 0x4be   : > { %v6077_v60 = vmul.f32 -1.442695, %v9360_v53  ;;  %v3608_v10 = vmul.f32 %v6479_v23, %v9340_v17  ;;  %v3458_v54 = vpop.f32.mrb[29].mxu0 }
 0x4bf   : > { %v6076_v6 = vmul.f32 -1.442695, %v9363_v25  ;;  %v3607_v7 = vmul.f32 %v9340_v17, %v3458_v54 }
 0x4c0   : > { %6884 = vpow2.f32 %v6077_v60  ;;  %v9370_v63 = vadd.f32 %v9345_v37, %v3608_v10 }
 0x4c1   : > { %6886 = vpow2.f32 %v6076_v6  ;;  %v9373_v5 = vadd.f32 %v9345_v37, %v3607_v7  ;;  %v6482_v30 = vpop.f32.mrb[30].mxu0 }
 0x4c2   : > { %v6079_v3 = vmul.f32 -1.442695, %v9370_v63  ;;  %v3610_v16 = vmul.f32 %v6482_v30, %v9340_v17  ;;  %v3468_v29 = vpop.f32.mrb[31].mxu0 }
 0x4c3   : > { %v6078_v57 = vmul.f32 -1.442695, %v9373_v5  ;;  %v3609_v56 = vmul.f32 %v9340_v17, %v3468_v29 }
 0x4c4   : > { %6888 = vpow2.f32 %v6079_v3  ;;  %v9380_v14 = vadd.f32 %v9345_v37, %v3610_v16 }
 0x4c5   : > { %6890 = vpow2.f32 %v6078_v57  ;;  %v9383_v20 = vadd.f32 %v9345_v37, %v3609_v56  ;;  %v6485_v28 = vpop.f32.mrb[32].mxu0 }
 0x4c6   : > { %v6881_v32 = vpop.eup %6880  ;;  %v6081_v1 = vmul.f32 -1.442695, %v9380_v14  ;;  %v3612_v50 = vmul.f32 %v6485_v28, %v9340_v17  ;;  %v3478_v27 = vpop.f32.mrb[33].mxu0 }
 0x4c7   : > { %v6883_v4 = vpop.eup %6882  ;;  %v3770_v33 = vadd.f32 1.0, %v6881_v32  ;;  %v6080_v9 = vmul.f32 -1.442695, %v9383_v20  ;;  %v3611_v8 = vmul.f32 %v9340_v17, %v3478_v27 }
 0x4c8   : > { %v3769_v23 = vadd.f32 1.0, %v6883_v4  ;;  %6892 = vpow2.f32 %v6081_v1  ;;  %v9390_v60 = vadd.f32 %v9345_v37, %v3612_v50 }
 0x4c9   : > { %6894 = vrcp.f32 %v3770_v33  ;;  %v9393_v10 = vadd.f32 %v9345_v37, %v3611_v8  ;;  %v6488_v54 = vpop.f32.mrb[34].mxu0 }
 0x4ca   : > { %v6885_v6 = vpop.eup %6884  ;;  %6896 = vrcp.f32 %v3769_v23  ;;  %v6083_v7 = vmul.f32 -1.442695, %v9390_v60  ;;  %v3614_v30 = vmul.f32 %v6488_v54, %v9340_v17  ;;  %v3488_v3 = vpop.f32.mrb[35].mxu0 }
 0x4cb   : > { %v6887_v16 = vpop.eup %6886  ;;  %v3772_v29 = vadd.f32 1.0, %v6885_v6  ;;  %6898 = vpow2.f32 %v6080_v9  ;;  %v6082_v57 = vmul.f32 -1.442695, %v9393_v10  ;;  %v3613_v56 = vmul.f32 %v9340_v17, %v3488_v3 }
 0x4cc   : > { %v3771_v28 = vadd.f32 1.0, %v6887_v16  ;;  %6900 = vpow2.f32 %v6083_v7  ;;  %v9400_v32 = vadd.f32 %v9345_v37, %v3614_v30 }
 0x4cd   : > { %6902 = vrcp.f32 %v3772_v29  ;;  %v9403_v1 = vadd.f32 %v9345_v37, %v3613_v56  ;;  %v6491_v50 = vpop.f32.mrb[36].mxu0 }
 0x4ce   : > { %v6889_v27 = vpop.eup %6888  ;;  %6904 = vrcp.f32 %v3771_v28  ;;  %v6085_v4 = vmul.f32 -1.442695, %v9400_v32  ;;  %v3616_v33 = vmul.f32 %v6491_v50, %v9340_v17  ;;  %v3498_v9 = vpop.f32.mrb[37].mxu0 }
 0x4cf   : > { %v6891_v8 = vpop.eup %6890  ;;  %v3774_v23 = vadd.f32 1.0, %v6889_v27  ;;  %6906 = vpow2.f32 %v6082_v57  ;;  %v6084_v54 = vmul.f32 -1.442695, %v9403_v1  ;;  %v3615_v6 = vmul.f32 %v9340_v17, %v3498_v9 }
 0x4d0   : > { %v3773_v7 = vadd.f32 1.0, %v6891_v8  ;;  %6908 = vpow2.f32 %v6085_v4  ;;  %v9410_v30 = vadd.f32 %v9345_v37, %v3616_v33 }
 0x4d1   : > { %6910 = vrcp.f32 %v3774_v23  ;;  %v9413_v3 = vadd.f32 %v9345_v37, %v3615_v6  ;;  %v6494_v16 = vpop.f32.mrb[38].mxu0 }
 0x4d2   : > { %v6893_v29 = vpop.eup %6892  ;;  %6912 = vrcp.f32 %v3773_v7  ;;  %v6087_v56 = vmul.f32 -1.442695, %v9410_v30  ;;  %v3618_v57 = vmul.f32 %v6494_v16, %v9340_v17  ;;  %v3508_v28 = vpop.f32.mrb[39].mxu0 }
 0x4d3   : > { %v6895_v50 = vpop.eup %6894  ;;  %v3776_v27 = vadd.f32 1.0, %v6893_v29  ;;  %6914 = vpow2.f32 %v6084_v54  ;;  %v6086_v4 = vmul.f32 -1.442695, %v9413_v3  ;;  %v3617_v33 = vmul.f32 %v9340_v17, %v3508_v28 }
 0x4d4   : > { %v6897_v9 = vpop.eup %6896  ;;  %v3866_v8 = vmul.f32 %v6895_v50, %v9350_v43  ;;  %6916 = vpow2.f32 %v6087_v56  ;;  %v9421_v23 = vadd.f32 %v9345_v37, %v3618_v57 }
 0x4d5   : > { %v6899_v6 = vpop.eup %6898  ;;  %v3865_v7 = vmul.f32 %v6897_v9, %v9353_v26  ;;  %6918 = vrcp.f32 %v3776_v27  ;;  %v9425_v16 = vadd.f32 %v9345_v37, %v3617_v33  ;;  %v6497_v29 = vpop.f32.mrb[40].mxu0 }
 0x4d6   : > { %v6901_v54 = vpop.eup %6900  ;;  %3903 = vst.msk [vmem:[#allocation2 + $0x21] sm:$0xff] %vm738_vm1, %v3866_v8  ;;  %v3775_v36 = vadd.f32 1.0, %v6899_v6  ;;  %6920 = vpow2.f32 %v6086_v4  ;;  %v6089_v28 = vmul.f32 -1.442695, %v9421_v23  ;;  %v3620_v43 = vmul.f32 %v6497_v29, %v9340_v17  ;;  %v3518_v56 = vpop.f32.mrb[41].mxu0 }
 0x4d7   : > { %v6903_v57 = vpop.eup %6902  ;;  %3902 = vst.msk [vmem:[#allocation2 + $0x19] sm:$0xff] %vm738_vm1, %v3865_v7  ;;  %v3778_v50 = vadd.f32 1.0, %v6901_v54  ;;  %v6088_v26 = vmul.f32 -1.442695, %v9425_v16  ;;  %v3619_v27 = vmul.f32 %v9340_v17, %v3518_v56 }
 0x4d8   : > { %v6905_v33 = vpop.eup %6904  ;;  %v3868_v9 = vmul.f32 %v6903_v57, %v9360_v53  ;;  %6922 = vrcp.f32 %v3775_v36  ;;  %v9435_v8 = vadd.f32 %v9345_v37, %v3620_v43 }
 0x4d9   : > { %v6907_v4 = vpop.eup %6906  ;;  %v3867_v6 = vmul.f32 %v6905_v33, %v9363_v25  ;;  %6924 = vrcp.f32 %v3778_v50  ;;  %v9439_v29 = vadd.f32 %v9345_v37, %v3619_v27  ;;  %v6500_v7 = vpop.f32.mrb[42].mxu0 }
 0x4da   : > { %v6909_v54 = vpop.eup %6908  ;;  %3905 = vst.msk [vmem:[#allocation2 + $0x39] sm:$0xff] %vm738_vm1, %v3868_v9  ;;  %v3777_v22 = vadd.f32 1.0, %v6907_v4  ;;  %6926 = vpow2.f32 %v6089_v28  ;;  %v6091_v56 = vmul.f32 -1.442695, %v9435_v8  ;;  %v3622_v36 = vmul.f32 %v6500_v7, %v9340_v17  ;;  %v3528_v53 = vpop.f32.mrb[43].mxu0 }
 0x4db   : > { %v6911_v43 = vpop.eup %6910  ;;  %3904 = vst.msk [vmem:[#allocation2 + $0x31] sm:$0xff] %vm738_vm1, %v3867_v6  ;;  %v3780_v57 = vadd.f32 1.0, %v6909_v54  ;;  %6928 = vpow2.f32 %v6088_v26  ;;  %v6090_v25 = vmul.f32 -1.442695, %v9439_v29  ;;  %v3621_v50 = vmul.f32 %v9340_v17, %v3528_v53 }
 0x4dc   : > { %v6913_v27 = vpop.eup %6912  ;;  %v3870_v33 = vmul.f32 %v6911_v43, %v9370_v63  ;;  %6930 = vrcp.f32 %v3777_v22  ;;  %v9449_v28 = vadd.f32 %v9345_v37, %v3622_v36 }
 0x4dd   : > { %v6915_v9 = vpop.eup %6914  ;;  %v3869_v4 = vmul.f32 %v6913_v27, %v9373_v5  ;;  %6932 = vrcp.f32 %v3780_v57  ;;  %v9453_v7 = vadd.f32 %v9345_v37, %v3621_v50  ;;  %v6503_v6 = vpop.f32.mrb[44].mxu0 }
 0x4de   : > { %v6917_v26 = vpop.eup %6916  ;;  %3907 = vst.msk [vmem:[#allocation2 + $0x51] sm:$0xff] %vm738_vm1, %v3870_v33  ;;  %v3779_v54 = vadd.f32 1.0, %v6915_v9  ;;  %6934 = vpow2.f32 %v6091_v56  ;;  %v6093_v53 = vmul.f32 -1.442695, %v9449_v28  ;;  %v3624_v22 = vmul.f32 %v6503_v6, %v9340_v17  ;;  %v3538_v63 = vpop.f32.mrb[45].mxu0 }
 0x4df   : > { %v6919_v36 = vpop.eup %6918  ;;  %3906 = vst.msk [vmem:[#allocation2 + $0x49] sm:$0xff] %vm738_vm1, %v3869_v4  ;;  %v3782_v43 = vadd.f32 1.0, %v6917_v26  ;;  %6936 = vpow2.f32 %v6090_v25  ;;  %v3623_v5 = vmul.f32 %v9340_v17, %v3538_v63  ;;  %v6092_v27 = vmul.f32 -1.442695, %v9453_v7 }
 0x4e0   : > { %v6921_v57 = vpop.eup %6920  ;;  %v3872_v50 = vmul.f32 %v6919_v36, %v9380_v14  ;;  %6938 = vrcp.f32 %v3779_v54  ;;  %v9463_v56 = vadd.f32 %v9345_v37, %v3624_v22 }
 0x4e1   : > { %6940 = vrcp.f32 %v3782_v43  ;;  %v3781_v33 = vadd.f32 1.0, %v6921_v57  ;;  %v9466_v9 = vadd.f32 %v9345_v37, %v3623_v5  ;;  %v6506_v6 = vpop.f32.mrb[46].mxu0 }
 0x4e2   : > { %v6923_v4 = vpop.eup %6922  ;;  %3909 = vst.msk [vmem:[#allocation2 + $0x69] sm:$0xff] %vm738_vm1, %v3872_v50  ;;  %6942 = vpow2.f32 %v6093_v53  ;;  %v6095_v25 = vmul.f32 -1.442695, %v9463_v56  ;;  %v3626_v14 = vmul.f32 %v6506_v6, %v9340_v17  ;;  %v3548_v26 = vpop.f32.mrb[47].mxu0 }
 0x4e3   : > { %v6925_v54 = vpop.eup %6924  ;;  %v3871_v63 = vmul.f32 %v6923_v4, %v9383_v20  ;;  %6944 = vrcp.f32 %v3781_v33  ;;  %v6094_v22 = vmul.f32 -1.442695, %v9466_v9  ;;  %v3625_v36 = vmul.f32 %v9340_v17, %v3548_v26 }
 0x4e4   : > { %v6927_v43 = vpop.eup %6926  ;;  %v3874_v5 = vmul.f32 %v6925_v54, %v9390_v60  ;;  %6946 = vpow2.f32 %v6092_v27  ;;  %v9476_v57 = vadd.f32 %v9345_v37, %v3626_v14 }
 0x4e5   : > { %v6929_v53 = vpop.eup %6928  ;;  %3908 = vst.msk [vmem:[#allocation2 + $0x61] sm:$0xff] %vm738_vm1, %v3871_v63  ;;  %v3784_v50 = vadd.f32 1.0, %v6927_v43  ;;  %6948 = vpow2.f32 %v6095_v25  ;;  %v9480_v6 = vadd.f32 %v9345_v37, %v3625_v36  ;;  %v6509_v20 = vpop.f32.mrb[48].mxu0 }
 0x4e6   : > { %v6931_v33 = vpop.eup %6930  ;;  %3911 = vst.msk [vmem:[#allocation2 + $0x81] sm:$0xff] %vm738_vm1, %v3874_v5  ;;  %v3783_v4 = vadd.f32 1.0, %v6929_v53  ;;  %6950 = vpow2.f32 %v6094_v22  ;;  %v6097_v60 = vmul.f32 -1.442695, %v9476_v57  ;;  %v3628_v27 = vmul.f32 %v6509_v20, %v9340_v17  ;;  %v3558_v14 = vpop.f32.mrb[49].mxu0 }
 0x4e7   : > { %v6933_v26 = vpop.eup %6932  ;;  %v3873_v54 = vmul.f32 %v6931_v33, %v9393_v10  ;;  %6952 = vrcp.f32 %v3784_v50  ;;  %v6096_v25 = vmul.f32 -1.442695, %v9480_v6  ;;  %v3627_v63 = vmul.f32 %v9340_v17, %v3558_v14 }
 0x4e8   : > { %v6935_v36 = vpop.eup %6934  ;;  %v3876_v43 = vmul.f32 %v6933_v26, %v9400_v32  ;;  %6954 = vrcp.f32 %v3783_v4  ;;  %v9490_v5 = vadd.f32 %v9345_v37, %v3628_v27 }
 0x4e9   : > { %v6937_v22 = vpop.eup %6936  ;;  %3910 = vst.msk [vmem:[#allocation2 + $0x79] sm:$0xff] %vm738_vm1, %v3873_v54  ;;  %v3786_v53 = vadd.f32 1.0, %v6935_v36  ;;  %6956 = vpow2.f32 %v6097_v60  ;;  %v9494_v20 = vadd.f32 %v9345_v37, %v3627_v63  ;;  %v6512_v10 = vpop.f32.mrb[50].mxu0  ;;  %v9678_v62 = vld [vmem:[#allocation2 + $0x69] sm:$0xff] }
 0x4ea   : > { %v6939_v50 = vpop.eup %6938  ;;  %3913 = vst.msk [vmem:[#allocation2 + $0x99] sm:$0xff] %vm738_vm1, %v3876_v43  ;;  %v3785_v33 = vadd.f32 1.0, %v6937_v22  ;;  %6958 = vpow2.f32 %v6096_v25  ;;  %v6099_v32 = vmul.f32 -1.442695, %v9490_v5  ;;  %v3630_v4 = vmul.f32 %v6512_v10, %v9340_v17  ;;  %v3568_v27 = vpop.f32.mrb[51].mxu0  ;;  %12110 = vst [vmem:[#allocation67_spill] sm:$0xff] %v9678_v62 }
 0x4eb   : > { %v6941_v14 = vpop.eup %6940  ;;  %v3875_v26 = vmul.f32 %v6939_v50, %v9403_v1  ;;  %6960 = vrcp.f32 %v3786_v53  ;;  %v6098_v60 = vmul.f32 -1.442695, %v9494_v20  ;;  %v3629_v54 = vmul.f32 %v9340_v17, %v3568_v27 }
 0x4ec   : > { %v6943_v63 = vpop.eup %6942  ;;  %v3878_v36 = vmul.f32 %v6941_v14, %v9410_v30  ;;  %6962 = vrcp.f32 %v3785_v33  ;;  %v9504_v43 = vadd.f32 %v9345_v37, %v3630_v4  ;;  %v9676_v38 = vld [vmem:[#allocation2 + $0x61] sm:$0xff] }
 0x4ed   : > { %v6945_v25 = vpop.eup %6944  ;;  %3912 = vst.msk [vmem:[#allocation2 + $0x91] sm:$0xff] %vm738_vm1, %v3875_v26  ;;  %v3788_v22 = vadd.f32 1.0, %v6943_v63  ;;  %6964 = vpow2.f32 %v6099_v32  ;;  %v9508_v10 = vadd.f32 %v9345_v37, %v3629_v54  ;;  %v6515_v1 = vpop.f32.mrb[52].mxu0  ;;  %12109 = vst [vmem:[#allocation66_spill] sm:$0xff] %v9676_v38  ;;  %v9680_v55 = vld [vmem:[#allocation2 + $0x81] sm:$0xff] }
 0x4ee   : > { %v6947_v53 = vpop.eup %6946  ;;  %3915 = vst.msk [vmem:[#allocation2 + $0xb1] sm:$0xff] %vm738_vm1, %v3878_v36  ;;  %v3877_v50 = vmul.f32 %v6945_v25, %v9413_v3  ;;  %6966 = vpow2.f32 %v6098_v60  ;;  %v6101_v30 = vmul.f32 -1.442695, %v9504_v43  ;;  %v3632_v33 = vmul.f32 %v6515_v1, %v9340_v17  ;;  %v3578_v4 = vpop.f32.mrb[53].mxu0  ;;  %12111 = vst [vmem:[#allocation68_spill] sm:$0xff] %v9680_v55 }
 0x4ef   : > { %v6949_v27 = vpop.eup %6948  ;;  %6968 = vrcp.f32 %v3788_v22  ;;  %v3787_v14 = vadd.f32 1.0, %v6947_v53  ;;  %v3631_v32 = vmul.f32 %v9340_v17, %v3578_v4  ;;  %v6100_v63 = vmul.f32 -1.442695, %v9508_v10 }
 0x4f0   : > { %v6951_v26 = vpop.eup %6950  ;;  %3914 = vst.msk [vmem:[#allocation2 + $0xa9] sm:$0xff] %vm738_vm1, %v3877_v50  ;;  %v3790_v54 = vadd.f32 1.0, %v6949_v27  ;;  %6970 = vpow2.f32 %v6101_v30  ;;  %v9518_v3 = vadd.f32 %v9345_v37, %v3632_v33  ;;  %v9692_v61 = vld [vmem:[#allocation2 + $0x79] sm:$0xff] }
 0x4f1   : > { %v6953_v60 = vpop.eup %6952  ;;  %6972 = vrcp.f32 %v3787_v14  ;;  %v3789_v36 = vadd.f32 1.0, %v6951_v26  ;;  %v9521_v25 = vadd.f32 %v9345_v37, %v3631_v32  ;;  %v6518_v22 = vpop.f32.mrb[54].mxu0  ;;  %12112 = vst [vmem:[#allocation69_spill] sm:$0xff] %v9692_v61  ;;  %v9696_v59 = vld [vmem:[#allocation2 + $0x99] sm:$0xff] }
 0x4f2   : > { %v6955_v1 = vpop.eup %6954  ;;  %v3880_v53 = vmul.f32 %v6953_v60, %v9421_v23  ;;  %6974 = vrcp.f32 %v3790_v54  ;;  %v6103_v50 = vmul.f32 -1.442695, %v9518_v3  ;;  %v3634_v30 = vmul.f32 %v6518_v22, %v9340_v17  ;;  %v3588_v4 = vpop.f32.mrb[55].mxu0  ;;  %12114 = vst [vmem:[#allocation71_spill] sm:$0xff] %v9696_v59 }
 0x4f3   : > { %v6957_v27 = vpop.eup %6956  ;;  %v3879_v33 = vmul.f32 %v6955_v1, %v9425_v16  ;;  %6976 = vrcp.f32 %v3789_v36  ;;  %v3633_v14 = vmul.f32 %v9340_v17, %v3588_v4  ;;  %v6102_v13 = vmul.f32 -1.442695, %v9521_v25 }
 0x4f4   : > { %v6959_v26 = vpop.eup %6958  ;;  %3917 = vst.msk [vmem:[#allocation2 + $0xc9] sm:$0xff] %vm738_vm1, %v3880_v53  ;;  %v3792_v32 = vadd.f32 1.0, %v6957_v27  ;;  %6978 = vpow2.f32 %v6100_v63  ;;  %v9531_v23 = vadd.f32 %v9345_v37, %v3634_v30  ;;  %v9656_v42 = vld [vmem:[#allocation2 + $0x98] sm:$0xff] }
 0x4f5   : > { %v6961_v54 = vpop.eup %6960  ;;  %3916 = vst.msk [vmem:[#allocation2 + $0xc1] sm:$0xff] %vm738_vm1, %v3879_v33  ;;  %v3791_v60 = vadd.f32 1.0, %v6959_v26  ;;  %6980 = vpow2.f32 %v6103_v50  ;;  %v9535_v16 = vadd.f32 %v9345_v37, %v3633_v14  ;;  %12106 = vst [vmem:[#allocation63_spill] sm:$0xff] %v9656_v42  ;;  %v9694_v58 = vld [vmem:[#allocation2 + $0x91] sm:$0xff] }
 0x4f6   : > { %v6963_v36 = vpop.eup %6962  ;;  %v3882_v17 = vmul.f32 %v6961_v54, %v9435_v8  ;;  %6982 = vrcp.f32 %v3792_v32  ;;  %v6105_v22 = vmul.f32 -1.442695, %v9531_v23  ;;  %12113 = vst [vmem:[#allocation70_spill] sm:$0xff] %v9694_v58  ;;  %v9714_v40 = vld [vmem:[#allocation2 + $0xb1] sm:$0xff] }
 0x4f7   : > { %v6965_v63 = vpop.eup %6964  ;;  %v3881_v1 = vmul.f32 %v6963_v36, %v9439_v29  ;;  %6984 = vrcp.f32 %v3791_v60  ;;  %v6104_v50 = vmul.f32 -1.442695, %v9535_v16  ;;  %v9658_v52 = vld [vmem:[#allocation2 + $0xa8] sm:$0xff]  ;;  %v9660_v2 = vld [vmem:[#allocation2 + $0xb0] sm:$0xff]  ;;  %12118 = vst [vmem:[#allocation75_spill] sm:$0xff] %v9714_v40 }
 0x4f8   : > { %v6967_v53 = vpop.eup %6966  ;;  %3919 = vst.msk [vmem:[#allocation2 + $0xe1] sm:$0xff] %vm738_vm1, %v3882_v17  ;;  %v3794_v30 = vadd.f32 1.0, %v6965_v63  ;;  %6986 = vpow2.f32 %v6102_v13  ;;  %12107 = vst [vmem:[#allocation64_spill] sm:$0xff] %v9658_v52  ;;  %v9710_v45 = vld [vmem:[#allocation2 + $0xa9] sm:$0xff] }
 0x4f9   : > { %v6969_v4 = vpop.eup %6968  ;;  %3918 = vst.msk [vmem:[#allocation2 + $0xd9] sm:$0xff] %vm738_vm1, %v3881_v1  ;;  %v3793_v37 = vadd.f32 1.0, %v6967_v53  ;;  %6988 = vpow2.f32 %v6105_v22  ;;  %12108 = vst [vmem:[#allocation65_spill] sm:$0xff] %v9660_v2 }
 0x4fa   : > { %v6971_v8 = vpop.eup %6970  ;;  %v3884_v27 = vmul.f32 %v6969_v4, %v9449_v28  ;;  %6990 = vrcp.f32 %v3794_v30  ;;  %12117 = vst [vmem:[#allocation74_spill] sm:$0xff] %v9710_v45 }
 0x4fb   : > { %v6973_v33 = vpop.eup %6972  ;;  %6992 = vrcp.f32 %v3793_v37  ;;  %v3796_v29 = vadd.f32 1.0, %v6971_v8  ;;  %v9718_v24 = vld [vmem:[#allocation2 + $0xc9] sm:$0xff] }
 0x4fc   : > { %v6975_v14 = vpop.eup %6974  ;;  %3921 = vst.msk [vmem:[#allocation2 + $0xf9] sm:$0xff] %vm738_vm1, %v3884_v27  ;;  %v3883_v26 = vmul.f32 %v6973_v33, %v9453_v7  ;;  %6994 = vpow2.f32 %v6104_v50  ;;  %v9698_v49 = vld [vmem:[#allocation2 + $0xc0] sm:$0xff]  ;;  %v9700_v19 = vld [vmem:[#allocation2 + $0xc8] sm:$0xff]  ;;  %12120 = vst [vmem:[#allocation77_spill] sm:$0xff] %v9718_v24 }
 0x4fd   : > { %v6977_v13 = vpop.eup %6976  ;;  %v3886_v32 = vmul.f32 %v6975_v14, %v9463_v56  ;;  %6996 = vrcp.f32 %v3796_v29  ;;  %12115 = vst [vmem:[#allocation72_spill] sm:$0xff] %v9698_v49  ;;  %12116 = vst [vmem:[#allocation73_spill] sm:$0xff] %v9700_v19  ;;  %v9716_v11 = vld [vmem:[#allocation2 + $0xc1] sm:$0xff] }
 0x4fe   : > { %v6979_v54 = vpop.eup %6978  ;;  %3920 = vst.msk [vmem:[#allocation2 + $0xf1] sm:$0xff] %vm738_vm1, %v3883_v26  ;;  %v3885_v60 = vmul.f32 %v6977_v13, %v9466_v9  ;;  %12119 = vst [vmem:[#allocation76_spill] sm:$0xff] %v9716_v11 }
 0x4ff   : > { %v6981_v28 = vpop.eup %6980  ;;  %3923 = vst.msk [vmem:[#allocation2 + $0x111] sm:$0xff] %vm738_vm1, %v3886_v32  ;;  %v3795_v36 = vadd.f32 1.0, %v6979_v54  ;;  %v12078_v32 = vld [vmem:[#allocation3_spill] sm:$0xff] }
 0x500   : > { %v6983_v17 = vpop.eup %6982  ;;  %3922 = vst.msk [vmem:[#allocation2 + $0x109] sm:$0xff] %vm738_vm1, %v3885_v60  ;;  %v3798_v22 = vadd.f32 1.0, %v6981_v28  ;;  %v3934_v60 = vld [vmem:[#allocation2] sm:$0xff] }
 0x501   : > { %v6985_v63 = vpop.eup %6984  ;;  %v3888_v7 = vmul.f32 %v6983_v17, %v9476_v57  ;;  %6998 = vrcp.f32 %v3795_v36  ;;  %v4034_v28 = vld [vmem:[#allocation2 + $0x1] sm:$0xff] }
 0x502   : > { %v6987_v1 = vpop.eup %6986  ;;  %v3887_v56 = vmul.f32 %v6985_v63, %v9480_v6  ;;  %7000 = vrcp.f32 %v3798_v22  ;;  %v3935_v22 = vld [vmem:[#allocation2 + $0x8] sm:$0xff] }
 0x503   : > { %v6989_v53 = vpop.eup %6988  ;;  %3925 = vst.msk [vmem:[#allocation2 + $0x129] sm:$0xff] %vm738_vm1, %v3888_v7  ;;  %v3797_v9 = vadd.f32 1.0, %v6987_v1  ;;  %v12079_v1 = vld [vmem:[#allocation5_spill] sm:$0xff] }
 0x504   : > { %v6991_v30 = vpop.eup %6990  ;;  %3924 = vst.msk [vmem:[#allocation2 + $0x121] sm:$0xff] %vm738_vm1, %v3887_v56  ;;  %v3800_v50 = vadd.f32 1.0, %v6989_v53 }
 0x505   : > { %v6993_v4 = vpop.eup %6992  ;;  %v3890_v37 = vmul.f32 %v6991_v30, %v9490_v5  ;;  %7002 = vrcp.f32 %v3797_v9  ;;  %v3897_v5 = vld [vmem:[%s11678_s15] sm:$0x7] }
 0x506   : > { %v6995_v8 = vpop.eup %6994  ;;  %v3889_v57 = vmul.f32 %v6993_v4, %v9494_v20  ;;  %7004 = vrcp.f32 %v3800_v50  ;;  %v9568_v13 = vrot.slane %v3897_v5, %v12038_v34  ;;  %v9580_v56 = vrot.slane %v3897_v5, %v12079_v1  ;;  %v4134_v30 = vld [vmem:[#allocation2 + $0x2] sm:$0xff] }
 0x507   : > { %v6997_v27 = vpop.eup %6996  ;;  %3927 = vst.msk [vmem:[#allocation2 + $0x141] sm:$0xff] %vm738_vm1, %v3890_v37  ;;  %v3799_v6 = vadd.f32 1.0, %v6995_v8  ;;  %v3899_v8 = vld [vmem:[%s11678_s15 + $0x8] sm:$0x7] }
 0x508   : > { %3926 = vst.msk [vmem:[#allocation2 + $0x139] sm:$0xff] %vm738_vm1, %v3889_v57  ;;  %v3892_v33 = vmul.f32 %v6997_v27, %v9504_v43  ;;  %v9571_v43 = vrot.slane %v3897_v5, %v12078_v32  ;;  %v3970_v63 = vmul.f32 %v9568_v13, %v3934_v60  ;;  %v3971_v9 = vmul.f32 %v9568_v13, %v3935_v22  ;;  %v9597_v5 = vld [vmem:[#allocation2 + $0x20] sm:$0xff]  ;;  %v9607_v60 = vld [vmem:[#allocation2 + $0x48] sm:$0xff] }
 0x509   : > { %7006 = vrcp.f32 %v3799_v6  ;;  %v4170_v37 = vmul.f32 %v9580_v56, %v4134_v30  ;;  %v3898_v6 = vld [vmem:[%s11678_s15 + $0x4] sm:$0x7]  ;;  %12081 = vst [vmem:[#allocation18_spill] sm:$0xff] %v9597_v5  ;;  %12086 = vst [vmem:[#allocation35_spill] sm:$0xff] %v9607_v60  ;;  %v9654_v31 = vrot.slane %v3899_v8, %v12078_v32  ;;  %v3973_v15 = vmul.f32 %v9568_v13, %v9597_v5 }
 0x50a   : > { %3929 = vst.msk [vmem:[#allocation2 + $0x159] sm:$0xff] %vm738_vm1, %v3892_v33  ;;  %v4070_v7 = vmul.f32 %v9571_v43, %v4034_v28  ;;  %v4564_v33 = vld [vmem:[#allocation2 + $0x198] sm:$0xff]  ;;  %v9616_v22 = vld [vmem:[#allocation2 + $0x60] sm:$0xff]  ;;  %v3983_v47 = vmul.f32 %v9568_v13, %v9656_v42  ;;  %v3984_v41 = vmul.f32 %v9568_v13, %v9658_v52  ;;  %v9708_v12 = vmul.f32 %v9568_v13, %v9660_v2 }
 0x50b   : > { %v6999_v29 = vpop.eup %6998  ;;  %12090 = vst [vmem:[#allocation22_spill] sm:$0xff] %v9616_v22  ;;  %v9635_v30 = vld [vmem:[#allocation2 + $0x80] sm:$0xff]  ;;  %12105 = vst [vmem:[#allocation62_spill] sm:$0xff] %v9654_v31  ;;  %v3978_v21 = vmul.f32 %v9568_v13, %v9616_v22  ;;  %v4078_v31 = vmul.f32 %v9571_v43, %v9676_v38  ;;  %v3986_v38 = vmul.f32 %v9568_v13, %v9698_v49 }
 0x50c   : > { %v7001_v14 = vpop.eup %7000  ;;  %v3891_v20 = vmul.f32 %v6999_v29, %v9508_v10  ;;  %v4035_v10 = vld [vmem:[#allocation2 + $0x9] sm:$0xff]  ;;  %v4102_v4 = vadd.f32 %v4070_v7, %v3970_v63  ;;  %v4565_v29 = vld [vmem:[#allocation2 + $0x1a0] sm:$0xff]  ;;  %v9625_v7 = vrot.slane %v3898_v6, %v12038_v34  ;;  %12098 = vst [vmem:[#allocation55_spill] sm:$0xff] %v9635_v30  ;;  %v3981_v44 = vmul.f32 %v9568_v13, %v9635_v30 }
 0x50d   : > { %v3894_v26 = vmul.f32 %v7001_v14, %v9518_v3  ;;  %v9599_v14 = vld [vmem:[#allocation2 + $0x19] sm:$0xff] }
 0x50e   : > { %3928 = vst.msk [vmem:[#allocation2 + $0x151] sm:$0xff] %vm738_vm1, %v3891_v20  ;;  %12082 = vst [vmem:[#allocation31_spill] sm:$0xff] %v9599_v14  ;;  %v9601_v20 = vld [vmem:[#allocation2 + $0x21] sm:$0xff]  ;;  %v9609_v28 = vadd.f32 %v4170_v37, %v4102_v4  ;;  %v9641_v4 = vld [vmem:[#allocation2 + $0x39] sm:$0xff] }
 0x50f   : > { %v7003_v54 = vpop.eup %7002  ;;  %3931 = vst.msk [vmem:[#allocation2 + $0x171] sm:$0xff] %vm738_vm1, %v3894_v26  ;;  %12083 = vst [vmem:[#allocation15_spill] sm:$0xff] %v9601_v20  ;;  %v9603_v26 = vld [vmem:[#allocation2 + $0x30] sm:$0xff]  ;;  %v4073_v39 = vmul.f32 %v9571_v43, %v9601_v20  ;;  %v4075_v18 = vmul.f32 %v9571_v43, %v9641_v4  ;;  %v9746_v20 = vld [vmem:[#allocation2 + $0xd9] sm:$0xff] }
 0x510   : > { %v7005_v36 = vpop.eup %7004  ;;  %v3893_v17 = vmul.f32 %v7003_v54, %v9521_v25  ;;  %v4071_v25 = vmul.f32 %v9571_v43, %v4035_v10  ;;  %12084 = vst [vmem:[#allocation34_spill] sm:$0xff] %v9603_v26  ;;  %v9605_v54 = vld [vmem:[#allocation2 + $0x38] sm:$0xff]  ;;  %12087 = vst [vmem:[#allocation12_spill] sm:$0xff] %v9609_v28  ;;  %v9618_v10 = vld [vmem:[#allocation2 + $0x68] sm:$0xff]  ;;  %v3974_v46 = vmul.f32 %v9568_v13, %v9603_v26 }
 0x511   : > { %v3896_v3 = vmul.f32 %v7005_v36, %v9531_v23  ;;  %v4135_v23 = vld [vmem:[#allocation2 + $0xa] sm:$0xff]  ;;  %12085 = vst [vmem:[#allocation10_spill] sm:$0xff] %v9605_v54  ;;  %v9612_v36 = vrot.slane %v3899_v8, %v12038_v34  ;;  %12091 = vst [vmem:[#allocation3_spill] sm:$0xff] %v9618_v10  ;;  %v3979_v35 = vmul.f32 %v9568_v13, %v9618_v10  ;;  %v9810_v42 = vld [vmem:[#allocation2 + $0x120] sm:$0xff] }
 0x512   : > { %3930 = vst.msk [vmem:[#allocation2 + $0x169] sm:$0xff] %vm738_vm1, %v3893_v17  ;;  %v4103_v57 = vadd.f32 %v4071_v25, %v3971_v9  ;;  %v4171_v27 = vmul.f32 %v9580_v56, %v4135_v23  ;;  %v9614_v17 = vld [vmem:[#allocation2 + $0x50] sm:$0xff]  ;;  %12094 = vst [vmem:[#allocation51_spill] sm:$0xff] %v9625_v7  ;;  %v9631_v9 = vrot.slane %v3898_v6, %v12079_v1  ;;  %v9633_v25 = vld [vmem:[#allocation2 + $0x78] sm:$0xff] }
 0x513   : > { %v7007_v53 = vpop.eup %7006  ;;  %3933 = vst.msk [vmem:[#allocation2 + $0x189] sm:$0xff] %vm738_vm1, %v3896_v3  ;;  %12088 = vst [vmem:[#allocation13_spill] sm:$0xff] %v9612_v36  ;;  %v9620_v3 = vld [vmem:[#allocation2 + $0x31] sm:$0xff]  ;;  %v9643_v37 = vld [vmem:[#allocation2 + $0x49] sm:$0xff]  ;;  %v3977_v8 = vmul.f32 %v9568_v13, %v9614_v17  ;;  %v3980_v48 = vmul.f32 %v9568_v13, %v9633_v25  ;;  %v9770_v49 = vadd.f32 %v4073_v39, %v3973_v15 }
 0x514   : > { %v3895_v50 = vmul.f32 %v7007_v53, %v9535_v16  ;;  %v9595_v16 = vld [vmem:[#allocation2 + $0x18] sm:$0xff]  ;;  %12089 = vst [vmem:[#allocation29_spill] sm:$0xff] %v9614_v17  ;;  %12092 = vst [vmem:[#allocation49_spill] sm:$0xff] %v9620_v3  ;;  %v9622_v63 = vadd.f32 %v4171_v27, %v4103_v57  ;;  %v9628_v53 = vrot.slane %v3898_v6, %v12078_v32  ;;  %v9762_v28 = vld [vmem:[#allocation2 + $0xf0] sm:$0xff] }
 0x515   : > { %12080 = vst [vmem:[#allocation27_spill] sm:$0xff] %v9595_v16  ;;  %12096 = vst [vmem:[#allocation53_spill] sm:$0xff] %v9631_v9  ;;  %v3972_v23 = vmul.f32 %v9568_v13, %v9595_v16  ;;  %v9645_v57 = vld [vmem:[#allocation2 + $0x51] sm:$0xff]  ;;  %v9648_v27 = vmul.f32 %v9612_v36, %v4564_v33  ;;  %v9651_v6 = vmul.f32 %v9612_v36, %v4565_v29  ;;  %v9925_v10 = vld [vmem:[#allocation2 + $0xda] sm:$0xff] }
 0x516   : > { %3932 = vst.msk [vmem:[#allocation2 + $0x181] sm:$0xff] %vm738_vm1, %v3895_v50  ;;  %12093 = vst [vmem:[#allocation50_spill] sm:$0xff] %v9622_v63  ;;  %v9637_v50 = vld [vmem:[#allocation2 + $0x90] sm:$0xff]  ;;  %v3975_v33 = vmul.f32 %v9568_v13, %v9605_v54  ;;  %v4072_v29 = vmul.f32 %v9571_v43, %v9599_v14  ;;  %v3976_v32 = vmul.f32 %v9568_v13, %v9607_v60  ;;  %v9951_v54 = vld [vmem:[#allocation2 + $0x158] sm:$0xff] }
 0x517   : > { %12095 = vst [vmem:[#allocation52_spill] sm:$0xff] %v9628_v53  ;;  %12097 = vst [vmem:[#allocation54_spill] sm:$0xff] %v9633_v25  ;;  %v3982_v0 = vmul.f32 %v9568_v13, %v9637_v50  ;;  %v4074_v51 = vmul.f32 %v9571_v43, %v9620_v3  ;;  %v4076_v34 = vmul.f32 %v9571_v43, %v9643_v37  ;;  %v9788_v39 = vld [vmem:[#allocation2 + $0x110] sm:$0xff]  ;;  %v9923_v25 = vld [vmem:[#allocation2 + $0xc2] sm:$0xff] }
 0x518   : > { %12099 = vst [vmem:[#allocation56_spill] sm:$0xff] %v9637_v50  ;;  %12100 = vst [vmem:[#allocation57_spill] sm:$0xff] %v9641_v4  ;;  %v4077_v1 = vmul.f32 %v9571_v43, %v9645_v57  ;;  %v4079_v36 = vmul.f32 %v9571_v43, %v9678_v62  ;;  %v4080_v9 = vmul.f32 %v9571_v43, %v9692_v61  ;;  %v9881_v50 = vld [vmem:[#allocation2 + $0x7a] sm:$0xff]  ;;  %v9933_v17 = vld [vmem:[#allocation2 + $0xf2] sm:$0xff] }
 0x519   : > { %12101 = vst [vmem:[#allocation58_spill] sm:$0xff] %v9643_v37  ;;  %12102 = vst [vmem:[#allocation59_spill] sm:$0xff] %v9645_v57  ;;  %v4081_v4 = vmul.f32 %v9571_v43, %v9680_v55  ;;  %v4082_v37 = vmul.f32 %v9571_v43, %v9694_v58  ;;  %v9740_v57 = vld [vmem:[#allocation2 + $0xe0] sm:$0xff]  ;;  %v3987_v3 = vmul.f32 %v9568_v13, %v9700_v19  ;;  %v9764_v19 = vld [vmem:[#allocation2 + $0xf8] sm:$0xff] }
 0x51a   : > { %12103 = vst [vmem:[#allocation60_spill] sm:$0xff] %v9648_v27  ;;  %12104 = vst [vmem:[#allocation61_spill] sm:$0xff] %v9651_v6  ;;  %v9728_v6 = vld [vmem:[#allocation2 + $0xd8] sm:$0xff]  ;;  %v9730_v27 = vld [vmem:[#allocation2 + $0xe1] sm:$0xff]  ;;  %v4083_v62 = vmul.f32 %v9571_v43, %v9696_v59  ;;  %v4084_v61 = vmul.f32 %v9571_v43, %v9710_v45  ;;  %v4085_v58 = vmul.f32 %v9571_v43, %v9714_v40 }
 0x51b   : > { %12121 = vst [vmem:[#allocation78_spill] sm:$0xff] %v9728_v6  ;;  %12122 = vst [vmem:[#allocation79_spill] sm:$0xff] %v9730_v27  ;;  %v9752_v55 = vld [vmem:[#allocation2 + $0xf9] sm:$0xff]  ;;  %v4086_v53 = vmul.f32 %v9571_v43, %v9716_v11  ;;  %v4087_v14 = vmul.f32 %v9571_v43, %v9718_v24  ;;  %v9760_v63 = vadd.f32 %v4072_v29, %v3972_v23  ;;  %v9774_v11 = vld [vmem:[#allocation2 + $0x108] sm:$0xff] }
 0x51c   : > { %12123 = vst [vmem:[#allocation80_spill] sm:$0xff] %v9740_v57  ;;  %12124 = vst [vmem:[#allocation81_spill] sm:$0xff] %v9746_v20  ;;  %v3988_v45 = vmul.f32 %v9568_v13, %v9728_v6  ;;  %v4089_v59 = vmul.f32 %v9571_v43, %v9730_v27  ;;  %v9772_v40 = vadd.f32 %v4074_v51, %v3974_v46  ;;  %v9778_v29 = vld [vmem:[#allocation2 + $0xf1] sm:$0xff]  ;;  %v9780_v24 = vld [vmem:[#allocation2 + $0x109] sm:$0xff] }
 0x51d   : > { %12125 = vst [vmem:[#allocation82_spill] sm:$0xff] %v9752_v55  ;;  %12126 = vst [vmem:[#allocation83_spill] sm:$0xff] %v9762_v28  ;;  %v3989_v23 = vmul.f32 %v9568_v13, %v9740_v57  ;;  %v4088_v2 = vmul.f32 %v9571_v43, %v9746_v20  ;;  %v9784_v6 = vadd.f32 %v4075_v18, %v3975_v33  ;;  %v9790_v51 = vld [vmem:[#allocation2 + $0x111] sm:$0xff]  ;;  %v9802_v18 = vld [vmem:[#allocation2 + $0x129] sm:$0xff] }
 0x51e   : > { %12127 = vst [vmem:[#allocation84_spill] sm:$0xff] %v9764_v19  ;;  %12128 = vst [vmem:[#allocation85_spill] sm:$0xff] %v9774_v11  ;;  %v9786_v52 = vadd.f32 %v4076_v34, %v3976_v32  ;;  %v4091_v46 = vmul.f32 %v9571_v43, %v9752_v55  ;;  %v9794_v15 = vadd.f32 %v4077_v1, %v3977_v8  ;;  %v9812_v55 = vld [vmem:[#allocation2 + $0x128] sm:$0xff]  ;;  %v9836_v8 = vld [vmem:[#allocation2 + $0x32] sm:$0xff] }
 0x51f   : > { %12129 = vst [vmem:[#allocation86_spill] sm:$0xff] %v9778_v29  ;;  %12130 = vst [vmem:[#allocation87_spill] sm:$0xff] %v9780_v24  ;;  %v9796_v27 = vadd.f32 %v4078_v31, %v3978_v21  ;;  %v9798_v57 = vadd.f32 %v4079_v36, %v3979_v35  ;;  %v3990_v20 = vmul.f32 %v9568_v13, %v9762_v28  ;;  %v9818_v31 = vld [vmem:[#allocation2 + $0x121] sm:$0xff]  ;;  %v9949_v60 = vld [vmem:[#allocation2 + $0x150] sm:$0xff] }
 0x520   : > { %12131 = vst [vmem:[#allocation88_spill] sm:$0xff] %v9788_v39  ;;  %12132 = vst [vmem:[#allocation89_spill] sm:$0xff] %v9790_v51  ;;  %v9804_v34 = vadd.f32 %v4080_v9, %v3980_v48  ;;  %v9806_v33 = vadd.f32 %v4081_v4, %v3981_v44  ;;  %v9808_v32 = vadd.f32 %v4082_v37, %v3982_v0  ;;  %v9832_v4 = vld [vmem:[#allocation2 + $0x1a] sm:$0xff]  ;;  %v9834_v37 = vld [vmem:[#allocation2 + $0x22] sm:$0xff] }
 0x521   : > { %12133 = vst [vmem:[#allocation90_spill] sm:$0xff] %v9802_v18  ;;  %12134 = vst [vmem:[#allocation91_spill] sm:$0xff] %v9810_v42  ;;  %v3991_v21 = vmul.f32 %v9568_v13, %v9764_v19  ;;  %v3992_v35 = vmul.f32 %v9568_v13, %v9774_v11  ;;  %v4090_v48 = vmul.f32 %v9571_v43, %v9778_v29  ;;  %v9838_v29 = vld [vmem:[#allocation2 + $0x138] sm:$0xff]  ;;  %v9967_v16 = vld [vmem:[#allocation2 + $0x12a] sm:$0xff] }
 0x522   : > { %12135 = vst [vmem:[#allocation92_spill] sm:$0xff] %v9812_v55  ;;  %12136 = vst [vmem:[#allocation93_spill] sm:$0xff] %v9818_v31  ;;  %v4092_v44 = vmul.f32 %v9571_v43, %v9780_v24  ;;  %v3993_v0 = vmul.f32 %v9568_v13, %v9788_v39  ;;  %v4093_v1 = vmul.f32 %v9571_v43, %v9790_v51  ;;  %v9840_v11 = vld [vmem:[#allocation2 + $0x139] sm:$0xff]  ;;  %v9953_v26 = vld [vmem:[#allocation2 + $0x151] sm:$0xff] }
 0x523   : > { %v9828_v36 = vadd.f32 %v4083_v62, %v3983_v47  ;;  %v9830_v9 = vadd.f32 %v4084_v61, %v3984_v41  ;;  %12137 = vst [vmem:[#allocation94_spill] sm:$0xff] %v9832_v4  ;;  %12138 = vst [vmem:[#allocation95_spill] sm:$0xff] %v9834_v37  ;;  %v9843_v24 = vadd.f32 %v4085_v58, %v9708_v12  ;;  %v9851_v41 = vld [vmem:[#allocation2 + $0x3a] sm:$0xff]  ;;  %v9853_v61 = vld [vmem:[#allocation2 + $0x4a] sm:$0xff] }
 0x524   : > { %12139 = vst [vmem:[#allocation96_spill] sm:$0xff] %v9836_v8  ;;  %12140 = vst [vmem:[#allocation97_spill] sm:$0xff] %v9838_v29  ;;  %v9845_v39 = vadd.f32 %v4086_v53, %v3986_v38  ;;  %v9847_v51 = vadd.f32 %v4087_v14, %v3987_v3  ;;  %v9849_v47 = vadd.f32 %v4088_v2, %v3988_v45  ;;  %v9855_v62 = vld [vmem:[#allocation2 + $0x140] sm:$0xff]  ;;  %v9867_v38 = vld [vmem:[#allocation2 + $0x52] sm:$0xff] }
 0x525   : > { %12141 = vst [vmem:[#allocation98_spill] sm:$0xff] %v9840_v11  ;;  %12144 = vst [vmem:[#allocation101_spill] sm:$0xff] %v9851_v41  ;;  %v3994_v19 = vmul.f32 %v9568_v13, %v9810_v42  ;;  %v3995_v28 = vmul.f32 %v9568_v13, %v9812_v55  ;;  %v9861_v12 = vld [vmem:[#allocation2 + $0x141] sm:$0xff]  ;;  %v4094_v58 = vmul.f32 %v9571_v43, %v9818_v31  ;;  %v9869_v2 = vld [vmem:[#allocation2 + $0x6a] sm:$0xff] }
 0x526   : > { %12142 = vst [vmem:[#allocation99_spill] sm:$0xff] %v9847_v51  ;;  %12143 = vst [vmem:[#allocation100_spill] sm:$0xff] %v9849_v47  ;;  %v4095_v45 = vmul.f32 %v9571_v43, %v9802_v18  ;;  %v9871_v14 = vadd.f32 %v4089_v59, %v3989_v23  ;;  %v9873_v3 = vadd.f32 %v4090_v48, %v3990_v20  ;;  %v9879_v55 = vld [vmem:[#allocation2 + $0x62] sm:$0xff]  ;;  %v9891_v20 = vld [vmem:[#allocation2 + $0x92] sm:$0xff] }
 0x527   : > { %12145 = vst [vmem:[#allocation102_spill] sm:$0xff] %v9853_v61  ;;  %12146 = vst [vmem:[#allocation103_spill] sm:$0xff] %v9855_v62  ;;  %v9875_v53 = vadd.f32 %v4091_v46, %v3991_v21  ;;  %v9877_v42 = vadd.f32 %v4092_v44, %v3992_v35  ;;  %v9883_v31 = vld [vmem:[#allocation2 + $0x82] sm:$0xff]  ;;  %v3996_v18 = vmul.f32 %v9568_v13, %v9838_v29  ;;  %v9893_v23 = vld [vmem:[#allocation2 + $0x9a] sm:$0xff] }
 0x528   : > { %12147 = vst [vmem:[#allocation104_spill] sm:$0xff] %v9861_v12  ;;  %12148 = vst [vmem:[#allocation105_spill] sm:$0xff] %v9867_v38  ;;  %v4096_v30 = vmul.f32 %v9571_v43, %v9840_v11  ;;  %v9889_v59 = vadd.f32 %v4093_v1, %v3993_v0  ;;  %v9895_v46 = vld [vmem:[#allocation2 + $0xb2] sm:$0xff]  ;;  %v9899_v21 = vmul.f32 %v9580_v56, %v9832_v4  ;;  %v9907_v0 = vld [vmem:[#allocation2 + $0xaa] sm:$0xff] }
 0x529   : > { %12149 = vst [vmem:[#allocation106_spill] sm:$0xff] %v9869_v2  ;;  %12150 = vst [vmem:[#allocation107_spill] sm:$0xff] %v9871_v14  ;;  %v3997_v35 = vmul.f32 %v9568_v13, %v9855_v62  ;;  %v9903_v48 = vld [vmem:[#allocation2 + $0x159] sm:$0xff]  ;;  %v4097_v44 = vmul.f32 %v9571_v43, %v9861_v12  ;;  %v9909_v1 = vld [vmem:[#allocation2 + $0xca] sm:$0xff]  ;;  %v9913_v11 = vmul.f32 %v9580_v56, %v9834_v37 }
 0x52a   : > { %12151 = vst [vmem:[#allocation108_spill] sm:$0xff] %v9873_v3  ;;  %12152 = vst [vmem:[#allocation109_spill] sm:$0xff] %v9875_v53  ;;  %v9917_v4 = vmul.f32 %v9580_v56, %v9836_v8  ;;  %v9919_v29 = vadd.f32 %v4094_v58, %v3994_v19  ;;  %v9921_v62 = vadd.f32 %v4095_v45, %v3995_v28  ;;  %v9927_v12 = vld [vmem:[#allocation2 + $0xe2] sm:$0xff]  ;;  %v9935_v8 = vld [vmem:[#allocation2 + $0xfa] sm:$0xff] }
 0x52b   : > { %12153 = vst [vmem:[#allocation110_spill] sm:$0xff] %v9877_v42  ;;  %12154 = vst [vmem:[#allocation111_spill] sm:$0xff] %v9879_v55  ;;  %v4175_v22 = vmul.f32 %v9580_v56, %v9851_v41  ;;  %v4176_v37 = vmul.f32 %v9580_v56, %v9853_v61  ;;  %v9937_v19 = vld [vmem:[#allocation2 + $0x10a] sm:$0xff]  ;;  %v9939_v28 = vld [vmem:[#allocation2 + $0x112] sm:$0xff]  ;;  %v4177_v58 = vmul.f32 %v9580_v56, %v9867_v38 }
 0x52c   : > { %12155 = vst [vmem:[#allocation112_spill] sm:$0xff] %v9881_v50  ;;  %12156 = vst [vmem:[#allocation113_spill] sm:$0xff] %v9883_v31  ;;  %v4178_v45 = vmul.f32 %v9580_v56, %v9879_v55  ;;  %v4179_v41 = vmul.f32 %v9580_v56, %v9869_v2  ;;  %v4180_v61 = vmul.f32 %v9580_v56, %v9881_v50  ;;  %v9965_v50 = vld [vmem:[#allocation2 + $0x122] sm:$0xff]  ;;  %v10005_v42 = vld [vmem:[#allocation2 + $0x15a] sm:$0xff] }
 0x52d   : > { %12157 = vst [vmem:[#allocation114_spill] sm:$0xff] %v9889_v59  ;;  %12158 = vst [vmem:[#allocation115_spill] sm:$0xff] %v9891_v20  ;;  %v4099_v5 = vmul.f32 %v9571_v43, %v9903_v48  ;;  %v9957_v7 = vadd.f32 %v4096_v30, %v3996_v18  ;;  %v4181_v55 = vmul.f32 %v9580_v56, %v9883_v31  ;;  %v9977_v31 = vld [vmem:[#allocation2 + $0x171] sm:$0xff] }
 0x52e   : > { %12159 = vst [vmem:[#allocation116_spill] sm:$0xff] %v9893_v23  ;;  %12160 = vst [vmem:[#allocation117_spill] sm:$0xff] %v9895_v46  ;;  %v4182_v2 = vmul.f32 %v9580_v56, %v9891_v20  ;;  %v9963_v38 = vadd.f32 %v4097_v44, %v3997_v35  ;;  %v4184_v30 = vmul.f32 %v9580_v56, %v9907_v0  ;;  %v9979_v20 = vld [vmem:[#allocation2 + $0x13a] sm:$0xff]  ;;  %v9981_v35 = vld [vmem:[#allocation2 + $0x152] sm:$0xff] }
 0x52f   : > { %12161 = vst [vmem:[#allocation118_spill] sm:$0xff] %v9903_v48  ;;  %12162 = vst [vmem:[#allocation119_spill] sm:$0xff] %v9907_v0  ;;  %v4185_v18 = vmul.f32 %v9580_v56, %v9895_v46  ;;  %v4186_v44 = vmul.f32 %v9580_v56, %v9923_v25  ;;  %v4187_v48 = vmul.f32 %v9580_v56, %v9909_v1  ;;  %v9993_v46 = vld [vmem:[#allocation2 + $0x170] sm:$0xff] }
 0x530   : > { %12163 = vst [vmem:[#allocation120_spill] sm:$0xff] %v9909_v1  ;;  %12164 = vst [vmem:[#allocation121_spill] sm:$0xff] %v9919_v29  ;;  %v4183_v29 = vmul.f32 %v9580_v56, %v9893_v23  ;;  %v4188_v23 = vmul.f32 %v9580_v56, %v9925_v10  ;;  %v4189_v0 = vmul.f32 %v9580_v56, %v9927_v12  ;;  %v10031_v47 = vld [vmem:[#allocation2 + $0x16a] sm:$0xff] }
 0x531   : > { %12165 = vst [vmem:[#allocation122_spill] sm:$0xff] %v9921_v62  ;;  %12166 = vst [vmem:[#allocation123_spill] sm:$0xff] %v9923_v25  ;;  %v9969_v62 = vld [vmem:[#allocation2 + $0x142] sm:$0xff]  ;;  %v3999_v59 = vmul.f32 %v9568_v13, %v9951_v54  ;;  %v4098_v1 = vmul.f32 %v9571_v43, %v9953_v26  ;;  %v4191_v53 = vmul.f32 %v9580_v56, %v9935_v8 }
 0x532   : > { %12167 = vst [vmem:[#allocation124_spill] sm:$0xff] %v9925_v10  ;;  %12168 = vst [vmem:[#allocation125_spill] sm:$0xff] %v9927_v12  ;;  %v9999_v25 = vld [vmem:[#allocation2 + $0x169] sm:$0xff]  ;;  %v4190_v10 = vmul.f32 %v9580_v56, %v9933_v17  ;;  %v10007_v12 = vld [vmem:[#allocation2 + $0x172] sm:$0xff]  ;;  %v4194_v3 = vmul.f32 %v9580_v56, %v9965_v50  ;;  %v4196_v14 = vmul.f32 %v9580_v56, %v9979_v20 }
 0x533   : > { %12169 = vst [vmem:[#allocation126_spill] sm:$0xff] %v9933_v17  ;;  %12170 = vst [vmem:[#allocation127_spill] sm:$0xff] %v9935_v8  ;;  %v4195_v17 = vmul.f32 %v9580_v56, %v9967_v16  ;;  %v4197_v8 = vmul.f32 %v9580_v56, %v9969_v62  ;;  %v4131_v51 = vadd.f32 %v4099_v5, %v3999_v59 }
 0x534   : > { %12171 = vst [vmem:[#allocation128_spill] sm:$0xff] %v9937_v19  ;;  %12172 = vst [vmem:[#allocation129_spill] sm:$0xff] %v9939_v28  ;;  %v10052_v5 = vadd.f32 %v4175_v22, %v9784_v6  ;;  %v10057_v59 = vadd.f32 %v4176_v37, %v9786_v52  ;;  %v10069_v22 = vadd.f32 %v4180_v61, %v9804_v34 }
 0x535   : > { %12173 = vst [vmem:[#allocation130_spill] sm:$0xff] %v9949_v60  ;;  %12174 = vst [vmem:[#allocation131_spill] sm:$0xff] %v9951_v54  ;;  %v4193_v54 = vmul.f32 %v9580_v56, %v9939_v28  ;;  %v4001_v28 = vmul.f32 %v9568_v13, %v9993_v46  ;;  %v10072_v6 = vadd.f32 %v4181_v55, %v9806_v33  ;;  %v12190_v55 = vld [vmem:[#allocation100_spill] sm:$0xff]  ;;  %v12191_v33 = vld [vmem:[#allocation107_spill] sm:$0xff] }
 0x536   : > { %12175 = vst [vmem:[#allocation132_spill] sm:$0xff] %v9953_v26  ;;  %12176 = vst [vmem:[#allocation133_spill] sm:$0xff] %v9957_v7  ;;  %v3998_v7 = vmul.f32 %v9568_v13, %v9949_v60  ;;  %v4192_v60 = vmul.f32 %v9580_v56, %v9937_v19  ;;  %v4101_v26 = vmul.f32 %v9571_v43, %v9977_v31 }
 0x537   : > { %12177 = vst [vmem:[#allocation134_spill] sm:$0xff] %v9963_v38  ;;  %12178 = vst [vmem:[#allocation135_spill] sm:$0xff] %v9965_v50  ;;  %v9991_v38 = vld [vmem:[#allocation2 + $0x168] sm:$0xff]  ;;  %v4100_v50 = vmul.f32 %v9571_v43, %v9999_v25  ;;  %v10049_v43 = vadd.f32 %v9917_v4, %v9772_v40  ;;  %v10066_v40 = vadd.f32 %v4179_v41, %v9798_v57  ;;  %v12189_v57 = vld [vmem:[#allocation99_spill] sm:$0xff] }
 0x538   : > { %12179 = vst [vmem:[#allocation136_spill] sm:$0xff] %v9967_v16  ;;  %12180 = vst [vmem:[#allocation137_spill] sm:$0xff] %v9969_v62  ;;  %v4000_v19 = vmul.f32 %v9568_v13, %v9991_v38  ;;  %v4198_v16 = vmul.f32 %v9580_v56, %v9981_v35  ;;  %v4201_v62 = vmul.f32 %v9580_v56, %v10007_v12  ;;  %v12196_v61 = vld [vmem:[#allocation121_spill] sm:$0xff] }
 0x539   : > { %12181 = vst [vmem:[#allocation138_spill] sm:$0xff] %v9977_v31  ;;  %12182 = vst [vmem:[#allocation139_spill] sm:$0xff] %v9979_v20  ;;  %v4130_v31 = vadd.f32 %v4098_v1, %v3998_v7  ;;  %v4199_v20 = vmul.f32 %v9580_v56, %v10005_v42  ;;  %v10045_v13 = vadd.f32 %v9913_v11, %v9770_v49 }
 0x53a   : > { %12183 = vst [vmem:[#allocation140_spill] sm:$0xff] %v9981_v35  ;;  %12184 = vst [vmem:[#allocation141_spill] sm:$0xff] %v9991_v38  ;;  %v10041_v38 = vadd.f32 %v9899_v21, %v9760_v63  ;;  %v4200_v7 = vmul.f32 %v9580_v56, %v10031_v47  ;;  %v10060_v63 = vadd.f32 %v4177_v58, %v9794_v15  ;;  %v12208_v58 = vld [vmem:[#allocation27_spill] sm:$0xff] }
 0x53b   : > { %12185 = vst [vmem:[#allocation142_spill] sm:$0xff] %v9999_v25  ;;  %12186 = vst [vmem:[#allocation143_spill] sm:$0xff] %v10005_v42  ;;  %v10063_v21 = vadd.f32 %v4178_v45, %v9796_v27  ;;  %v4132_v11 = vadd.f32 %v4100_v50, %v4000_v19  ;;  %v4133_v49 = vadd.f32 %v4101_v26, %v4001_v28  ;;  %v12232_v42 = vld [vmem:[#allocation88_spill] sm:$0xff]  ;;  %v12233_v35 = vld [vmem:[#allocation91_spill] sm:$0xff] }
 0x53c   : > { %12187 = vst [vmem:[#allocation144_spill] sm:$0xff] %v10007_v12  ;;  %12188 = vst [vmem:[#allocation145_spill] sm:$0xff] %v10031_v47  ;;  %v10075_v52 = vadd.f32 %v4182_v2, %v9808_v32  ;;  %v10078_v56 = vadd.f32 %v4183_v29, %v9828_v36  ;;  %v10081_v27 = vadd.f32 %v4184_v30, %v9830_v9  ;;  %v12192_v29 = vld [vmem:[#allocation108_spill] sm:$0xff]  ;;  %v12193_v9 = vld [vmem:[#allocation109_spill] sm:$0xff] }
 0x53d   : > { %v10084_v26 = vadd.f32 %v4185_v18, %v9843_v24  ;;  %v10087_v50 = vadd.f32 %v4186_v44, %v9845_v39  ;;  %v10090_v15 = vadd.f32 %v4187_v48, %v12189_v57  ;;  %v10093_v34 = vadd.f32 %v4188_v23, %v12190_v55  ;;  %v12194_v24 = vld [vmem:[#allocation110_spill] sm:$0xff]  ;;  %v12234_v25 = vld [vmem:[#allocation92_spill] sm:$0xff] }
 0x53e   : > { %v10096_v32 = vadd.f32 %v4189_v0, %v12191_v33  ;;  %v10099_v36 = vadd.f32 %v4190_v10, %v12192_v29  ;;  %v10102_v4 = vadd.f32 %v4191_v53, %v12193_v9  ;;  %v10105_v37 = vadd.f32 %v4192_v60, %v12194_v24  ;;  %v12195_v39 = vld [vmem:[#allocation114_spill] sm:$0xff]  ;;  %v12200_v0 = vld [vmem:[#allocation133_spill] sm:$0xff]  ;;  %v12218_v33 = vld [vmem:[#allocation55_spill] sm:$0xff] }
 0x53f   : > { %v10108_v41 = vadd.f32 %v4193_v54, %v12195_v39  ;;  %v10111_v2 = vadd.f32 %v4194_v3, %v12196_v61  ;;  %v12198_v23 = vld [vmem:[#allocation122_spill] sm:$0xff]  ;;  %v10117_v1 = vadd.f32 %v4196_v14, %v12200_v0  ;;  %v10122_v53 = vadd.f32 %v4198_v16, %v4130_v31  ;;  %v12209_v3 = vld [vmem:[#allocation51_spill] sm:$0xff]  ;;  %v12214_v31 = vld [vmem:[#allocation29_spill] sm:$0xff] }
 0x540   : > { %v10114_v48 = vadd.f32 %v4195_v17, %v12198_v23  ;;  %v12202_v10 = vld [vmem:[#allocation134_spill] sm:$0xff]  ;;  %v10124_v28 = vadd.f32 %v4199_v20, %v4131_v51  ;;  %v10126_v60 = vadd.f32 %v4200_v7, %v4132_v11  ;;  %v10128_v54 = vadd.f32 %v4201_v62, %v4133_v49  ;;  %v12213_v16 = vld [vmem:[#allocation35_spill] sm:$0xff]  ;;  %v12219_v9 = vld [vmem:[#allocation56_spill] sm:$0xff] }
 0x541   : > { %12197 = vst [vmem:[#allocation99_spill] sm:$0xff] %v10111_v2  ;;  %12201 = vst [vmem:[#allocation107_spill] sm:$0xff] %v10117_v1  ;;  %v10120_v19 = vadd.f32 %v4197_v8, %v12202_v10  ;;  %v4270_v45 = vmul.f32 %v12209_v3, %v12208_v58  ;;  %v12210_v30 = vld [vmem:[#allocation18_spill] sm:$0xff]  ;;  %v4274_v51 = vmul.f32 %v12209_v3, %v12213_v16  ;;  %v12216_v11 = vld [vmem:[#allocation3_spill] sm:$0xff] }
 0x542   : > { %12199 = vst [vmem:[#allocation100_spill] sm:$0xff] %v10114_v48  ;;  %12204 = vst [vmem:[#allocation109_spill] sm:$0xff] %v10122_v53  ;;  %v4271_v17 = vmul.f32 %v12209_v3, %v12210_v30  ;;  %v12211_v18 = vld [vmem:[#allocation34_spill] sm:$0xff]  ;;  %v4275_v20 = vmul.f32 %v12209_v3, %v12214_v31  ;;  %v4277_v49 = vmul.f32 %v12209_v3, %v12216_v11  ;;  %v12220_v39 = vld [vmem:[#allocation63_spill] sm:$0xff] }
 0x543   : > { %12203 = vst [vmem:[#allocation108_spill] sm:$0xff] %v10120_v19  ;;  %12205 = vst [vmem:[#allocation110_spill] sm:$0xff] %v10124_v28  ;;  %v4272_v14 = vmul.f32 %v12209_v3, %v12211_v18  ;;  %v12212_v44 = vld [vmem:[#allocation10_spill] sm:$0xff]  ;;  %v4279_v29 = vmul.f32 %v12209_v3, %v12218_v33  ;;  %v4280_v24 = vmul.f32 %v12209_v3, %v12219_v9  ;;  %v12221_v23 = vld [vmem:[#allocation64_spill] sm:$0xff] }
 0x544   : > { %12206 = vst [vmem:[#allocation114_spill] sm:$0xff] %v10126_v60  ;;  %12207 = vst [vmem:[#allocation121_spill] sm:$0xff] %v10128_v54  ;;  %v4273_v8 = vmul.f32 %v12209_v3, %v12212_v44  ;;  %v12215_v62 = vld [vmem:[#allocation22_spill] sm:$0xff]  ;;  %v4281_v61 = vmul.f32 %v12209_v3, %v12220_v39  ;;  %v4282_v0 = vmul.f32 %v12209_v3, %v12221_v23  ;;  %v12222_v10 = vld [vmem:[#allocation65_spill] sm:$0xff] }
 0x545   : > { %v4276_v7 = vmul.f32 %v12209_v3, %v12215_v62  ;;  %v12217_v57 = vld [vmem:[#allocation54_spill] sm:$0xff]  ;;  %v4283_v58 = vmul.f32 %v12209_v3, %v12222_v10  ;;  %v12223_v30 = vld [vmem:[#allocation72_spill] sm:$0xff]  ;;  %v10160_v44 = vld [vmem:[#allocation2 + $0x180] sm:$0xff] }
 0x546   : > { %v4278_v55 = vmul.f32 %v12209_v3, %v12217_v57  ;;  %v4284_v18 = vmul.f32 %v12209_v3, %v12223_v30  ;;  %12224 = vst [vmem:[#allocation122_spill] sm:$0xff] %v10160_v44  ;;  %v12225_v16 = vld [vmem:[#allocation73_spill] sm:$0xff]  ;;  %v12226_v62 = vld [vmem:[#allocation78_spill] sm:$0xff]  ;;  %v12227_v57 = vld [vmem:[#allocation80_spill] sm:$0xff] }
 0x547   : > { %v4285_v31 = vmul.f32 %v12209_v3, %v12225_v16  ;;  %v4286_v11 = vmul.f32 %v12209_v3, %v12226_v62  ;;  %v4287_v33 = vmul.f32 %v12209_v3, %v12227_v57  ;;  %v12228_v9 = vld [vmem:[#allocation83_spill] sm:$0xff]  ;;  %v10170_v23 = vld [vmem:[#allocation2 + $0x188] sm:$0xff]  ;;  %v12230_v10 = vld [vmem:[#allocation84_spill] sm:$0xff]  ;;  %v4291_v16 = vmul.f32 %v12209_v3, %v12232_v42 }
 0x548   : > { %v4288_v39 = vmul.f32 %v12209_v3, %v12228_v9  ;;  %12229 = vst [vmem:[#allocation133_spill] sm:$0xff] %v10170_v23  ;;  %v4289_v12 = vmul.f32 %v12209_v3, %v12230_v10  ;;  %v12231_v30 = vld [vmem:[#allocation85_spill] sm:$0xff]  ;;  %v4292_v62 = vmul.f32 %v12209_v3, %v12233_v35  ;;  %v4293_v57 = vmul.f32 %v12209_v3, %v12234_v25  ;;  %v12236_v60 = vld [vmem:[#allocation103_spill] sm:$0xff]  ;;  %v12237_v53 = vld [vmem:[#allocation130_spill] sm:$0xff] }
 0x549   : > { %v4290_v47 = vmul.f32 %v12209_v3, %v12231_v30  ;;  %v12235_v54 = vld [vmem:[#allocation97_spill] sm:$0xff]  ;;  %v4295_v28 = vmul.f32 %v12209_v3, %v12236_v60  ;;  %v4296_v10 = vmul.f32 %v12209_v3, %v12237_v53  ;;  %v12238_v19 = vld [vmem:[#allocation131_spill] sm:$0xff]  ;;  %v4299_v35 = vmul.f32 %v12209_v3, %v9993_v46  ;;  %v12240_v48 = vld [vmem:[#allocation12_spill] sm:$0xff] }
 0x54a   : > { %v4294_v9 = vmul.f32 %v12209_v3, %v12235_v54  ;;  %v4297_v30 = vmul.f32 %v12209_v3, %v12238_v19  ;;  %v12239_v1 = vld [vmem:[#allocation141_spill] sm:$0xff]  ;;  %v4300_v25 = vmul.f32 %v12209_v3, %v10160_v44  ;;  %v4301_v54 = vmul.f32 %v12209_v3, %v10170_v23  ;;  %v12241_v2 = vld [vmem:[#allocation50_spill] sm:$0xff] }
 0x54b   : > { %v4298_v42 = vmul.f32 %v12209_v3, %v12239_v1  ;;  %v10199_v60 = vadd.f32 %v4270_v45, %v12240_v48  ;;  %v10202_v53 = vadd.f32 %v4271_v17, %v12241_v2  ;;  %v10205_v19 = vadd.f32 %v4272_v14, %v10041_v38  ;;  %v12283_v23 = vld [vmem:[#allocation93_spill] sm:$0xff] }
 0x54c   : > { %v10208_v1 = vadd.f32 %v4273_v8, %v10045_v13  ;;  %v10211_v46 = vadd.f32 %v4274_v51, %v10049_v43  ;;  %v10214_v44 = vadd.f32 %v4275_v20, %v10052_v5  ;;  %v10217_v3 = vadd.f32 %v4276_v7, %v10057_v59  ;;  %v12256_v20 = vld [vmem:[#allocation121_spill] sm:$0xff] }
 0x54d   : > { %v10220_v48 = vadd.f32 %v4277_v49, %v10060_v63  ;;  %v10223_v2 = vadd.f32 %v4278_v55, %v10063_v21  ;;  %v10226_v38 = vadd.f32 %v4279_v29, %v10066_v40  ;;  %v10229_v13 = vadd.f32 %v4280_v24, %v10069_v22  ;;  %v12259_v49 = vld [vmem:[#allocation52_spill] sm:$0xff]  ;;  %v12260_v29 = vld [vmem:[#allocation15_spill] sm:$0xff] }
 0x54e   : > { %v10232_v43 = vadd.f32 %v4281_v61, %v10072_v6  ;;  %v10235_v5 = vadd.f32 %v4282_v0, %v10075_v52  ;;  %v10238_v59 = vadd.f32 %v4283_v58, %v10078_v56  ;;  %v10241_v63 = vadd.f32 %v4284_v18, %v10081_v27  ;;  %v12261_v61 = vld [vmem:[#allocation49_spill] sm:$0xff] }
 0x54f   : > { %v10244_v21 = vadd.f32 %v4285_v31, %v10084_v26  ;;  %v10247_v40 = vadd.f32 %v4286_v11, %v10087_v50  ;;  %v10250_v22 = vadd.f32 %v4287_v33, %v10090_v15  ;;  %v10253_v6 = vadd.f32 %v4288_v39, %v10093_v34  ;;  %v12242_v15 = vld [vmem:[#allocation99_spill] sm:$0xff]  ;;  %v12244_v34 = vld [vmem:[#allocation100_spill] sm:$0xff]  ;;  %v12262_v58 = vld [vmem:[#allocation57_spill] sm:$0xff] }
 0x550   : > { %v10256_v52 = vadd.f32 %v4289_v12, %v10096_v32  ;;  %v10259_v56 = vadd.f32 %v4290_v47, %v10099_v36  ;;  %v10262_v27 = vadd.f32 %v4291_v16, %v10102_v4  ;;  %v10265_v26 = vadd.f32 %v4292_v62, %v10105_v37  ;;  %v12246_v12 = vld [vmem:[#allocation107_spill] sm:$0xff]  ;;  %v12248_v47 = vld [vmem:[#allocation108_spill] sm:$0xff]  ;;  %v12250_v4 = vld [vmem:[#allocation109_spill] sm:$0xff] }
 0x551   : > { %v10268_v50 = vadd.f32 %v4293_v57, %v10108_v41  ;;  %v10271_v45 = vadd.f32 %v4294_v9, %v12242_v15  ;;  %v10274_v17 = vadd.f32 %v4295_v28, %v12244_v34  ;;  %v10277_v32 = vadd.f32 %v4296_v10, %v12246_v12  ;;  %v12252_v37 = vld [vmem:[#allocation110_spill] sm:$0xff]  ;;  %v12258_v28 = vld [vmem:[#allocation31_spill] sm:$0xff]  ;;  %v12267_v10 = vld [vmem:[#allocation69_spill] sm:$0xff] }
 0x552   : > { %v10280_v36 = vadd.f32 %v4297_v30, %v12248_v47  ;;  %v10283_v14 = vadd.f32 %v4298_v42, %v12250_v4  ;;  %v10286_v8 = vadd.f32 %v4299_v35, %v12252_v37  ;;  %v12254_v41 = vld [vmem:[#allocation114_spill] sm:$0xff]  ;;  %v10292_v7 = vadd.f32 %v4301_v54, %v12256_v20  ;;  %v12264_v33 = vld [vmem:[#allocation59_spill] sm:$0xff]  ;;  %v12268_v42 = vld [vmem:[#allocation68_spill] sm:$0xff] }
 0x553   : > { %12243 = vst [vmem:[#allocation134_spill] sm:$0xff] %v10271_v45  ;;  %12245 = vst [vmem:[#allocation27_spill] sm:$0xff] %v10274_v17  ;;  %v10289_v51 = vadd.f32 %v4300_v25, %v12254_v41  ;;  %v4370_v55 = vmul.f32 %v12259_v49, %v12258_v28  ;;  %v4371_v24 = vmul.f32 %v12259_v49, %v12260_v29  ;;  %v12263_v31 = vld [vmem:[#allocation58_spill] sm:$0xff]  ;;  %v12266_v57 = vld [vmem:[#allocation67_spill] sm:$0xff] }
 0x554   : > { %12247 = vst [vmem:[#allocation51_spill] sm:$0xff] %v10277_v32  ;;  %12249 = vst [vmem:[#allocation18_spill] sm:$0xff] %v10280_v36  ;;  %v4372_v0 = vmul.f32 %v12259_v49, %v12261_v61  ;;  %v4373_v18 = vmul.f32 %v12259_v49, %v12262_v58  ;;  %v4374_v11 = vmul.f32 %v12259_v49, %v12263_v31  ;;  %v12265_v16 = vld [vmem:[#allocation66_spill] sm:$0xff]  ;;  %v12270_v15 = vld [vmem:[#allocation71_spill] sm:$0xff] }
 0x555   : > { %12251 = vst [vmem:[#allocation34_spill] sm:$0xff] %v10283_v14  ;;  %12253 = vst [vmem:[#allocation10_spill] sm:$0xff] %v10286_v8  ;;  %v4375_v39 = vmul.f32 %v12259_v49, %v12264_v33  ;;  %v4376_v62 = vmul.f32 %v12259_v49, %v12265_v16  ;;  %v4377_v9 = vmul.f32 %v12259_v49, %v12266_v57  ;;  %v12269_v25 = vld [vmem:[#allocation70_spill] sm:$0xff]  ;;  %v12272_v4 = vld [vmem:[#allocation75_spill] sm:$0xff] }
 0x556   : > { %12255 = vst [vmem:[#allocation35_spill] sm:$0xff] %v10289_v51  ;;  %12257 = vst [vmem:[#allocation29_spill] sm:$0xff] %v10292_v7  ;;  %v4378_v30 = vmul.f32 %v12259_v49, %v12267_v10  ;;  %v4379_v35 = vmul.f32 %v12259_v49, %v12268_v42  ;;  %v4380_v54 = vmul.f32 %v12259_v49, %v12269_v25  ;;  %v12271_v12 = vld [vmem:[#allocation74_spill] sm:$0xff]  ;;  %v12273_v41 = vld [vmem:[#allocation76_spill] sm:$0xff] }
 0x557   : > { %v4381_v34 = vmul.f32 %v12259_v49, %v12270_v15  ;;  %v4382_v47 = vmul.f32 %v12259_v49, %v12271_v12  ;;  %v4383_v37 = vmul.f32 %v12259_v49, %v12272_v4  ;;  %v4384_v20 = vmul.f32 %v12259_v49, %v12273_v41  ;;  %v10324_v28 = vld [vmem:[#allocation2 + $0x181] sm:$0xff]  ;;  %v12277_v33 = vld [vmem:[#allocation79_spill] sm:$0xff]  ;;  %v12286_v8 = vld [vmem:[#allocation104_spill] sm:$0xff] }
 0x558   : > { %12274 = vst [vmem:[#allocation22_spill] sm:$0xff] %v10324_v28  ;;  %v12275_v29 = vld [vmem:[#allocation77_spill] sm:$0xff]  ;;  %v4387_v16 = vmul.f32 %v12259_v49, %v12277_v33  ;;  %v12278_v57 = vld [vmem:[#allocation86_spill] sm:$0xff]  ;;  %v12281_v12 = vld [vmem:[#allocation87_spill] sm:$0xff]  ;;  %v4395_v14 = vmul.f32 %v12259_v49, %v12286_v8  ;;  %v10363_v8 = vadd.f32 %v4370_v55, %v10199_v60  ;;  %v10384_v60 = vadd.f32 %v4377_v9, %v10220_v48 }
 0x559   : > { %v4385_v61 = vmul.f32 %v12259_v49, %v12275_v29  ;;  %v12276_v58 = vld [vmem:[#allocation81_spill] sm:$0xff]  ;;  %v4388_v10 = vmul.f32 %v12259_v49, %v12278_v57  ;;  %v10334_v42 = vld [vmem:[#allocation2 + $0x189] sm:$0xff]  ;;  %v4390_v4 = vmul.f32 %v12259_v49, %v12281_v12  ;;  %v12287_v36 = vld [vmem:[#allocation132_spill] sm:$0xff]  ;;  %v10405_v48 = vadd.f32 %v4384_v20, %v10241_v63 }
 0x55a   : > { %v4386_v31 = vmul.f32 %v12259_v49, %v12276_v58  ;;  %12279 = vst [vmem:[#allocation3_spill] sm:$0xff] %v10334_v42  ;;  %v12280_v25 = vld [vmem:[#allocation82_spill] sm:$0xff]  ;;  %v12282_v41 = vld [vmem:[#allocation89_spill] sm:$0xff]  ;;  %v4392_v58 = vmul.f32 %v12259_v49, %v12283_v23 }
 0x55b   : > { %v4389_v15 = vmul.f32 %v12259_v49, %v12280_v25  ;;  %v4391_v29 = vmul.f32 %v12259_v49, %v12282_v41  ;;  %v12284_v7 = vld [vmem:[#allocation90_spill] sm:$0xff]  ;;  %v4396_v25 = vmul.f32 %v12259_v49, %v12287_v36  ;;  %v10366_v36 = vadd.f32 %v4371_v24, %v10202_v53 }
 0x55c   : > { %v4393_v33 = vmul.f32 %v12259_v49, %v12284_v7  ;;  %v12285_v51 = vld [vmem:[#allocation98_spill] sm:$0xff]  ;;  %v4400_v7 = vmul.f32 %v12259_v49, %v10324_v28  ;;  %v10378_v28 = vadd.f32 %v4375_v39, %v10214_v44  ;;  %v10387_v53 = vadd.f32 %v4378_v30, %v10223_v2 }
 0x55d   : > { %v4394_v57 = vmul.f32 %v12259_v49, %v12285_v51  ;;  %v12288_v32 = vld [vmem:[#allocation118_spill] sm:$0xff]  ;;  %v4401_v51 = vmul.f32 %v12259_v49, %v10334_v42  ;;  %v10399_v44 = vadd.f32 %v4382_v47, %v10235_v5  ;;  %v10408_v2 = vadd.f32 %v4385_v61, %v10244_v21  ;;  %v12305_v9 = vld [vmem:[#allocation29_spill] sm:$0xff]  ;;  %v12332_v42 = vld [vmem:[#allocation135_spill] sm:$0xff] }
 0x55e   : > { %v4397_v12 = vmul.f32 %v12259_v49, %v12288_v32  ;;  %v12289_v17 = vld [vmem:[#allocation142_spill] sm:$0xff]  ;;  %v10369_v32 = vadd.f32 %v4372_v0, %v10205_v19  ;;  %v10390_v19 = vadd.f32 %v4379_v35, %v10226_v38  ;;  %v10411_v38 = vadd.f32 %v4386_v31, %v10247_v40  ;;  %v12308_v35 = vld [vmem:[#allocation53_spill] sm:$0xff] }
 0x55f   : > { %v4398_v41 = vmul.f32 %v12259_v49, %v12289_v17  ;;  %v12290_v45 = vld [vmem:[#allocation138_spill] sm:$0xff]  ;;  %v10372_v17 = vadd.f32 %v4373_v18, %v10208_v1  ;;  %v10393_v1 = vadd.f32 %v4380_v54, %v10229_v13  ;;  %v10414_v13 = vadd.f32 %v4387_v16, %v10250_v22  ;;  %v12311_v61 = vld [vmem:[#allocation101_spill] sm:$0xff] }
 0x560   : > { %v4399_v23 = vmul.f32 %v12259_v49, %v12290_v45  ;;  %v10375_v45 = vadd.f32 %v4374_v11, %v10211_v46  ;;  %v10381_v49 = vadd.f32 %v4376_v62, %v10217_v3  ;;  %v10396_v46 = vadd.f32 %v4381_v34, %v10232_v43  ;;  %v12291_v22 = vld [vmem:[#allocation134_spill] sm:$0xff]  ;;  %v12309_v34 = vld [vmem:[#allocation95_spill] sm:$0xff] }
 0x561   : > { %v10402_v3 = vadd.f32 %v4383_v37, %v10238_v59  ;;  %v10417_v43 = vadd.f32 %v4388_v10, %v10253_v6  ;;  %v10420_v5 = vadd.f32 %v4389_v15, %v10256_v52  ;;  %v10423_v59 = vadd.f32 %v4390_v4, %v10259_v56  ;;  %v12293_v6 = vld [vmem:[#allocation27_spill] sm:$0xff]  ;;  %v12297_v56 = vld [vmem:[#allocation18_spill] sm:$0xff]  ;;  %v12310_v37 = vld [vmem:[#allocation96_spill] sm:$0xff] }
 0x562   : > { %v10426_v63 = vadd.f32 %v4391_v29, %v10262_v27  ;;  %v10429_v21 = vadd.f32 %v4392_v58, %v10265_v26  ;;  %v10432_v40 = vadd.f32 %v4393_v33, %v10268_v50  ;;  %v10435_v55 = vadd.f32 %v4394_v57, %v12291_v22  ;;  %v12295_v52 = vld [vmem:[#allocation51_spill] sm:$0xff]  ;;  %v12299_v27 = vld [vmem:[#allocation34_spill] sm:$0xff]  ;;  %v12313_v15 = vld [vmem:[#allocation105_spill] sm:$0xff] }
 0x563   : > { %v10438_v24 = vadd.f32 %v4395_v14, %v12293_v6  ;;  %v10441_v0 = vadd.f32 %v4396_v25, %v12295_v52  ;;  %v10444_v18 = vadd.f32 %v4397_v12, %v12297_v56  ;;  %v10447_v11 = vadd.f32 %v4398_v41, %v12299_v27  ;;  %v12301_v26 = vld [vmem:[#allocation10_spill] sm:$0xff]  ;;  %v12303_v50 = vld [vmem:[#allocation35_spill] sm:$0xff]  ;;  %v12316_v25 = vld [vmem:[#allocation112_spill] sm:$0xff] }
 0x564   : > { %12292 = vst [vmem:[#allocation54_spill] sm:$0xff] %v10435_v55  ;;  %v10450_v39 = vadd.f32 %v4399_v23, %v12301_v26  ;;  %v10453_v62 = vadd.f32 %v4400_v7, %v12303_v50  ;;  %v10456_v30 = vadd.f32 %v4401_v51, %v12305_v9  ;;  %v12307_v14 = vld [vmem:[#allocation94_spill] sm:$0xff]  ;;  %v4471_v47 = vmul.f32 %v12308_v35, %v12309_v34  ;;  %v12314_v29 = vld [vmem:[#allocation111_spill] sm:$0xff]  ;;  %v12317_v41 = vld [vmem:[#allocation113_spill] sm:$0xff] }
 0x565   : > { %12294 = vst [vmem:[#allocation55_spill] sm:$0xff] %v10438_v24  ;;  %12296 = vst [vmem:[#allocation56_spill] sm:$0xff] %v10441_v0  ;;  %v4470_v54 = vmul.f32 %v12308_v35, %v12307_v14  ;;  %v4472_v20 = vmul.f32 %v12308_v35, %v12310_v37  ;;  %v4473_v31 = vmul.f32 %v12308_v35, %v12311_v61  ;;  %v12312_v16 = vld [vmem:[#allocation102_spill] sm:$0xff]  ;;  %v12318_v7 = vld [vmem:[#allocation115_spill] sm:$0xff] }
 0x566   : > { %12298 = vst [vmem:[#allocation63_spill] sm:$0xff] %v10444_v18  ;;  %12300 = vst [vmem:[#allocation64_spill] sm:$0xff] %v10447_v11  ;;  %v4474_v10 = vmul.f32 %v12308_v35, %v12312_v16  ;;  %v4475_v4 = vmul.f32 %v12308_v35, %v12313_v15  ;;  %v4476_v58 = vmul.f32 %v12308_v35, %v12314_v29  ;;  %v12315_v33 = vld [vmem:[#allocation106_spill] sm:$0xff]  ;;  %v12319_v22 = vld [vmem:[#allocation116_spill] sm:$0xff] }
 0x567   : > { %12302 = vst [vmem:[#allocation65_spill] sm:$0xff] %v10450_v39  ;;  %12304 = vst [vmem:[#allocation72_spill] sm:$0xff] %v10453_v62  ;;  %v4477_v57 = vmul.f32 %v12308_v35, %v12315_v33  ;;  %v4478_v12 = vmul.f32 %v12308_v35, %v12316_v25  ;;  %v4479_v23 = vmul.f32 %v12308_v35, %v12317_v41  ;;  %v12320_v52 = vld [vmem:[#allocation119_spill] sm:$0xff]  ;;  %v12321_v27 = vld [vmem:[#allocation117_spill] sm:$0xff] }
 0x568   : > { %12306 = vst [vmem:[#allocation73_spill] sm:$0xff] %v10456_v30  ;;  %v4480_v51 = vmul.f32 %v12308_v35, %v12318_v7  ;;  %v4481_v6 = vmul.f32 %v12308_v35, %v12319_v22  ;;  %v4482_v56 = vmul.f32 %v12308_v35, %v12320_v52  ;;  %v4483_v26 = vmul.f32 %v12308_v35, %v12321_v27  ;;  %v12322_v50 = vld [vmem:[#allocation123_spill] sm:$0xff]  ;;  %v10488_v14 = vld [vmem:[#allocation2 + $0x182] sm:$0xff]  ;;  %v12324_v34 = vld [vmem:[#allocation120_spill] sm:$0xff] }
 0x569   : > { %v4484_v9 = vmul.f32 %v12308_v35, %v12322_v50  ;;  %12323 = vst [vmem:[#allocation78_spill] sm:$0xff] %v10488_v14  ;;  %v4485_v37 = vmul.f32 %v12308_v35, %v12324_v34  ;;  %v12325_v61 = vld [vmem:[#allocation124_spill] sm:$0xff]  ;;  %v12326_v15 = vld [vmem:[#allocation125_spill] sm:$0xff]  ;;  %v12327_v33 = vld [vmem:[#allocation126_spill] sm:$0xff] }
 0x56a   : > { %v4486_v16 = vmul.f32 %v12308_v35, %v12325_v61  ;;  %v4487_v29 = vmul.f32 %v12308_v35, %v12326_v15  ;;  %v4488_v25 = vmul.f32 %v12308_v35, %v12327_v33  ;;  %v10498_v41 = vld [vmem:[#allocation2 + $0x18a] sm:$0xff]  ;;  %v12330_v52 = vld [vmem:[#allocation128_spill] sm:$0xff]  ;;  %v12331_v50 = vld [vmem:[#allocation129_spill] sm:$0xff]  ;;  %v4492_v61 = vmul.f32 %v12308_v35, %v12332_v42 }
 0x56b   : > { %12328 = vst [vmem:[#allocation80_spill] sm:$0xff] %v10498_v41  ;;  %v12329_v7 = vld [vmem:[#allocation127_spill] sm:$0xff]  ;;  %v4490_v27 = vmul.f32 %v12308_v35, %v12330_v52  ;;  %v4491_v34 = vmul.f32 %v12308_v35, %v12331_v50  ;;  %v12333_v30 = vld [vmem:[#allocation136_spill] sm:$0xff]  ;;  %v12335_v39 = vld [vmem:[#allocation137_spill] sm:$0xff] }
 0x56c   : > { %v4489_v22 = vmul.f32 %v12308_v35, %v12329_v7  ;;  %v4493_v15 = vmul.f32 %v12308_v35, %v12333_v30  ;;  %v12334_v62 = vld [vmem:[#allocation139_spill] sm:$0xff]  ;;  %v4495_v11 = vmul.f32 %v12308_v35, %v12335_v39  ;;  %v12336_v18 = vld [vmem:[#allocation140_spill] sm:$0xff]  ;;  %v12338_v24 = vld [vmem:[#allocation145_spill] sm:$0xff]  ;;  %v4500_v30 = vmul.f32 %v12308_v35, %v10488_v14 }
 0x56d   : > { %v4494_v33 = vmul.f32 %v12308_v35, %v12334_v62  ;;  %v4496_v7 = vmul.f32 %v12308_v35, %v12336_v18  ;;  %v12337_v0 = vld [vmem:[#allocation143_spill] sm:$0xff]  ;;  %v4498_v50 = vmul.f32 %v12308_v35, %v12338_v24  ;;  %v12339_v55 = vld [vmem:[#allocation144_spill] sm:$0xff]  ;;  %v4501_v62 = vmul.f32 %v12308_v35, %v10498_v41  ;;  %v4557_v41 = vld [vmem:[#allocation2 + $0x140] sm:$0xff] }
 0x56e   : > { %v4497_v52 = vmul.f32 %v12308_v35, %v12337_v0  ;;  %v4499_v42 = vmul.f32 %v12308_v35, %v12339_v55  ;;  %v10527_v39 = vadd.f32 %v4470_v54, %v10363_v8  ;;  %v10530_v18 = vadd.f32 %v4471_v47, %v10366_v36  ;;  %v4535_v54 = vld [vmem:[#allocation2 + $0x38] sm:$0xff]  ;;  %v4536_v47 = vld [vmem:[#allocation2 + $0x48] sm:$0xff] }
 0x56f   : > { %v10533_v0 = vadd.f32 %v4472_v20, %v10369_v32  ;;  %v10536_v24 = vadd.f32 %v4473_v31, %v10372_v17  ;;  %v10539_v55 = vadd.f32 %v4474_v10, %v10375_v45  ;;  %v10542_v14 = vadd.f32 %v4475_v4, %v10378_v28  ;;  %v4538_v20 = vld [vmem:[#allocation2 + $0x60] sm:$0xff]  ;;  %v4539_v31 = vld [vmem:[#allocation2 + $0x68] sm:$0xff] }
 0x570   : > { %v10545_v35 = vadd.f32 %v4476_v58, %v10381_v49  ;;  %v10548_v8 = vadd.f32 %v4477_v57, %v10384_v60  ;;  %v10551_v36 = vadd.f32 %v4478_v12, %v10387_v53  ;;  %v10554_v32 = vadd.f32 %v4479_v23, %v10390_v19  ;;  %v4534_v53 = vld [vmem:[#allocation2 + $0x30] sm:$0xff]  ;;  %v4541_v4 = vld [vmem:[#allocation2 + $0x80] sm:$0xff]  ;;  %v12340_v57 = vld [vmem:[#allocation54_spill] sm:$0xff] }
 0x571   : > { %v10557_v17 = vadd.f32 %v4480_v51, %v10393_v1  ;;  %v10560_v45 = vadd.f32 %v4481_v6, %v10396_v46  ;;  %v10563_v28 = vadd.f32 %v4482_v56, %v10399_v44  ;;  %v10566_v49 = vadd.f32 %v4483_v26, %v10402_v3  ;;  %v4537_v3 = vld [vmem:[#allocation2 + $0x50] sm:$0xff]  ;;  %v4544_v6 = vld [vmem:[#allocation2 + $0xa8] sm:$0xff] }
 0x572   : > { %v10569_v60 = vadd.f32 %v4484_v9, %v10405_v48  ;;  %v10572_v19 = vadd.f32 %v4485_v37, %v10408_v2  ;;  %v10575_v1 = vadd.f32 %v4486_v16, %v10411_v38  ;;  %v10578_v46 = vadd.f32 %v4487_v29, %v10414_v13  ;;  %v4540_v13 = vld [vmem:[#allocation2 + $0x78] sm:$0xff]  ;;  %v4542_v58 = vld [vmem:[#allocation2 + $0x90] sm:$0xff] }
 0x573   : > { %v10581_v44 = vadd.f32 %v4488_v25, %v10417_v43  ;;  %v10584_v48 = vadd.f32 %v4489_v22, %v10420_v5  ;;  %v10587_v10 = vadd.f32 %v4490_v27, %v10423_v59  ;;  %v10590_v2 = vadd.f32 %v4491_v34, %v10426_v63  ;;  %v12342_v5 = vld [vmem:[#allocation55_spill] sm:$0xff]  ;;  %v12344_v59 = vld [vmem:[#allocation56_spill] sm:$0xff]  ;;  %v4547_v22 = vld [vmem:[#allocation2 + $0xc8] sm:$0xff] }
 0x574   : > { %v10593_v38 = vadd.f32 %v4492_v61, %v10429_v21  ;;  %v10596_v43 = vadd.f32 %v4493_v15, %v10432_v40  ;;  %v10599_v12 = vadd.f32 %v4494_v33, %v12340_v57  ;;  %v10602_v23 = vadd.f32 %v4495_v11, %v12342_v5  ;;  %v4543_v63 = vld [vmem:[#allocation2 + $0x98] sm:$0xff]  ;;  %v4545_v56 = vld [vmem:[#allocation2 + $0xb0] sm:$0xff]  ;;  %v12350_v40 = vld [vmem:[#allocation65_spill] sm:$0xff] }
 0x575   : > { %v10605_v51 = vadd.f32 %v4496_v7, %v12344_v59  ;;  %v12346_v21 = vld [vmem:[#allocation63_spill] sm:$0xff]  ;;  %v12348_v9 = vld [vmem:[#allocation64_spill] sm:$0xff]  ;;  %v10614_v16 = vadd.f32 %v4499_v42, %v12350_v40  ;;  %v4546_v11 = vld [vmem:[#allocation2 + $0xc0] sm:$0xff] }
 0x576   : > { %12341 = vst [vmem:[#allocation83_spill] sm:$0xff] %v10599_v12  ;;  %12343 = vst [vmem:[#allocation84_spill] sm:$0xff] %v10602_v23  ;;  %v10608_v26 = vadd.f32 %v4497_v52, %v12346_v21  ;;  %v10611_v37 = vadd.f32 %v4498_v50, %v12348_v9  ;;  %v12352_v29 = vld [vmem:[#allocation72_spill] sm:$0xff]  ;;  %v12354_v34 = vld [vmem:[#allocation73_spill] sm:$0xff] }
 0x577   : > { %12345 = vst [vmem:[#allocation85_spill] sm:$0xff] %v10605_v51  ;;  %12351 = vst [vmem:[#allocation92_spill] sm:$0xff] %v10614_v16  ;;  %v10617_v25 = vadd.f32 %v4500_v30, %v12352_v29  ;;  %v4548_v27 = vld [vmem:[#allocation2 + $0xd8] sm:$0xff]  ;;  %v10620_v61 = vadd.f32 %v4501_v62, %v12354_v34  ;;  %v4549_v15 = vld [vmem:[#allocation2 + $0xe0] sm:$0xff] }
 0x578   : > { %12347 = vst [vmem:[#allocation88_spill] sm:$0xff] %v10608_v26  ;;  %12349 = vst [vmem:[#allocation91_spill] sm:$0xff] %v10611_v37  ;;  %v4550_v33 = vld [vmem:[#allocation2 + $0xf0] sm:$0xff]  ;;  %v4551_v7 = vld [vmem:[#allocation2 + $0xf8] sm:$0xff] }
 0x579   : > { %12353 = vst [vmem:[#allocation97_spill] sm:$0xff] %v10617_v25  ;;  %12355 = vst [vmem:[#allocation103_spill] sm:$0xff] %v10620_v61  ;;  %v12356_v52 = vld [vmem:[#allocation13_spill] sm:$0xff]  ;;  %v4552_v42 = vld [vmem:[#allocation2 + $0x108] sm:$0xff] }
 0x57a   : > { %v4570_v57 = vmul.f32 %v12356_v52, %v4534_v53  ;;  %v4571_v50 = vmul.f32 %v12356_v52, %v4535_v54  ;;  %v4572_v5 = vmul.f32 %v12356_v52, %v4536_v47  ;;  %v4553_v59 = vld [vmem:[#allocation2 + $0x110] sm:$0xff]  ;;  %v4554_v21 = vld [vmem:[#allocation2 + $0x120] sm:$0xff]  ;;  %v4573_v30 = vmul.f32 %v12356_v52, %v4537_v3  ;;  %v4555_v29 = vld [vmem:[#allocation2 + $0x128] sm:$0xff] }
 0x57b   : > { %v4574_v9 = vmul.f32 %v12356_v52, %v4538_v20  ;;  %v4575_v40 = vmul.f32 %v12356_v52, %v4539_v31  ;;  %v4576_v62 = vmul.f32 %v12356_v52, %v4540_v13  ;;  %v4556_v34 = vld [vmem:[#allocation2 + $0x138] sm:$0xff]  ;;  %v4577_v53 = vmul.f32 %v12356_v52, %v4541_v4  ;;  %v4558_v25 = vld [vmem:[#allocation2 + $0x150] sm:$0xff]  ;;  %v4560_v3 = vld [vmem:[#allocation2 + $0x168] sm:$0xff] }
 0x57c   : > { %v4578_v54 = vmul.f32 %v12356_v52, %v4542_v58  ;;  %v4579_v47 = vmul.f32 %v12356_v52, %v4543_v63  ;;  %v4580_v61 = vmul.f32 %v12356_v52, %v4544_v6  ;;  %v4559_v16 = vld [vmem:[#allocation2 + $0x158] sm:$0xff]  ;;  %v4581_v20 = vmul.f32 %v12356_v52, %v4545_v56  ;;  %v4561_v26 = vld [vmem:[#allocation2 + $0x170] sm:$0xff]  ;;  %v12357_v12 = vld [vmem:[#allocation122_spill] sm:$0xff] }
 0x57d   : > { %v4582_v31 = vmul.f32 %v12356_v52, %v4546_v11  ;;  %v4583_v13 = vmul.f32 %v12356_v52, %v4547_v22  ;;  %v4584_v37 = vmul.f32 %v12356_v52, %v4548_v27  ;;  %v4585_v4 = vmul.f32 %v12356_v52, %v4549_v15 }
 0x57e   : > { %v4586_v58 = vmul.f32 %v12356_v52, %v4550_v33  ;;  %v4587_v63 = vmul.f32 %v12356_v52, %v4551_v7  ;;  %v4588_v6 = vmul.f32 %v12356_v52, %v4552_v42  ;;  %v4589_v51 = vmul.f32 %v12356_v52, %v4553_v59  ;;  %v12358_v59 = vld [vmem:[#allocation133_spill] sm:$0xff] }
 0x57f   : > { %v4590_v23 = vmul.f32 %v12356_v52, %v4554_v21  ;;  %v4591_v56 = vmul.f32 %v12356_v52, %v4555_v29  ;;  %v4592_v11 = vmul.f32 %v12356_v52, %v4556_v34  ;;  %v4593_v22 = vmul.f32 %v12356_v52, %v4557_v41 }
 0x580   : > { %v4594_v27 = vmul.f32 %v12356_v52, %v4558_v25  ;;  %v4595_v15 = vmul.f32 %v12356_v52, %v4559_v16  ;;  %v4596_v33 = vmul.f32 %v12356_v52, %v4560_v3  ;;  %v4597_v7 = vmul.f32 %v12356_v52, %v4561_v26  ;;  %v4647_v3 = vld [vmem:[#allocation2 + $0xc9] sm:$0xff] }
 0x581   : > { %v4598_v42 = vmul.f32 %v12356_v52, %v12357_v12  ;;  %v4599_v21 = vmul.f32 %v12356_v52, %v12358_v59  ;;  %v10655_v29 = vadd.f32 %v4570_v57, %v10527_v39  ;;  %v10658_v34 = vadd.f32 %v4571_v50, %v10530_v18  ;;  %v4636_v52 = vld [vmem:[#allocation2 + $0x49] sm:$0xff] }
 0x582   : > { %v10661_v41 = vadd.f32 %v4572_v5, %v10533_v0  ;;  %v10664_v16 = vadd.f32 %v4573_v30, %v10536_v24  ;;  %v10667_v26 = vadd.f32 %v4574_v9, %v10539_v55  ;;  %v10670_v12 = vadd.f32 %v4575_v40, %v10542_v14  ;;  %v4643_v9 = vld [vmem:[#allocation2 + $0x99] sm:$0xff]  ;;  %v4652_v59 = vld [vmem:[#allocation2 + $0x109] sm:$0xff] }
 0x583   : > { %v10673_v25 = vadd.f32 %v4576_v62, %v10545_v35  ;;  %v10676_v39 = vadd.f32 %v4577_v53, %v10548_v8  ;;  %v10679_v18 = vadd.f32 %v4578_v54, %v10551_v36  ;;  %v10682_v0 = vadd.f32 %v4579_v47, %v10554_v32  ;;  %v12363_v40 = vld [vmem:[#allocation85_spill] sm:$0xff]  ;;  %v4645_v47 = vld [vmem:[#allocation2 + $0xb1] sm:$0xff] }
 0x584   : > { %v10685_v24 = vadd.f32 %v4580_v61, %v10557_v17  ;;  %v10688_v55 = vadd.f32 %v4581_v20, %v10560_v45  ;;  %v10691_v14 = vadd.f32 %v4582_v31, %v10563_v28  ;;  %v10694_v35 = vadd.f32 %v4583_v13, %v10566_v49  ;;  %v4634_v17 = vld [vmem:[#allocation2 + $0x31] sm:$0xff]  ;;  %v4635_v61 = vld [vmem:[#allocation2 + $0x39] sm:$0xff] }
 0x585   : > { %v10697_v8 = vadd.f32 %v4584_v37, %v10569_v60  ;;  %v10700_v36 = vadd.f32 %v4585_v4, %v10572_v19  ;;  %v10703_v32 = vadd.f32 %v4586_v58, %v10575_v1  ;;  %v4637_v45 = vld [vmem:[#allocation2 + $0x51] sm:$0xff]  ;;  %v10706_v57 = vadd.f32 %v4587_v63, %v10578_v46  ;;  %v4638_v19 = vld [vmem:[#allocation2 + $0x61] sm:$0xff]  ;;  %v4639_v37 = vld [vmem:[#allocation2 + $0x69] sm:$0xff] }
 0x586   : > { %v10709_v28 = vadd.f32 %v4588_v6, %v10581_v44  ;;  %v10712_v49 = vadd.f32 %v4589_v51, %v10584_v48  ;;  %v10715_v60 = vadd.f32 %v4590_v23, %v10587_v10  ;;  %v4641_v1 = vld [vmem:[#allocation2 + $0x81] sm:$0xff]  ;;  %v10718_v50 = vadd.f32 %v4591_v56, %v10590_v2  ;;  %v12359_v44 = vld [vmem:[#allocation83_spill] sm:$0xff]  ;;  %v4640_v48 = vld [vmem:[#allocation2 + $0x79] sm:$0xff] }
 0x587   : > { %v10721_v5 = vadd.f32 %v4592_v11, %v10593_v38  ;;  %v10724_v46 = vadd.f32 %v4593_v22, %v10596_v43  ;;  %v10727_v30 = vadd.f32 %v4594_v27, %v12359_v44  ;;  %v4642_v51 = vld [vmem:[#allocation2 + $0x91] sm:$0xff]  ;;  %v10733_v62 = vadd.f32 %v4596_v33, %v12363_v40  ;;  %v4644_v43 = vld [vmem:[#allocation2 + $0xa9] sm:$0xff]  ;;  %v12371_v13 = vld [vmem:[#allocation97_spill] sm:$0xff] }
 0x588   : > { %v12361_v10 = vld [vmem:[#allocation84_spill] sm:$0xff]  ;;  %v12367_v38 = vld [vmem:[#allocation91_spill] sm:$0xff]  ;;  %v12375_v6 = vld [vmem:[#allocation61_spill] sm:$0xff] }
 0x589   : > { %12360 = vst [vmem:[#allocation130_spill] sm:$0xff] %v10727_v30  ;;  %v10730_v23 = vadd.f32 %v4595_v15, %v12361_v10  ;;  %12364 = vst [vmem:[#allocation141_spill] sm:$0xff] %v10733_v62  ;;  %v12365_v2 = vld [vmem:[#allocation88_spill] sm:$0xff]  ;;  %v10739_v54 = vadd.f32 %v4598_v42, %v12367_v38  ;;  %v12374_v63 = vld [vmem:[#allocation103_spill] sm:$0xff] }
 0x58a   : > { %v10736_v53 = vadd.f32 %v4597_v7, %v12365_v2  ;;  %v12369_v20 = vld [vmem:[#allocation92_spill] sm:$0xff]  ;;  %v10750_v56 = vadd.f32 %v12375_v6, %v12374_v63  ;;  %v4646_v11 = vld [vmem:[#allocation2 + $0xc1] sm:$0xff] }
 0x58b   : > { %12362 = vst [vmem:[#allocation131_spill] sm:$0xff] %v10730_v23  ;;  %12368 = vst [vmem:[#allocation50_spill] sm:$0xff] %v10739_v54  ;;  %v10742_v31 = vadd.f32 %v4599_v21, %v12369_v20  ;;  %v12372_v4 = vld [vmem:[#allocation60_spill] sm:$0xff]  ;;  %v4649_v27 = vld [vmem:[#allocation2 + $0xe1] sm:$0xff] }
 0x58c   : > { %12366 = vst [vmem:[#allocation12_spill] sm:$0xff] %v10736_v53  ;;  %v10746_v58 = vadd.f32 %v12372_v4, %v12371_v13  ;;  %12376 = vst [vmem:[#allocation107_spill] sm:$0xff] %v10750_v56  ;;  %v4648_v22 = vld [vmem:[#allocation2 + $0xd9] sm:$0xff]  ;;  %v12377_v15 = vld [vmem:[#allocation62_spill] sm:$0xff] }
 0x58d   : > { %12370 = vst [vmem:[#allocation99_spill] sm:$0xff] %v10742_v31  ;;  %v4670_v33 = vmul.f32 %v12377_v15, %v4634_v17  ;;  %v4650_v7 = vld [vmem:[#allocation2 + $0xf1] sm:$0xff]  ;;  %v4651_v42 = vld [vmem:[#allocation2 + $0xf9] sm:$0xff]  ;;  %v4671_v44 = vmul.f32 %v12377_v15, %v4635_v61  ;;  %v4672_v21 = vmul.f32 %v12377_v15, %v4636_v52  ;;  %v4673_v10 = vmul.f32 %v12377_v15, %v4637_v45  ;;  %v4654_v38 = vld [vmem:[#allocation2 + $0x121] sm:$0xff] }
 0x58e   : > { %12373 = vst [vmem:[#allocation100_spill] sm:$0xff] %v10746_v58  ;;  %v4674_v40 = vmul.f32 %v12377_v15, %v4638_v19  ;;  %v4653_v2 = vld [vmem:[#allocation2 + $0x111] sm:$0xff]  ;;  %v4655_v20 = vld [vmem:[#allocation2 + $0x129] sm:$0xff]  ;;  %v4675_v13 = vmul.f32 %v12377_v15, %v4639_v37  ;;  %v4676_v4 = vmul.f32 %v12377_v15, %v4640_v48  ;;  %v4677_v17 = vmul.f32 %v12377_v15, %v4641_v1  ;;  %v4656_v6 = vld [vmem:[#allocation2 + $0x139] sm:$0xff] }
 0x58f   : > { %v4678_v63 = vmul.f32 %v12377_v15, %v4642_v51  ;;  %v4657_v56 = vld [vmem:[#allocation2 + $0x141] sm:$0xff]  ;;  %v4658_v61 = vld [vmem:[#allocation2 + $0x151] sm:$0xff]  ;;  %v4679_v52 = vmul.f32 %v12377_v15, %v4643_v9  ;;  %v4680_v45 = vmul.f32 %v12377_v15, %v4644_v43  ;;  %v4681_v19 = vmul.f32 %v12377_v15, %v4645_v47  ;;  %v4659_v31 = vld [vmem:[#allocation2 + $0x159] sm:$0xff] }
 0x590   : > { %v4682_v58 = vmul.f32 %v12377_v15, %v4646_v11  ;;  %v4660_v54 = vld [vmem:[#allocation2 + $0x169] sm:$0xff]  ;;  %v4661_v37 = vld [vmem:[#allocation2 + $0x171] sm:$0xff]  ;;  %v4683_v48 = vmul.f32 %v12377_v15, %v4647_v3  ;;  %v4684_v1 = vmul.f32 %v12377_v15, %v4648_v22  ;;  %v4685_v51 = vmul.f32 %v12377_v15, %v4649_v27  ;;  %v4664_v62 = vld [vmem:[#allocation2 + $0x199] sm:$0xff] }
 0x591   : > { %v4686_v53 = vmul.f32 %v12377_v15, %v4650_v7  ;;  %v4665_v23 = vld [vmem:[#allocation2 + $0x1a1] sm:$0xff]  ;;  %v4687_v9 = vmul.f32 %v12377_v15, %v4651_v42  ;;  %v4688_v43 = vmul.f32 %v12377_v15, %v4652_v59  ;;  %v4689_v47 = vmul.f32 %v12377_v15, %v4653_v2 }
 0x592   : > { %v4690_v11 = vmul.f32 %v12377_v15, %v4654_v38  ;;  %v4691_v30 = vmul.f32 %v12377_v15, %v4655_v20  ;;  %v10775_v3 = vmul.f32 %v12377_v15, %v4656_v6  ;;  %v10778_v22 = vmul.f32 %v12377_v15, %v4657_v56  ;;  %v12379_v2 = vld [vmem:[#allocation22_spill] sm:$0xff]  ;;  %v12380_v20 = vld [vmem:[#allocation3_spill] sm:$0xff] }
 0x593   : > { %v10781_v27 = vmul.f32 %v12377_v15, %v4658_v61  ;;  %v10784_v7 = vmul.f32 %v12377_v15, %v4659_v31  ;;  %v10787_v42 = vmul.f32 %v12377_v15, %v4660_v54  ;;  %v10790_v59 = vmul.f32 %v12377_v15, %v4661_v37 }
 0x594   : > { %v10794_v38 = vmul.f32 %v12377_v15, %v12379_v2  ;;  %v10798_v56 = vmul.f32 %v12377_v15, %v12380_v20  ;;  %v10801_v6 = vmul.f32 %v12377_v15, %v4664_v62  ;;  %v10804_v31 = vmul.f32 %v12377_v15, %v4665_v23  ;;  %v7191_v2 = vld [vmem:[%s11678_s15 + $0x8] sm:$0x7]  ;;  %v12382_v20 = vld [vmem:[#allocation5_spill] sm:$0xff] }
 0x595   : > { %12378 = vst [vmem:[#allocation108_spill] sm:$0xff] %v10790_v59  ;;  %v4702_v54 = vadd.f32 %v4670_v33, %v10655_v29  ;;  %v4703_v61 = vadd.f32 %v4671_v44, %v10658_v34  ;;  %v4704_v37 = vadd.f32 %v4672_v21, %v10661_v41  ;;  %v4705_v59 = vadd.f32 %v4673_v10, %v10664_v16  ;;  %v4734_v41 = vld [vmem:[#allocation2 + $0x32] sm:$0xff] }
 0x596   : > { %12381 = vst [vmem:[#allocation109_spill] sm:$0xff] %v10798_v56  ;;  %v10814_v56 = vrot.slane %v7191_v2, %v12382_v20  ;;  %v4706_v62 = vadd.f32 %v4674_v40, %v10667_v26  ;;  %v10818_v23 = vadd.f32 %v4675_v13, %v10670_v12  ;;  %v10821_v29 = vadd.f32 %v4676_v4, %v10673_v25  ;;  %v4735_v12 = vld [vmem:[#allocation2 + $0x3a] sm:$0xff]  ;;  %v4737_v21 = vld [vmem:[#allocation2 + $0x52] sm:$0xff]  ;;  %v4741_v40 = vld [vmem:[#allocation2 + $0x82] sm:$0xff] }
 0x597   : > { %v10824_v34 = vadd.f32 %v4677_v17, %v10676_v39  ;;  %v10827_v16 = vadd.f32 %v4678_v63, %v10679_v18  ;;  %v10830_v15 = vadd.f32 %v4679_v52, %v10682_v0  ;;  %v10833_v33 = vadd.f32 %v4680_v45, %v10685_v24  ;;  %v4736_v0 = vld [vmem:[#allocation2 + $0x4a] sm:$0xff]  ;;  %v4738_v24 = vld [vmem:[#allocation2 + $0x62] sm:$0xff]  ;;  %v4745_v17 = vld [vmem:[#allocation2 + $0xb2] sm:$0xff] }
 0x598   : > { %v10836_v26 = vadd.f32 %v4681_v19, %v10688_v55  ;;  %v10839_v25 = vadd.f32 %v4682_v58, %v10691_v14  ;;  %v10842_v39 = vadd.f32 %v4683_v48, %v10694_v35  ;;  %v10845_v44 = vadd.f32 %v4684_v1, %v10697_v8  ;;  %v4739_v35 = vld [vmem:[#allocation2 + $0x6a] sm:$0xff]  ;;  %v4740_v58 = vld [vmem:[#allocation2 + $0x7a] sm:$0xff]  ;;  %v4746_v63 = vld [vmem:[#allocation2 + $0xc2] sm:$0xff] }
 0x599   : > { %v10848_v18 = vadd.f32 %v4685_v51, %v10700_v36  ;;  %v10851_v10 = vadd.f32 %v4686_v53, %v10703_v32  ;;  %v10854_v55 = vadd.f32 %v4687_v9, %v10706_v57  ;;  %v10857_v14 = vadd.f32 %v4688_v43, %v10709_v28  ;;  %v4742_v53 = vld [vmem:[#allocation2 + $0x92] sm:$0xff]  ;;  %v4743_v57 = vld [vmem:[#allocation2 + $0x9a] sm:$0xff]  ;;  %v4744_v4 = vld [vmem:[#allocation2 + $0xaa] sm:$0xff] }
 0x59a   : > { %v4770_v8 = vmul.f32 %v10814_v56, %v4734_v41  ;;  %v10861_v36 = vadd.f32 %v4689_v47, %v10712_v49  ;;  %v10864_v13 = vadd.f32 %v4690_v11, %v10715_v60  ;;  %v10867_v32 = vadd.f32 %v4691_v30, %v10718_v50  ;;  %v4747_v52 = vld [vmem:[#allocation2 + $0xca] sm:$0xff]  ;;  %v10876_v60 = vld [vmem:[%s11679_s16] ss:$0 sm:$0xff]  ;;  %v4749_v30 = vld [vmem:[#allocation2 + $0xe2] sm:$0xff] }
 0x59b   : > { %v4771_v28 = vmul.f32 %v10814_v56, %v4735_v12  ;;  %v4772_v45 = vmul.f32 %v10814_v56, %v4736_v0  ;;  %v4773_v19 = vmul.f32 %v10814_v56, %v4737_v21  ;;  %v4774_v49 = vmul.f32 %v10814_v56, %v4738_v24  ;;  %v4748_v50 = vld [vmem:[#allocation2 + $0xda] sm:$0xff]  ;;  %v4750_v47 = vld [vmem:[#allocation2 + $0xf2] sm:$0xff]  ;;  %v4752_v12 = vld [vmem:[#allocation2 + $0x10a] sm:$0xff] }
 0x59c   : > { %v4802_v48 = vadd.f32 %v4770_v8, %v4702_v54  ;;  %v4775_v1 = vmul.f32 %v10814_v56, %v4739_v35  ;;  %v4776_v51 = vmul.f32 %v10814_v56, %v4740_v58  ;;  %v4777_v9 = vmul.f32 %v10814_v56, %v4741_v40  ;;  %v4751_v11 = vld [vmem:[#allocation2 + $0xfa] sm:$0xff]  ;;  %v4753_v0 = vld [vmem:[#allocation2 + $0x112] sm:$0xff]  ;;  %v4754_v40 = vld [vmem:[#allocation2 + $0x122] sm:$0xff] }
 0x59d   : > { %v4803_v43 = vadd.f32 %v4771_v28, %v4703_v61  ;;  %v4778_v2 = vmul.f32 %v10814_v56, %v4742_v53  ;;  %v4779_v54 = vmul.f32 %v10814_v56, %v4743_v57  ;;  %v4780_v20 = vmul.f32 %v10814_v56, %v4744_v4 }
 0x59e   : > { %v4804_v41 = vadd.f32 %v4772_v45, %v4704_v37  ;;  %v4781_v21 = vmul.f32 %v10814_v56, %v4745_v17  ;;  %v4782_v24 = vmul.f32 %v10814_v56, %v4746_v63  ;;  %v4783_v35 = vmul.f32 %v10814_v56, %v4747_v52  ;;  %v10893_v37 = vld [vmem:[%s11680_s17] ss:$0 sm:$0xff] }
 0x59f   : > { %v4805_v58 = vadd.f32 %v4773_v19, %v4705_v59  ;;  %v4784_v61 = vmul.f32 %v10814_v56, %v4748_v50  ;;  %v4785_v8 = vmul.f32 %v10814_v56, %v4749_v30  ;;  %v4806_v53 = vadd.f32 %v4774_v49, %v4706_v62 }
 0x5a0   : > { %v4840_v57 = vmul.f32 %v10876_v60, %v4802_v48  ;;  %v4786_v4 = vmul.f32 %v10814_v56, %v4750_v47  ;;  %v4787_v28 = vmul.f32 %v10814_v56, %v4751_v11  ;;  %v4807_v17 = vadd.f32 %v4775_v1, %v10818_v23 }
 0x5a1   : > { %v4841_v59 = vmul.f32 %v10876_v60, %v4803_v43  ;;  %v4788_v63 = vmul.f32 %v10814_v56, %v4752_v12  ;;  %v4789_v52 = vmul.f32 %v10814_v56, %v4753_v0  ;;  %v4808_v62 = vadd.f32 %v4776_v51, %v10821_v29 }
 0x5a2   : > { %v4842_v45 = vmul.f32 %v10876_v60, %v4804_v41  ;;  %v4790_v19 = vmul.f32 %v10814_v56, %v4754_v40  ;;  %v4809_v49 = vadd.f32 %v4777_v9, %v10824_v34  ;;  %v4810_v48 = vadd.f32 %v4778_v2, %v10827_v16 }
 0x5a3   : > { %v4843_v50 = vmul.f32 %v10876_v60, %v4805_v58  ;;  %v4811_v23 = vadd.f32 %v4779_v54, %v10830_v15  ;;  %v4812_v30 = vadd.f32 %v4780_v20, %v10833_v33  ;;  %v4844_v1 = vmul.f32 %v10876_v60, %v4806_v53 }
 0x5a4   : > { %v10911_v43 = vadd.f32 %v10893_v37, %v4840_v57  ;;  %v4813_v29 = vadd.f32 %v4781_v21, %v10836_v26  ;;  %v4814_v51 = vadd.f32 %v4782_v24, %v10839_v25  ;;  %v4845_v47 = vmul.f32 %v10876_v60, %v4807_v17 }
 0x5a5   : > { %v10917_v34 = vadd.f32 %v10893_v37, %v4841_v59  ;;  %v4815_v16 = vadd.f32 %v4783_v35, %v10842_v39  ;;  %v4816_v15 = vadd.f32 %v4784_v61, %v10845_v44  ;;  %v4846_v33 = vmul.f32 %v10876_v60, %v4808_v62 }
 0x5a6   : > { %v10923_v9 = vadd.f32 %v10893_v37, %v4842_v45  ;;  %v4817_v11 = vadd.f32 %v4785_v8, %v10848_v18  ;;  %v4818_v26 = vadd.f32 %v4786_v4, %v10851_v10  ;;  %v4847_v25 = vmul.f32 %v10876_v60, %v4809_v49 }
 0x5a7   : > { %v10929_v2 = vadd.f32 %v10893_v37, %v4843_v50  ;;  %v4819_v54 = vadd.f32 %v4787_v28, %v10854_v55  ;;  %v4848_v39 = vmul.f32 %v10876_v60, %v4810_v48  ;;  %v10934_v44 = vadd.f32 %v10893_v37, %v4844_v1 }
 0x5a8   : > { %v6108_v20 = vmul.f32 -1.442695, %v10911_v43  ;;  %v4820_v41 = vadd.f32 %v4788_v63, %v10857_v14  ;;  %v4849_v18 = vmul.f32 %v10876_v60, %v4811_v23  ;;  %v10940_v10 = vadd.f32 %v10893_v37, %v4845_v47 }
 0x5a9   : > { %v6109_v12 = vmul.f32 -1.442695, %v10917_v34  ;;  %v4821_v0 = vadd.f32 %v4789_v52, %v10861_v36  ;;  %v4850_v55 = vmul.f32 %v10876_v60, %v4812_v30  ;;  %v10946_v21 = vadd.f32 %v10893_v37, %v4846_v33 }
 0x5aa   : > { %v6110_v24 = vmul.f32 -1.442695, %v10923_v9  ;;  %v4822_v35 = vadd.f32 %v4790_v19, %v10864_v13  ;;  %v4851_v14 = vmul.f32 %v10876_v60, %v4813_v29  ;;  %v10952_v58 = vadd.f32 %v10893_v37, %v4847_v25  ;;  %v4755_v29 = vld [vmem:[#allocation2 + $0x12a] sm:$0xff] }
 0x5ab   : > { %v6111_v40 = vmul.f32 -1.442695, %v10929_v2  ;;  %v4852_v61 = vmul.f32 %v10876_v60, %v4814_v51  ;;  %v10957_v36 = vadd.f32 %v10893_v37, %v4848_v39  ;;  %7008 = vpow2.f32 %v6108_v20  ;;  %v4756_v20 = vld [vmem:[#allocation2 + $0x13a] sm:$0xff] }
 0x5ac   : > { %v6112_v8 = vmul.f32 -1.442695, %v10934_v44  ;;  %v4853_v53 = vmul.f32 %v10876_v60, %v4815_v16  ;;  %v10962_v57 = vadd.f32 %v10893_v37, %v4849_v18  ;;  %7010 = vpow2.f32 %v6109_v12 }
 0x5ad   : > { %v6113_v13 = vmul.f32 -1.442695, %v10940_v10  ;;  %v4854_v4 = vmul.f32 %v10876_v60, %v4816_v15  ;;  %v10967_v28 = vadd.f32 %v10893_v37, %v4850_v55  ;;  %7012 = vpow2.f32 %v6110_v24 }
 0x5ae   : > { %v6114_v17 = vmul.f32 -1.442695, %v10946_v21  ;;  %v4855_v59 = vmul.f32 %v10876_v60, %v4817_v11  ;;  %v10972_v63 = vadd.f32 %v10893_v37, %v4851_v14  ;;  %7014 = vpow2.f32 %v6111_v40  ;;  %v4758_v14 = vld [vmem:[#allocation2 + $0x152] sm:$0xff] }
 0x5af   : > { %v6115_v52 = vmul.f32 -1.442695, %v10952_v58  ;;  %v4856_v62 = vmul.f32 %v10876_v60, %v4818_v26  ;;  %v10977_v45 = vadd.f32 %v10893_v37, %v4852_v61  ;;  %7016 = vpow2.f32 %v6112_v8 }
 0x5b0   : > { %v6116_v19 = vmul.f32 -1.442695, %v10957_v36  ;;  %v4857_v49 = vmul.f32 %v10876_v60, %v4819_v54  ;;  %v10982_v48 = vadd.f32 %v10893_v37, %v4853_v53  ;;  %7018 = vpow2.f32 %v6113_v13  ;;  %v12383_v13 = vld [vmem:[#allocation130_spill] sm:$0xff] }
 0x5b1   : > { %v6117_v50 = vmul.f32 -1.442695, %v10962_v57  ;;  %v4858_v23 = vmul.f32 %v10876_v60, %v4820_v41  ;;  %v10987_v30 = vadd.f32 %v10893_v37, %v4854_v4  ;;  %7020 = vpow2.f32 %v6114_v17 }
 0x5b2   : > { %v6118_v1 = vmul.f32 -1.442695, %v10967_v28  ;;  %v4859_v51 = vmul.f32 %v10876_v60, %v4821_v0  ;;  %v10992_v47 = vadd.f32 %v10893_v37, %v4855_v59  ;;  %7022 = vpow2.f32 %v6115_v52  ;;  %v12384_v59 = vld [vmem:[#allocation131_spill] sm:$0xff] }
 0x5b3   : > { %v6119_v16 = vmul.f32 -1.442695, %v10972_v63  ;;  %v4860_v15 = vmul.f32 %v10876_v60, %v4822_v35  ;;  %v10997_v33 = vadd.f32 %v10893_v37, %v4856_v62  ;;  %7024 = vpow2.f32 %v6116_v19 }
 0x5b4   : > { %v6120_v11 = vmul.f32 -1.442695, %v10977_v45  ;;  %v4724_v26 = vadd.f32 %v10775_v3, %v10721_v5  ;;  %v11003_v25 = vadd.f32 %v10893_v37, %v4857_v49  ;;  %7026 = vpow2.f32 %v6117_v50  ;;  %v4757_v3 = vld [vmem:[#allocation2 + $0x142] sm:$0xff]  ;;  %v4760_v50 = vld [vmem:[#allocation2 + $0x16a] sm:$0xff] }
 0x5b5   : > { %v6121_v54 = vmul.f32 -1.442695, %v10982_v48  ;;  %v7009_v39 = vpop.eup %7008  ;;  %v4791_v41 = vmul.f32 %v10814_v56, %v4755_v29  ;;  %v11008_v18 = vadd.f32 %v10893_v37, %v4858_v23  ;;  %7028 = vpow2.f32 %v6118_v1 }
 0x5b6   : > { %v6122_v12 = vmul.f32 -1.442695, %v10987_v30  ;;  %v7011_v0 = vpop.eup %7010  ;;  %v4725_v5 = vadd.f32 %v10778_v22, %v10724_v46  ;;  %v11014_v55 = vadd.f32 %v10893_v37, %v4859_v51  ;;  %7030 = vpow2.f32 %v6119_v16 }
 0x5b7   : > { %v6123_v24 = vmul.f32 -1.442695, %v10992_v47  ;;  %v7013_v35 = vpop.eup %7012  ;;  %v4823_v40 = vadd.f32 %v4791_v41, %v10867_v32  ;;  %v11019_v61 = vadd.f32 %v10893_v37, %v4860_v15  ;;  %7032 = vpow2.f32 %v6120_v11  ;;  %v4759_v32 = vld [vmem:[#allocation2 + $0x15a] sm:$0xff] }
 0x5b8   : > { %v6124_v8 = vmul.f32 -1.442695, %v10997_v33  ;;  %v7015_v53 = vpop.eup %7014  ;;  %v4726_v46 = vadd.f32 %v10781_v27, %v12383_v13  ;;  %v4792_v22 = vmul.f32 %v10814_v56, %v4756_v20  ;;  %7034 = vpow2.f32 %v6121_v54  ;;  %v12385_v11 = vld [vmem:[#allocation141_spill] sm:$0xff] }
 0x5b9   : > { %v6125_v4 = vmul.f32 -1.442695, %v11003_v25  ;;  %v7017_v17 = vpop.eup %7016  ;;  %v4727_v52 = vadd.f32 %v10784_v7, %v12384_v59  ;;  %v4793_v62 = vmul.f32 %v10814_v56, %v4757_v3  ;;  %7036 = vpow2.f32 %v6122_v12 }
 0x5ba   : > { %v6126_v19 = vmul.f32 -1.442695, %v11008_v18  ;;  %v7019_v49 = vpop.eup %7018  ;;  %v4794_v23 = vmul.f32 %v10814_v56, %v4758_v14  ;;  %v4824_v27 = vadd.f32 %v4792_v22, %v4724_v26  ;;  %7038 = vpow2.f32 %v6123_v24  ;;  %v4761_v14 = vld [vmem:[#allocation2 + $0x172] sm:$0xff] }
 0x5bb   : > { %v6127_v1 = vmul.f32 -1.442695, %v11014_v55  ;;  %v7021_v29 = vpop.eup %7020  ;;  %v4825_v51 = vadd.f32 %v4793_v62, %v4725_v5  ;;  %v4861_v16 = vmul.f32 %v10876_v60, %v4823_v40  ;;  %7040 = vpow2.f32 %v6124_v8  ;;  %v12388_v62 = vld [vmem:[#allocation50_spill] sm:$0xff] }
 0x5bc   : > { %v6128_v7 = vmul.f32 -1.442695, %v11019_v61  ;;  %v7023_v15 = vpop.eup %7022  ;;  %v4728_v54 = vadd.f32 %v10787_v42, %v12385_v11  ;;  %v4795_v20 = vmul.f32 %v10814_v56, %v4759_v32  ;;  %7042 = vpow2.f32 %v6125_v4  ;;  %v12387_v32 = vld [vmem:[#allocation108_spill] sm:$0xff] }
 0x5bd   : > { %v5006_v41 = vadd.f32 1.0, %v7009_v39  ;;  %v7025_v12 = vpop.eup %7024  ;;  %v4796_v26 = vmul.f32 %v10814_v56, %v4760_v50  ;;  %v4826_v3 = vadd.f32 %v4794_v23, %v4726_v46  ;;  %7044 = vpow2.f32 %v6126_v19  ;;  %v12386_v46 = vld [vmem:[#allocation12_spill] sm:$0xff] }
 0x5be   : > { %v5007_v24 = vadd.f32 1.0, %v7011_v0  ;;  %v7027_v5 = vpop.eup %7026  ;;  %v4827_v40 = vadd.f32 %v4795_v20, %v4727_v52  ;;  %v4862_v8 = vmul.f32 %v10876_v60, %v4824_v27  ;;  %7046 = vpow2.f32 %v6127_v1  ;;  %v12390_v20 = vld [vmem:[#allocation109_spill] sm:$0xff] }
 0x5bf   : > { %v5008_v13 = vadd.f32 1.0, %v7013_v35  ;;  %v7029_v22 = vpop.eup %7028  ;;  %v4863_v42 = vmul.f32 %v10876_v60, %v4825_v51  ;;  %v11041_v59 = vadd.f32 %v10893_v37, %v4861_v16  ;;  %7048 = vpow2.f32 %v6128_v7 }
 0x5c0   : > { %v5009_v39 = vadd.f32 1.0, %v7015_v53  ;;  %v11043_v4 = vpop.eup %7030  ;;  %v4729_v0 = vadd.f32 %v12387_v32, %v12386_v46  ;;  %v4730_v52 = vadd.f32 %v10794_v38, %v12388_v62  ;;  %v5010_v19 = vadd.f32 1.0, %v7017_v17 }
 0x5c1   : > { %7050 = vrcp.f32 %v5006_v41  ;;  %v7033_v50 = vpop.eup %7032  ;;  %v4797_v35 = vmul.f32 %v10814_v56, %v4761_v14  ;;  %v4828_v23 = vadd.f32 %v4796_v26, %v4728_v54  ;;  %v5011_v27 = vadd.f32 1.0, %v7019_v49  ;;  %v12389_v54 = vld [vmem:[#allocation99_spill] sm:$0xff] }
 0x5c2   : > { %7052 = vrcp.f32 %v5007_v24  ;;  %v11050_v1 = vpop.eup %7034  ;;  %v4864_v53 = vmul.f32 %v10876_v60, %v4826_v3  ;;  %v11054_v51 = vadd.f32 %v10893_v37, %v4862_v8  ;;  %v5012_v16 = vadd.f32 1.0, %v7021_v29  ;;  %v12391_v24 = vld [vmem:[#allocation100_spill] sm:$0xff] }
 0x5c3   : > { %7054 = vrcp.f32 %v5008_v13  ;;  %v11056_v7 = vpop.eup %7036  ;;  %v4865_v38 = vmul.f32 %v10876_v60, %v4827_v40  ;;  %v11060_v17 = vadd.f32 %v10893_v37, %v4863_v42  ;;  %v6129_v11 = vmul.f32 -1.442695, %v11041_v59  ;;  %v12392_v40 = vld [vmem:[#allocation78_spill] sm:$0xff] }
 0x5c4   : > { %7056 = vrcp.f32 %v5009_v39  ;;  %v11063_v49 = vpop.eup %7038  ;;  %v4731_v41 = vadd.f32 %v12390_v20, %v12389_v54  ;;  %v4829_v26 = vadd.f32 %v4797_v35, %v4729_v0  ;;  %v5013_v3 = vadd.f32 1.0, %v7023_v15  ;;  %v4764_v39 = vld [vmem:[#allocation2 + $0x19a] sm:$0xff] }
 0x5c5   : > { %7058 = vrcp.f32 %v5010_v19  ;;  %v11067_v29 = vpop.eup %7040  ;;  %v4732_v14 = vadd.f32 %v10801_v6, %v12391_v24  ;;  %v4798_v8 = vmul.f32 %v10814_v56, %v12392_v40  ;;  %v5014_v13 = vadd.f32 1.0, %v7025_v12  ;;  %v12393_v35 = vld [vmem:[#allocation80_spill] sm:$0xff] }
 0x5c6   : > { %7060 = vrcp.f32 %v5011_v27  ;;  %v11073_v42 = vpop.eup %7042  ;;  %v4866_v46 = vmul.f32 %v10876_v60, %v4828_v23  ;;  %v11077_v32 = vadd.f32 %v10893_v37, %v4864_v53  ;;  %v6130_v15 = vmul.f32 -1.442695, %v11054_v51 }
 0x5c7   : > { %7062 = vrcp.f32 %v5012_v16  ;;  %v11080_v0 = vpop.eup %7044  ;;  %v4830_v62 = vadd.f32 %v4798_v8, %v4730_v52  ;;  %v11083_v6 = vadd.f32 %v10893_v37, %v4865_v38  ;;  %v6131_v12 = vmul.f32 -1.442695, %v11060_v17  ;;  %v12394_v16 = vld [vmem:[#allocation107_spill] sm:$0xff] }
 0x5c8   : > { %7064 = vpow2.f32 %v6129_v11  ;;  %v11086_v19 = vpop.eup %7046  ;;  %v4799_v23 = vmul.f32 %v10814_v56, %v12393_v35  ;;  %v4867_v27 = vmul.f32 %v10876_v60, %v4829_v26  ;;  %v5015_v53 = vadd.f32 1.0, %v7027_v5 }
 0x5c9   : > { %7066 = vrcp.f32 %v5013_v3  ;;  %v11091_v54 = vpop.eup %7048  ;;  %v4733_v52 = vadd.f32 %v10804_v31, %v12394_v16  ;;  %v4800_v38 = vmul.f32 %v10814_v56, %v4764_v39  ;;  %v5016_v20 = vadd.f32 1.0, %v7029_v22 }
 0x5ca   : > { %7068 = vrcp.f32 %v5014_v13  ;;  %v4831_v24 = vadd.f32 %v4799_v23, %v4731_v41  ;;  %v11097_v40 = vadd.f32 %v10893_v37, %v4866_v46  ;;  %v6132_v8 = vmul.f32 -1.442695, %v11077_v32 }
 0x5cb   : > { %v7051_v11 = vpop.eup %7050  ;;  %7070 = vpow2.f32 %v6130_v15  ;;  %v4868_v5 = vmul.f32 %v10876_v60, %v4830_v62  ;;  %v6133_v3 = vmul.f32 -1.442695, %v11083_v6  ;;  %v11106_v22 = vadd.f32 %v10893_v37, %v4867_v27  ;;  %v4765_v15 = vld [vmem:[#allocation2 + $0x1a2] sm:$0xff] }
 0x5cc   : > { %v7053_v26 = vpop.eup %7052  ;;  %7072 = vpow2.f32 %v6131_v12  ;;  %v11103_v31 = vmul.f32 %v7051_v11, %v10911_v43  ;;  %v5017_v41 = vadd.f32 1.0, %v11043_v4  ;;  %v5018_v35 = vadd.f32 1.0, %v7033_v50 }
 0x5cd   : > { %v7055_v39 = vpop.eup %7054  ;;  %7074 = vrcp.f32 %v5015_v53  ;;  %v11110_v13 = vmul.f32 %v7053_v26, %v10917_v34  ;;  %v6134_v23 = vmul.f32 -1.442695, %v11097_v40  ;;  %v4832_v11 = vadd.f32 %v4800_v38, %v4732_v14 }
 0x5ce   : > { %v7057_v46 = vpop.eup %7056  ;;  %7076 = vrcp.f32 %v5016_v20  ;;  %v11113_v62 = vmul.f32 %v7055_v39, %v10923_v9  ;;  %v5136_v43 = vsel %vm738_vm1, %v11103_v31, 0.0  ;;  %v4801_v20 = vmul.f32 %v10814_v56, %v4765_v15 }
 0x5cf   : > { %v7059_v12 = vpop.eup %7058  ;;  %7078 = vpow2.f32 %v6132_v8  ;;  %v11119_v4 = vmul.f32 %v7057_v46, %v10929_v2  ;;  %v5137_v34 = vsel %vm738_vm1, %v11110_v13, 0.0  ;;  %v5019_v8 = vadd.f32 1.0, %v11050_v1 }
 0x5d0   : > { %v7061_v27 = vpop.eup %7060  ;;  %7080 = vpow2.f32 %v6133_v3  ;;  %v11124_v50 = vmul.f32 %v7059_v12, %v10934_v44  ;;  %v5138_v9 = vadd.f32 %v5137_v34, %v5136_v43  ;;  %v5139_v53 = vsel %vm738_vm1, %v11113_v62, 0.0 }
 0x5d1   : > { %v7063_v16 = vpop.eup %7062  ;;  %7082 = vrcp.f32 %v5017_v41  ;;  %v4869_v26 = vmul.f32 %v10876_v60, %v4831_v24  ;;  %v5020_v3 = vadd.f32 1.0, %v11056_v7  ;;  %v11135_v46 = vmul.f32 %v7061_v27, %v10940_v10 }
 0x5d2   : > { %v11130_v2 = vpop.eup %7064  ;;  %7084 = vrcp.f32 %v5018_v35  ;;  %v5140_v44 = vadd.f32 %v5139_v53, %v5138_v9  ;;  %v11138_v43 = vmul.f32 %v7063_v16, %v10946_v21  ;;  %v5141_v56 = vsel %vm738_vm1, %v11119_v4, 0.0 }
 0x5d3   : > { %v7067_v39 = vpop.eup %7066  ;;  %v5143_v1 = vsel %vm738_vm1, %v11124_v50, 0.0  ;;  %v11145_v38 = vadd.f32 %v10893_v37, %v4868_v5  ;;  %7086 = vpow2.f32 %v6134_v23  ;;  %v6135_v7 = vmul.f32 -1.442695, %v11106_v22 }
 0x5d4   : > { %v7069_v14 = vpop.eup %7068  ;;  %v5142_v24 = vadd.f32 %v5141_v56, %v5140_v44  ;;  %v4833_v10 = vadd.f32 %v4801_v20, %v4733_v52  ;;  %v5021_v15 = vadd.f32 1.0, %v11063_v49  ;;  %7088 = vrcp.f32 %v5019_v8 }
 0x5d5   : > { %v7071_v41 = vpop.eup %7070  ;;  %v4870_v35 = vmul.f32 %v10876_v60, %v4832_v11  ;;  %v5022_v12 = vadd.f32 1.0, %v11067_v29  ;;  %7090 = vrcp.f32 %v5020_v3  ;;  %v11154_v5 = vmul.f32 %v7067_v39, %v10952_v58 }
 0x5d6   : > { %v11149_v21 = vpop.eup %7072  ;;  %v5144_v34 = vadd.f32 %v5143_v1, %v5142_v24  ;;  %v11157_v23 = vmul.f32 %v7069_v14, %v10957_v36  ;;  %v5145_v52 = vsel %vm738_vm1, %v11135_v46, 0.0  ;;  %v5147_v49 = vsel %vm738_vm1, %v11138_v43, 0.0 }
 0x5d7   : > { %v7075_v27 = vpop.eup %7074  ;;  %v11164_v53 = vadd.f32 %v10893_v37, %v4869_v26  ;;  %7092 = vpow2.f32 %v6135_v7  ;;  %v6136_v29 = vmul.f32 -1.442695, %v11145_v38  ;;  %v5023_v58 = vadd.f32 1.0, %v11073_v42 }
 0x5d8   : > { %v7077_v9 = vpop.eup %7076  ;;  %v5146_v16 = vadd.f32 %v5145_v52, %v5144_v34  ;;  %7094 = vrcp.f32 %v5021_v15  ;;  %v4871_v11 = vmul.f32 %v10876_v60, %v4833_v10  ;;  %v5024_v8 = vadd.f32 1.0, %v11080_v0 }
 0x5d9   : > { %v7079_v20 = vpop.eup %7078  ;;  %7096 = vrcp.f32 %v5022_v12  ;;  %v11171_v39 = vmul.f32 %v7075_v27, %v10962_v57  ;;  %v11174_v26 = vmul.f32 %v7077_v9, %v10967_v28  ;;  %v5149_v56 = vsel %vm738_vm1, %v11154_v5, 0.0 }
 0x5da   : > { %v7081_v36 = vpop.eup %7080  ;;  %v5148_v3 = vadd.f32 %v5147_v49, %v5146_v16  ;;  %v5151_v42 = vsel %vm738_vm1, %v11157_v23, 0.0  ;;  %v11181_v60 = vadd.f32 %v10893_v37, %v4870_v35  ;;  %7098 = vpow2.f32 %v6136_v29 }
 0x5db   : > { %v7083_v44 = vpop.eup %7082  ;;  %v6137_v0 = vmul.f32 -1.442695, %v11164_v53  ;;  %v5025_v57 = vadd.f32 1.0, %v11086_v19  ;;  %7100 = vrcp.f32 %v5023_v58  ;;  %v5026_v28 = vadd.f32 1.0, %v11091_v54 }
 0x5dc   : > { %v7085_v1 = vpop.eup %7084  ;;  %v5150_v14 = vadd.f32 %v5149_v56, %v5148_v3  ;;  %7102 = vrcp.f32 %v5024_v8  ;;  %v11187_v15 = vmul.f32 %v7083_v44, %v10972_v63  ;;  %v5153_v35 = vsel %vm738_vm1, %v11171_v39, 0.0 }
 0x5dd   : > { %v7087_v7 = vpop.eup %7086  ;;  %v11190_v12 = vmul.f32 %v7085_v1, %v10977_v45  ;;  %v5155_v34 = vsel %vm738_vm1, %v11174_v26, 0.0  ;;  %v11197_v27 = vadd.f32 %v10893_v37, %v4871_v11  ;;  %7104 = vpow2.f32 %v6137_v0 }
 0x5de   : > { %v5152_v24 = vadd.f32 %v5151_v42, %v5150_v14  ;;  %v7089_v10 = vpop.eup %7088  ;;  %v6138_v54 = vmul.f32 -1.442695, %v11181_v60  ;;  %v5027_v63 = vadd.f32 1.0, %v11130_v2  ;;  %7106 = vrcp.f32 %v5025_v57 }
 0x5df   : > { %v7091_v19 = vpop.eup %7090  ;;  %v5028_v45 = vadd.f32 1.0, %v7071_v41  ;;  %7108 = vrcp.f32 %v5026_v28  ;;  %v11202_v16 = vmul.f32 %v7089_v10, %v10982_v48  ;;  %v5157_v37 = vsel %vm738_vm1, %v11187_v15, 0.0 }
 0x5e0   : > { %v5154_v52 = vadd.f32 %v5153_v35, %v5152_v24  ;;  %v11205_v58 = vmul.f32 %v7091_v19, %v10987_v30  ;;  %v5159_v11 = vsel %vm738_vm1, %v11190_v12, 0.0  ;;  %7110 = vpow2.f32 %v6138_v54 }
 0x5e1   : > { %v7093_v49 = vpop.eup %7092  ;;  %v6139_v2 = vmul.f32 -1.442695, %v11197_v27  ;;  %v5029_v3 = vadd.f32 1.0, %v11149_v21  ;;  %7112 = vrcp.f32 %v5027_v63  ;;  %v5030_v48 = vadd.f32 1.0, %v7079_v20 }
 0x5e2   : > { %v5156_v9 = vadd.f32 %v5155_v34, %v5154_v52  ;;  %v7095_v29 = vpop.eup %7094  ;;  %7114 = vrcp.f32 %v5028_v45  ;;  %v5161_v0 = vsel %vm738_vm1, %v11202_v16, 0.0  ;;  %v5163_v14 = vsel %vm738_vm1, %v11205_v58, 0.0 }
 0x5e3   : > { %v7097_v8 = vpop.eup %7096  ;;  %v11214_v42 = vmul.f32 %v7095_v29, %v10992_v47  ;;  %7116 = vpow2.f32 %v6139_v2  ;;  %v5031_v28 = vadd.f32 1.0, %v7081_v36  ;;  %v5032_v24 = vadd.f32 1.0, %v7087_v7 }
 0x5e4   : > { %v5158_v41 = vadd.f32 %v5157_v37, %v5156_v9  ;;  %v7099_v44 = vpop.eup %7098  ;;  %v11217_v1 = vmul.f32 %v7097_v8, %v10997_v33  ;;  %7118 = vrcp.f32 %v5029_v3  ;;  %v5033_v52 = vadd.f32 1.0, %v7093_v49 }
 0x5e5   : > { %v7101_v30 = vpop.eup %7100  ;;  %7120 = vrcp.f32 %v5030_v48  ;;  %v5165_v34 = vsel %vm738_vm1, %v11214_v42, 0.0  ;;  %v5034_v63 = vadd.f32 1.0, %v7099_v44 }
 0x5e6   : > { %v5160_v56 = vadd.f32 %v5159_v11, %v5158_v41  ;;  %v7103_v57 = vpop.eup %7102  ;;  %v11224_v35 = vmul.f32 %v7101_v30, %v11003_v25  ;;  %v5167_v19 = vsel %vm738_vm1, %v11217_v1, 0.0  ;;  %7122 = vrcp.f32 %v5031_v28 }
 0x5e7   : > { %v7105_v20 = vpop.eup %7104  ;;  %v11227_v33 = vmul.f32 %v7103_v57, %v11008_v18  ;;  %7124 = vrcp.f32 %v5032_v24 }
 0x5e8   : > { %v5162_v21 = vadd.f32 %v5161_v0, %v5160_v56  ;;  %v7107_v47 = vpop.eup %7106  ;;  %v5169_v29 = vsel %vm738_vm1, %v11224_v35, 0.0  ;;  %v5035_v8 = vadd.f32 1.0, %v7105_v20  ;;  %7126 = vrcp.f32 %v5033_v52 }
 0x5e9   : > { %v7109_v54 = vpop.eup %7108  ;;  %v11234_v25 = vmul.f32 %v7107_v47, %v11014_v55  ;;  %v5171_v37 = vsel %vm738_vm1, %v11227_v33, 0.0  ;;  %7128 = vrcp.f32 %v5034_v63 }
 0x5ea   : > { %v5164_v10 = vadd.f32 %v5163_v14, %v5162_v21  ;;  %v7111_v7 = vpop.eup %7110  ;;  %v11237_v18 = vmul.f32 %v7109_v54, %v11019_v61  ;;  %7130 = vrcp.f32 %v5035_v8 }
 0x5eb   : > { %v7113_v9 = vpop.eup %7112  ;;  %v5036_v41 = vadd.f32 1.0, %v7111_v7  ;;  %v5173_v48 = vsel %vm738_vm1, %v11234_v25, 0.0 }
 0x5ec   : > { %v5166_v36 = vadd.f32 %v5165_v34, %v5164_v10  ;;  %v7115_v11 = vpop.eup %7114  ;;  %v11244_v55 = vmul.f32 %v7113_v9, %v11041_v59  ;;  %v5175_v56 = vsel %vm738_vm1, %v11237_v18, 0.0 }
 0x5ed   : > { %v7117_v2 = vpop.eup %7116  ;;  %v11247_v61 = vmul.f32 %v7115_v11, %v11054_v51  ;;  %7132 = vrcp.f32 %v5036_v41 }
 0x5ee   : > { %v5168_v45 = vadd.f32 %v5167_v19, %v5166_v36  ;;  %v7119_v44 = vpop.eup %7118  ;;  %v5037_v14 = vadd.f32 1.0, %v7117_v2  ;;  %v5177_v51 = vsel %vm738_vm1, %v11244_v55, 0.0 }
 0x5ef   : > { %v7121_v30 = vpop.eup %7120  ;;  %v11254_v28 = vmul.f32 %v7119_v44, %v11060_v17  ;;  %v5179_v20 = vsel %vm738_vm1, %v11247_v61, 0.0 }
 0x5f0   : > { %v5170_v49 = vadd.f32 %v5169_v29, %v5168_v45  ;;  %v7123_v21 = vpop.eup %7122  ;;  %v11257_v59 = vmul.f32 %v7121_v30, %v11077_v32  ;;  %7134 = vrcp.f32 %v5037_v14 }
 0x5f1   : > { %v7125_v24 = vpop.eup %7124  ;;  %v11264_v19 = vmul.f32 %v7123_v21, %v11083_v6  ;;  %v5181_v32 = vsel %vm738_vm1, %v11254_v28, 0.0 }
 0x5f2   : > { %v5172_v3 = vadd.f32 %v5171_v37, %v5170_v49  ;;  %v7127_v34 = vpop.eup %7126  ;;  %v11267_v17 = vmul.f32 %v7125_v24, %v11097_v40  ;;  %v5183_v54 = vsel %vm738_vm1, %v11257_v59, 0.0 }
 0x5f3   : > { %v7129_v36 = vpop.eup %7128  ;;  %v11274_v45 = vmul.f32 %v7127_v34, %v11106_v22  ;;  %v5185_v6 = vsel %vm738_vm1, %v11264_v19, 0.0 }
 0x5f4   : > { %v5174_v0 = vadd.f32 %v5173_v48, %v5172_v3  ;;  %v7131_v63 = vpop.eup %7130  ;;  %v11277_v9 = vmul.f32 %v7129_v36, %v11145_v38  ;;  %v5187_v40 = vsel %vm738_vm1, %v11267_v17, 0.0 }
 0x5f5   : > { %v11284_v49 = vmul.f32 %v7131_v63, %v11164_v53  ;;  %v5189_v22 = vsel %vm738_vm1, %v11274_v45, 0.0 }
 0x5f6   : > { %v5176_v57 = vadd.f32 %v5175_v56, %v5174_v0  ;;  %v5191_v38 = vsel %vm738_vm1, %v11277_v9, 0.0 }
 0x5f7   : > { %v7133_v29 = vpop.eup %7132  ;;  %v5193_v48 = vsel %vm738_vm1, %v11284_v49, 0.0 }
 0x5f8   : > { %v5178_v10 = vadd.f32 %v5177_v51, %v5176_v57  ;;  %v11287_v8 = vmul.f32 %v7133_v29, %v11181_v60 }
 0x5fa   : > { %v5180_v47 = vadd.f32 %v5179_v20, %v5178_v10  ;;  %v7135_v2 = vpop.eup %7134  ;;  %v5195_v53 = vsel %vm738_vm1, %v11287_v8, 0.0 }
 0x5fb   : > { %v11294_v44 = vmul.f32 %v7135_v2, %v11197_v27  ;;  %v5134_v27 = vld [vmem:[%s11681_s18] sm:$0x3] }
 0x5fc   : > { %v5182_v52 = vadd.f32 %v5181_v32, %v5180_v47 }
 0x5fd   : > { %v5197_v30 = vsel %vm738_vm1, %v11294_v44, 0.0 }
 0x5fe   : > { %v5184_v7 = vadd.f32 %v5183_v54, %v5182_v52  ;;  %v5276_v54 = vld [vmem:[%s11683_s20] sm:$0xff] }
 0x5ff   : > { %6519 = vmatprep.subr.mxu1 %v5276_v54 }
 0x600   : > { %v5186_v37 = vadd.f32 %v5185_v6, %v5184_v7  ;;  %6520 = vmatpush3.msra.mxu1 %v5276_v54 }
 0x602   : > { %v5188_v11 = vadd.f32 %v5187_v40, %v5186_v37 }
 0x604   : > { %v5190_v41 = vadd.f32 %v5189_v22, %v5188_v11  ;;  %v5135_v22 = vld [vmem:[%s11682_s19] sm:$0x3] }
 0x606   : > { %v5192_v3 = vadd.f32 %v5191_v38, %v5190_v41 }
 0x608   : > { %v5194_v60 = vadd.f32 %v5193_v48, %v5192_v3 }
 0x60a   : > { %v5196_v56 = vadd.f32 %v5195_v53, %v5194_v60 }
 0x60c   : > { %v5198_v0 = vadd.f32 %v5197_v30, %v5196_v56 }
 0x60e   : > { %v5199_v14 = vrot.slane %v5198_v0, 4 }
 0x610   : > { %v5200_v57 = vadd.f32 %v5199_v14, %v5198_v0 }
 0x612   : > { %v5201_v21 = vrot.slane %v5200_v57, 2 }
 0x614   : > { %v5202_v51 = vadd.f32 %v5201_v21, %v5200_v57  ;;  %v12395_v57 = vld [vmem:[#allocation4_spill] sm:$0xff] }
 0x616   : > { %v5203_v20 = vrot.slane %v5202_v51, 1 }
 0x618   : > { %v5204_v24 = vadd.f32 %v5203_v20, %v5202_v51 }
 0x61a   : > { %v5205_v10 = vmul.f32 0.00390625, %v5204_v24 }
 0x61c   : > { %v5206_v47 = vmul.f32 %v5205_v10, %v5134_v27 }
 0x61e   : > { %v5219_v34 = vsel %vm2780_vm4, %v5206_v47, 0.0  ;;  %v5207_v32 = vsel %vm2767_vm5, %v5206_v47, 0.0 }
 0x61f   : > { %5220 = vadd.xlane.f32.xlu1 %v5219_v34 }
 0x623   : > { %5208 = vadd.xlane.f32.xlu1 %v5207_v32 }
 0x6ac   : > { %v5221_v36 = vpop.xlane.xlu1 %5220 }
 0x6ad   : > { %v6141_v52 = vmul.f32 -1.442695, %v5221_v36 }
 0x6af   : > { %7136 = vpow2.f32 %v6141_v52  ;;  %v12396_v52 = vld [vmem:[#allocation17_spill] sm:$0xff] }
 0x6b0   : > { %v5209_v7 = vpop.xlane.xlu1 %5208 }
 0x6b1   : > { %v6140_v63 = vmul.f32 -1.442695, %v5209_v7 }
 0x6b3   : > { %7138 = vpow2.f32 %v6140_v63 }
 0x6b9   : > { %v7137_v6 = vpop.eup %7136 }
 0x6ba   : > { %v5225_v40 = vadd.f32 1.0, %v7137_v6 }
 0x6bc   : > { %7140 = vrcp.f32 %v5225_v40  ;;  %v12397_v40 = vld [vmem:[#allocation25_spill] sm:$0xff] }
 0x6bd   : > { %v7139_v29 = vpop.eup %7138 }
 0x6be   : > { %v5213_v37 = vadd.f32 1.0, %v7139_v29 }
 0x6c0   : > { %7142 = vrcp.f32 %v5213_v37 }
 0x6c6   : > { %v7141_v11 = vpop.eup %7140 }
 0x6c7   : > { %v5228_v38 = vmul.f32 %v7141_v11, %v5221_v36 }
 0x6c9   : > { %v5229_v2 = vmul.f32 %v5228_v38, %v5135_v22 }
 0x6ca   : > { %v7143_v41 = vpop.eup %7142 }
 0x6cb   : > { %v5216_v3 = vmul.f32 %v7143_v41, %v5209_v7  ;;  %v5231_v48 = vrot.slane %v5229_v2, 1  ;;  %v12398_v41 = vld [vmem:[#allocation46_spill] sm:$0xff] }
 0x6cd   : > { %v5217_v53 = vmul.f32 %v5216_v3, %v5135_v22 }
 0x6cf   : > { %v5233_v60 = vadd.f32 %v5231_v48, %v5217_v53 }
 0x6d1   : > { %v6142_v56 = vmul.f32 -1.442695, %v5233_v60  ;;  %v12399_v60 = vld [vmem:[#allocation32_spill] sm:$0xff] }
 0x6d3   : > { %7144 = vpow2.f32 %v6142_v56 }
 0x6dd   : > { %v7145_v30 = vpop.eup %7144 }
 0x6de   : > { %v5237_v0 = vadd.f32 1.0, %v7145_v30 }
 0x6e0   : > { %7146 = vrcp.f32 %v5237_v0 }
 0x6ea   : > { %v7147_v14 = vpop.eup %7146 }
 0x6eb   : > { %v11314_v21 = vrot.slane %v7147_v14, %v12395_v57 }
 0x6ed   : > { %v5244_v51 = vmul.f32 %v11314_v21, %v11103_v31  ;;  %v5245_v20 = vmul.f32 %v11314_v21, %v11110_v13  ;;  %v5246_v24 = vmul.f32 %v11314_v21, %v11113_v62  ;;  %v5247_v27 = vmul.f32 %v11314_v21, %v11119_v4 }
 0x6ee   : > { %v5248_v10 = vmul.f32 %v11314_v21, %v11124_v50  ;;  %v5249_v31 = vmul.f32 %v11314_v21, %v11135_v46  ;;  %v5250_v13 = vmul.f32 %v11314_v21, %v11138_v43  ;;  %v5251_v62 = vmul.f32 %v11314_v21, %v11154_v5 }
 0x6ef   : > { %6521 = vmatprep.mubr.msk.f32.mxu1 %vm738_vm1, %v5244_v51  ;;  %v5252_v4 = vmul.f32 %v11314_v21, %v11157_v23  ;;  %v5253_v50 = vmul.f32 %v11314_v21, %v11171_v39  ;;  %v5254_v46 = vmul.f32 %v11314_v21, %v11174_v26  ;;  %v5255_v43 = vmul.f32 %v11314_v21, %v11187_v15  ;;  %v12400_v51 = vld [vmem:[#allocation41_spill] sm:$0xff] }
 0x6f0   : > { %6522 = vmatmul.mubr.msk.f32.vlgmr.msra.gmra.mrb[40].mxu1 %vm738_vm1, %v5245_v20  ;;  %v5256_v5 = vmul.f32 %v11314_v21, %v11190_v12  ;;  %v5257_v23 = vmul.f32 %v11314_v21, %v11202_v16  ;;  %v5258_v39 = vmul.f32 %v11314_v21, %v11205_v58  ;;  %v5259_v26 = vmul.f32 %v11314_v21, %v11214_v42 }
 0x6f1   : > { %6524 = vmatprep.mubr.msk.f32.mxu1 %vm738_vm1, %v5246_v24  ;;  %v5260_v15 = vmul.f32 %v11314_v21, %v11217_v1  ;;  %v5261_v12 = vmul.f32 %v11314_v21, %v11224_v35  ;;  %v5262_v16 = vmul.f32 %v11314_v21, %v11227_v33  ;;  %v5263_v58 = vmul.f32 %v11314_v21, %v11234_v25 }
 0x6f2   : > { %v5264_v42 = vmul.f32 %v11314_v21, %v11237_v18  ;;  %v5265_v1 = vmul.f32 %v11314_v21, %v11244_v55  ;;  %v5266_v35 = vmul.f32 %v11314_v21, %v11247_v61  ;;  %v5267_v33 = vmul.f32 %v11314_v21, %v11254_v28 }
 0x6f3   : > { %v5268_v25 = vmul.f32 %v11314_v21, %v11257_v59  ;;  %v5269_v18 = vmul.f32 %v11314_v21, %v11264_v19  ;;  %v5270_v55 = vmul.f32 %v11314_v21, %v11267_v17  ;;  %v5271_v61 = vmul.f32 %v11314_v21, %v11274_v45  ;;  %v5709_v45 = vld [vmem:[%s11686_s23 + $0x8] sm:$0xff] }
 0x6f4   : > { %6525 = vmatmul.mubr.msk.f32.gmra.mrb[42].mxu1 %vm738_vm1, %v5247_v27  ;;  %v5272_v28 = vmul.f32 %v11314_v21, %v11277_v9  ;;  %v5273_v59 = vmul.f32 %v11314_v21, %v11284_v49  ;;  %v5274_v19 = vmul.f32 %v11314_v21, %v11287_v8  ;;  %v5275_v17 = vmul.f32 %v11314_v21, %v11294_v44  ;;  %v11418_v9 = vld [vmem:[%s11684_s21] ss:$0 sm:$0xff] }
 0x6f5   : > { %6527 = vmatprep.mubr.msk.f32.mxu1 %vm738_vm1, %v5248_v10  ;;  %5788 = vmatprep.mubr.f32.mxu0 %v5709_v45  ;;  %v11423_v49 = vld [vmem:[%s11685_s22] ss:$0 sm:$0xff]  ;;  %v12401_v10 = vld [vmem:[#allocation42_spill] sm:$0xff] }
 0x6f8   : > { %6528 = vmatmul.mubr.msk.f32.gmra.mrb[44].mxu1 %vm738_vm1, %v5249_v31 }
 0x6f9   : > { %6530 = vmatprep.mubr.msk.f32.mxu1 %vm738_vm1, %v5250_v13 }
 0x6fc   : > { %6531 = vmatmul.mubr.msk.f32.gmra.mrb[46].mxu1 %vm738_vm1, %v5251_v62 }
 0x6fd   : > { %6533 = vmatprep.mubr.msk.f32.mxu1 %vm738_vm1, %v5252_v4 }
 0x700   : > { %6534 = vmatmul.mubr.msk.f32.gmra.mrb[48].mxu1 %vm738_vm1, %v5253_v50 }
 0x701   : > { %6536 = vmatprep.mubr.msk.f32.mxu1 %vm738_vm1, %v5254_v46 }
 0x704   : > { %6537 = vmatmul.mubr.msk.f32.gmra.mrb[50].mxu1 %vm738_vm1, %v5255_v43  ;;  %v12402_v43 = vld [vmem:[#allocation6_spill] sm:$0xff] }
 0x705   : > { %6539 = vmatprep.mubr.msk.f32.mxu1 %vm738_vm1, %v5256_v5 }
 0x708   : > { %6540 = vmatmul.mubr.msk.f32.gmra.mrb[52].mxu1 %vm738_vm1, %v5257_v23 }
 0x709   : > { %6542 = vmatprep.mubr.msk.f32.mxu1 %vm738_vm1, %v5258_v39 }
 0x70c   : > { %6543 = vmatmul.mubr.msk.f32.gmra.mrb[54].mxu1 %vm738_vm1, %v5259_v26  ;;  %v12403_v26 = vld [vmem:[#allocation39_spill] sm:$0xff] }
 0x70d   : > { %6545 = vmatprep.mubr.msk.f32.mxu1 %vm738_vm1, %v5260_v15 }
 0x710   : > { %6546 = vmatmul.mubr.msk.f32.gmra.mrb[56].mxu1 %vm738_vm1, %v5261_v12 }
 0x711   : > { %6548 = vmatprep.mubr.msk.f32.mxu1 %vm738_vm1, %v5262_v16 }
 0x714   : > { %6549 = vmatmul.mubr.msk.f32.gmra.mrb[58].mxu1 %vm738_vm1, %v5263_v58 }
 0x715   : > { %6551 = vmatprep.mubr.msk.f32.mxu1 %vm738_vm1, %v5264_v42 }
 0x718   : > { %6552 = vmatmul.mubr.msk.f32.gmra.mrb[60].mxu1 %vm738_vm1, %v5265_v1 }
 0x719   : > { %6554 = vmatprep.mubr.msk.f32.mxu1 %vm738_vm1, %v5266_v35  ;;  %v12404_v35 = vld [vmem:[#allocation21_spill] sm:$0xff] }
 0x71c   : > { %6555 = vmatmul.mubr.msk.f32.gmra.mrb[62].mxu1 %vm738_vm1, %v5267_v33 }
 0x71d   : > { %6557 = vmatprep.mubr.msk.f32.mxu1 %vm738_vm1, %v5268_v25 }
 0x720   : > { %6558 = vmatmul.mubr.msk.f32.gmra.mrb[64].mxu1 %vm738_vm1, %v5269_v18 }
 0x721   : > { %6560 = vmatprep.mubr.msk.f32.mxu1 %vm738_vm1, %v5270_v55  ;;  %v12405_v55 = vld [vmem:[#allocation40_spill] sm:$0xff] }
 0x724   : > { %6561 = vmatmul.mubr.msk.f32.gmra.mrb[66].mxu1 %vm738_vm1, %v5271_v61 }
 0x725   : > { %6563 = vmatprep.mubr.msk.f32.mxu1 %vm738_vm1, %v5272_v28 }
 0x728   : > { %6564 = vmatmul.mubr.msk.f32.gmra.mrb[68].mxu1 %vm738_vm1, %v5273_v59 }
 0x729   : > { %6566 = vmatprep.mubr.msk.f32.mxu1 %vm738_vm1, %v5274_v19 }
 0x72c   : > { %6567 = vmatmul.mubr.msk.f32.gmra.mrb[70].mxu1 %vm738_vm1, %v5275_v17 }
 0x7c3   : > { %v6523_v8 = vpop.f32.mrb[40].mxu1 }
 0x7c4   : > { %v5607_v44 = vmul.f32 %v6523_v8, %v11418_v9  ;;  %v5441_v47 = vpop.f32.mrb[41].mxu1  ;;  %v12406_v8 = vld [vmem:[#allocation47_spill] sm:$0xff] }
 0x7c5   : > { %v5606_v34 = vmul.f32 %v11418_v9, %v5441_v47 }
 0x7c6   : > { %v5645_v32 = vadd.f32 %v11423_v49, %v5607_v44 }
 0x7c7   : > { %v5644_v54 = vadd.f32 %v11423_v49, %v5606_v34  ;;  %v6526_v36 = vpop.f32.mrb[42].mxu1 }
 0x7c8   : > { %v11430_v7 = vadd.f32 %v5645_v32, %v12396_v52  ;;  %v5609_v63 = vmul.f32 %v6526_v36, %v11418_v9  ;;  %v5451_v6 = vpop.f32.mrb[43].mxu1  ;;  %v12407_v32 = vld [vmem:[#allocation33_spill] sm:$0xff] }
 0x7c9   : > { %v11434_v29 = vadd.f32 %v5644_v54, %v12397_v40  ;;  %v5608_v37 = vmul.f32 %v11418_v9, %v5451_v6 }
 0x7ca   : > { %v5647_v11 = vadd.f32 %v11423_v49, %v5609_v63 }
 0x7cb   : > { %v6571_v22 = vpack.c.bf16 %v11430_v7, %v11434_v29  ;;  %v5646_v38 = vadd.f32 %v11423_v49, %v5608_v37  ;;  %v6529_v2 = vpop.f32.mrb[44].mxu1  ;;  %v12408_v37 = vld [vmem:[#allocation23_spill] sm:$0xff] }
 0x7cc   : > { %v11442_v3 = vadd.f32 %v5647_v11, %v12398_v41  ;;  %v5611_v48 = vmul.f32 %v6529_v2, %v11418_v9  ;;  %v5461_v53 = vpop.f32.mrb[45].mxu1  ;;  %v12409_v41 = vld [vmem:[#allocation16_spill] sm:$0xff] }
 0x7cd   : > { %v11446_v56 = vadd.f32 %v5646_v38, %v12399_v60  ;;  %v5610_v30 = vmul.f32 %v11418_v9, %v5461_v53 }
 0x7ce   : > { %v5649_v0 = vadd.f32 %v11423_v49, %v5611_v48 }
 0x7cf   : > { %v6575_v14 = vpack.c.bf16 %v11442_v3, %v11446_v56  ;;  %v5648_v57 = vadd.f32 %v11423_v49, %v5610_v30  ;;  %v6532_v21 = vpop.f32.mrb[46].mxu1 }
 0x7d0   : > { %v11454_v20 = vadd.f32 %v5649_v0, %v12400_v51  ;;  %v5613_v24 = vmul.f32 %v6532_v21, %v11418_v9  ;;  %v5471_v27 = vpop.f32.mrb[47].mxu1  ;;  %v12410_v21 = vld [vmem:[#allocation43_spill] sm:$0xff] }
 0x7d1   : > { %v11458_v31 = vadd.f32 %v5648_v57, %v12401_v10  ;;  %v5612_v13 = vmul.f32 %v11418_v9, %v5471_v27  ;;  %v12411_v10 = vld [vmem:[#allocation14_spill] sm:$0xff] }
 0x7d2   : > { %v5651_v62 = vadd.f32 %v11423_v49, %v5613_v24 }
 0x7d3   : > { %v6579_v4 = vpack.c.bf16 %v11454_v20, %v11458_v31  ;;  %v5650_v50 = vadd.f32 %v11423_v49, %v5612_v13  ;;  %v6535_v46 = vpop.f32.mrb[48].mxu1 }
 0x7d4   : > { %v11466_v5 = vadd.f32 %v5651_v62, %v12402_v43  ;;  %v5615_v23 = vmul.f32 %v6535_v46, %v11418_v9  ;;  %v5481_v39 = vpop.f32.mrb[49].mxu1 }
 0x7d5   : > { %v11470_v15 = vadd.f32 %v5650_v50, %v12403_v26  ;;  %v5614_v12 = vmul.f32 %v11418_v9, %v5481_v39  ;;  %v12412_v39 = vld [vmem:[#allocation19_spill] sm:$0xff] }
 0x7d6   : > { %v5653_v16 = vadd.f32 %v11423_v49, %v5615_v23 }
 0x7d7   : > { %v6583_v58 = vpack.c.bf16 %v11466_v5, %v11470_v15  ;;  %v5652_v42 = vadd.f32 %v11423_v49, %v5614_v12  ;;  %v6538_v1 = vpop.f32.mrb[50].mxu1 }
 0x7d8   : > { %v11478_v33 = vadd.f32 %v5653_v16, %v12404_v35  ;;  %v5617_v25 = vmul.f32 %v6538_v1, %v11418_v9  ;;  %v5491_v18 = vpop.f32.mrb[51].mxu1 }
 0x7d9   : > { %v11482_v61 = vadd.f32 %v5652_v42, %v12405_v55  ;;  %v5616_v28 = vmul.f32 %v11418_v9, %v5491_v18  ;;  %v12413_v42 = vld [vmem:[#allocation30_spill] sm:$0xff] }
 0x7da   : > { %v5655_v59 = vadd.f32 %v11423_v49, %v5617_v25 }
 0x7db   : > { %v6587_v19 = vpack.c.bf16 %v11478_v33, %v11482_v61  ;;  %v5654_v17 = vadd.f32 %v11423_v49, %v5616_v28  ;;  %v6541_v45 = vpop.f32.mrb[52].mxu1 }
 0x7dc   : > { %v11490_v44 = vadd.f32 %v5655_v59, %v12406_v8  ;;  %v5619_v47 = vmul.f32 %v6541_v45, %v11418_v9  ;;  %v5501_v34 = vpop.f32.mrb[53].mxu1  ;;  %v12414_v59 = vld [vmem:[#allocation48_spill] sm:$0xff] }
 0x7dd   : > { %v11494_v54 = vadd.f32 %v5654_v17, %v12407_v32  ;;  %v5618_v36 = vmul.f32 %v11418_v9, %v5501_v34 }
 0x7de   : > { %v5657_v52 = vadd.f32 %v11423_v49, %v5619_v47  ;;  %v12415_v47 = vld [vmem:[#allocation36_spill] sm:$0xff] }
 0x7df   : > { %v6591_v63 = vpack.c.bf16 %v11490_v44, %v11494_v54  ;;  %v5656_v6 = vadd.f32 %v11423_v49, %v5618_v36  ;;  %v6544_v40 = vpop.f32.mrb[54].mxu1  ;;  %v5711_v44 = vld [vmem:[%s11686_s23 + $0x18] sm:$0xff]  ;;  %v5710_v54 = vld [vmem:[%s11686_s23 + $0x10] sm:$0xff] }
 0x7e0   : > { %v11502_v11 = vadd.f32 %v5657_v52, %v12408_v37  ;;  %v5621_v38 = vmul.f32 %v6544_v40, %v11418_v9  ;;  %v5511_v2 = vpop.f32.mrb[55].mxu1  ;;  %v12416_v37 = vld [vmem:[#allocation8_spill] sm:$0xff] }
 0x7e1   : > { %v11506_v48 = vadd.f32 %v5656_v6, %v12409_v41  ;;  %v5620_v53 = vmul.f32 %v11418_v9, %v5511_v2 }
 0x7e2   : > { %v5659_v60 = vadd.f32 %v11423_v49, %v5621_v38 }
 0x7e3   : > { %v6595_v30 = vpack.c.bf16 %v11502_v11, %v11506_v48  ;;  %v5658_v0 = vadd.f32 %v11423_v49, %v5620_v53  ;;  %v6547_v57 = vpop.f32.mrb[56].mxu1  ;;  %v12417_v53 = vld [vmem:[#allocation7_spill] sm:$0xff]  ;;  %v5712_v11 = vld [vmem:[%s11686_s23 + $0x20] sm:$0xff]  ;;  %v5715_v48 = vld [vmem:[%s11686_s23 + $0x38] sm:$0xff] }
 0x7e4   : > { %v11514_v51 = vadd.f32 %v5659_v60, %v12410_v21  ;;  %v5623_v24 = vmul.f32 %v6547_v57, %v11418_v9  ;;  %v5521_v27 = vpop.f32.mrb[57].mxu1  ;;  %v12418_v21 = vld [vmem:[#allocation11_spill] sm:$0xff] }
 0x7e5   : > { %v11518_v13 = vadd.f32 %v5658_v0, %v12411_v10  ;;  %v5622_v62 = vmul.f32 %v11418_v9, %v5521_v27 }
 0x7e6   : > { %v5661_v50 = vadd.f32 %v11423_v49, %v5623_v24 }
 0x7e7   : > { %v6599_v46 = vpack.c.bf16 %v11514_v51, %v11518_v13  ;;  %v5660_v43 = vadd.f32 %v11423_v49, %v5622_v62  ;;  %v6550_v23 = vpop.f32.mrb[58].mxu1  ;;  %v12419_v62 = vld [vmem:[#allocation9_spill] sm:$0xff]  ;;  %v5717_v51 = vld [vmem:[%s11686_s23 + $0x48] sm:$0xff] }
 0x7e8   : > { %v5693_v26 = vadd.f32 %v5661_v50, %v12412_v39  ;;  %v5625_v12 = vmul.f32 %v6550_v23, %v11418_v9  ;;  %v5531_v16 = vpop.f32.mrb[59].mxu1  ;;  %v12420_v39 = vld [vmem:[#allocation45_spill] sm:$0xff] }
 0x7e9   : > { %v5692_v1 = vadd.f32 %v5660_v43, %v12413_v42  ;;  %v5624_v35 = vmul.f32 %v11418_v9, %v5531_v16  ;;  %v12421_v42 = vld [vmem:[#allocation44_spill] sm:$0xff]  ;;  %v5716_v13 = vld [vmem:[%s11686_s23 + $0x40] sm:$0xff] }
 0x7ea   : > { %v5663_v25 = vadd.f32 %v11423_v49, %v5625_v12 }
 0x7eb   : > { %v5662_v18 = vadd.f32 %v11423_v49, %v5624_v35  ;;  %v6553_v55 = vpop.f32.mrb[60].mxu1  ;;  %v6569_v28 = vpack.c.bf16 %v5693_v26, %v5692_v1 }
 0x7ec   : > { %v5695_v17 = vadd.f32 %v5663_v25, %v12414_v59  ;;  %v5627_v45 = vmul.f32 %v6553_v55, %v11418_v9  ;;  %v5541_v8 = vpop.f32.mrb[61].mxu1 }
 0x7ed   : > { %v5694_v34 = vadd.f32 %v5662_v18, %v12415_v47  ;;  %v5626_v32 = vmul.f32 %v11418_v9, %v5541_v8  ;;  %6570 = vmatprep.subr.bf16.mxu0 %v6569_v28  ;;  %v12422_v18 = vld [vmem:[#allocation26_spill] sm:$0xff] }
 0x7ee   : > { %v5665_v36 = vadd.f32 %v11423_v49, %v5627_v45  ;;  %6572 = vmatpush3.bf16.msra.mxu0 %v6571_v22 }
 0x7ef   : > { %v5664_v52 = vadd.f32 %v11423_v49, %v5626_v32  ;;  %v6556_v6 = vpop.f32.mrb[62].mxu1  ;;  %v6573_v40 = vpack.c.bf16 %v5695_v17, %v5694_v34  ;;  %v12423_v17 = vld [vmem:[#allocation37_spill] sm:$0xff]  ;;  %v12424_v34 = vld [vmem:[#allocation20_spill] sm:$0xff] }
 0x7f0   : > { %v5697_v38 = vadd.f32 %v5665_v36, %v12416_v37  ;;  %v5629_v2 = vmul.f32 %v6556_v6, %v11418_v9  ;;  %v5551_v41 = vpop.f32.mrb[63].mxu1  ;;  %v12425_v6 = vld [vmem:[#allocation28_spill] sm:$0xff] }
 0x7f1   : > { %v5696_v60 = vadd.f32 %v5664_v52, %v12417_v53  ;;  %v5628_v0 = vmul.f32 %v11418_v9, %v5551_v41  ;;  %6574 = vmatprep.subr.bf16.mxu0 %v6573_v40  ;;  %v12427_v41 = vld [vmem:[#allocation24_spill] sm:$0xff] }
 0x7f2   : > { %v5667_v57 = vadd.f32 %v11423_v49, %v5629_v2  ;;  %6576 = vmatpush3.bf16.msra.mxu0 %v6575_v14 }
 0x7f3   : > { %v5666_v7 = vadd.f32 %v11423_v49, %v5628_v0  ;;  %v6559_v29 = vpop.f32.mrb[64].mxu1  ;;  %v6577_v22 = vpack.c.bf16 %v5697_v38, %v5696_v60  ;;  %v5718_v60 = vld [vmem:[%s11686_s23 + $0x50] sm:$0xff]  ;;  %v5721_v0 = vld [vmem:[%s11686_s23 + $0x68] sm:$0xff] }
 0x7f4   : > { %v5699_v24 = vadd.f32 %v5667_v57, %v12418_v21  ;;  %v5631_v27 = vmul.f32 %v6559_v29, %v11418_v9  ;;  %v5561_v10 = vpop.f32.mrb[65].mxu1  ;;  %v5720_v57 = vld [vmem:[%s11686_s23 + $0x60] sm:$0xff]  ;;  %v5722_v29 = vld [vmem:[%s11686_s23 + $0x70] sm:$0xff] }
 0x7f5   : > { %v5698_v50 = vadd.f32 %v5666_v7, %v12419_v62  ;;  %v5630_v43 = vmul.f32 %v11418_v9, %v5561_v10  ;;  %6578 = vmatprep.subr.bf16.mxu0 %v6577_v22  ;;  %v5723_v7 = vld [vmem:[%s11686_s23 + $0x78] sm:$0xff] }
 0x7f6   : > { %v5669_v23 = vadd.f32 %v11423_v49, %v5631_v27  ;;  %6580 = vmatpush3.bf16.msra.mxu0 %v6579_v4 }
 0x7f7   : > { %v5668_v3 = vadd.f32 %v11423_v49, %v5630_v43  ;;  %v6562_v56 = vpop.f32.mrb[66].mxu1  ;;  %v6581_v14 = vpack.c.bf16 %v5699_v24, %v5698_v50 }
 0x7f8   : > { %v5701_v26 = vadd.f32 %v5669_v23, %v12420_v39  ;;  %v5633_v12 = vmul.f32 %v6562_v56, %v11418_v9  ;;  %v5571_v16 = vpop.f32.mrb[67].mxu1 }
 0x7f9   : > { %v5700_v1 = vadd.f32 %v5668_v3, %v12421_v42  ;;  %v5632_v35 = vmul.f32 %v11418_v9, %v5571_v16  ;;  %6582 = vmatprep.subr.bf16.mxu0 %v6581_v14 }
 0x7fa   : > { %v5671_v25 = vadd.f32 %v11423_v49, %v5633_v12  ;;  %6584 = vmatpush3.bf16.msra.mxu0 %v6583_v58 }
 0x7fb   : > { %v5670_v20 = vadd.f32 %v11423_v49, %v5632_v35  ;;  %v6565_v31 = vpop.f32.mrb[68].mxu1  ;;  %v6585_v4 = vpack.c.bf16 %v5701_v26, %v5700_v1 }
 0x7fc   : > { %v5703_v55 = vadd.f32 %v5671_v25, %v12422_v18  ;;  %v5635_v28 = vmul.f32 %v6565_v31, %v11418_v9  ;;  %v5581_v59 = vpop.f32.mrb[69].mxu1 }
 0x7fd   : > { %v5702_v45 = vadd.f32 %v5670_v20, %v12423_v17  ;;  %v5634_v8 = vmul.f32 %v11418_v9, %v5581_v59  ;;  %6586 = vmatprep.subr.bf16.mxu0 %v6585_v4 }
 0x7fe   : > { %v5673_v47 = vadd.f32 %v11423_v49, %v5635_v28  ;;  %6588 = vmatpush3.bf16.msra.mxu0 %v6587_v19  ;;  %v12426_v19 = vld [vmem:[#allocation38_spill] sm:$0xff] }
 0x7ff   : > { %v5672_v5 = vadd.f32 %v11423_v49, %v5634_v8  ;;  %v6568_v15 = vpop.f32.mrb[70].mxu1  ;;  %v6589_v58 = vpack.c.bf16 %v5703_v55, %v5702_v45 }
 0x800   : > { %v5705_v32 = vadd.f32 %v5673_v47, %v12424_v34  ;;  %v5637_v36 = vmul.f32 %v6568_v15, %v11418_v9  ;;  %v5591_v52 = vpop.f32.mrb[71].mxu1 }
 0x801   : > { %v5704_v40 = vadd.f32 %v5672_v5, %v12425_v6  ;;  %v5636_v37 = vmul.f32 %v11418_v9, %v5591_v52  ;;  %6590 = vmatprep.subr.bf16.mxu0 %v6589_v58 }
 0x802   : > { %v5675_v38 = vadd.f32 %v11423_v49, %v5637_v36  ;;  %6592 = vmatpush3.bf16.msra.mxu0 %v6591_v63  ;;  %v5713_v63 = vld [vmem:[%s11686_s23 + $0x28] sm:$0xff] }
 0x803   : > { %v5674_v33 = vadd.f32 %v11423_v49, %v5636_v37  ;;  %v6593_v61 = vpack.c.bf16 %v5705_v32, %v5704_v40  ;;  %v5708_v49 = vld [vmem:[%s11686_s23] sm:$0xff] }
 0x804   : > { %v5707_v2 = vadd.f32 %v5675_v38, %v12426_v19 }
 0x805   : > { %v5706_v53 = vadd.f32 %v5674_v33, %v12427_v41  ;;  %6594 = vmatprep.subr.bf16.mxu0 %v6593_v61 }
 0x806   : > { %6596 = vmatpush3.bf16.msra.mxu0 %v6595_v30  ;;  %v5714_v30 = vld [vmem:[%s11686_s23 + $0x30] sm:$0xff] }
 0x807   : > { %v6597_v9 = vpack.c.bf16 %v5707_v2, %v5706_v53 }
 0x809   : > { %6598 = vmatprep.subr.bf16.mxu0 %v6597_v9 }
 0x80a   : > { %6600 = vmatpush3.bf16.msra.mxu0 %v6599_v46  ;;  %v5719_v46 = vld [vmem:[%s11686_s23 + $0x58] sm:$0xff] }
 0x80d   : > { %5789 = vmatmul.mubr.f32.vlgmr.msra.gmra.mrb[56].mxu0 %v5708_v49 }
 0x80e   : > { %5793 = vmatprep.mubr.f32.mxu0 %v5711_v44 }
 0x811   : > { %5794 = vmatmul.mubr.f32.gmra.mrb[58].mxu0 %v5710_v54 }
 0x812   : > { %5798 = vmatprep.mubr.f32.mxu0 %v5713_v63 }
 0x815   : > { %5799 = vmatmul.mubr.f32.gmra.mrb[60].mxu0 %v5712_v11 }
 0x816   : > { %5803 = vmatprep.mubr.f32.mxu0 %v5715_v48 }
 0x819   : > { %5804 = vmatmul.mubr.f32.gmra.mrb[62].mxu0 %v5714_v30 }
 0x81a   : > { %5808 = vmatprep.mubr.f32.mxu0 %v5717_v51 }
 0x81d   : > { %5809 = vmatmul.mubr.f32.gmra.mrb[64].mxu0 %v5716_v13 }
 0x81e   : > { %5813 = vmatprep.mubr.f32.mxu0 %v5719_v46 }
 0x821   : > { %5814 = vmatmul.mubr.f32.gmra.mrb[66].mxu0 %v5718_v60 }
 0x822   : > { %5818 = vmatprep.mubr.f32.mxu0 %v5721_v0 }
 0x825   : > { %5819 = vmatmul.mubr.f32.gmra.mrb[68].mxu0 %v5720_v57 }
 0x826   : > { %5823 = vmatprep.mubr.f32.mxu0 %v5723_v7 }
 0x829   : > { %5824 = vmatmul.mubr.f32.gmra.mrb[70].mxu0 %v5722_v29 }
 0x8e0   : > { %v6345_v22 = vpop.f32.mrb[56].mxu0 }
 0x8e1   : > { %v6346_v21 = vpop.f32.mrb[57].mxu0 }
 0x8e2   : > { %v6347_v24 = vadd.f32 %v6346_v21, %v6345_v22 }
 0x8e4   : > { %5829 = vst.msk [vmem:[%s11642_s29] sm:$0xff] %vm829_vm3, %v6347_v24  ;;  %v6348_v27 = vpop.f32.mrb[58].mxu0 }
 0x8e5   : > { %v6349_v10 = vpop.f32.mrb[59].mxu0 }
 0x8e6   : > { %v6350_v62 = vadd.f32 %v6349_v10, %v6348_v27 }
 0x8e8   : > { %5830 = vst.msk [vmem:[%s11642_s29 + $0x8] sm:$0xff] %vm829_vm3, %v6350_v62  ;;  %v6351_v50 = vpop.f32.mrb[60].mxu0 }
 0x8e9   : > { %v6352_v43 = vpop.f32.mrb[61].mxu0 }
 0x8ea   : > { %v6353_v23 = vadd.f32 %v6352_v43, %v6351_v50 }
 0x8ec   : > { %5831 = vst.msk [vmem:[%s11642_s29 + $0x10] sm:$0xff] %vm829_vm3, %v6353_v23  ;;  %v6354_v3 = vpop.f32.mrb[62].mxu0 }
 0x8ed   : > { %v6355_v56 = vpop.f32.mrb[63].mxu0 }
 0x8ee   : > { %v6356_v14 = vadd.f32 %v6355_v56, %v6354_v3 }
 0x8f0   : > { %5832 = vst.msk [vmem:[%s11642_s29 + $0x18] sm:$0xff] %vm829_vm3, %v6356_v14  ;;  %v6357_v39 = vpop.f32.mrb[64].mxu0 }
 0x8f1   : > { %v6358_v26 = vpop.f32.mrb[65].mxu0 }
 0x8f2   : > { %v6359_v12 = vadd.f32 %v6358_v26, %v6357_v39 }
 0x8f4   : > { %5833 = vst.msk [vmem:[%s11642_s29 + $0x20] sm:$0xff] %vm829_vm3, %v6359_v12  ;;  %v6360_v16 = vpop.f32.mrb[66].mxu0 }
 0x8f5   : > { %v6361_v42 = vpop.f32.mrb[67].mxu0 }
 0x8f6   : > { %v6362_v1 = vadd.f32 %v6361_v42, %v6360_v16 }
 0x8f8   : > { %5834 = vst.msk [vmem:[%s11642_s29 + $0x28] sm:$0xff] %vm829_vm3, %v6362_v1  ;;  %v6363_v35 = vpop.f32.mrb[68].mxu0 }
 0x8f9   : > { %v6364_v25 = vpop.f32.mrb[69].mxu0 }
 0x8fa   : > { %v6365_v20 = vadd.f32 %v6364_v25, %v6363_v35 }
 0x8fc   : > { %5835 = vst.msk [vmem:[%s11642_s29 + $0x30] sm:$0xff] %vm829_vm3, %v6365_v20  ;;  %v6366_v31 = vpop.f32.mrb[70].mxu0 }
 0x8fd   : > { %v6367_v4 = vpop.f32.mrb[71].mxu0 }
 0x8fe   : > { %v6368_v18 = vadd.f32 %v6367_v4, %v6366_v31 }
 0x900   : > { %5836 = vst.msk [vmem:[%s11642_s29 + $0x38] sm:$0xff] %vm829_vm3, %v6368_v18 }
 0x901 PF: > { %s34_s5 = sadd.s32 1, %s7198_s5  }
 0x902   : > { %p31_p4 = scmp.ge.s32.totalorder %s34_s5, 4  }
 0x904   :  { %33 = sbr.rel (!%p31_p4) target bundleno = 10 (0xa), region = 148 }

</bundles_post_ra>
